<compile_context>
chip_gen: v7x
topology: tpu7x:2x2x1
jax: 0.10.0
libtpu: 0.0.40
codegen_flags: <defaults>
</compile_context>

<pallas_src>
import numpy as np

import jax
import jax.numpy as jnp
from jax.experimental import pallas as pl
from jax.experimental.pallas import tpu as pltpu


# ----------------------------------------------------------------------------
# Fused kernel (one batch element per grid step)
# ----------------------------------------------------------------------------
def _unet_fused_kernel(x_ref,
                       w1, b1, w2, b2, w3, b3, w4, b4, w5, b5, w6, b6,
                       mup_ref,
                       o_ref,
                       p_in, p64, p64h, p128h, p128f):
    """x_ref: (1,H,W,Cin); w*: (9,Cin,Cout) bf16; b*: (1,Cout) f32;
    mup_ref: (H*W, (H//2)*(W//2)) f32; o_ref: (1,H,W,Cout_net);
    p_*: zero-padded VMEM activation buffers (Hc+2, Wc+2, C) f32."""
    H, W = x_ref.shape[1], x_ref.shape[2]
    H2, W2 = H // 2, W // 2

    def conv3x3(pref, w_ref, b_ref, act):
        # 3x3 conv, padding=1 (borders of `pref` are zero), bf16 MXU operands,
        # fp32 accumulation, fused bias + activation.  Returns (Hc*Wc, Cout).
        hp, wp, cin = pref.shape
        hc, wc = hp - 2, wp - 2
        cout = w_ref.shape[-1]
        xp = pref[...]                                      # (hc+2, wc+2, cin) f32
        acc = jnp.zeros((hc * wc, cout), jnp.float32)
        for dy in range(3):                                 # 9 unrolled MXU matmuls
            for dx in range(3):
                patch = xp[dy:dy + hc, dx:dx + wc, :].reshape(hc * wc, cin)
                acc = acc + jnp.dot(patch.astype(jnp.bfloat16),
                                    w_ref[3 * dy + dx],
                                    preferred_element_type=jnp.float32)
        acc = acc + b_ref[...]
        if act == "relu":
            return jnp.maximum(acc, 0.0)
        return jax.nn.sigmoid(acc)

    # Zero the padded activation buffers every grid step (cheap: <0.4 MiB total)
    # so the conv halos are 0 and correctness holds even when the "parallel"
    # batch axis is split across TensorCores (per-core scratch on v7x).
    p_in[...] = jnp.zeros_like(p_in)
    p64[...] = jnp.zeros_like(p64)
    p64h[...] = jnp.zeros_like(p64h)
    p128h[...] = jnp.zeros_like(p128h)
    p128f[...] = jnp.zeros_like(p128f)

    # ---------------- encoder ----------------
    p_in[1:H + 1, 1:W + 1, :] = x_ref[0]
    a1 = conv3x3(p_in, w1, b1, "relu")                      # (H*W, 64)
    p64[1:H + 1, 1:W + 1, :] = a1.reshape(H, W, a1.shape[-1])
    a2 = conv3x3(p64, w2, b2, "relu")                       # (H*W, 64)

    # ---------------- 2x2 max pool, stride 2 ----------------
    c64 = a2.shape[-1]
    pooled = a2.reshape(H2, 2, W2, 2, c64).max(axis=(1, 3))  # (H2, W2, 64)
    p64h[1:H2 + 1, 1:W2 + 1, :] = pooled

    # ---------------- middle ----------------
    a3 = conv3x3(p64h, w3, b3, "relu")                      # (H2*W2, 128)
    p128h[1:H2 + 1, 1:W2 + 1, :] = a3.reshape(H2, W2, a3.shape[-1])
    a4 = conv3x3(p128h, w4, b4, "relu")                     # (H2*W2, 128)

    # ---------------- bilinear upsample x2 (align_corners=True) ----------------
    # One lane-dense MXU matmul: (H*W, H2*W2) @ (H2*W2, 128); kept in fp32 since
    # the interpolation weights are not bf16-exact and the op is tiny.
    up = jnp.dot(mup_ref[...], a4, preferred_element_type=jnp.float32)  # (H*W,128)
    p128f[1:H + 1, 1:W + 1, :] = up.reshape(H, W, up.shape[-1])

    # ---------------- decoder ----------------
    a5 = conv3x3(p128f, w5, b5, "relu")                     # (H*W, 64)
    p64[1:H + 1, 1:W + 1, :] = a5.reshape(H, W, a5.shape[-1])   # reuse buffer
    a6 = conv3x3(p64, w6, b6, "sigmoid")                    # (H*W, Cout)
    o_ref[0] = a6.reshape(H, W, o_ref.shape[-1])


# ----------------------------------------------------------------------------
# Host-side helpers
# ----------------------------------------------------------------------------
def _interp_matrix(n_in, n_out):
    """(n_out, n_in) bilinear weights, matching F.interpolate align_corners=True."""
    if n_in == 1:
        return np.ones((n_out, 1), np.float32)
    coords = np.arange(n_out, dtype=np.float64) * (n_in - 1) / (n_out - 1)
    lo = np.clip(np.floor(coords).astype(np.int64), 0, n_in - 2)
    frac = (coords - lo).astype(np.float32)
    m = np.zeros((n_out, n_in), np.float32)
    rows = np.arange(n_out)
    m[rows, lo] += 1.0 - frac
    m[rows, lo + 1] += frac
    return m


def _full_spec(arr):
    nd = arr.ndim
    return pl.BlockSpec(arr.shape, lambda n, _nd=nd: (0,) * _nd)


# ----------------------------------------------------------------------------
# Parameter init (deterministic, PyTorch Conv2d-style uniform bounds)
# ----------------------------------------------------------------------------
def init_params(key, in_channels, out_channels):
    shapes = [
        ("enc1", in_channels, 64),
        ("enc2", 64, 64),
        ("mid1", 64, 128),
        ("mid2", 128, 128),
        ("dec1", 128, 64),
        ("dec2", 64, out_channels),
    ]
    params = {}
    for name, cin, cout in shapes:
        key, kw, kb = jax.random.split(key, 3)
        bound = 1.0 / jnp.sqrt(cin * 9.0)
        params[name + "_w"] = jax.random.uniform(
            kw, (3, 3, cin, cout), jnp.float32, -bound, bound)
        params[name + "_b"] = jax.random.uniform(
            kb, (cout,), jnp.float32, -bound, bound)
    return params


# ----------------------------------------------------------------------------
# UNet forward (NCHW in/out, matching the PyTorch module)
# ----------------------------------------------------------------------------
def unet_forward(x_nchw, params):
    x = jnp.transpose(x_nchw, (0, 2, 3, 1)).astype(jnp.float32)   # NCHW -> NHWC
    N, H, W, Cin = x.shape
    assert H % 2 == 0 and W % 2 == 0, "UNet kernel assumes even spatial dims"
    H2, W2 = H // 2, W // 2
    Cout_net = params["dec2_w"].shape[-1]

    # Bilinear x2 upsample (align_corners=True) as a single (H*W, H2*W2) matrix.
    m_up = jnp.asarray(np.kron(_interp_matrix(H2, H), _interp_matrix(W2, W)),
                       jnp.float32)

    names = ["enc1", "enc2", "mid1", "mid2", "dec1", "dec2"]
    ws = [params[n + "_w"].reshape(9, params[n + "_w"].shape[2],
                                   params[n + "_w"].shape[3]).astype(jnp.bfloat16)
          for n in names]
    bs = [params[n + "_b"].reshape(1, -1).astype(jnp.float32) for n in names]

    operands = [x]
    in_specs = [pl.BlockSpec((1, H, W, Cin), lambda n: (n, 0, 0, 0))]
    for w, b in zip(ws, bs):
        operands += [w, b]
        in_specs += [_full_spec(w), _full_spec(b)]
    operands.append(m_up)
    in_specs.append(_full_spec(m_up))

    out = pl.pallas_call(
        _unet_fused_kernel,
        out_shape=jax.ShapeDtypeStruct((N, H, W, Cout_net), jnp.float32),
        grid=(N,),
        in_specs=in_specs,
        out_specs=pl.BlockSpec((1, H, W, Cout_net), lambda n: (n, 0, 0, 0)),
        scratch_shapes=[
            pltpu.VMEM((H + 2, W + 2, Cin), jnp.float32),    # enc1 input (padded)
            pltpu.VMEM((H + 2, W + 2, 64), jnp.float32),     # enc2 / dec2 input
            pltpu.VMEM((H2 + 2, W2 + 2, 64), jnp.float32),   # mid1 input (pooled)
            pltpu.VMEM((H2 + 2, W2 + 2, 128), jnp.float32),  # mid2 input
            pltpu.VMEM((H + 2, W + 2, 128), jnp.float32),    # dec1 input (upsampled)
        ],
        compiler_params=pltpu.CompilerParams(
            dimension_semantics=("parallel",)),
    )(*operands)

    return jnp.transpose(out, (0, 3, 1, 2))                      # NHWC -> NCHW


if __name__ == "__main__":
    key = jax.random.PRNGKey(0)
    k_params, k_x = jax.random.split(key)

    batch, in_channels, out_channels, spatial = 2, 4, 2, 16
    params = init_params(k_params, in_channels, out_channels)
    x = jax.random.normal(k_x, (batch, in_channels, spatial, spatial), jnp.float32)

    fwd = jax.jit(unet_forward)
    y = fwd(x, params)
    jax.block_until_ready(y)

    assert y.shape == (batch, out_channels, spatial, spatial), y.shape
    assert bool(jnp.all(jnp.isfinite(y)))
    assert bool(jnp.all((y >= 0.0) & (y <= 1.0)))   # sigmoid output range
    print("KERNEL_OK")
</pallas_src>

<mosaic_0001>
module attributes {stable_mosaic.version = 11 : i64} {
  func.func @_unet_fused_kernel(%arg0: i32, %arg1: memref<1x16x16x4xf32, #tpu.memory_space<vmem>>, %arg2: memref<9x4x64xbf16, #tpu.memory_space<vmem>>, %arg3: memref<1x64xf32, #tpu.memory_space<vmem>>, %arg4: memref<9x64x64xbf16, #tpu.memory_space<vmem>>, %arg5: memref<1x64xf32, #tpu.memory_space<vmem>>, %arg6: memref<9x64x128xbf16, #tpu.memory_space<vmem>>, %arg7: memref<1x128xf32, #tpu.memory_space<vmem>>, %arg8: memref<9x128x128xbf16, #tpu.memory_space<vmem>>, %arg9: memref<1x128xf32, #tpu.memory_space<vmem>>, %arg10: memref<9x128x64xbf16, #tpu.memory_space<vmem>>, %arg11: memref<1x64xf32, #tpu.memory_space<vmem>>, %arg12: memref<9x64x2xbf16, #tpu.memory_space<vmem>>, %arg13: memref<1x2xf32, #tpu.memory_space<vmem>>, %arg14: memref<256x64xf32, #tpu.memory_space<vmem>>, %arg15: memref<1x16x16x2xf32, #tpu.memory_space<vmem>>, %arg16: memref<18x18x4xf32, #tpu.memory_space<vmem>>, %arg17: memref<18x18x64xf32, #tpu.memory_space<vmem>>, %arg18: memref<10x10x64xf32, #tpu.memory_space<vmem>>, %arg19: memref<10x10x128xf32, #tpu.memory_space<vmem>>, %arg20: memref<18x18x128xf32, #tpu.memory_space<vmem>>) attributes {dimension_semantics = [#tpu.dimension_semantics<parallel>], iteration_bounds = array<i64: 2>, scalar_prefetch = 0 : i64, scratch_operands = 5 : i64, tpu.core_type = #tpu.core_type<tc>, window_params = [{transform_indices = @transform_0, window_bounds = array<i64: 1, 16, 16, 4>}, {pipeline_mode = #tpu.pipeline_mode<synchronous>, transform_indices = @transform_1, window_bounds = array<i64: 9, 4, 64>}, {pipeline_mode = #tpu.pipeline_mode<synchronous>, transform_indices = @transform_2, window_bounds = array<i64: 1, 64>}, {pipeline_mode = #tpu.pipeline_mode<synchronous>, transform_indices = @transform_3, window_bounds = array<i64: 9, 64, 64>}, {pipeline_mode = #tpu.pipeline_mode<synchronous>, transform_indices = @transform_4, window_bounds = array<i64: 1, 64>}, {pipeline_mode = #tpu.pipeline_mode<synchronous>, transform_indices = @transform_5, window_bounds = array<i64: 9, 64, 128>}, {pipeline_mode = #tpu.pipeline_mode<synchronous>, transform_indices = @transform_6, window_bounds = array<i64: 1, 128>}, {pipeline_mode = #tpu.pipeline_mode<synchronous>, transform_indices = @transform_7, window_bounds = array<i64: 9, 128, 128>}, {pipeline_mode = #tpu.pipeline_mode<synchronous>, transform_indices = @transform_8, window_bounds = array<i64: 1, 128>}, {pipeline_mode = #tpu.pipeline_mode<synchronous>, transform_indices = @transform_9, window_bounds = array<i64: 9, 128, 64>}, {pipeline_mode = #tpu.pipeline_mode<synchronous>, transform_indices = @transform_10, window_bounds = array<i64: 1, 64>}, {pipeline_mode = #tpu.pipeline_mode<synchronous>, transform_indices = @transform_11, window_bounds = array<i64: 9, 64, 2>}, {pipeline_mode = #tpu.pipeline_mode<synchronous>, transform_indices = @transform_12, window_bounds = array<i64: 1, 2>}, {pipeline_mode = #tpu.pipeline_mode<synchronous>, transform_indices = @transform_13, window_bounds = array<i64: 256, 64>}, {transform_indices = @transform_14, window_bounds = array<i64: 1, 16, 16, 2>}]} {
    %cst = arith.constant 0.000000e+00 : f32
    %0 = vector.broadcast %cst : f32 to vector<18x18x4xf32>
    %c0 = arith.constant 0 : index
    %c0_0 = arith.constant 0 : index
    %c0_1 = arith.constant 0 : index
    %1 = vector.load %arg16[%c0, %c0_0, %c0_1] : memref<18x18x4xf32, #tpu.memory_space<vmem>>, vector<18x18x4xf32>
    tpu.vector_store %arg16[%c0, %c0_0, %c0_1], %0 {strides = array<i32>} : memref<18x18x4xf32, #tpu.memory_space<vmem>>, vector<18x18x4xf32>,
    %cst_2 = arith.constant 0.000000e+00 : f32
    %2 = vector.broadcast %cst_2 : f32 to vector<18x18x64xf32>
    %c0_3 = arith.constant 0 : index
    %c0_4 = arith.constant 0 : index
    %c0_5 = arith.constant 0 : index
    %3 = vector.load %arg17[%c0_3, %c0_4, %c0_5] : memref<18x18x64xf32, #tpu.memory_space<vmem>>, vector<18x18x64xf32>
    tpu.vector_store %arg17[%c0_3, %c0_4, %c0_5], %2 {strides = array<i32>} : memref<18x18x64xf32, #tpu.memory_space<vmem>>, vector<18x18x64xf32>,
    %cst_6 = arith.constant 0.000000e+00 : f32
    %4 = vector.broadcast %cst_6 : f32 to vector<10x10x64xf32>
    %c0_7 = arith.constant 0 : index
    %c0_8 = arith.constant 0 : index
    %c0_9 = arith.constant 0 : index
    %5 = vector.load %arg18[%c0_7, %c0_8, %c0_9] : memref<10x10x64xf32, #tpu.memory_space<vmem>>, vector<10x10x64xf32>
    tpu.vector_store %arg18[%c0_7, %c0_8, %c0_9], %4 {strides = array<i32>} : memref<10x10x64xf32, #tpu.memory_space<vmem>>, vector<10x10x64xf32>,
    %cst_10 = arith.constant 0.000000e+00 : f32
    %6 = vector.broadcast %cst_10 : f32 to vector<10x10x128xf32>
    %c0_11 = arith.constant 0 : index
    %c0_12 = arith.constant 0 : index
    %c0_13 = arith.constant 0 : index
    %7 = vector.load %arg19[%c0_11, %c0_12, %c0_13] : memref<10x10x128xf32, #tpu.memory_space<vmem>>, vector<10x10x128xf32>
    tpu.vector_store %arg19[%c0_11, %c0_12, %c0_13], %6 {strides = array<i32>} : memref<10x10x128xf32, #tpu.memory_space<vmem>>, vector<10x10x128xf32>,
    %cst_14 = arith.constant 0.000000e+00 : f32
    %8 = vector.broadcast %cst_14 : f32 to vector<18x18x128xf32>
    %c0_15 = arith.constant 0 : index
    %c0_16 = arith.constant 0 : index
    %c0_17 = arith.constant 0 : index
    %9 = vector.load %arg20[%c0_15, %c0_16, %c0_17] : memref<18x18x128xf32, #tpu.memory_space<vmem>>, vector<18x18x128xf32>
    tpu.vector_store %arg20[%c0_15, %c0_16, %c0_17], %8 {strides = array<i32>} : memref<18x18x128xf32, #tpu.memory_space<vmem>>, vector<18x18x128xf32>,
    %c0_18 = arith.constant 0 : index
    %c0_19 = arith.constant 0 : index
    %c0_20 = arith.constant 0 : index
    %c0_21 = arith.constant 0 : index
    %10 = vector.load %arg1[%c0_18, %c0_19, %c0_20, %c0_21] : memref<1x16x16x4xf32, #tpu.memory_space<vmem>>, vector<1x16x16x4xf32>
    %11 = vector.shape_cast %10 : vector<1x16x16x4xf32> to vector<16x16x4xf32>
    %c1 = arith.constant 1 : index
    %c1_22 = arith.constant 1 : index
    %c0_23 = arith.constant 0 : index
    %12 = vector.load %arg16[%c1, %c1_22, %c0_23] : memref<18x18x4xf32, #tpu.memory_space<vmem>>, vector<16x16x4xf32>
    tpu.vector_store %arg16[%c1, %c1_22, %c0_23], %11 {strides = array<i32>} : memref<18x18x4xf32, #tpu.memory_space<vmem>>, vector<16x16x4xf32>,
    %c0_24 = arith.constant 0 : index
    %c0_25 = arith.constant 0 : index
    %c0_26 = arith.constant 0 : index
    %13 = vector.load %arg16[%c0_24, %c0_25, %c0_26] : memref<18x18x4xf32, #tpu.memory_space<vmem>>, vector<18x18x4xf32>
    %cst_27 = arith.constant 0.000000e+00 : f32
    %14 = vector.broadcast %cst_27 : f32 to vector<256x64xf32>
    %15 = vector.extract_strided_slice %13 {offsets = [0, 0, 0], sizes = [16, 16, 4], strides = [1, 1, 1]} : vector<18x18x4xf32> to vector<16x16x4xf32>
    %16 = vector.shape_cast %15 : vector<16x16x4xf32> to vector<256x4xf32>
    %17 = arith.truncf %16 : vector<256x4xf32> to vector<256x4xbf16>
    %c0_28 = arith.constant 0 : index
    %c0_29 = arith.constant 0 : index
    %c0_30 = arith.constant 0 : index
    %18 = vector.load %arg2[%c0_28, %c0_29, %c0_30] : memref<9x4x64xbf16, #tpu.memory_space<vmem>>, vector<1x4x64xbf16>
    %19 = vector.shape_cast %18 : vector<1x4x64xbf16> to vector<4x64xbf16>
    %cst_31 = arith.constant dense<0.000000e+00> : vector<256x64xf32>
    %20 = tpu.matmul %17, %19, %cst_31 {dimension_numbers = #tpu.dot_dimension_numbers<[1], [0], [0], [1], [0, 0, 1, 1], [], []>} : vector<256x4xbf16>, vector<4x64xbf16>, vector<256x64xf32> -> vector<256x64xf32>
    %21 = arith.addf %14, %20 : vector<256x64xf32>
    %22 = vector.extract_strided_slice %13 {offsets = [0, 1, 0], sizes = [16, 16, 4], strides = [1, 1, 1]} : vector<18x18x4xf32> to vector<16x16x4xf32>
    %23 = vector.shape_cast %22 : vector<16x16x4xf32> to vector<256x4xf32>
    %24 = arith.truncf %23 : vector<256x4xf32> to vector<256x4xbf16>
    %c1_32 = arith.constant 1 : index
    %c0_33 = arith.constant 0 : index
    %c0_34 = arith.constant 0 : index
    %25 = vector.load %arg2[%c1_32, %c0_33, %c0_34] : memref<9x4x64xbf16, #tpu.memory_space<vmem>>, vector<1x4x64xbf16>
    %26 = vector.shape_cast %25 : vector<1x4x64xbf16> to vector<4x64xbf16>
    %cst_35 = arith.constant dense<0.000000e+00> : vector<256x64xf32>
    %27 = tpu.matmul %24, %26, %cst_35 {dimension_numbers = #tpu.dot_dimension_numbers<[1], [0], [0], [1], [0, 0, 1, 1], [], []>} : vector<256x4xbf16>, vector<4x64xbf16>, vector<256x64xf32> -> vector<256x64xf32>
    %28 = arith.addf %21, %27 : vector<256x64xf32>
    %29 = vector.extract_strided_slice %13 {offsets = [0, 2, 0], sizes = [16, 16, 4], strides = [1, 1, 1]} : vector<18x18x4xf32> to vector<16x16x4xf32>
    %30 = vector.shape_cast %29 : vector<16x16x4xf32> to vector<256x4xf32>
    %31 = arith.truncf %30 : vector<256x4xf32> to vector<256x4xbf16>
    %c2 = arith.constant 2 : index
    %c0_36 = arith.constant 0 : index
    %c0_37 = arith.constant 0 : index
    %32 = vector.load %arg2[%c2, %c0_36, %c0_37] : memref<9x4x64xbf16, #tpu.memory_space<vmem>>, vector<1x4x64xbf16>
    %33 = vector.shape_cast %32 : vector<1x4x64xbf16> to vector<4x64xbf16>
    %cst_38 = arith.constant dense<0.000000e+00> : vector<256x64xf32>
    %34 = tpu.matmul %31, %33, %cst_38 {dimension_numbers = #tpu.dot_dimension_numbers<[1], [0], [0], [1], [0, 0, 1, 1], [], []>} : vector<256x4xbf16>, vector<4x64xbf16>, vector<256x64xf32> -> vector<256x64xf32>
    %35 = arith.addf %28, %34 : vector<256x64xf32>
    %36 = vector.extract_strided_slice %13 {offsets = [1, 0, 0], sizes = [16, 16, 4], strides = [1, 1, 1]} : vector<18x18x4xf32> to vector<16x16x4xf32>
    %37 = vector.shape_cast %36 : vector<16x16x4xf32> to vector<256x4xf32>
    %38 = arith.truncf %37 : vector<256x4xf32> to vector<256x4xbf16>
    %c3 = arith.constant 3 : index
    %c0_39 = arith.constant 0 : index
    %c0_40 = arith.constant 0 : index
    %39 = vector.load %arg2[%c3, %c0_39, %c0_40] : memref<9x4x64xbf16, #tpu.memory_space<vmem>>, vector<1x4x64xbf16>
    %40 = vector.shape_cast %39 : vector<1x4x64xbf16> to vector<4x64xbf16>
    %cst_41 = arith.constant dense<0.000000e+00> : vector<256x64xf32>
    %41 = tpu.matmul %38, %40, %cst_41 {dimension_numbers = #tpu.dot_dimension_numbers<[1], [0], [0], [1], [0, 0, 1, 1], [], []>} : vector<256x4xbf16>, vector<4x64xbf16>, vector<256x64xf32> -> vector<256x64xf32>
    %42 = arith.addf %35, %41 : vector<256x64xf32>
    %43 = vector.extract_strided_slice %13 {offsets = [1, 1, 0], sizes = [16, 16, 4], strides = [1, 1, 1]} : vector<18x18x4xf32> to vector<16x16x4xf32>
    %44 = vector.shape_cast %43 : vector<16x16x4xf32> to vector<256x4xf32>
    %45 = arith.truncf %44 : vector<256x4xf32> to vector<256x4xbf16>
    %c4 = arith.constant 4 : index
    %c0_42 = arith.constant 0 : index
    %c0_43 = arith.constant 0 : index
    %46 = vector.load %arg2[%c4, %c0_42, %c0_43] : memref<9x4x64xbf16, #tpu.memory_space<vmem>>, vector<1x4x64xbf16>
    %47 = vector.shape_cast %46 : vector<1x4x64xbf16> to vector<4x64xbf16>
    %cst_44 = arith.constant dense<0.000000e+00> : vector<256x64xf32>
    %48 = tpu.matmul %45, %47, %cst_44 {dimension_numbers = #tpu.dot_dimension_numbers<[1], [0], [0], [1], [0, 0, 1, 1], [], []>} : vector<256x4xbf16>, vector<4x64xbf16>, vector<256x64xf32> -> vector<256x64xf32>
    %49 = arith.addf %42, %48 : vector<256x64xf32>
    %50 = vector.extract_strided_slice %13 {offsets = [1, 2, 0], sizes = [16, 16, 4], strides = [1, 1, 1]} : vector<18x18x4xf32> to vector<16x16x4xf32>
    %51 = vector.shape_cast %50 : vector<16x16x4xf32> to vector<256x4xf32>
    %52 = arith.truncf %51 : vector<256x4xf32> to vector<256x4xbf16>
    %c5 = arith.constant 5 : index
    %c0_45 = arith.constant 0 : index
    %c0_46 = arith.constant 0 : index
    %53 = vector.load %arg2[%c5, %c0_45, %c0_46] : memref<9x4x64xbf16, #tpu.memory_space<vmem>>, vector<1x4x64xbf16>
    %54 = vector.shape_cast %53 : vector<1x4x64xbf16> to vector<4x64xbf16>
    %cst_47 = arith.constant dense<0.000000e+00> : vector<256x64xf32>
    %55 = tpu.matmul %52, %54, %cst_47 {dimension_numbers = #tpu.dot_dimension_numbers<[1], [0], [0], [1], [0, 0, 1, 1], [], []>} : vector<256x4xbf16>, vector<4x64xbf16>, vector<256x64xf32> -> vector<256x64xf32>
    %56 = arith.addf %49, %55 : vector<256x64xf32>
    %57 = vector.extract_strided_slice %13 {offsets = [2, 0, 0], sizes = [16, 16, 4], strides = [1, 1, 1]} : vector<18x18x4xf32> to vector<16x16x4xf32>
    %58 = vector.shape_cast %57 : vector<16x16x4xf32> to vector<256x4xf32>
    %59 = arith.truncf %58 : vector<256x4xf32> to vector<256x4xbf16>
    %c6 = arith.constant 6 : index
    %c0_48 = arith.constant 0 : index
    %c0_49 = arith.constant 0 : index
    %60 = vector.load %arg2[%c6, %c0_48, %c0_49] : memref<9x4x64xbf16, #tpu.memory_space<vmem>>, vector<1x4x64xbf16>
    %61 = vector.shape_cast %60 : vector<1x4x64xbf16> to vector<4x64xbf16>
    %cst_50 = arith.constant dense<0.000000e+00> : vector<256x64xf32>
    %62 = tpu.matmul %59, %61, %cst_50 {dimension_numbers = #tpu.dot_dimension_numbers<[1], [0], [0], [1], [0, 0, 1, 1], [], []>} : vector<256x4xbf16>, vector<4x64xbf16>, vector<256x64xf32> -> vector<256x64xf32>
    %63 = arith.addf %56, %62 : vector<256x64xf32>
    %64 = vector.extract_strided_slice %13 {offsets = [2, 1, 0], sizes = [16, 16, 4], strides = [1, 1, 1]} : vector<18x18x4xf32> to vector<16x16x4xf32>
    %65 = vector.shape_cast %64 : vector<16x16x4xf32> to vector<256x4xf32>
    %66 = arith.truncf %65 : vector<256x4xf32> to vector<256x4xbf16>
    %c7 = arith.constant 7 : index
    %c0_51 = arith.constant 0 : index
    %c0_52 = arith.constant 0 : index
    %67 = vector.load %arg2[%c7, %c0_51, %c0_52] : memref<9x4x64xbf16, #tpu.memory_space<vmem>>, vector<1x4x64xbf16>
    %68 = vector.shape_cast %67 : vector<1x4x64xbf16> to vector<4x64xbf16>
    %cst_53 = arith.constant dense<0.000000e+00> : vector<256x64xf32>
    %69 = tpu.matmul %66, %68, %cst_53 {dimension_numbers = #tpu.dot_dimension_numbers<[1], [0], [0], [1], [0, 0, 1, 1], [], []>} : vector<256x4xbf16>, vector<4x64xbf16>, vector<256x64xf32> -> vector<256x64xf32>
    %70 = arith.addf %63, %69 : vector<256x64xf32>
    %71 = vector.extract_strided_slice %13 {offsets = [2, 2, 0], sizes = [16, 16, 4], strides = [1, 1, 1]} : vector<18x18x4xf32> to vector<16x16x4xf32>
    %72 = vector.shape_cast %71 : vector<16x16x4xf32> to vector<256x4xf32>
    %73 = arith.truncf %72 : vector<256x4xf32> to vector<256x4xbf16>
    %c8 = arith.constant 8 : index
    %c0_54 = arith.constant 0 : index
    %c0_55 = arith.constant 0 : index
    %74 = vector.load %arg2[%c8, %c0_54, %c0_55] : memref<9x4x64xbf16, #tpu.memory_space<vmem>>, vector<1x4x64xbf16>
    %75 = vector.shape_cast %74 : vector<1x4x64xbf16> to vector<4x64xbf16>
    %cst_56 = arith.constant dense<0.000000e+00> : vector<256x64xf32>
    %76 = tpu.matmul %73, %75, %cst_56 {dimension_numbers = #tpu.dot_dimension_numbers<[1], [0], [0], [1], [0, 0, 1, 1], [], []>} : vector<256x4xbf16>, vector<4x64xbf16>, vector<256x64xf32> -> vector<256x64xf32>
    %77 = arith.addf %70, %76 : vector<256x64xf32>
    %c0_57 = arith.constant 0 : index
    %c0_58 = arith.constant 0 : index
    %78 = vector.load %arg3[%c0_57, %c0_58] : memref<1x64xf32, #tpu.memory_space<vmem>>, vector<1x64xf32>
    %79 = vector.broadcast %78 : vector<1x64xf32> to vector<256x64xf32>
    %80 = arith.addf %77, %79 : vector<256x64xf32>
    %cst_59 = arith.constant 0.000000e+00 : f32
    %81 = vector.broadcast %cst_59 : f32 to vector<256x64xf32>
    %82 = arith.maximumf %80, %81 : vector<256x64xf32>
    %83 = vector.shape_cast %82 : vector<256x64xf32> to vector<16x16x64xf32>
    %c1_60 = arith.constant 1 : index
    %c1_61 = arith.constant 1 : index
    %c0_62 = arith.constant 0 : index
    %84 = vector.load %arg17[%c1_60, %c1_61, %c0_62] : memref<18x18x64xf32, #tpu.memory_space<vmem>>, vector<16x16x64xf32>
    tpu.vector_store %arg17[%c1_60, %c1_61, %c0_62], %83 {strides = array<i32>} : memref<18x18x64xf32, #tpu.memory_space<vmem>>, vector<16x16x64xf32>,
    %c0_63 = arith.constant 0 : index
    %c0_64 = arith.constant 0 : index
    %c0_65 = arith.constant 0 : index
    %85 = vector.load %arg17[%c0_63, %c0_64, %c0_65] : memref<18x18x64xf32, #tpu.memory_space<vmem>>, vector<18x18x64xf32>
    %cst_66 = arith.constant 0.000000e+00 : f32
    %86 = vector.broadcast %cst_66 : f32 to vector<256x64xf32>
    %87 = vector.extract_strided_slice %85 {offsets = [0, 0, 0], sizes = [16, 16, 64], strides = [1, 1, 1]} : vector<18x18x64xf32> to vector<16x16x64xf32>
    %88 = vector.shape_cast %87 : vector<16x16x64xf32> to vector<256x64xf32>
    %89 = arith.truncf %88 : vector<256x64xf32> to vector<256x64xbf16>
    %c0_67 = arith.constant 0 : index
    %c0_68 = arith.constant 0 : index
    %c0_69 = arith.constant 0 : index
    %90 = vector.load %arg4[%c0_67, %c0_68, %c0_69] : memref<9x64x64xbf16, #tpu.memory_space<vmem>>, vector<1x64x64xbf16>
    %91 = vector.shape_cast %90 : vector<1x64x64xbf16> to vector<64x64xbf16>
    %cst_70 = arith.constant dense<0.000000e+00> : vector<256x64xf32>
    %92 = tpu.matmul %89, %91, %cst_70 {dimension_numbers = #tpu.dot_dimension_numbers<[1], [0], [0], [1], [0, 0, 1, 1], [], []>} : vector<256x64xbf16>, vector<64x64xbf16>, vector<256x64xf32> -> vector<256x64xf32>
    %93 = arith.addf %86, %92 : vector<256x64xf32>
    %94 = vector.extract_strided_slice %85 {offsets = [0, 1, 0], sizes = [16, 16, 64], strides = [1, 1, 1]} : vector<18x18x64xf32> to vector<16x16x64xf32>
    %95 = vector.shape_cast %94 : vector<16x16x64xf32> to vector<256x64xf32>
    %96 = arith.truncf %95 : vector<256x64xf32> to vector<256x64xbf16>
    %c1_71 = arith.constant 1 : index
    %c0_72 = arith.constant 0 : index
    %c0_73 = arith.constant 0 : index
    %97 = vector.load %arg4[%c1_71, %c0_72, %c0_73] : memref<9x64x64xbf16, #tpu.memory_space<vmem>>, vector<1x64x64xbf16>
    %98 = vector.shape_cast %97 : vector<1x64x64xbf16> to vector<64x64xbf16>
    %cst_74 = arith.constant dense<0.000000e+00> : vector<256x64xf32>
    %99 = tpu.matmul %96, %98, %cst_74 {dimension_numbers = #tpu.dot_dimension_numbers<[1], [0], [0], [1], [0, 0, 1, 1], [], []>} : vector<256x64xbf16>, vector<64x64xbf16>, vector<256x64xf32> -> vector<256x64xf32>
    %100 = arith.addf %93, %99 : vector<256x64xf32>
    %101 = vector.extract_strided_slice %85 {offsets = [0, 2, 0], sizes = [16, 16, 64], strides = [1, 1, 1]} : vector<18x18x64xf32> to vector<16x16x64xf32>
    %102 = vector.shape_cast %101 : vector<16x16x64xf32> to vector<256x64xf32>
    %103 = arith.truncf %102 : vector<256x64xf32> to vector<256x64xbf16>
    %c2_75 = arith.constant 2 : index
    %c0_76 = arith.constant 0 : index
    %c0_77 = arith.constant 0 : index
    %104 = vector.load %arg4[%c2_75, %c0_76, %c0_77] : memref<9x64x64xbf16, #tpu.memory_space<vmem>>, vector<1x64x64xbf16>
    %105 = vector.shape_cast %104 : vector<1x64x64xbf16> to vector<64x64xbf16>
    %cst_78 = arith.constant dense<0.000000e+00> : vector<256x64xf32>
    %106 = tpu.matmul %103, %105, %cst_78 {dimension_numbers = #tpu.dot_dimension_numbers<[1], [0], [0], [1], [0, 0, 1, 1], [], []>} : vector<256x64xbf16>, vector<64x64xbf16>, vector<256x64xf32> -> vector<256x64xf32>
    %107 = arith.addf %100, %106 : vector<256x64xf32>
    %108 = vector.extract_strided_slice %85 {offsets = [1, 0, 0], sizes = [16, 16, 64], strides = [1, 1, 1]} : vector<18x18x64xf32> to vector<16x16x64xf32>
    %109 = vector.shape_cast %108 : vector<16x16x64xf32> to vector<256x64xf32>
    %110 = arith.truncf %109 : vector<256x64xf32> to vector<256x64xbf16>
    %c3_79 = arith.constant 3 : index
    %c0_80 = arith.constant 0 : index
    %c0_81 = arith.constant 0 : index
    %111 = vector.load %arg4[%c3_79, %c0_80, %c0_81] : memref<9x64x64xbf16, #tpu.memory_space<vmem>>, vector<1x64x64xbf16>
    %112 = vector.shape_cast %111 : vector<1x64x64xbf16> to vector<64x64xbf16>
    %cst_82 = arith.constant dense<0.000000e+00> : vector<256x64xf32>
    %113 = tpu.matmul %110, %112, %cst_82 {dimension_numbers = #tpu.dot_dimension_numbers<[1], [0], [0], [1], [0, 0, 1, 1], [], []>} : vector<256x64xbf16>, vector<64x64xbf16>, vector<256x64xf32> -> vector<256x64xf32>
    %114 = arith.addf %107, %113 : vector<256x64xf32>
    %115 = vector.extract_strided_slice %85 {offsets = [1, 1, 0], sizes = [16, 16, 64], strides = [1, 1, 1]} : vector<18x18x64xf32> to vector<16x16x64xf32>
    %116 = vector.shape_cast %115 : vector<16x16x64xf32> to vector<256x64xf32>
    %117 = arith.truncf %116 : vector<256x64xf32> to vector<256x64xbf16>
    %c4_83 = arith.constant 4 : index
    %c0_84 = arith.constant 0 : index
    %c0_85 = arith.constant 0 : index
    %118 = vector.load %arg4[%c4_83, %c0_84, %c0_85] : memref<9x64x64xbf16, #tpu.memory_space<vmem>>, vector<1x64x64xbf16>
    %119 = vector.shape_cast %118 : vector<1x64x64xbf16> to vector<64x64xbf16>
    %cst_86 = arith.constant dense<0.000000e+00> : vector<256x64xf32>
    %120 = tpu.matmul %117, %119, %cst_86 {dimension_numbers = #tpu.dot_dimension_numbers<[1], [0], [0], [1], [0, 0, 1, 1], [], []>} : vector<256x64xbf16>, vector<64x64xbf16>, vector<256x64xf32> -> vector<256x64xf32>
    %121 = arith.addf %114, %120 : vector<256x64xf32>
    %122 = vector.extract_strided_slice %85 {offsets = [1, 2, 0], sizes = [16, 16, 64], strides = [1, 1, 1]} : vector<18x18x64xf32> to vector<16x16x64xf32>
    %123 = vector.shape_cast %122 : vector<16x16x64xf32> to vector<256x64xf32>
    %124 = arith.truncf %123 : vector<256x64xf32> to vector<256x64xbf16>
    %c5_87 = arith.constant 5 : index
    %c0_88 = arith.constant 0 : index
    %c0_89 = arith.constant 0 : index
    %125 = vector.load %arg4[%c5_87, %c0_88, %c0_89] : memref<9x64x64xbf16, #tpu.memory_space<vmem>>, vector<1x64x64xbf16>
    %126 = vector.shape_cast %125 : vector<1x64x64xbf16> to vector<64x64xbf16>
    %cst_90 = arith.constant dense<0.000000e+00> : vector<256x64xf32>
    %127 = tpu.matmul %124, %126, %cst_90 {dimension_numbers = #tpu.dot_dimension_numbers<[1], [0], [0], [1], [0, 0, 1, 1], [], []>} : vector<256x64xbf16>, vector<64x64xbf16>, vector<256x64xf32> -> vector<256x64xf32>
    %128 = arith.addf %121, %127 : vector<256x64xf32>
    %129 = vector.extract_strided_slice %85 {offsets = [2, 0, 0], sizes = [16, 16, 64], strides = [1, 1, 1]} : vector<18x18x64xf32> to vector<16x16x64xf32>
    %130 = vector.shape_cast %129 : vector<16x16x64xf32> to vector<256x64xf32>
    %131 = arith.truncf %130 : vector<256x64xf32> to vector<256x64xbf16>
    %c6_91 = arith.constant 6 : index
    %c0_92 = arith.constant 0 : index
    %c0_93 = arith.constant 0 : index
    %132 = vector.load %arg4[%c6_91, %c0_92, %c0_93] : memref<9x64x64xbf16, #tpu.memory_space<vmem>>, vector<1x64x64xbf16>
    %133 = vector.shape_cast %132 : vector<1x64x64xbf16> to vector<64x64xbf16>
    %cst_94 = arith.constant dense<0.000000e+00> : vector<256x64xf32>
    %134 = tpu.matmul %131, %133, %cst_94 {dimension_numbers = #tpu.dot_dimension_numbers<[1], [0], [0], [1], [0, 0, 1, 1], [], []>} : vector<256x64xbf16>, vector<64x64xbf16>, vector<256x64xf32> -> vector<256x64xf32>
    %135 = arith.addf %128, %134 : vector<256x64xf32>
    %136 = vector.extract_strided_slice %85 {offsets = [2, 1, 0], sizes = [16, 16, 64], strides = [1, 1, 1]} : vector<18x18x64xf32> to vector<16x16x64xf32>
    %137 = vector.shape_cast %136 : vector<16x16x64xf32> to vector<256x64xf32>
    %138 = arith.truncf %137 : vector<256x64xf32> to vector<256x64xbf16>
    %c7_95 = arith.constant 7 : index
    %c0_96 = arith.constant 0 : index
    %c0_97 = arith.constant 0 : index
    %139 = vector.load %arg4[%c7_95, %c0_96, %c0_97] : memref<9x64x64xbf16, #tpu.memory_space<vmem>>, vector<1x64x64xbf16>
    %140 = vector.shape_cast %139 : vector<1x64x64xbf16> to vector<64x64xbf16>
    %cst_98 = arith.constant dense<0.000000e+00> : vector<256x64xf32>
    %141 = tpu.matmul %138, %140, %cst_98 {dimension_numbers = #tpu.dot_dimension_numbers<[1], [0], [0], [1], [0, 0, 1, 1], [], []>} : vector<256x64xbf16>, vector<64x64xbf16>, vector<256x64xf32> -> vector<256x64xf32>
    %142 = arith.addf %135, %141 : vector<256x64xf32>
    %143 = vector.extract_strided_slice %85 {offsets = [2, 2, 0], sizes = [16, 16, 64], strides = [1, 1, 1]} : vector<18x18x64xf32> to vector<16x16x64xf32>
    %144 = vector.shape_cast %143 : vector<16x16x64xf32> to vector<256x64xf32>
    %145 = arith.truncf %144 : vector<256x64xf32> to vector<256x64xbf16>
    %c8_99 = arith.constant 8 : index
    %c0_100 = arith.constant 0 : index
    %c0_101 = arith.constant 0 : index
    %146 = vector.load %arg4[%c8_99, %c0_100, %c0_101] : memref<9x64x64xbf16, #tpu.memory_space<vmem>>, vector<1x64x64xbf16>
    %147 = vector.shape_cast %146 : vector<1x64x64xbf16> to vector<64x64xbf16>
    %cst_102 = arith.constant dense<0.000000e+00> : vector<256x64xf32>
    %148 = tpu.matmul %145, %147, %cst_102 {dimension_numbers = #tpu.dot_dimension_numbers<[1], [0], [0], [1], [0, 0, 1, 1], [], []>} : vector<256x64xbf16>, vector<64x64xbf16>, vector<256x64xf32> -> vector<256x64xf32>
    %149 = arith.addf %142, %148 : vector<256x64xf32>
    %c0_103 = arith.constant 0 : index
    %c0_104 = arith.constant 0 : index
    %150 = vector.load %arg5[%c0_103, %c0_104] : memref<1x64xf32, #tpu.memory_space<vmem>>, vector<1x64xf32>
    %151 = vector.broadcast %150 : vector<1x64xf32> to vector<256x64xf32>
    %152 = arith.addf %149, %151 : vector<256x64xf32>
    %cst_105 = arith.constant 0.000000e+00 : f32
    %153 = vector.broadcast %cst_105 : f32 to vector<256x64xf32>
    %154 = arith.maximumf %152, %153 : vector<256x64xf32>
    %155 = vector.shape_cast %154 : vector<256x64xf32> to vector<8x2x8x2x64xf32>
    %cst_106 = arith.constant dense<0xFF800000> : vector<8x8x64xf32>
    %156 = vector.multi_reduction <maximumf>, %155, %cst_106 [1, 3] : vector<8x2x8x2x64xf32> to vector<8x8x64xf32>
    %c1_107 = arith.constant 1 : index
    %c1_108 = arith.constant 1 : index
    %c0_109 = arith.constant 0 : index
    %157 = vector.load %arg18[%c1_107, %c1_108, %c0_109] : memref<10x10x64xf32, #tpu.memory_space<vmem>>, vector<8x8x64xf32>
    tpu.vector_store %arg18[%c1_107, %c1_108, %c0_109], %156 {strides = array<i32>} : memref<10x10x64xf32, #tpu.memory_space<vmem>>, vector<8x8x64xf32>,
    %c0_110 = arith.constant 0 : index
    %c0_111 = arith.constant 0 : index
    %c0_112 = arith.constant 0 : index
    %158 = vector.load %arg18[%c0_110, %c0_111, %c0_112] : memref<10x10x64xf32, #tpu.memory_space<vmem>>, vector<10x10x64xf32>
    %cst_113 = arith.constant 0.000000e+00 : f32
    %159 = vector.broadcast %cst_113 : f32 to vector<64x128xf32>
    %160 = vector.extract_strided_slice %158 {offsets = [0, 0, 0], sizes = [8, 8, 64], strides = [1, 1, 1]} : vector<10x10x64xf32> to vector<8x8x64xf32>
    %161 = vector.shape_cast %160 : vector<8x8x64xf32> to vector<64x64xf32>
    %162 = arith.truncf %161 : vector<64x64xf32> to vector<64x64xbf16>
    %c0_114 = arith.constant 0 : index
    %c0_115 = arith.constant 0 : index
    %c0_116 = arith.constant 0 : index
    %163 = vector.load %arg6[%c0_114, %c0_115, %c0_116] : memref<9x64x128xbf16, #tpu.memory_space<vmem>>, vector<1x64x128xbf16>
    %164 = vector.shape_cast %163 : vector<1x64x128xbf16> to vector<64x128xbf16>
    %cst_117 = arith.constant dense<0.000000e+00> : vector<64x128xf32>
    %165 = tpu.matmul %162, %164, %cst_117 {dimension_numbers = #tpu.dot_dimension_numbers<[1], [0], [0], [1], [0, 0, 1, 1], [], []>} : vector<64x64xbf16>, vector<64x128xbf16>, vector<64x128xf32> -> vector<64x128xf32>
    %166 = arith.addf %159, %165 : vector<64x128xf32>
    %167 = vector.extract_strided_slice %158 {offsets = [0, 1, 0], sizes = [8, 8, 64], strides = [1, 1, 1]} : vector<10x10x64xf32> to vector<8x8x64xf32>
    %168 = vector.shape_cast %167 : vector<8x8x64xf32> to vector<64x64xf32>
    %169 = arith.truncf %168 : vector<64x64xf32> to vector<64x64xbf16>
    %c1_118 = arith.constant 1 : index
    %c0_119 = arith.constant 0 : index
    %c0_120 = arith.constant 0 : index
    %170 = vector.load %arg6[%c1_118, %c0_119, %c0_120] : memref<9x64x128xbf16, #tpu.memory_space<vmem>>, vector<1x64x128xbf16>
    %171 = vector.shape_cast %170 : vector<1x64x128xbf16> to vector<64x128xbf16>
    %cst_121 = arith.constant dense<0.000000e+00> : vector<64x128xf32>
    %172 = tpu.matmul %169, %171, %cst_121 {dimension_numbers = #tpu.dot_dimension_numbers<[1], [0], [0], [1], [0, 0, 1, 1], [], []>} : vector<64x64xbf16>, vector<64x128xbf16>, vector<64x128xf32> -> vector<64x128xf32>
    %173 = arith.addf %166, %172 : vector<64x128xf32>
    %174 = vector.extract_strided_slice %158 {offsets = [0, 2, 0], sizes = [8, 8, 64], strides = [1, 1, 1]} : vector<10x10x64xf32> to vector<8x8x64xf32>
    %175 = vector.shape_cast %174 : vector<8x8x64xf32> to vector<64x64xf32>
    %176 = arith.truncf %175 : vector<64x64xf32> to vector<64x64xbf16>
    %c2_122 = arith.constant 2 : index
    %c0_123 = arith.constant 0 : index
    %c0_124 = arith.constant 0 : index
    %177 = vector.load %arg6[%c2_122, %c0_123, %c0_124] : memref<9x64x128xbf16, #tpu.memory_space<vmem>>, vector<1x64x128xbf16>
    %178 = vector.shape_cast %177 : vector<1x64x128xbf16> to vector<64x128xbf16>
    %cst_125 = arith.constant dense<0.000000e+00> : vector<64x128xf32>
    %179 = tpu.matmul %176, %178, %cst_125 {dimension_numbers = #tpu.dot_dimension_numbers<[1], [0], [0], [1], [0, 0, 1, 1], [], []>} : vector<64x64xbf16>, vector<64x128xbf16>, vector<64x128xf32> -> vector<64x128xf32>
    %180 = arith.addf %173, %179 : vector<64x128xf32>
    %181 = vector.extract_strided_slice %158 {offsets = [1, 0, 0], sizes = [8, 8, 64], strides = [1, 1, 1]} : vector<10x10x64xf32> to vector<8x8x64xf32>
    %182 = vector.shape_cast %181 : vector<8x8x64xf32> to vector<64x64xf32>
    %183 = arith.truncf %182 : vector<64x64xf32> to vector<64x64xbf16>
    %c3_126 = arith.constant 3 : index
    %c0_127 = arith.constant 0 : index
    %c0_128 = arith.constant 0 : index
    %184 = vector.load %arg6[%c3_126, %c0_127, %c0_128] : memref<9x64x128xbf16, #tpu.memory_space<vmem>>, vector<1x64x128xbf16>
    %185 = vector.shape_cast %184 : vector<1x64x128xbf16> to vector<64x128xbf16>
    %cst_129 = arith.constant dense<0.000000e+00> : vector<64x128xf32>
    %186 = tpu.matmul %183, %185, %cst_129 {dimension_numbers = #tpu.dot_dimension_numbers<[1], [0], [0], [1], [0, 0, 1, 1], [], []>} : vector<64x64xbf16>, vector<64x128xbf16>, vector<64x128xf32> -> vector<64x128xf32>
    %187 = arith.addf %180, %186 : vector<64x128xf32>
    %188 = vector.extract_strided_slice %158 {offsets = [1, 1, 0], sizes = [8, 8, 64], strides = [1, 1, 1]} : vector<10x10x64xf32> to vector<8x8x64xf32>
    %189 = vector.shape_cast %188 : vector<8x8x64xf32> to vector<64x64xf32>
    %190 = arith.truncf %189 : vector<64x64xf32> to vector<64x64xbf16>
    %c4_130 = arith.constant 4 : index
    %c0_131 = arith.constant 0 : index
    %c0_132 = arith.constant 0 : index
    %191 = vector.load %arg6[%c4_130, %c0_131, %c0_132] : memref<9x64x128xbf16, #tpu.memory_space<vmem>>, vector<1x64x128xbf16>
    %192 = vector.shape_cast %191 : vector<1x64x128xbf16> to vector<64x128xbf16>
    %cst_133 = arith.constant dense<0.000000e+00> : vector<64x128xf32>
    %193 = tpu.matmul %190, %192, %cst_133 {dimension_numbers = #tpu.dot_dimension_numbers<[1], [0], [0], [1], [0, 0, 1, 1], [], []>} : vector<64x64xbf16>, vector<64x128xbf16>, vector<64x128xf32> -> vector<64x128xf32>
    %194 = arith.addf %187, %193 : vector<64x128xf32>
    %195 = vector.extract_strided_slice %158 {offsets = [1, 2, 0], sizes = [8, 8, 64], strides = [1, 1, 1]} : vector<10x10x64xf32> to vector<8x8x64xf32>
    %196 = vector.shape_cast %195 : vector<8x8x64xf32> to vector<64x64xf32>
    %197 = arith.truncf %196 : vector<64x64xf32> to vector<64x64xbf16>
    %c5_134 = arith.constant 5 : index
    %c0_135 = arith.constant 0 : index
    %c0_136 = arith.constant 0 : index
    %198 = vector.load %arg6[%c5_134, %c0_135, %c0_136] : memref<9x64x128xbf16, #tpu.memory_space<vmem>>, vector<1x64x128xbf16>
    %199 = vector.shape_cast %198 : vector<1x64x128xbf16> to vector<64x128xbf16>
    %cst_137 = arith.constant dense<0.000000e+00> : vector<64x128xf32>
    %200 = tpu.matmul %197, %199, %cst_137 {dimension_numbers = #tpu.dot_dimension_numbers<[1], [0], [0], [1], [0, 0, 1, 1], [], []>} : vector<64x64xbf16>, vector<64x128xbf16>, vector<64x128xf32> -> vector<64x128xf32>
    %201 = arith.addf %194, %200 : vector<64x128xf32>
    %202 = vector.extract_strided_slice %158 {offsets = [2, 0, 0], sizes = [8, 8, 64], strides = [1, 1, 1]} : vector<10x10x64xf32> to vector<8x8x64xf32>
    %203 = vector.shape_cast %202 : vector<8x8x64xf32> to vector<64x64xf32>
    %204 = arith.truncf %203 : vector<64x64xf32> to vector<64x64xbf16>
    %c6_138 = arith.constant 6 : index
    %c0_139 = arith.constant 0 : index
    %c0_140 = arith.constant 0 : index
    %205 = vector.load %arg6[%c6_138, %c0_139, %c0_140] : memref<9x64x128xbf16, #tpu.memory_space<vmem>>, vector<1x64x128xbf16>
    %206 = vector.shape_cast %205 : vector<1x64x128xbf16> to vector<64x128xbf16>
    %cst_141 = arith.constant dense<0.000000e+00> : vector<64x128xf32>
    %207 = tpu.matmul %204, %206, %cst_141 {dimension_numbers = #tpu.dot_dimension_numbers<[1], [0], [0], [1], [0, 0, 1, 1], [], []>} : vector<64x64xbf16>, vector<64x128xbf16>, vector<64x128xf32> -> vector<64x128xf32>
    %208 = arith.addf %201, %207 : vector<64x128xf32>
    %209 = vector.extract_strided_slice %158 {offsets = [2, 1, 0], sizes = [8, 8, 64], strides = [1, 1, 1]} : vector<10x10x64xf32> to vector<8x8x64xf32>
    %210 = vector.shape_cast %209 : vector<8x8x64xf32> to vector<64x64xf32>
    %211 = arith.truncf %210 : vector<64x64xf32> to vector<64x64xbf16>
    %c7_142 = arith.constant 7 : index
    %c0_143 = arith.constant 0 : index
    %c0_144 = arith.constant 0 : index
    %212 = vector.load %arg6[%c7_142, %c0_143, %c0_144] : memref<9x64x128xbf16, #tpu.memory_space<vmem>>, vector<1x64x128xbf16>
    %213 = vector.shape_cast %212 : vector<1x64x128xbf16> to vector<64x128xbf16>
    %cst_145 = arith.constant dense<0.000000e+00> : vector<64x128xf32>
    %214 = tpu.matmul %211, %213, %cst_145 {dimension_numbers = #tpu.dot_dimension_numbers<[1], [0], [0], [1], [0, 0, 1, 1], [], []>} : vector<64x64xbf16>, vector<64x128xbf16>, vector<64x128xf32> -> vector<64x128xf32>
    %215 = arith.addf %208, %214 : vector<64x128xf32>
    %216 = vector.extract_strided_slice %158 {offsets = [2, 2, 0], sizes = [8, 8, 64], strides = [1, 1, 1]} : vector<10x10x64xf32> to vector<8x8x64xf32>
    %217 = vector.shape_cast %216 : vector<8x8x64xf32> to vector<64x64xf32>
    %218 = arith.truncf %217 : vector<64x64xf32> to vector<64x64xbf16>
    %c8_146 = arith.constant 8 : index
    %c0_147 = arith.constant 0 : index
    %c0_148 = arith.constant 0 : index
    %219 = vector.load %arg6[%c8_146, %c0_147, %c0_148] : memref<9x64x128xbf16, #tpu.memory_space<vmem>>, vector<1x64x128xbf16>
    %220 = vector.shape_cast %219 : vector<1x64x128xbf16> to vector<64x128xbf16>
    %cst_149 = arith.constant dense<0.000000e+00> : vector<64x128xf32>
    %221 = tpu.matmul %218, %220, %cst_149 {dimension_numbers = #tpu.dot_dimension_numbers<[1], [0], [0], [1], [0, 0, 1, 1], [], []>} : vector<64x64xbf16>, vector<64x128xbf16>, vector<64x128xf32> -> vector<64x128xf32>
    %222 = arith.addf %215, %221 : vector<64x128xf32>
    %c0_150 = arith.constant 0 : index
    %c0_151 = arith.constant 0 : index
    %223 = vector.load %arg7[%c0_150, %c0_151] : memref<1x128xf32, #tpu.memory_space<vmem>>, vector<1x128xf32>
    %224 = vector.broadcast %223 : vector<1x128xf32> to vector<64x128xf32>
    %225 = arith.addf %222, %224 : vector<64x128xf32>
    %cst_152 = arith.constant 0.000000e+00 : f32
    %226 = vector.broadcast %cst_152 : f32 to vector<64x128xf32>
    %227 = arith.maximumf %225, %226 : vector<64x128xf32>
    %228 = vector.shape_cast %227 : vector<64x128xf32> to vector<8x8x128xf32>
    %c1_153 = arith.constant 1 : index
    %c1_154 = arith.constant 1 : index
    %c0_155 = arith.constant 0 : index
    %229 = vector.load %arg19[%c1_153, %c1_154, %c0_155] : memref<10x10x128xf32, #tpu.memory_space<vmem>>, vector<8x8x128xf32>
    tpu.vector_store %arg19[%c1_153, %c1_154, %c0_155], %228 {strides = array<i32>} : memref<10x10x128xf32, #tpu.memory_space<vmem>>, vector<8x8x128xf32>,
    %c0_156 = arith.constant 0 : index
    %c0_157 = arith.constant 0 : index
    %c0_158 = arith.constant 0 : index
    %230 = vector.load %arg19[%c0_156, %c0_157, %c0_158] : memref<10x10x128xf32, #tpu.memory_space<vmem>>, vector<10x10x128xf32>
    %cst_159 = arith.constant 0.000000e+00 : f32
    %231 = vector.broadcast %cst_159 : f32 to vector<64x128xf32>
    %232 = vector.extract_strided_slice %230 {offsets = [0, 0, 0], sizes = [8, 8, 128], strides = [1, 1, 1]} : vector<10x10x128xf32> to vector<8x8x128xf32>
    %233 = vector.shape_cast %232 : vector<8x8x128xf32> to vector<64x128xf32>
    %234 = arith.truncf %233 : vector<64x128xf32> to vector<64x128xbf16>
    %c0_160 = arith.constant 0 : index
    %c0_161 = arith.constant 0 : index
    %c0_162 = arith.constant 0 : index
    %235 = vector.load %arg8[%c0_160, %c0_161, %c0_162] : memref<9x128x128xbf16, #tpu.memory_space<vmem>>, vector<1x128x128xbf16>
    %236 = vector.shape_cast %235 : vector<1x128x128xbf16> to vector<128x128xbf16>
    %cst_163 = arith.constant dense<0.000000e+00> : vector<64x128xf32>
    %237 = tpu.matmul %234, %236, %cst_163 {dimension_numbers = #tpu.dot_dimension_numbers<[1], [0], [0], [1], [0, 0, 1, 1], [], []>} : vector<64x128xbf16>, vector<128x128xbf16>, vector<64x128xf32> -> vector<64x128xf32>
    %238 = arith.addf %231, %237 : vector<64x128xf32>
    %239 = vector.extract_strided_slice %230 {offsets = [0, 1, 0], sizes = [8, 8, 128], strides = [1, 1, 1]} : vector<10x10x128xf32> to vector<8x8x128xf32>
    %240 = vector.shape_cast %239 : vector<8x8x128xf32> to vector<64x128xf32>
    %241 = arith.truncf %240 : vector<64x128xf32> to vector<64x128xbf16>
    %c1_164 = arith.constant 1 : index
    %c0_165 = arith.constant 0 : index
    %c0_166 = arith.constant 0 : index
    %242 = vector.load %arg8[%c1_164, %c0_165, %c0_166] : memref<9x128x128xbf16, #tpu.memory_space<vmem>>, vector<1x128x128xbf16>
    %243 = vector.shape_cast %242 : vector<1x128x128xbf16> to vector<128x128xbf16>
    %cst_167 = arith.constant dense<0.000000e+00> : vector<64x128xf32>
    %244 = tpu.matmul %241, %243, %cst_167 {dimension_numbers = #tpu.dot_dimension_numbers<[1], [0], [0], [1], [0, 0, 1, 1], [], []>} : vector<64x128xbf16>, vector<128x128xbf16>, vector<64x128xf32> -> vector<64x128xf32>
    %245 = arith.addf %238, %244 : vector<64x128xf32>
    %246 = vector.extract_strided_slice %230 {offsets = [0, 2, 0], sizes = [8, 8, 128], strides = [1, 1, 1]} : vector<10x10x128xf32> to vector<8x8x128xf32>
    %247 = vector.shape_cast %246 : vector<8x8x128xf32> to vector<64x128xf32>
    %248 = arith.truncf %247 : vector<64x128xf32> to vector<64x128xbf16>
    %c2_168 = arith.constant 2 : index
    %c0_169 = arith.constant 0 : index
    %c0_170 = arith.constant 0 : index
    %249 = vector.load %arg8[%c2_168, %c0_169, %c0_170] : memref<9x128x128xbf16, #tpu.memory_space<vmem>>, vector<1x128x128xbf16>
    %250 = vector.shape_cast %249 : vector<1x128x128xbf16> to vector<128x128xbf16>
    %cst_171 = arith.constant dense<0.000000e+00> : vector<64x128xf32>
    %251 = tpu.matmul %248, %250, %cst_171 {dimension_numbers = #tpu.dot_dimension_numbers<[1], [0], [0], [1], [0, 0, 1, 1], [], []>} : vector<64x128xbf16>, vector<128x128xbf16>, vector<64x128xf32> -> vector<64x128xf32>
    %252 = arith.addf %245, %251 : vector<64x128xf32>
    %253 = vector.extract_strided_slice %230 {offsets = [1, 0, 0], sizes = [8, 8, 128], strides = [1, 1, 1]} : vector<10x10x128xf32> to vector<8x8x128xf32>
    %254 = vector.shape_cast %253 : vector<8x8x128xf32> to vector<64x128xf32>
    %255 = arith.truncf %254 : vector<64x128xf32> to vector<64x128xbf16>
    %c3_172 = arith.constant 3 : index
    %c0_173 = arith.constant 0 : index
    %c0_174 = arith.constant 0 : index
    %256 = vector.load %arg8[%c3_172, %c0_173, %c0_174] : memref<9x128x128xbf16, #tpu.memory_space<vmem>>, vector<1x128x128xbf16>
    %257 = vector.shape_cast %256 : vector<1x128x128xbf16> to vector<128x128xbf16>
    %cst_175 = arith.constant dense<0.000000e+00> : vector<64x128xf32>
    %258 = tpu.matmul %255, %257, %cst_175 {dimension_numbers = #tpu.dot_dimension_numbers<[1], [0], [0], [1], [0, 0, 1, 1], [], []>} : vector<64x128xbf16>, vector<128x128xbf16>, vector<64x128xf32> -> vector<64x128xf32>
    %259 = arith.addf %252, %258 : vector<64x128xf32>
    %260 = vector.extract_strided_slice %230 {offsets = [1, 1, 0], sizes = [8, 8, 128], strides = [1, 1, 1]} : vector<10x10x128xf32> to vector<8x8x128xf32>
    %261 = vector.shape_cast %260 : vector<8x8x128xf32> to vector<64x128xf32>
    %262 = arith.truncf %261 : vector<64x128xf32> to vector<64x128xbf16>
    %c4_176 = arith.constant 4 : index
    %c0_177 = arith.constant 0 : index
    %c0_178 = arith.constant 0 : index
    %263 = vector.load %arg8[%c4_176, %c0_177, %c0_178] : memref<9x128x128xbf16, #tpu.memory_space<vmem>>, vector<1x128x128xbf16>
    %264 = vector.shape_cast %263 : vector<1x128x128xbf16> to vector<128x128xbf16>
    %cst_179 = arith.constant dense<0.000000e+00> : vector<64x128xf32>
    %265 = tpu.matmul %262, %264, %cst_179 {dimension_numbers = #tpu.dot_dimension_numbers<[1], [0], [0], [1], [0, 0, 1, 1], [], []>} : vector<64x128xbf16>, vector<128x128xbf16>, vector<64x128xf32> -> vector<64x128xf32>
    %266 = arith.addf %259, %265 : vector<64x128xf32>
    %267 = vector.extract_strided_slice %230 {offsets = [1, 2, 0], sizes = [8, 8, 128], strides = [1, 1, 1]} : vector<10x10x128xf32> to vector<8x8x128xf32>
    %268 = vector.shape_cast %267 : vector<8x8x128xf32> to vector<64x128xf32>
    %269 = arith.truncf %268 : vector<64x128xf32> to vector<64x128xbf16>
    %c5_180 = arith.constant 5 : index
    %c0_181 = arith.constant 0 : index
    %c0_182 = arith.constant 0 : index
    %270 = vector.load %arg8[%c5_180, %c0_181, %c0_182] : memref<9x128x128xbf16, #tpu.memory_space<vmem>>, vector<1x128x128xbf16>
    %271 = vector.shape_cast %270 : vector<1x128x128xbf16> to vector<128x128xbf16>
    %cst_183 = arith.constant dense<0.000000e+00> : vector<64x128xf32>
    %272 = tpu.matmul %269, %271, %cst_183 {dimension_numbers = #tpu.dot_dimension_numbers<[1], [0], [0], [1], [0, 0, 1, 1], [], []>} : vector<64x128xbf16>, vector<128x128xbf16>, vector<64x128xf32> -> vector<64x128xf32>
    %273 = arith.addf %266, %272 : vector<64x128xf32>
    %274 = vector.extract_strided_slice %230 {offsets = [2, 0, 0], sizes = [8, 8, 128], strides = [1, 1, 1]} : vector<10x10x128xf32> to vector<8x8x128xf32>
    %275 = vector.shape_cast %274 : vector<8x8x128xf32> to vector<64x128xf32>
    %276 = arith.truncf %275 : vector<64x128xf32> to vector<64x128xbf16>
    %c6_184 = arith.constant 6 : index
    %c0_185 = arith.constant 0 : index
    %c0_186 = arith.constant 0 : index
    %277 = vector.load %arg8[%c6_184, %c0_185, %c0_186] : memref<9x128x128xbf16, #tpu.memory_space<vmem>>, vector<1x128x128xbf16>
    %278 = vector.shape_cast %277 : vector<1x128x128xbf16> to vector<128x128xbf16>
    %cst_187 = arith.constant dense<0.000000e+00> : vector<64x128xf32>
    %279 = tpu.matmul %276, %278, %cst_187 {dimension_numbers = #tpu.dot_dimension_numbers<[1], [0], [0], [1], [0, 0, 1, 1], [], []>} : vector<64x128xbf16>, vector<128x128xbf16>, vector<64x128xf32> -> vector<64x128xf32>
    %280 = arith.addf %273, %279 : vector<64x128xf32>
    %281 = vector.extract_strided_slice %230 {offsets = [2, 1, 0], sizes = [8, 8, 128], strides = [1, 1, 1]} : vector<10x10x128xf32> to vector<8x8x128xf32>
    %282 = vector.shape_cast %281 : vector<8x8x128xf32> to vector<64x128xf32>
    %283 = arith.truncf %282 : vector<64x128xf32> to vector<64x128xbf16>
    %c7_188 = arith.constant 7 : index
    %c0_189 = arith.constant 0 : index
    %c0_190 = arith.constant 0 : index
    %284 = vector.load %arg8[%c7_188, %c0_189, %c0_190] : memref<9x128x128xbf16, #tpu.memory_space<vmem>>, vector<1x128x128xbf16>
    %285 = vector.shape_cast %284 : vector<1x128x128xbf16> to vector<128x128xbf16>
    %cst_191 = arith.constant dense<0.000000e+00> : vector<64x128xf32>
    %286 = tpu.matmul %283, %285, %cst_191 {dimension_numbers = #tpu.dot_dimension_numbers<[1], [0], [0], [1], [0, 0, 1, 1], [], []>} : vector<64x128xbf16>, vector<128x128xbf16>, vector<64x128xf32> -> vector<64x128xf32>
    %287 = arith.addf %280, %286 : vector<64x128xf32>
    %288 = vector.extract_strided_slice %230 {offsets = [2, 2, 0], sizes = [8, 8, 128], strides = [1, 1, 1]} : vector<10x10x128xf32> to vector<8x8x128xf32>
    %289 = vector.shape_cast %288 : vector<8x8x128xf32> to vector<64x128xf32>
    %290 = arith.truncf %289 : vector<64x128xf32> to vector<64x128xbf16>
    %c8_192 = arith.constant 8 : index
    %c0_193 = arith.constant 0 : index
    %c0_194 = arith.constant 0 : index
    %291 = vector.load %arg8[%c8_192, %c0_193, %c0_194] : memref<9x128x128xbf16, #tpu.memory_space<vmem>>, vector<1x128x128xbf16>
    %292 = vector.shape_cast %291 : vector<1x128x128xbf16> to vector<128x128xbf16>
    %cst_195 = arith.constant dense<0.000000e+00> : vector<64x128xf32>
    %293 = tpu.matmul %290, %292, %cst_195 {dimension_numbers = #tpu.dot_dimension_numbers<[1], [0], [0], [1], [0, 0, 1, 1], [], []>} : vector<64x128xbf16>, vector<128x128xbf16>, vector<64x128xf32> -> vector<64x128xf32>
    %294 = arith.addf %287, %293 : vector<64x128xf32>
    %c0_196 = arith.constant 0 : index
    %c0_197 = arith.constant 0 : index
    %295 = vector.load %arg9[%c0_196, %c0_197] : memref<1x128xf32, #tpu.memory_space<vmem>>, vector<1x128xf32>
    %296 = vector.broadcast %295 : vector<1x128xf32> to vector<64x128xf32>
    %297 = arith.addf %294, %296 : vector<64x128xf32>
    %cst_198 = arith.constant 0.000000e+00 : f32
    %298 = vector.broadcast %cst_198 : f32 to vector<64x128xf32>
    %299 = arith.maximumf %297, %298 : vector<64x128xf32>
    %c0_199 = arith.constant 0 : index
    %c0_200 = arith.constant 0 : index
    %300 = vector.load %arg14[%c0_199, %c0_200] : memref<256x64xf32, #tpu.memory_space<vmem>>, vector<256x64xf32>
    %cst_201 = arith.constant dense<0.000000e+00> : vector<256x128xf32>
    %301 = tpu.matmul %300, %299, %cst_201 {dimension_numbers = #tpu.dot_dimension_numbers<[1], [0], [0], [1], [0, 0, 1, 1], [], []>} : vector<256x64xf32>, vector<64x128xf32>, vector<256x128xf32> -> vector<256x128xf32>
    %302 = vector.shape_cast %301 : vector<256x128xf32> to vector<16x16x128xf32>
    %c1_202 = arith.constant 1 : index
    %c1_203 = arith.constant 1 : index
    %c0_204 = arith.constant 0 : index
    %303 = vector.load %arg20[%c1_202, %c1_203, %c0_204] : memref<18x18x128xf32, #tpu.memory_space<vmem>>, vector<16x16x128xf32>
    tpu.vector_store %arg20[%c1_202, %c1_203, %c0_204], %302 {strides = array<i32>} : memref<18x18x128xf32, #tpu.memory_space<vmem>>, vector<16x16x128xf32>,
    %c0_205 = arith.constant 0 : index
    %c0_206 = arith.constant 0 : index
    %c0_207 = arith.constant 0 : index
    %304 = vector.load %arg20[%c0_205, %c0_206, %c0_207] : memref<18x18x128xf32, #tpu.memory_space<vmem>>, vector<18x18x128xf32>
    %cst_208 = arith.constant 0.000000e+00 : f32
    %305 = vector.broadcast %cst_208 : f32 to vector<256x64xf32>
    %306 = vector.extract_strided_slice %304 {offsets = [0, 0, 0], sizes = [16, 16, 128], strides = [1, 1, 1]} : vector<18x18x128xf32> to vector<16x16x128xf32>
    %307 = vector.shape_cast %306 : vector<16x16x128xf32> to vector<256x128xf32>
    %308 = arith.truncf %307 : vector<256x128xf32> to vector<256x128xbf16>
    %c0_209 = arith.constant 0 : index
    %c0_210 = arith.constant 0 : index
    %c0_211 = arith.constant 0 : index
    %309 = vector.load %arg10[%c0_209, %c0_210, %c0_211] : memref<9x128x64xbf16, #tpu.memory_space<vmem>>, vector<1x128x64xbf16>
    %310 = vector.shape_cast %309 : vector<1x128x64xbf16> to vector<128x64xbf16>
    %cst_212 = arith.constant dense<0.000000e+00> : vector<256x64xf32>
    %311 = tpu.matmul %308, %310, %cst_212 {dimension_numbers = #tpu.dot_dimension_numbers<[1], [0], [0], [1], [0, 0, 1, 1], [], []>} : vector<256x128xbf16>, vector<128x64xbf16>, vector<256x64xf32> -> vector<256x64xf32>
    %312 = arith.addf %305, %311 : vector<256x64xf32>
    %313 = vector.extract_strided_slice %304 {offsets = [0, 1, 0], sizes = [16, 16, 128], strides = [1, 1, 1]} : vector<18x18x128xf32> to vector<16x16x128xf32>
    %314 = vector.shape_cast %313 : vector<16x16x128xf32> to vector<256x128xf32>
    %315 = arith.truncf %314 : vector<256x128xf32> to vector<256x128xbf16>
    %c1_213 = arith.constant 1 : index
    %c0_214 = arith.constant 0 : index
    %c0_215 = arith.constant 0 : index
    %316 = vector.load %arg10[%c1_213, %c0_214, %c0_215] : memref<9x128x64xbf16, #tpu.memory_space<vmem>>, vector<1x128x64xbf16>
    %317 = vector.shape_cast %316 : vector<1x128x64xbf16> to vector<128x64xbf16>
    %cst_216 = arith.constant dense<0.000000e+00> : vector<256x64xf32>
    %318 = tpu.matmul %315, %317, %cst_216 {dimension_numbers = #tpu.dot_dimension_numbers<[1], [0], [0], [1], [0, 0, 1, 1], [], []>} : vector<256x128xbf16>, vector<128x64xbf16>, vector<256x64xf32> -> vector<256x64xf32>
    %319 = arith.addf %312, %318 : vector<256x64xf32>
    %320 = vector.extract_strided_slice %304 {offsets = [0, 2, 0], sizes = [16, 16, 128], strides = [1, 1, 1]} : vector<18x18x128xf32> to vector<16x16x128xf32>
    %321 = vector.shape_cast %320 : vector<16x16x128xf32> to vector<256x128xf32>
    %322 = arith.truncf %321 : vector<256x128xf32> to vector<256x128xbf16>
    %c2_217 = arith.constant 2 : index
    %c0_218 = arith.constant 0 : index
    %c0_219 = arith.constant 0 : index
    %323 = vector.load %arg10[%c2_217, %c0_218, %c0_219] : memref<9x128x64xbf16, #tpu.memory_space<vmem>>, vector<1x128x64xbf16>
    %324 = vector.shape_cast %323 : vector<1x128x64xbf16> to vector<128x64xbf16>
    %cst_220 = arith.constant dense<0.000000e+00> : vector<256x64xf32>
    %325 = tpu.matmul %322, %324, %cst_220 {dimension_numbers = #tpu.dot_dimension_numbers<[1], [0], [0], [1], [0, 0, 1, 1], [], []>} : vector<256x128xbf16>, vector<128x64xbf16>, vector<256x64xf32> -> vector<256x64xf32>
    %326 = arith.addf %319, %325 : vector<256x64xf32>
    %327 = vector.extract_strided_slice %304 {offsets = [1, 0, 0], sizes = [16, 16, 128], strides = [1, 1, 1]} : vector<18x18x128xf32> to vector<16x16x128xf32>
    %328 = vector.shape_cast %327 : vector<16x16x128xf32> to vector<256x128xf32>
    %329 = arith.truncf %328 : vector<256x128xf32> to vector<256x128xbf16>
    %c3_221 = arith.constant 3 : index
    %c0_222 = arith.constant 0 : index
    %c0_223 = arith.constant 0 : index
    %330 = vector.load %arg10[%c3_221, %c0_222, %c0_223] : memref<9x128x64xbf16, #tpu.memory_space<vmem>>, vector<1x128x64xbf16>
    %331 = vector.shape_cast %330 : vector<1x128x64xbf16> to vector<128x64xbf16>
    %cst_224 = arith.constant dense<0.000000e+00> : vector<256x64xf32>
    %332 = tpu.matmul %329, %331, %cst_224 {dimension_numbers = #tpu.dot_dimension_numbers<[1], [0], [0], [1], [0, 0, 1, 1], [], []>} : vector<256x128xbf16>, vector<128x64xbf16>, vector<256x64xf32> -> vector<256x64xf32>
    %333 = arith.addf %326, %332 : vector<256x64xf32>
    %334 = vector.extract_strided_slice %304 {offsets = [1, 1, 0], sizes = [16, 16, 128], strides = [1, 1, 1]} : vector<18x18x128xf32> to vector<16x16x128xf32>
    %335 = vector.shape_cast %334 : vector<16x16x128xf32> to vector<256x128xf32>
    %336 = arith.truncf %335 : vector<256x128xf32> to vector<256x128xbf16>
    %c4_225 = arith.constant 4 : index
    %c0_226 = arith.constant 0 : index
    %c0_227 = arith.constant 0 : index
    %337 = vector.load %arg10[%c4_225, %c0_226, %c0_227] : memref<9x128x64xbf16, #tpu.memory_space<vmem>>, vector<1x128x64xbf16>
    %338 = vector.shape_cast %337 : vector<1x128x64xbf16> to vector<128x64xbf16>
    %cst_228 = arith.constant dense<0.000000e+00> : vector<256x64xf32>
    %339 = tpu.matmul %336, %338, %cst_228 {dimension_numbers = #tpu.dot_dimension_numbers<[1], [0], [0], [1], [0, 0, 1, 1], [], []>} : vector<256x128xbf16>, vector<128x64xbf16>, vector<256x64xf32> -> vector<256x64xf32>
    %340 = arith.addf %333, %339 : vector<256x64xf32>
    %341 = vector.extract_strided_slice %304 {offsets = [1, 2, 0], sizes = [16, 16, 128], strides = [1, 1, 1]} : vector<18x18x128xf32> to vector<16x16x128xf32>
    %342 = vector.shape_cast %341 : vector<16x16x128xf32> to vector<256x128xf32>
    %343 = arith.truncf %342 : vector<256x128xf32> to vector<256x128xbf16>
    %c5_229 = arith.constant 5 : index
    %c0_230 = arith.constant 0 : index
    %c0_231 = arith.constant 0 : index
    %344 = vector.load %arg10[%c5_229, %c0_230, %c0_231] : memref<9x128x64xbf16, #tpu.memory_space<vmem>>, vector<1x128x64xbf16>
    %345 = vector.shape_cast %344 : vector<1x128x64xbf16> to vector<128x64xbf16>
    %cst_232 = arith.constant dense<0.000000e+00> : vector<256x64xf32>
    %346 = tpu.matmul %343, %345, %cst_232 {dimension_numbers = #tpu.dot_dimension_numbers<[1], [0], [0], [1], [0, 0, 1, 1], [], []>} : vector<256x128xbf16>, vector<128x64xbf16>, vector<256x64xf32> -> vector<256x64xf32>
    %347 = arith.addf %340, %346 : vector<256x64xf32>
    %348 = vector.extract_strided_slice %304 {offsets = [2, 0, 0], sizes = [16, 16, 128], strides = [1, 1, 1]} : vector<18x18x128xf32> to vector<16x16x128xf32>
    %349 = vector.shape_cast %348 : vector<16x16x128xf32> to vector<256x128xf32>
    %350 = arith.truncf %349 : vector<256x128xf32> to vector<256x128xbf16>
    %c6_233 = arith.constant 6 : index
    %c0_234 = arith.constant 0 : index
    %c0_235 = arith.constant 0 : index
    %351 = vector.load %arg10[%c6_233, %c0_234, %c0_235] : memref<9x128x64xbf16, #tpu.memory_space<vmem>>, vector<1x128x64xbf16>
    %352 = vector.shape_cast %351 : vector<1x128x64xbf16> to vector<128x64xbf16>
    %cst_236 = arith.constant dense<0.000000e+00> : vector<256x64xf32>
    %353 = tpu.matmul %350, %352, %cst_236 {dimension_numbers = #tpu.dot_dimension_numbers<[1], [0], [0], [1], [0, 0, 1, 1], [], []>} : vector<256x128xbf16>, vector<128x64xbf16>, vector<256x64xf32> -> vector<256x64xf32>
    %354 = arith.addf %347, %353 : vector<256x64xf32>
    %355 = vector.extract_strided_slice %304 {offsets = [2, 1, 0], sizes = [16, 16, 128], strides = [1, 1, 1]} : vector<18x18x128xf32> to vector<16x16x128xf32>
    %356 = vector.shape_cast %355 : vector<16x16x128xf32> to vector<256x128xf32>
    %357 = arith.truncf %356 : vector<256x128xf32> to vector<256x128xbf16>
    %c7_237 = arith.constant 7 : index
    %c0_238 = arith.constant 0 : index
    %c0_239 = arith.constant 0 : index
    %358 = vector.load %arg10[%c7_237, %c0_238, %c0_239] : memref<9x128x64xbf16, #tpu.memory_space<vmem>>, vector<1x128x64xbf16>
    %359 = vector.shape_cast %358 : vector<1x128x64xbf16> to vector<128x64xbf16>
    %cst_240 = arith.constant dense<0.000000e+00> : vector<256x64xf32>
    %360 = tpu.matmul %357, %359, %cst_240 {dimension_numbers = #tpu.dot_dimension_numbers<[1], [0], [0], [1], [0, 0, 1, 1], [], []>} : vector<256x128xbf16>, vector<128x64xbf16>, vector<256x64xf32> -> vector<256x64xf32>
    %361 = arith.addf %354, %360 : vector<256x64xf32>
    %362 = vector.extract_strided_slice %304 {offsets = [2, 2, 0], sizes = [16, 16, 128], strides = [1, 1, 1]} : vector<18x18x128xf32> to vector<16x16x128xf32>
    %363 = vector.shape_cast %362 : vector<16x16x128xf32> to vector<256x128xf32>
    %364 = arith.truncf %363 : vector<256x128xf32> to vector<256x128xbf16>
    %c8_241 = arith.constant 8 : index
    %c0_242 = arith.constant 0 : index
    %c0_243 = arith.constant 0 : index
    %365 = vector.load %arg10[%c8_241, %c0_242, %c0_243] : memref<9x128x64xbf16, #tpu.memory_space<vmem>>, vector<1x128x64xbf16>
    %366 = vector.shape_cast %365 : vector<1x128x64xbf16> to vector<128x64xbf16>
    %cst_244 = arith.constant dense<0.000000e+00> : vector<256x64xf32>
    %367 = tpu.matmul %364, %366, %cst_244 {dimension_numbers = #tpu.dot_dimension_numbers<[1], [0], [0], [1], [0, 0, 1, 1], [], []>} : vector<256x128xbf16>, vector<128x64xbf16>, vector<256x64xf32> -> vector<256x64xf32>
    %368 = arith.addf %361, %367 : vector<256x64xf32>
    %c0_245 = arith.constant 0 : index
    %c0_246 = arith.constant 0 : index
    %369 = vector.load %arg11[%c0_245, %c0_246] : memref<1x64xf32, #tpu.memory_space<vmem>>, vector<1x64xf32>
    %370 = vector.broadcast %369 : vector<1x64xf32> to vector<256x64xf32>
    %371 = arith.addf %368, %370 : vector<256x64xf32>
    %cst_247 = arith.constant 0.000000e+00 : f32
    %372 = vector.broadcast %cst_247 : f32 to vector<256x64xf32>
    %373 = arith.maximumf %371, %372 : vector<256x64xf32>
    %374 = vector.shape_cast %373 : vector<256x64xf32> to vector<16x16x64xf32>
    %c1_248 = arith.constant 1 : index
    %c1_249 = arith.constant 1 : index
    %c0_250 = arith.constant 0 : index
    %375 = vector.load %arg17[%c1_248, %c1_249, %c0_250] : memref<18x18x64xf32, #tpu.memory_space<vmem>>, vector<16x16x64xf32>
    tpu.vector_store %arg17[%c1_248, %c1_249, %c0_250], %374 {strides = array<i32>} : memref<18x18x64xf32, #tpu.memory_space<vmem>>, vector<16x16x64xf32>,
    %c0_251 = arith.constant 0 : index
    %c0_252 = arith.constant 0 : index
    %c0_253 = arith.constant 0 : index
    %376 = vector.load %arg17[%c0_251, %c0_252, %c0_253] : memref<18x18x64xf32, #tpu.memory_space<vmem>>, vector<18x18x64xf32>
    %cst_254 = arith.constant 0.000000e+00 : f32
    %377 = vector.broadcast %cst_254 : f32 to vector<256x2xf32>
    %378 = vector.extract_strided_slice %376 {offsets = [0, 0, 0], sizes = [16, 16, 64], strides = [1, 1, 1]} : vector<18x18x64xf32> to vector<16x16x64xf32>
    %379 = vector.shape_cast %378 : vector<16x16x64xf32> to vector<256x64xf32>
    %380 = arith.truncf %379 : vector<256x64xf32> to vector<256x64xbf16>
    %c0_255 = arith.constant 0 : index
    %c0_256 = arith.constant 0 : index
    %c0_257 = arith.constant 0 : index
    %381 = vector.load %arg12[%c0_255, %c0_256, %c0_257] : memref<9x64x2xbf16, #tpu.memory_space<vmem>>, vector<1x64x2xbf16>
    %382 = vector.shape_cast %381 : vector<1x64x2xbf16> to vector<64x2xbf16>
    %cst_258 = arith.constant dense<0.000000e+00> : vector<256x2xf32>
    %383 = tpu.matmul %380, %382, %cst_258 {dimension_numbers = #tpu.dot_dimension_numbers<[1], [0], [0], [1], [0, 0, 1, 1], [], []>} : vector<256x64xbf16>, vector<64x2xbf16>, vector<256x2xf32> -> vector<256x2xf32>
    %384 = arith.addf %377, %383 : vector<256x2xf32>
    %385 = vector.extract_strided_slice %376 {offsets = [0, 1, 0], sizes = [16, 16, 64], strides = [1, 1, 1]} : vector<18x18x64xf32> to vector<16x16x64xf32>
    %386 = vector.shape_cast %385 : vector<16x16x64xf32> to vector<256x64xf32>
    %387 = arith.truncf %386 : vector<256x64xf32> to vector<256x64xbf16>
    %c1_259 = arith.constant 1 : index
    %c0_260 = arith.constant 0 : index
    %c0_261 = arith.constant 0 : index
    %388 = vector.load %arg12[%c1_259, %c0_260, %c0_261] : memref<9x64x2xbf16, #tpu.memory_space<vmem>>, vector<1x64x2xbf16>
    %389 = vector.shape_cast %388 : vector<1x64x2xbf16> to vector<64x2xbf16>
    %cst_262 = arith.constant dense<0.000000e+00> : vector<256x2xf32>
    %390 = tpu.matmul %387, %389, %cst_262 {dimension_numbers = #tpu.dot_dimension_numbers<[1], [0], [0], [1], [0, 0, 1, 1], [], []>} : vector<256x64xbf16>, vector<64x2xbf16>, vector<256x2xf32> -> vector<256x2xf32>
    %391 = arith.addf %384, %390 : vector<256x2xf32>
    %392 = vector.extract_strided_slice %376 {offsets = [0, 2, 0], sizes = [16, 16, 64], strides = [1, 1, 1]} : vector<18x18x64xf32> to vector<16x16x64xf32>
    %393 = vector.shape_cast %392 : vector<16x16x64xf32> to vector<256x64xf32>
    %394 = arith.truncf %393 : vector<256x64xf32> to vector<256x64xbf16>
    %c2_263 = arith.constant 2 : index
    %c0_264 = arith.constant 0 : index
    %c0_265 = arith.constant 0 : index
    %395 = vector.load %arg12[%c2_263, %c0_264, %c0_265] : memref<9x64x2xbf16, #tpu.memory_space<vmem>>, vector<1x64x2xbf16>
    %396 = vector.shape_cast %395 : vector<1x64x2xbf16> to vector<64x2xbf16>
    %cst_266 = arith.constant dense<0.000000e+00> : vector<256x2xf32>
    %397 = tpu.matmul %394, %396, %cst_266 {dimension_numbers = #tpu.dot_dimension_numbers<[1], [0], [0], [1], [0, 0, 1, 1], [], []>} : vector<256x64xbf16>, vector<64x2xbf16>, vector<256x2xf32> -> vector<256x2xf32>
    %398 = arith.addf %391, %397 : vector<256x2xf32>
    %399 = vector.extract_strided_slice %376 {offsets = [1, 0, 0], sizes = [16, 16, 64], strides = [1, 1, 1]} : vector<18x18x64xf32> to vector<16x16x64xf32>
    %400 = vector.shape_cast %399 : vector<16x16x64xf32> to vector<256x64xf32>
    %401 = arith.truncf %400 : vector<256x64xf32> to vector<256x64xbf16>
    %c3_267 = arith.constant 3 : index
    %c0_268 = arith.constant 0 : index
    %c0_269 = arith.constant 0 : index
    %402 = vector.load %arg12[%c3_267, %c0_268, %c0_269] : memref<9x64x2xbf16, #tpu.memory_space<vmem>>, vector<1x64x2xbf16>
    %403 = vector.shape_cast %402 : vector<1x64x2xbf16> to vector<64x2xbf16>
    %cst_270 = arith.constant dense<0.000000e+00> : vector<256x2xf32>
    %404 = tpu.matmul %401, %403, %cst_270 {dimension_numbers = #tpu.dot_dimension_numbers<[1], [0], [0], [1], [0, 0, 1, 1], [], []>} : vector<256x64xbf16>, vector<64x2xbf16>, vector<256x2xf32> -> vector<256x2xf32>
    %405 = arith.addf %398, %404 : vector<256x2xf32>
    %406 = vector.extract_strided_slice %376 {offsets = [1, 1, 0], sizes = [16, 16, 64], strides = [1, 1, 1]} : vector<18x18x64xf32> to vector<16x16x64xf32>
    %407 = vector.shape_cast %406 : vector<16x16x64xf32> to vector<256x64xf32>
    %408 = arith.truncf %407 : vector<256x64xf32> to vector<256x64xbf16>
    %c4_271 = arith.constant 4 : index
    %c0_272 = arith.constant 0 : index
    %c0_273 = arith.constant 0 : index
    %409 = vector.load %arg12[%c4_271, %c0_272, %c0_273] : memref<9x64x2xbf16, #tpu.memory_space<vmem>>, vector<1x64x2xbf16>
    %410 = vector.shape_cast %409 : vector<1x64x2xbf16> to vector<64x2xbf16>
    %cst_274 = arith.constant dense<0.000000e+00> : vector<256x2xf32>
    %411 = tpu.matmul %408, %410, %cst_274 {dimension_numbers = #tpu.dot_dimension_numbers<[1], [0], [0], [1], [0, 0, 1, 1], [], []>} : vector<256x64xbf16>, vector<64x2xbf16>, vector<256x2xf32> -> vector<256x2xf32>
    %412 = arith.addf %405, %411 : vector<256x2xf32>
    %413 = vector.extract_strided_slice %376 {offsets = [1, 2, 0], sizes = [16, 16, 64], strides = [1, 1, 1]} : vector<18x18x64xf32> to vector<16x16x64xf32>
    %414 = vector.shape_cast %413 : vector<16x16x64xf32> to vector<256x64xf32>
    %415 = arith.truncf %414 : vector<256x64xf32> to vector<256x64xbf16>
    %c5_275 = arith.constant 5 : index
    %c0_276 = arith.constant 0 : index
    %c0_277 = arith.constant 0 : index
    %416 = vector.load %arg12[%c5_275, %c0_276, %c0_277] : memref<9x64x2xbf16, #tpu.memory_space<vmem>>, vector<1x64x2xbf16>
    %417 = vector.shape_cast %416 : vector<1x64x2xbf16> to vector<64x2xbf16>
    %cst_278 = arith.constant dense<0.000000e+00> : vector<256x2xf32>
    %418 = tpu.matmul %415, %417, %cst_278 {dimension_numbers = #tpu.dot_dimension_numbers<[1], [0], [0], [1], [0, 0, 1, 1], [], []>} : vector<256x64xbf16>, vector<64x2xbf16>, vector<256x2xf32> -> vector<256x2xf32>
    %419 = arith.addf %412, %418 : vector<256x2xf32>
    %420 = vector.extract_strided_slice %376 {offsets = [2, 0, 0], sizes = [16, 16, 64], strides = [1, 1, 1]} : vector<18x18x64xf32> to vector<16x16x64xf32>
    %421 = vector.shape_cast %420 : vector<16x16x64xf32> to vector<256x64xf32>
    %422 = arith.truncf %421 : vector<256x64xf32> to vector<256x64xbf16>
    %c6_279 = arith.constant 6 : index
    %c0_280 = arith.constant 0 : index
    %c0_281 = arith.constant 0 : index
    %423 = vector.load %arg12[%c6_279, %c0_280, %c0_281] : memref<9x64x2xbf16, #tpu.memory_space<vmem>>, vector<1x64x2xbf16>
    %424 = vector.shape_cast %423 : vector<1x64x2xbf16> to vector<64x2xbf16>
    %cst_282 = arith.constant dense<0.000000e+00> : vector<256x2xf32>
    %425 = tpu.matmul %422, %424, %cst_282 {dimension_numbers = #tpu.dot_dimension_numbers<[1], [0], [0], [1], [0, 0, 1, 1], [], []>} : vector<256x64xbf16>, vector<64x2xbf16>, vector<256x2xf32> -> vector<256x2xf32>
    %426 = arith.addf %419, %425 : vector<256x2xf32>
    %427 = vector.extract_strided_slice %376 {offsets = [2, 1, 0], sizes = [16, 16, 64], strides = [1, 1, 1]} : vector<18x18x64xf32> to vector<16x16x64xf32>
    %428 = vector.shape_cast %427 : vector<16x16x64xf32> to vector<256x64xf32>
    %429 = arith.truncf %428 : vector<256x64xf32> to vector<256x64xbf16>
    %c7_283 = arith.constant 7 : index
    %c0_284 = arith.constant 0 : index
    %c0_285 = arith.constant 0 : index
    %430 = vector.load %arg12[%c7_283, %c0_284, %c0_285] : memref<9x64x2xbf16, #tpu.memory_space<vmem>>, vector<1x64x2xbf16>
    %431 = vector.shape_cast %430 : vector<1x64x2xbf16> to vector<64x2xbf16>
    %cst_286 = arith.constant dense<0.000000e+00> : vector<256x2xf32>
    %432 = tpu.matmul %429, %431, %cst_286 {dimension_numbers = #tpu.dot_dimension_numbers<[1], [0], [0], [1], [0, 0, 1, 1], [], []>} : vector<256x64xbf16>, vector<64x2xbf16>, vector<256x2xf32> -> vector<256x2xf32>
    %433 = arith.addf %426, %432 : vector<256x2xf32>
    %434 = vector.extract_strided_slice %376 {offsets = [2, 2, 0], sizes = [16, 16, 64], strides = [1, 1, 1]} : vector<18x18x64xf32> to vector<16x16x64xf32>
    %435 = vector.shape_cast %434 : vector<16x16x64xf32> to vector<256x64xf32>
    %436 = arith.truncf %435 : vector<256x64xf32> to vector<256x64xbf16>
    %c8_287 = arith.constant 8 : index
    %c0_288 = arith.constant 0 : index
    %c0_289 = arith.constant 0 : index
    %437 = vector.load %arg12[%c8_287, %c0_288, %c0_289] : memref<9x64x2xbf16, #tpu.memory_space<vmem>>, vector<1x64x2xbf16>
    %438 = vector.shape_cast %437 : vector<1x64x2xbf16> to vector<64x2xbf16>
    %cst_290 = arith.constant dense<0.000000e+00> : vector<256x2xf32>
    %439 = tpu.matmul %436, %438, %cst_290 {dimension_numbers = #tpu.dot_dimension_numbers<[1], [0], [0], [1], [0, 0, 1, 1], [], []>} : vector<256x64xbf16>, vector<64x2xbf16>, vector<256x2xf32> -> vector<256x2xf32>
    %440 = arith.addf %433, %439 : vector<256x2xf32>
    %c0_291 = arith.constant 0 : index
    %c0_292 = arith.constant 0 : index
    %441 = vector.load %arg13[%c0_291, %c0_292] : memref<1x2xf32, #tpu.memory_space<vmem>>, vector<1x2xf32>
    %442 = vector.broadcast %441 : vector<1x2xf32> to vector<256x2xf32>
    %443 = arith.addf %440, %442 : vector<256x2xf32>
    %444 = arith.negf %443 : vector<256x2xf32>
    %445 = math.exp %444 : vector<256x2xf32>
    %cst_293 = arith.constant 1.000000e+00 : f32
    %446 = vector.broadcast %cst_293 : f32 to vector<256x2xf32>
    %447 = arith.addf %446, %445 : vector<256x2xf32>
    %448 = arith.divf %446, %447 : vector<256x2xf32>
    %449 = vector.shape_cast %448 : vector<256x2xf32> to vector<16x16x2xf32>
    %c0_294 = arith.constant 0 : index
    %c0_295 = arith.constant 0 : index
    %c0_296 = arith.constant 0 : index
    %c0_297 = arith.constant 0 : index
    %450 = vector.load %arg15[%c0_294, %c0_295, %c0_296, %c0_297] : memref<1x16x16x2xf32, #tpu.memory_space<vmem>>, vector<1x16x16x2xf32>
    %451 = vector.shape_cast %450 : vector<1x16x16x2xf32> to vector<16x16x2xf32>
    %452 = vector.shape_cast %449 : vector<16x16x2xf32> to vector<1x16x16x2xf32>
    tpu.vector_store %arg15[%c0_294, %c0_295, %c0_296, %c0_297], %452 {strides = array<i32>} : memref<1x16x16x2xf32, #tpu.memory_space<vmem>>, vector<1x16x16x2xf32>,
    return
  }
  func.func @transform_0(%arg0: i32) -> (i32, i32, i32, i32) {
    %c0_i32 = arith.constant 0 : i32
    %c0_i32_0 = arith.constant 0 : i32
    %c0_i32_1 = arith.constant 0 : i32
    %c0_i32_2 = arith.constant 0 : i32
    return %arg0, %c0_i32, %c0_i32_0, %c0_i32_1 : i32, i32, i32, i32
  }
  func.func @transform_1(%arg0: i32) -> (i32, i32, i32) {
    %c0_i32 = arith.constant 0 : i32
    %c0_i32_0 = arith.constant 0 : i32
    %c0_i32_1 = arith.constant 0 : i32
    %c0_i32_2 = arith.constant 0 : i32
    return %c0_i32, %c0_i32_0, %c0_i32_1 : i32, i32, i32
  }
  func.func @transform_2(%arg0: i32) -> (i32, i32) {
    %c0_i32 = arith.constant 0 : i32
    %c0_i32_0 = arith.constant 0 : i32
    %c0_i32_1 = arith.constant 0 : i32
    return %c0_i32, %c0_i32_0 : i32, i32
  }
  func.func @transform_3(%arg0: i32) -> (i32, i32, i32) {
    %c0_i32 = arith.constant 0 : i32
    %c0_i32_0 = arith.constant 0 : i32
    %c0_i32_1 = arith.constant 0 : i32
    %c0_i32_2 = arith.constant 0 : i32
    return %c0_i32, %c0_i32_0, %c0_i32_1 : i32, i32, i32
  }
  func.func @transform_4(%arg0: i32) -> (i32, i32) {
    %c0_i32 = arith.constant 0 : i32
    %c0_i32_0 = arith.constant 0 : i32
    %c0_i32_1 = arith.constant 0 : i32
    return %c0_i32, %c0_i32_0 : i32, i32
  }
  func.func @transform_5(%arg0: i32) -> (i32, i32, i32) {
    %c0_i32 = arith.constant 0 : i32
    %c0_i32_0 = arith.constant 0 : i32
    %c0_i32_1 = arith.constant 0 : i32
    %c0_i32_2 = arith.constant 0 : i32
    return %c0_i32, %c0_i32_0, %c0_i32_1 : i32, i32, i32
  }
  func.func @transform_6(%arg0: i32) -> (i32, i32) {
    %c0_i32 = arith.constant 0 : i32
    %c0_i32_0 = arith.constant 0 : i32
    %c0_i32_1 = arith.constant 0 : i32
    return %c0_i32, %c0_i32_0 : i32, i32
  }
  func.func @transform_7(%arg0: i32) -> (i32, i32, i32) {
    %c0_i32 = arith.constant 0 : i32
    %c0_i32_0 = arith.constant 0 : i32
    %c0_i32_1 = arith.constant 0 : i32
    %c0_i32_2 = arith.constant 0 : i32
    return %c0_i32, %c0_i32_0, %c0_i32_1 : i32, i32, i32
  }
  func.func @transform_8(%arg0: i32) -> (i32, i32) {
    %c0_i32 = arith.constant 0 : i32
    %c0_i32_0 = arith.constant 0 : i32
    %c0_i32_1 = arith.constant 0 : i32
    return %c0_i32, %c0_i32_0 : i32, i32
  }
  func.func @transform_9(%arg0: i32) -> (i32, i32, i32) {
    %c0_i32 = arith.constant 0 : i32
    %c0_i32_0 = arith.constant 0 : i32
    %c0_i32_1 = arith.constant 0 : i32
    %c0_i32_2 = arith.constant 0 : i32
    return %c0_i32, %c0_i32_0, %c0_i32_1 : i32, i32, i32
  }
  func.func @transform_10(%arg0: i32) -> (i32, i32) {
    %c0_i32 = arith.constant 0 : i32
    %c0_i32_0 = arith.constant 0 : i32
    %c0_i32_1 = arith.constant 0 : i32
    return %c0_i32, %c0_i32_0 : i32, i32
  }
  func.func @transform_11(%arg0: i32) -> (i32, i32, i32) {
    %c0_i32 = arith.constant 0 : i32
    %c0_i32_0 = arith.constant 0 : i32
    %c0_i32_1 = arith.constant 0 : i32
    %c0_i32_2 = arith.constant 0 : i32
    return %c0_i32, %c0_i32_0, %c0_i32_1 : i32, i32, i32
  }
  func.func @transform_12(%arg0: i32) -> (i32, i32) {
    %c0_i32 = arith.constant 0 : i32
    %c0_i32_0 = arith.constant 0 : i32
    %c0_i32_1 = arith.constant 0 : i32
    return %c0_i32, %c0_i32_0 : i32, i32
  }
  func.func @transform_13(%arg0: i32) -> (i32, i32) {
    %c0_i32 = arith.constant 0 : i32
    %c0_i32_0 = arith.constant 0 : i32
    %c0_i32_1 = arith.constant 0 : i32
    return %c0_i32, %c0_i32_0 : i32, i32
  }
  func.func @transform_14(%arg0: i32) -> (i32, i32, i32, i32) {
    %c0_i32 = arith.constant 0 : i32
    %c0_i32_0 = arith.constant 0 : i32
    %c0_i32_1 = arith.constant 0 : i32
    %c0_i32_2 = arith.constant 0 : i32
    return %arg0, %c0_i32, %c0_i32_0, %c0_i32_1 : i32, i32, i32, i32
  }
}

</mosaic_0001>

<bundles_post_ra>
// kernel: unet_forward.1
= control target key start
LH: loop header
LB: loop body
LE: loop exit
PB: predicated region body
PF: predicated region fallthrough
CT: control target
= control target key end

     0   :  { %s21550_s29 = smov 0   ;;  %s26512_s0 = inlined_call_operand.vmem [shape: f32[2,16,16,4], index: 0, kind: input, shape index: {}]   ;;  %s26513_s1 = inlined_call_operand.vmem [shape: bf16[9,4,64], index: 1, kind: input, shape index: {}]   ;;  %s26514_s2 = inlined_call_operand.vmem [shape: f32[1,64], index: 2, kind: input, shape index: {}]   ;;  %s26515_s3 = inlined_call_operand.vmem [shape: bf16[9,64,64], index: 3, kind: input, shape index: {}]   ;;  %s26516_s4 = inlined_call_operand.vmem [shape: f32[1,64], index: 4, kind: input, shape index: {}]   ;;  %s26517_s5 = inlined_call_operand.vmem [shape: bf16[9,64,128], index: 5, kind: input, shape index: {}]   ;;  %s26518_s6 = inlined_call_operand.vmem [shape: f32[1,128], index: 6, kind: input, shape index: {}]   ;;  %s26519_s7 = inlined_call_operand.vmem [shape: bf16[9,128,128], index: 7, kind: input, shape index: {}]   ;;  %s26520_s8 = inlined_call_operand.vmem [shape: f32[1,128], index: 8, kind: input, shape index: {}]   ;;  %s26521_s9 = inlined_call_operand.vmem [shape: bf16[9,128,64], index: 9, kind: input, shape index: {}]   ;;  %s26522_s10 = inlined_call_operand.vmem [shape: f32[1,64], index: 10, kind: input, shape index: {}]   ;;  %s26523_s11 = inlined_call_operand.vmem [shape: bf16[9,64,2], index: 11, kind: input, shape index: {}]   ;;  %s26524_s12 = inlined_call_operand.vmem [shape: f32[1,2], index: 12, kind: input, shape index: {}]   ;;  %s26525_s13 = inlined_call_operand.vmem [shape: f32[256,64], index: 13, kind: input, shape index: {}]   ;;  %s26526_s14 = inlined_call_operand.vmem [shape: f32[2,16,16,2], index: 14, kind: output, shape index: {}]  }
   0x1 LB: > { %s15796_s30 = sadd.s32 4294967295, %s21471_s29   ;;  %p15800_p0 = scmp.ge.s32.totalorder %s21471_s29, 1  ;;  %s21471_s29 = sphi %s21550_s29, %s24_s29  }
   0x2   : > { %p412_p1 = scmp.lt.s32.totalorder %s21471_s29, 3 }
   0x4   : > { %p413_p2 = pnand %p15800_p0, %p412_p1 }
   0x6   : > { %416 = sbr.rel (%p413_p2) target bundleno = 4416 (0x1140), region = 76 }
   0xd   : > { %v15805_v0 = vld [vmem:[%s26513_s1 + $0x2] sm:$0x3]  ;;  %vm1038_vm0 = vcmask 1041408   ;;  %vm469_vm1 = vcmask 31744   ;;  %vm472_vm2 = vcmask 25600   ;;  %v21473_v2 = vmov 0.0  }
   0xe   : > { %21062 = vmatprep.subr.msk.bf16.mxu0 %vm1038_vm0, %v15805_v0  ;;  %v21563_v1 = vsel %vm1038_vm0, %v15805_v0, 0  ;;  %470 = vst.msk [vmem:[#allocation2] sm:$0xff] %vm469_vm1, %v21473_v2  ;;  %471 = vst.msk [vmem:[#allocation2 + $0x8] sm:$0xff] %vm469_vm1, %v21473_v2  ;;  %p458_p3 = scmp.lt.s32.totalorder %s15796_s30, 1  ;;  %v21747_v3 = vld [vmem:[%s26513_s1] sm:$0x3] }
   0xf   : > { %473 = vst.msk [vmem:[#allocation2 + $0x10] sm:$0x3] %vm472_vm2, %v21473_v2  ;;  %476 = vst.msk [vmem:[#allocation2 + $0x28] sm:$0x3] %vm472_vm2, %v21473_v2  ;;  %18005 = vmatpush3.bf16.msra.mxu0 %v21563_v1  ;;  %vm859_vm3 = vcmask 1046528   ;;  %vm1415_vm4 = vcmask 1045504  }
  0x10   : > { %474 = vst.msk [vmem:[#allocation2 + $0x18] sm:$0xff] %vm469_vm1, %v21473_v2  ;;  %475 = vst.msk [vmem:[#allocation2 + $0x20] sm:$0xff] %vm469_vm1, %v21473_v2  ;;  %s26738_s30 = smov (!%p458_p3, %s15796_s30), 1  ;;  %21063 = vmatprep.subr.msk.bf16.mxu0 %vm1038_vm0, %v21747_v3  ;;  %v1252_v48 = vsel %vm1038_vm0, %v21747_v3, 0  ;;  %v15838_v60 = vld [vmem:[%s26513_s1 + $0x4] sm:$0x3] }
  0x11   : > { %477 = vst.msk [vmem:[#allocation2 + $0x30] sm:$0xff] %vm469_vm1, %v21473_v2  ;;  %478 = vst.msk [vmem:[#allocation2 + $0x38] sm:$0xff] %vm469_vm1, %v21473_v2  ;;  %s17053_s19 = sshll.u32 %s26738_s30, 8  ;;  %vm525_vm5 = vcmask 523264   ;;  %vm528_vm6 = vcmask 517120   ;;  %vm7100_vm7 = vcmask 1041409  }
  0x12   : > { %479 = vst.msk [vmem:[#allocation2 + $0x40] sm:$0x3] %vm472_vm2, %v21473_v2  ;;  %482 = vst.msk [vmem:[#allocation2 + $0x58] sm:$0x3] %vm472_vm2, %v21473_v2  ;;  %s21762_s22 = scalar_lea.vmem %s26512_s0, %s17053_s19  ;;  %vm7102_vm8 = vcmask 1042434   ;;  %vm7104_vm9 = vcmask 1043459   ;;  %s26424_s23 = scalar_lea.vmem %s26526_s14, %s17053_s19 }
  0x13   : > { %480 = vst.msk [vmem:[#allocation2 + $0x48] sm:$0xff] %vm469_vm1, %v21473_v2  ;;  %481 = vst.msk [vmem:[#allocation2 + $0x50] sm:$0xff] %vm469_vm1, %v21473_v2  ;;  %v675_v4 = vld [vmem:[%s21762_s22] sm:$0xff]  ;;  %v676_v5 = vld [vmem:[%s21762_s22 + $0x8] sm:$0xff]  ;;  %vm7106_vm10 = vcmask 1044484   ;;  %vm7108_vm11 = vcmask 1045509  }
  0x14   : > { %483 = vst.msk [vmem:[#allocation2 + $0x60] sm:$0xff] %vm469_vm1, %v21473_v2  ;;  %484 = vst.msk [vmem:[#allocation2 + $0x68] sm:$0xff] %vm469_vm1, %v21473_v2  ;;  %v677_v6 = vld [vmem:[%s21762_s22 + $0x10] sm:$0xff]  ;;  %v678_v13 = vld [vmem:[%s21762_s22 + $0x18] sm:$0xff]  ;;  %vm7110_vm12 = vcmask 1046534   ;;  %vm7112_vm13 = vcmask 1047559  }
  0x15   : > { %485 = vst.msk [vmem:[#allocation2 + $0x70] sm:$0x3] %vm472_vm2, %v21473_v2  ;;  %488 = vst.msk [vmem:[#allocation2 + $0x88] sm:$0x3] %vm472_vm2, %v21473_v2  ;;  %v21767_v7 = vld [vmem:[#allocation2] sm:$0xff]  ;;  %v21769_v8 = vld [vmem:[#allocation2 + $0x8] sm:$0xff] }
  0x16   : > { %486 = vst.msk [vmem:[#allocation2 + $0x78] sm:$0xff] %vm469_vm1, %v21473_v2  ;;  %487 = vst.msk [vmem:[#allocation2 + $0x80] sm:$0xff] %vm469_vm1, %v21473_v2  ;;  %v742_v9 = vld [vmem:[#allocation2 + $0x10] sm:$0x3]  ;;  %v860_v10 = vrot.slane %v21767_v7, 1  ;;  %v861_v11 = vrot.slane %v21769_v8, 1 }
  0x17   : > { %489 = vst.msk [vmem:[#allocation2 + $0x90] sm:$0xff] %vm469_vm1, %v21473_v2  ;;  %490 = vst.msk [vmem:[#allocation2 + $0x98] sm:$0xff] %vm469_vm1, %v21473_v2  ;;  %v863_v12 = vrot.slane %v742_v9, 1  ;;  %v679_v14 = vld [vmem:[%s21762_s22 + $0x20] sm:$0xff]  ;;  %v1416_v15 = vrot.slane %v21767_v7, 2  ;;  %v1417_v16 = vrot.slane %v21769_v8, 2 }
  0x18   : > { %491 = vst.msk [vmem:[#allocation2 + $0xa0] sm:$0x3] %vm472_vm2, %v21473_v2  ;;  %494 = vst.msk [vmem:[#allocation2 + $0xb8] sm:$0x3] %vm472_vm2, %v21473_v2  ;;  %v1419_v17 = vrot.slane %v742_v9, 2  ;;  %v680_v18 = vld [vmem:[%s21762_s22 + $0x28] sm:$0xff]  ;;  %v862_v22 = vsel %vm859_vm3, %v860_v10, %v861_v11 }
  0x19   : > { %492 = vst.msk [vmem:[#allocation2 + $0xa8] sm:$0xff] %vm469_vm1, %v21473_v2  ;;  %493 = vst.msk [vmem:[#allocation2 + $0xb0] sm:$0xff] %vm469_vm1, %v21473_v2  ;;  %v681_v19 = vld [vmem:[%s21762_s22 + $0x30] sm:$0xff]  ;;  %v682_v20 = vld [vmem:[%s21762_s22 + $0x38] sm:$0xff]  ;;  %v864_v23 = vsel %vm859_vm3, %v861_v11, %v863_v12  ;;  %v21815_v37 = vsel %vm1415_vm4, %v1416_v15, %v1417_v16  ;;  %vm15708_vm14 = vcmask 15360  }
  0x1a   : > { %495 = vst.msk [vmem:[#allocation2 + $0xc0] sm:$0xff] %vm469_vm1, %v21473_v2  ;;  %496 = vst.msk [vmem:[#allocation2 + $0xc8] sm:$0xff] %vm469_vm1, %v21473_v2  ;;  %v683_v24 = vld [vmem:[%s21762_s22 + $0x40] sm:$0xff]  ;;  %v684_v25 = vld [vmem:[%s21762_s22 + $0x48] sm:$0xff]  ;;  %v972_v27 = vpack.c.bf16 %v864_v23, %v862_v22  ;;  %v21818_v38 = vsel %vm1415_vm4, %v1417_v16, %v1419_v17 }
  0x1b   : > { %497 = vst.msk [vmem:[#allocation2 + $0xd0] sm:$0x3] %vm472_vm2, %v21473_v2  ;;  %500 = vst.msk [vmem:[#allocation2 + $0xe8] sm:$0x3] %vm472_vm2, %v21473_v2  ;;  %v685_v26 = vld [vmem:[%s21762_s22 + $0x50] sm:$0xff]  ;;  %v686_v28 = vld [vmem:[%s21762_s22 + $0x58] sm:$0xff] }
  0x1c   : > { %498 = vst.msk [vmem:[#allocation2 + $0xd8] sm:$0xff] %vm469_vm1, %v21473_v2  ;;  %499 = vst.msk [vmem:[#allocation2 + $0xe0] sm:$0xff] %vm469_vm1, %v21473_v2  ;;  %v687_v29 = vld [vmem:[%s21762_s22 + $0x60] sm:$0xff]  ;;  %v688_v30 = vld [vmem:[%s21762_s22 + $0x68] sm:$0xff]  ;;  %18006 = vmatprep.mubr.msk.bf16.mxu0 %vm469_vm1, %v972_v27 }
  0x1d   : > { %501 = vst.msk [vmem:[#allocation2 + $0xf0] sm:$0xff] %vm469_vm1, %v21473_v2  ;;  %502 = vst.msk [vmem:[#allocation2 + $0xf8] sm:$0xff] %vm469_vm1, %v21473_v2  ;;  %v689_v31 = vld [vmem:[%s21762_s22 + $0x70] sm:$0xff]  ;;  %v690_v32 = vld [vmem:[%s21762_s22 + $0x78] sm:$0xff] }
  0x1e   : > { %503 = vst.msk [vmem:[#allocation2 + $0x100] sm:$0x3] %vm472_vm2, %v21473_v2  ;;  %506 = vst.msk [vmem:[#allocation2 + $0x118] sm:$0x3] %vm472_vm2, %v21473_v2  ;;  %v691_v33 = vld [vmem:[%s21762_s22 + $0x80] sm:$0xff]  ;;  %v692_v34 = vld [vmem:[%s21762_s22 + $0x88] sm:$0xff] }
  0x1f   : > { %504 = vst.msk [vmem:[#allocation2 + $0x108] sm:$0xff] %vm469_vm1, %v21473_v2  ;;  %505 = vst.msk [vmem:[#allocation2 + $0x110] sm:$0xff] %vm469_vm1, %v21473_v2  ;;  %v693_v35 = vld [vmem:[%s21762_s22 + $0x90] sm:$0xff]  ;;  %v694_v36 = vld [vmem:[%s21762_s22 + $0x98] sm:$0xff] }
  0x20   : > { %507 = vst.msk [vmem:[#allocation2 + $0x120] sm:$0xff] %vm469_vm1, %v21473_v2  ;;  %508 = vst.msk [vmem:[#allocation2 + $0x128] sm:$0xff] %vm469_vm1, %v21473_v2  ;;  %v695_v47 = vld [vmem:[%s21762_s22 + $0xa0] sm:$0xff] }
  0x21   : > { %509 = vst.msk [vmem:[#allocation2 + $0x130] sm:$0x3] %vm472_vm2, %v21473_v2  ;;  %512 = vst.msk [vmem:[#allocation2 + $0x148] sm:$0x3] %vm472_vm2, %v21473_v2 }
  0x22   : > { %510 = vst.msk [vmem:[#allocation2 + $0x138] sm:$0xff] %vm469_vm1, %v21473_v2  ;;  %511 = vst.msk [vmem:[#allocation2 + $0x140] sm:$0xff] %vm469_vm1, %v21473_v2 }
  0x23   : > { %513 = vst.msk [vmem:[#allocation2 + $0x150] sm:$0xff] %vm469_vm1, %v21473_v2  ;;  %514 = vst.msk [vmem:[#allocation2 + $0x158] sm:$0xff] %vm469_vm1, %v21473_v2 }
  0x24   : > { %515 = vst.msk [vmem:[#allocation2 + $0x160] sm:$0x3] %vm472_vm2, %v21473_v2  ;;  %518 = vst.msk [vmem:[#allocation2 + $0x178] sm:$0x3] %vm472_vm2, %v21473_v2 }
  0x25   : > { %516 = vst.msk [vmem:[#allocation2 + $0x168] sm:$0xff] %vm469_vm1, %v21473_v2  ;;  %517 = vst.msk [vmem:[#allocation2 + $0x170] sm:$0xff] %vm469_vm1, %v21473_v2 }
  0x26   : > { %519 = vst.msk [vmem:[#allocation2 + $0x180] sm:$0xff] %vm469_vm1, %v21473_v2  ;;  %520 = vst.msk [vmem:[#allocation2 + $0x188] sm:$0xff] %vm469_vm1, %v21473_v2 }
  0x27   : > { %521 = vst.msk [vmem:[#allocation2 + $0x190] sm:$0x3] %vm472_vm2, %v21473_v2  ;;  %524 = vst.msk [vmem:[#allocation2 + $0x1a8] sm:$0x3] %vm472_vm2, %v21473_v2 }
  0x28   : > { %522 = vst.msk [vmem:[#allocation2 + $0x198] sm:$0xff] %vm469_vm1, %v21473_v2  ;;  %523 = vst.msk [vmem:[#allocation2 + $0x1a0] sm:$0xff] %vm469_vm1, %v21473_v2 }
  0x29   : > { %601 = vst [vmem:[#allocation5] sm:$0xff] %v21473_v2  ;;  %602 = vst [vmem:[#allocation5 + $0x8] sm:$0x3] %v21473_v2 }
  0x2a   : > { %603 = vst [vmem:[#allocation5 + $0x10] sm:$0xff] %v21473_v2  ;;  %604 = vst [vmem:[#allocation5 + $0x18] sm:$0x3] %v21473_v2 }
  0x2b   : > { %605 = vst [vmem:[#allocation5 + $0x20] sm:$0xff] %v21473_v2  ;;  %606 = vst [vmem:[#allocation5 + $0x28] sm:$0x3] %v21473_v2 }
  0x2c   : > { %607 = vst [vmem:[#allocation5 + $0x30] sm:$0xff] %v21473_v2  ;;  %608 = vst [vmem:[#allocation5 + $0x38] sm:$0x3] %v21473_v2 }
  0x2d   : > { %609 = vst [vmem:[#allocation5 + $0x40] sm:$0xff] %v21473_v2  ;;  %610 = vst [vmem:[#allocation5 + $0x48] sm:$0x3] %v21473_v2 }
  0x2e   : > { %611 = vst [vmem:[#allocation5 + $0x50] sm:$0xff] %v21473_v2  ;;  %612 = vst [vmem:[#allocation5 + $0x58] sm:$0x3] %v21473_v2 }
  0x2f   : > { %613 = vst [vmem:[#allocation5 + $0x60] sm:$0xff] %v21473_v2  ;;  %614 = vst [vmem:[#allocation5 + $0x68] sm:$0x3] %v21473_v2 }
  0x30   : > { %615 = vst [vmem:[#allocation5 + $0x70] sm:$0xff] %v21473_v2  ;;  %616 = vst [vmem:[#allocation5 + $0x78] sm:$0x3] %v21473_v2 }
  0x31   : > { %617 = vst [vmem:[#allocation5 + $0x80] sm:$0xff] %v21473_v2  ;;  %618 = vst [vmem:[#allocation5 + $0x88] sm:$0x3] %v21473_v2 }
  0x32   : > { %620 = vst [vmem:[#allocation5 + $0x98] sm:$0x3] %v21473_v2  ;;  %623 = vst [vmem:[#allocation6 + $0x10] sm:$0x3] %v21473_v2 }
  0x33   : > { %624 = vst [vmem:[#allocation6 + $0x18] sm:$0xff] %v21473_v2  ;;  %625 = vst [vmem:[#allocation6 + $0x20] sm:$0xff] %v21473_v2 }
  0x34   : > { %626 = vst [vmem:[#allocation6 + $0x28] sm:$0x3] %v21473_v2  ;;  %627 = vst [vmem:[#allocation6 + $0x30] sm:$0xff] %v21473_v2 }
  0x35   : > { %628 = vst [vmem:[#allocation6 + $0x38] sm:$0xff] %v21473_v2  ;;  %629 = vst [vmem:[#allocation6 + $0x40] sm:$0x3] %v21473_v2 }
  0x36   : > { %630 = vst [vmem:[#allocation6 + $0x48] sm:$0xff] %v21473_v2  ;;  %631 = vst [vmem:[#allocation6 + $0x50] sm:$0xff] %v21473_v2 }
  0x37   : > { %632 = vst [vmem:[#allocation6 + $0x58] sm:$0x3] %v21473_v2  ;;  %633 = vst [vmem:[#allocation6 + $0x60] sm:$0xff] %v21473_v2 }
  0x38   : > { %634 = vst [vmem:[#allocation6 + $0x68] sm:$0xff] %v21473_v2  ;;  %635 = vst [vmem:[#allocation6 + $0x70] sm:$0x3] %v21473_v2 }
  0x39   : > { %636 = vst [vmem:[#allocation6 + $0x78] sm:$0xff] %v21473_v2  ;;  %637 = vst [vmem:[#allocation6 + $0x80] sm:$0xff] %v21473_v2 }
  0x3a   : > { %638 = vst [vmem:[#allocation6 + $0x88] sm:$0x3] %v21473_v2  ;;  %639 = vst [vmem:[#allocation6 + $0x90] sm:$0xff] %v21473_v2 }
  0x3b   : > { %640 = vst [vmem:[#allocation6 + $0x98] sm:$0xff] %v21473_v2  ;;  %641 = vst [vmem:[#allocation6 + $0xa0] sm:$0x3] %v21473_v2 }
  0x3c   : > { %642 = vst [vmem:[#allocation6 + $0xa8] sm:$0xff] %v21473_v2  ;;  %643 = vst [vmem:[#allocation6 + $0xb0] sm:$0xff] %v21473_v2 }
  0x3d   : > { %644 = vst [vmem:[#allocation6 + $0xb8] sm:$0x3] %v21473_v2  ;;  %645 = vst [vmem:[#allocation6 + $0xc0] sm:$0xff] %v21473_v2 }
  0x3e   : > { %646 = vst [vmem:[#allocation6 + $0xc8] sm:$0xff] %v21473_v2  ;;  %647 = vst [vmem:[#allocation6 + $0xd0] sm:$0x3] %v21473_v2 }
  0x3f   : > { %648 = vst [vmem:[#allocation6 + $0xd8] sm:$0xff] %v21473_v2  ;;  %649 = vst [vmem:[#allocation6 + $0xe0] sm:$0xff] %v21473_v2 }
  0x40   : > { %650 = vst [vmem:[#allocation6 + $0xe8] sm:$0x3] %v21473_v2  ;;  %651 = vst [vmem:[#allocation6 + $0xf0] sm:$0xff] %v21473_v2 }
  0x41   : > { %652 = vst [vmem:[#allocation6 + $0xf8] sm:$0xff] %v21473_v2  ;;  %653 = vst [vmem:[#allocation6 + $0x100] sm:$0x3] %v21473_v2 }
  0x42   : > { %654 = vst [vmem:[#allocation6 + $0x108] sm:$0xff] %v21473_v2  ;;  %655 = vst [vmem:[#allocation6 + $0x110] sm:$0xff] %v21473_v2 }
  0x43   : > { %656 = vst [vmem:[#allocation6 + $0x118] sm:$0x3] %v21473_v2  ;;  %657 = vst [vmem:[#allocation6 + $0x120] sm:$0xff] %v21473_v2 }
  0x44   : > { %658 = vst [vmem:[#allocation6 + $0x128] sm:$0xff] %v21473_v2  ;;  %659 = vst [vmem:[#allocation6 + $0x130] sm:$0x3] %v21473_v2 }
  0x45   : > { %660 = vst [vmem:[#allocation6 + $0x138] sm:$0xff] %v21473_v2  ;;  %661 = vst [vmem:[#allocation6 + $0x140] sm:$0xff] %v21473_v2 }
  0x46   : > { %662 = vst [vmem:[#allocation6 + $0x148] sm:$0x3] %v21473_v2  ;;  %663 = vst [vmem:[#allocation6 + $0x150] sm:$0xff] %v21473_v2 }
  0x47   : > { %664 = vst [vmem:[#allocation6 + $0x158] sm:$0xff] %v21473_v2  ;;  %665 = vst [vmem:[#allocation6 + $0x160] sm:$0x3] %v21473_v2 }
  0x48   : > { %666 = vst [vmem:[#allocation6 + $0x168] sm:$0xff] %v21473_v2  ;;  %667 = vst [vmem:[#allocation6 + $0x170] sm:$0xff] %v21473_v2 }
  0x49   : > { %668 = vst [vmem:[#allocation6 + $0x178] sm:$0x3] %v21473_v2  ;;  %669 = vst [vmem:[#allocation6 + $0x180] sm:$0xff] %v21473_v2 }
  0x4a   : > { %670 = vst [vmem:[#allocation6 + $0x188] sm:$0xff] %v21473_v2  ;;  %671 = vst [vmem:[#allocation6 + $0x190] sm:$0x3] %v21473_v2 }
  0x4b   : > { %674 = vst [vmem:[#allocation6 + $0x1a8] sm:$0x3] %v21473_v2  ;;  %26609 = vst [vmem:[#allocation7_spill] sm:$0xff] %v21767_v7 }
  0x4c   : > { %26610 = vst [vmem:[#allocation8_spill] sm:$0xff] %v21769_v8  ;;  %708 = vst.msk [vmem:[#allocation2 + $0x19] sm:$0xff] %vm469_vm1, %v675_v4 }
  0x4d   : > { %709 = vst.msk [vmem:[#allocation2 + $0x21] sm:$0xff] %vm469_vm1, %v676_v5  ;;  %710 = vst.msk [vmem:[#allocation2 + $0x31] sm:$0xff] %vm469_vm1, %v677_v6 }
  0x4e   : > { %711 = vst.msk [vmem:[#allocation2 + $0x39] sm:$0xff] %vm469_vm1, %v678_v13  ;;  %712 = vst.msk [vmem:[#allocation2 + $0x49] sm:$0xff] %vm469_vm1, %v679_v14 }
  0x4f   : > { %713 = vst.msk [vmem:[#allocation2 + $0x51] sm:$0xff] %vm469_vm1, %v680_v18  ;;  %714 = vst.msk [vmem:[#allocation2 + $0x61] sm:$0xff] %vm469_vm1, %v681_v19 }
  0x50   : > { %715 = vst.msk [vmem:[#allocation2 + $0x69] sm:$0xff] %vm469_vm1, %v682_v20  ;;  %716 = vst.msk [vmem:[#allocation2 + $0x79] sm:$0xff] %vm469_vm1, %v683_v24 }
  0x51   : > { %717 = vst.msk [vmem:[#allocation2 + $0x81] sm:$0xff] %vm469_vm1, %v684_v25  ;;  %718 = vst.msk [vmem:[#allocation2 + $0x91] sm:$0xff] %vm469_vm1, %v685_v26 }
  0x52   : > { %719 = vst.msk [vmem:[#allocation2 + $0x99] sm:$0xff] %vm469_vm1, %v686_v28  ;;  %720 = vst.msk [vmem:[#allocation2 + $0xa9] sm:$0xff] %vm469_vm1, %v687_v29 }
  0x53   : > { %721 = vst.msk [vmem:[#allocation2 + $0xb1] sm:$0xff] %vm469_vm1, %v688_v30  ;;  %722 = vst.msk [vmem:[#allocation2 + $0xc1] sm:$0xff] %vm469_vm1, %v689_v31  ;;  %v21820_v39 = vld [vmem:[#allocation2 + $0x18] sm:$0xff] }
  0x54   : > { %723 = vst.msk [vmem:[#allocation2 + $0xc9] sm:$0xff] %vm469_vm1, %v690_v32  ;;  %724 = vst.msk [vmem:[#allocation2 + $0xd9] sm:$0xff] %vm469_vm1, %v691_v33  ;;  %v21822_v40 = vld [vmem:[#allocation2 + $0x20] sm:$0xff]  ;;  %v21824_v41 = vld [vmem:[#allocation2 + $0x28] sm:$0x3]  ;;  %v865_v43 = vrot.slane %v21820_v39, 1 }
  0x55   : > { %26611 = vst [vmem:[#allocation9_spill] sm:$0xff] %v21815_v37  ;;  %26612 = vst [vmem:[#allocation10_spill] sm:$0xff] %v21818_v38  ;;  %v866_v44 = vrot.slane %v21822_v40, 1  ;;  %v868_v45 = vrot.slane %v21824_v41, 1  ;;  %v21834_v46 = vld [vmem:[#allocation2 + $0x30] sm:$0xff]  ;;  %v21839_v49 = vld [vmem:[#allocation2 + $0x38] sm:$0xff]  ;;  %v21847_v52 = vpack.c.bf16 %v21822_v40, %v21820_v39 }
  0x56   : > { %725 = vst.msk [vmem:[#allocation2 + $0xe1] sm:$0xff] %vm469_vm1, %v692_v34  ;;  %726 = vst.msk [vmem:[#allocation2 + $0xf1] sm:$0xff] %vm469_vm1, %v693_v35  ;;  %v21841_v50 = vld [vmem:[#allocation2 + $0x40] sm:$0x3]  ;;  %v870_v51 = vrot.slane %v21834_v46, 1  ;;  %v871_v55 = vrot.slane %v21839_v49, 1 }
  0x57   : > { %727 = vst.msk [vmem:[#allocation2 + $0xf9] sm:$0xff] %vm469_vm1, %v694_v36  ;;  %728 = vst.msk [vmem:[#allocation2 + $0x109] sm:$0xff] %vm469_vm1, %v695_v47  ;;  %v867_v53 = vsel %vm859_vm3, %v865_v43, %v866_v44  ;;  %v869_v54 = vsel %vm859_vm3, %v866_v44, %v868_v45  ;;  %v873_v56 = vrot.slane %v21841_v50, 1  ;;  %v21853_v57 = vld [vmem:[#allocation2 + $0x48] sm:$0xff]  ;;  %v21855_v58 = vld [vmem:[#allocation2 + $0x50] sm:$0xff] }
  0x58   : > { %26613 = vst [vmem:[#allocation11_spill] sm:$0xff] %v21847_v52  ;;  %v21857_v59 = vld [vmem:[#allocation2 + $0x58] sm:$0x3]  ;;  %v21862_v61 = vpack.c.bf16 %v869_v54, %v867_v53  ;;  %v875_v62 = vrot.slane %v21853_v57, 1  ;;  %v876_v63 = vrot.slane %v21855_v58, 1  ;;  %v21867_v1 = vld [vmem:[#allocation2 + $0x60] sm:$0xff]  ;;  %v872_v4 = vsel %vm859_vm3, %v870_v51, %v871_v55 }
  0x59   : > { %v878_v0 = vrot.slane %v21857_v59, 1  ;;  %v21869_v2 = vld [vmem:[#allocation2 + $0x68] sm:$0xff]  ;;  %v21871_v3 = vld [vmem:[#allocation2 + $0x78] sm:$0xff]  ;;  %v874_v5 = vsel %vm859_vm3, %v871_v55, %v873_v56  ;;  %v21875_v6 = vld [vmem:[#allocation2 + $0x70] sm:$0x3]  ;;  %v880_v9 = vrot.slane %v21867_v1, 1 }
  0x5a   : > { %26614 = vst [vmem:[#allocation12_spill] sm:$0xff] %v21862_v61  ;;  %v881_v10 = vrot.slane %v21869_v2, 1  ;;  %v21879_v11 = vld [vmem:[#allocation2 + $0x80] sm:$0xff]  ;;  %v21881_v12 = vld [vmem:[#allocation2 + $0x90] sm:$0xff]  ;;  %18007 = vmatmul.mubr.msk.bf16.vlgmr.msra.gmra.mrb[0].mxu0 %vm469_vm1, %v21862_v61  ;;  %v21885_v13 = vpack.c.bf16 %v874_v5, %v872_v4  ;;  %v877_v14 = vsel %vm859_vm3, %v875_v62, %v876_v63  ;;  %v883_v15 = vrot.slane %v21875_v6, 1  ;;  %v21891_v17 = vld [vmem:[#allocation2 + $0x98] sm:$0xff] }
  0x5b   : > { %v21889_v16 = vld [vmem:[#allocation2 + $0x88] sm:$0x3]  ;;  %v21893_v18 = vld [vmem:[#allocation2 + $0xa0] sm:$0x3]  ;;  %18039 = vmatpush3.bf16.msra.mxu0 %v1252_v48  ;;  %v879_v19 = vsel %vm859_vm3, %v876_v63, %v878_v0  ;;  %v885_v22 = vrot.slane %v21871_v3, 1  ;;  %v886_v23 = vrot.slane %v21879_v11, 1  ;;  %v21996_v51 = vpack.c.bf16 %v21869_v2, %v21867_v1 }
  0x5c   : > { %26615 = vst [vmem:[#allocation13_spill] sm:$0xff] %v21885_v13  ;;  %v882_v20 = vsel %vm859_vm3, %v880_v9, %v881_v10  ;;  %v21899_v24 = vld [vmem:[#allocation2 + $0xa8] sm:$0xff]  ;;  %v21901_v25 = vld [vmem:[#allocation2 + $0xb0] sm:$0xff]  ;;  %18010 = vmatprep.mubr.msk.bf16.mxu0 %vm469_vm1, %v21885_v13  ;;  %v884_v26 = vsel %vm859_vm3, %v881_v10, %v883_v15  ;;  %v888_v27 = vrot.slane %v21889_v16, 1  ;;  %v890_v28 = vrot.slane %v21881_v12, 1  ;;  %v21911_v31 = vld [vmem:[#allocation2 + $0xc0] sm:$0xff]  ;;  %21064 = vmatprep.subr.msk.bf16.mxu0 %vm1038_vm0, %v15838_v60 }
  0x5d   : > { %v891_v29 = vrot.slane %v21891_v17, 1  ;;  %v21909_v30 = vld [vmem:[#allocation2 + $0xb8] sm:$0x3]  ;;  %v893_v32 = vrot.slane %v21893_v18, 1  ;;  %v21915_v33 = vld [vmem:[#allocation2 + $0xc8] sm:$0xff]  ;;  %v21922_v43 = vpack.c.bf16 %v879_v19, %v877_v14  ;;  %v21924_v44 = vld [vmem:[#allocation2 + $0xe0] sm:$0xff]  ;;  %v21934_v54 = vpack.c.bf16 %v884_v26, %v882_v20 }
  0x5e   : > { %v21917_v34 = vld [vmem:[#allocation2 + $0xd0] sm:$0x3]  ;;  %v21919_v35 = vld [vmem:[#allocation2 + $0xd8] sm:$0xff]  ;;  %v696_v47 = vld [vmem:[%s21762_s22 + $0xa8] sm:$0xff]  ;;  %v21930_v48 = vsel %vm1038_vm0, %v15838_v60, 0  ;;  %v887_v55 = vsel %vm859_vm3, %v885_v22, %v886_v23  ;;  %v889_v0 = vsel %vm859_vm3, %v886_v23, %v888_v27  ;;  %v895_v4 = vrot.slane %v21899_v24, 1 }
  0x5f   : > { %26616 = vst [vmem:[#allocation14_spill] sm:$0xff] %v21922_v43  ;;  %v21926_v45 = vld [vmem:[#allocation2 + $0xf0] sm:$0xff]  ;;  %26617 = vst [vmem:[#allocation15_spill] sm:$0xff] %v21930_v48  ;;  %v21937_v56 = vld [vmem:[#allocation2 + $0xe8] sm:$0x3]  ;;  %v892_v60 = vsel %vm859_vm3, %v890_v28, %v891_v29  ;;  %v896_v5 = vrot.slane %v21901_v25, 1  ;;  %v894_v15 = vsel %vm859_vm3, %v891_v29, %v893_v32  ;;  %v21980_v21 = vpack.c.bf16 %v889_v0, %v887_v55 }
  0x60   : > { %26618 = vst [vmem:[#allocation16_spill] sm:$0xff] %v21934_v54  ;;  %v21939_v62 = vld [vmem:[#allocation2 + $0xf8] sm:$0xff]  ;;  %729 = vst.msk [vmem:[#allocation2 + $0x111] sm:$0xff] %vm469_vm1, %v696_v47  ;;  %v697_v63 = vld [vmem:[%s21762_s22 + $0xb0] sm:$0xff]  ;;  %v898_v19 = vrot.slane %v21909_v30, 1  ;;  %v900_v20 = vrot.slane %v21911_v31, 1  ;;  %v21982_v53 = vpack.c.bf16 %v894_v15, %v892_v60  ;;  %v22000_v55 = vpack.c.bf16 %v21879_v11, %v21871_v3 }
  0x61   : > { %v698_v9 = vld [vmem:[%s21762_s22 + $0xb8] sm:$0xff]  ;;  %730 = vst.msk [vmem:[#allocation2 + $0x121] sm:$0xff] %vm469_vm1, %v697_v63  ;;  %v699_v10 = vld [vmem:[%s21762_s22 + $0xc0] sm:$0xff]  ;;  %v700_v14 = vld [vmem:[%s21762_s22 + $0xc8] sm:$0xff]  ;;  %v901_v22 = vrot.slane %v21915_v33, 1  ;;  %v903_v29 = vrot.slane %v21917_v34, 1  ;;  %v22025_v13 = vpack.c.bf16 %v21924_v44, %v21919_v35  ;;  %v22029_v61 = vpack.c.bf16 %v21939_v62, %v21926_v45 }
  0x62   : > { %v21955_v23 = vld [vmem:[#allocation2 + $0x100] sm:$0x3]  ;;  %731 = vst.msk [vmem:[#allocation2 + $0x129] sm:$0xff] %vm469_vm1, %v698_v9  ;;  %732 = vst.msk [vmem:[#allocation2 + $0x139] sm:$0xff] %vm469_vm1, %v699_v10  ;;  %v701_v26 = vld [vmem:[%s21762_s22 + $0xd0] sm:$0xff]  ;;  %18011 = vmatmul.mubr.msk.bf16.gmra.mrb[4].mxu0 %vm469_vm1, %v21922_v43  ;;  %v905_v32 = vrot.slane %v21919_v35, 1  ;;  %v899_v36 = vsel %vm859_vm3, %v896_v5, %v898_v19 }
  0x63   : > { %733 = vst.msk [vmem:[#allocation2 + $0x141] sm:$0xff] %vm469_vm1, %v700_v14  ;;  %v702_v27 = vld [vmem:[%s21762_s22 + $0xd8] sm:$0xff]  ;;  %v703_v28 = vld [vmem:[%s21762_s22 + $0xe0] sm:$0xff]  ;;  %v906_v47 = vrot.slane %v21924_v44, 1  ;;  %v908_v63 = vrot.slane %v21937_v56, 1  ;;  %v21969_v42 = vld [vmem:[#allocation2 + $0x108] sm:$0xff]  ;;  %18014 = vmatprep.mubr.msk.bf16.mxu0 %vm469_vm1, %v21934_v54  ;;  %v902_v48 = vsel %vm859_vm3, %v900_v20, %v901_v22  ;;  %v904_v52 = vsel %vm859_vm3, %v901_v22, %v903_v29 }
  0x64   : > { %734 = vst.msk [vmem:[#allocation2 + $0x151] sm:$0xff] %vm469_vm1, %v701_v26  ;;  %735 = vst.msk [vmem:[#allocation2 + $0x159] sm:$0xff] %vm469_vm1, %v702_v27  ;;  %v704_v9 = vld [vmem:[%s21762_s22 + $0xe8] sm:$0xff]  ;;  %v910_v10 = vrot.slane %v21926_v45, 1  ;;  %v911_v14 = vrot.slane %v21939_v62, 1  ;;  %v21986_v26 = vpack.c.bf16 %v21839_v49, %v21834_v46  ;;  %v21990_v27 = vpack.c.bf16 %v21855_v58, %v21853_v57 }
  0x65   : > { %736 = vst.msk [vmem:[#allocation2 + $0x169] sm:$0xff] %vm469_vm1, %v703_v28  ;;  %737 = vst.msk [vmem:[#allocation2 + $0x171] sm:$0xff] %vm469_vm1, %v704_v9  ;;  %v897_v28 = vsel %vm859_vm3, %v895_v4, %v896_v5  ;;  %v913_v0 = vrot.slane %v21955_v23, 1  ;;  %v22009_v9 = vpack.c.bf16 %v21891_v17, %v21881_v12  ;;  %v22013_v4 = vpack.c.bf16 %v21901_v25, %v21899_v24 }
  0x66   : > { %26619 = vst [vmem:[#allocation17_spill] sm:$0xff] %v21980_v21  ;;  %26620 = vst [vmem:[#allocation18_spill] sm:$0xff] %v21982_v53  ;;  %v22017_v5 = vpack.c.bf16 %v21915_v33, %v21911_v31  ;;  %v915_v19 = vrot.slane %v21969_v42, 1  ;;  %v907_v7 = vsel %vm859_vm3, %v905_v32, %v906_v47 }
  0x67   : > { %26621 = vst [vmem:[#allocation19_spill] sm:$0xff] %v21986_v26  ;;  %26622 = vst [vmem:[#allocation20_spill] sm:$0xff] %v21990_v27  ;;  %v22003_v60 = vld [vmem:[#allocation2 + $0x110] sm:$0xff]  ;;  %v22005_v15 = vld [vmem:[#allocation2 + $0x118] sm:$0x3] }
  0x68   : > { %26623 = vst [vmem:[#allocation21_spill] sm:$0xff] %v21996_v51  ;;  %26624 = vst [vmem:[#allocation22_spill] sm:$0xff] %v22000_v55  ;;  %v916_v54 = vrot.slane %v22003_v60, 1  ;;  %v22021_v43 = vld [vmem:[#allocation2 + $0x120] sm:$0xff]  ;;  %v918_v37 = vrot.slane %v22005_v15, 1  ;;  %v26632_v55 = vrot.slane %v21822_v40, 2  ;;  %v914_v40 = vsel %vm859_vm3, %v911_v14, %v913_v0 }
  0x69   : > { %26625 = vst [vmem:[#allocation23_spill] sm:$0xff] %v22005_v15  ;;  %26626 = vst [vmem:[#allocation24_spill] sm:$0xff] %v22009_v9  ;;  %v22032_v38 = vld [vmem:[#allocation2 + $0x128] sm:$0xff]  ;;  %v22040_v9 = vpack.c.bf16 %v22003_v60, %v21969_v42 }
  0x6a   : > { %26627 = vst [vmem:[#allocation25_spill] sm:$0xff] %v22013_v4  ;;  %26628 = vst [vmem:[#allocation26_spill] sm:$0xff] %v22017_v5  ;;  %v22034_v4 = vld [vmem:[#allocation2 + $0x130] sm:$0x3]  ;;  %v22036_v5 = vld [vmem:[#allocation2 + $0x138] sm:$0xff]  ;;  %v26635_v27 = vmov %v26632_v55  ;;  %18015 = vmatmul.mubr.msk.bf16.gmra.mrb[8].mxu0 %vm469_vm1, %v21980_v21 }
  0x6b   : > { %26629 = vst [vmem:[#allocation27_spill] sm:$0xff] %v22025_v13  ;;  %26630 = vst [vmem:[#allocation28_spill] sm:$0xff] %v22029_v61  ;;  %v26633_v13 = vrot.slane %v21820_v39, 2  ;;  %v26634_v61 = vrot.slane %v21824_v41, 2  ;;  %v22056_v8 = vld [vmem:[#allocation2 + $0x140] sm:$0xff]  ;;  %v912_v39 = vsel %vm859_vm3, %v910_v10, %v911_v14  ;;  %v920_v41 = vrot.slane %v22021_v43, 1  ;;  %18018 = vmatprep.mubr.msk.bf16.mxu0 %vm469_vm1, %v21982_v53 }
  0x6c   : > { %26631 = vst [vmem:[#allocation29_spill] sm:$0xff] %v22040_v9  ;;  %v909_v9 = vsel %vm859_vm3, %v906_v47, %v908_v63  ;;  %v22058_v15 = vld [vmem:[#allocation2 + $0x148] sm:$0x3]  ;;  %v923_v20 = vrot.slane %v22034_v4, 1  ;;  %v22074_v47 = vld [vmem:[#allocation2 + $0x158] sm:$0xff]  ;;  %v917_v63 = vsel %vm859_vm3, %v915_v19, %v916_v54  ;;  %v919_v10 = vsel %vm859_vm3, %v916_v54, %v918_v37  ;;  %v22092_v21 = vld [vmem:[#allocation2 + $0x170] sm:$0xff] }
  0x6d   : > { %v1423_v51 = vsel %vm1415_vm4, %v26633_v13, %v26632_v55  ;;  %v1425_v26 = vsel %vm1415_vm4, %v26635_v27, %v26634_v61  ;;  %v921_v61 = vrot.slane %v22032_v38, 1  ;;  %v22066_v13 = vld [vmem:[#allocation2 + $0x150] sm:$0xff]  ;;  %v22078_v14 = vld [vmem:[#allocation2 + $0x160] sm:$0x3]  ;;  %v22080_v27 = vpack.c.bf16 %v899_v36, %v897_v28  ;;  %v22087_v53 = vld [vmem:[#allocation2 + $0x168] sm:$0xff] }
  0x6e   : > { %v22082_v55 = vpack.c.bf16 %v904_v52, %v902_v48  ;;  %v22084_v0 = vpack.c.bf16 %v909_v9, %v907_v7  ;;  %v930_v22 = vrot.slane %v22066_v13, 1  ;;  %v22089_v29 = vpack.c.bf16 %v914_v40, %v912_v39 }
  0x6f   : > { %v931_v32 = vrot.slane %v22074_v47, 1  ;;  %v22096_v37 = vpack.c.bf16 %v22032_v38, %v22021_v43  ;;  %v22100_v52 = vpack.c.bf16 %v22056_v8, %v22036_v5  ;;  %v22102_v7 = vpack.c.bf16 %v919_v10, %v917_v63 }
  0x70   : > { %v22105_v36 = vsel %vm859_vm3, %v920_v41, %v921_v61  ;;  %v22109_v48 = vpack.c.bf16 %v22074_v47, %v22066_v13  ;;  %v22113_v54 = vpack.c.bf16 %v22092_v21, %v22087_v53  ;;  %v22116_v28 = vsel %vm859_vm3, %v921_v61, %v923_v20 }
  0x71   : > { %v22119_v19 = vpack.c.bf16 %v1425_v26, %v1423_v51  ;;  %v1426_v39 = vrot.slane %v21834_v46, 2  ;;  %v1427_v41 = vrot.slane %v21839_v49, 2  ;;  %v1429_v63 = vrot.slane %v21841_v50, 2 }
  0x72   : > { %v1431_v10 = vrot.slane %v21853_v57, 2  ;;  %18019 = vmatmul.mubr.msk.bf16.gmra.mrb[12].mxu0 %vm469_vm1, %v22080_v27  ;;  %v1432_v61 = vrot.slane %v21855_v58, 2  ;;  %v1434_v20 = vrot.slane %v21857_v59, 2  ;;  %v1436_v51 = vrot.slane %v21867_v1, 2 }
  0x73   : > { %v1437_v26 = vrot.slane %v21869_v2, 2  ;;  %18022 = vmatprep.mubr.msk.bf16.mxu0 %vm469_vm1, %v22082_v55  ;;  %v1428_v46 = vsel %vm1415_vm4, %v1426_v39, %v1427_v41  ;;  %v1430_v49 = vsel %vm1415_vm4, %v1427_v41, %v1429_v63  ;;  %v1439_v50 = vrot.slane %v21875_v6, 2 }
  0x74   : > { %v1441_v57 = vrot.slane %v21871_v3, 2  ;;  %v22138_v40 = vpack.c.bf16 %v1430_v49, %v1428_v46  ;;  %v1433_v58 = vsel %vm1415_vm4, %v1431_v10, %v1432_v61  ;;  %v1435_v59 = vsel %vm1415_vm4, %v1432_v61, %v1434_v20 }
  0x75   : > { %v1438_v1 = vsel %vm1415_vm4, %v1436_v51, %v1437_v26  ;;  %v22143_v2 = vpack.c.bf16 %v1435_v59, %v1433_v58  ;;  %v1440_v9 = vsel %vm1415_vm4, %v1437_v26, %v1439_v50  ;;  %v1442_v39 = vrot.slane %v21879_v11, 2 }
  0x76   : > { %v1444_v41 = vrot.slane %v21889_v16, 2  ;;  %v22148_v63 = vpack.c.bf16 %v1440_v9, %v1438_v1  ;;  %v1446_v3 = vrot.slane %v21881_v12, 2  ;;  %v1447_v6 = vrot.slane %v21891_v17, 2 }
  0x77   : > { %v1449_v10 = vrot.slane %v21893_v18, 2  ;;  %v1443_v61 = vsel %vm1415_vm4, %v1441_v57, %v1442_v39  ;;  %v1451_v51 = vrot.slane %v21899_v24, 2  ;;  %v1452_v26 = vrot.slane %v21901_v25, 2 }
  0x78   : > { %v1445_v20 = vsel %vm1415_vm4, %v1442_v39, %v1444_v41  ;;  %v1448_v11 = vsel %vm1415_vm4, %v1446_v3, %v1447_v6  ;;  %v1454_v12 = vrot.slane %v21909_v30, 2  ;;  %v1456_v18 = vrot.slane %v21911_v31, 2 }
  0x79   : > { %v22157_v46 = vpack.c.bf16 %v1445_v20, %v1443_v61  ;;  %v1450_v16 = vsel %vm1415_vm4, %v1447_v6, %v1449_v10  ;;  %v1453_v17 = vsel %vm1415_vm4, %v1451_v51, %v1452_v26  ;;  %v1457_v49 = vrot.slane %v21915_v33, 2  ;;  %v787_v6 = vld [vmem:[#allocation2 + $0x178] sm:$0x3]  ;;  %v26636_v61 = vld [vmem:[#allocation23_spill] sm:$0xff] }
  0x7a   : > { %v22162_v9 = vpack.c.bf16 %v1450_v16, %v1448_v11  ;;  %18023 = vmatmul.mubr.msk.bf16.gmra.mrb[16].mxu0 %vm469_vm1, %v22084_v0  ;;  %v1455_v24 = vsel %vm1415_vm4, %v1452_v26, %v1454_v12  ;;  %v1459_v25 = vrot.slane %v21917_v34, 2  ;;  %v1461_v50 = vrot.slane %v21919_v35, 2 }
  0x7b   : > { %v1462_v57 = vrot.slane %v21924_v44, 2  ;;  %18026 = vmatprep.mubr.msk.bf16.mxu0 %vm469_vm1, %v22089_v29  ;;  %v22175_v30 = vpack.c.bf16 %v1455_v24, %v1453_v17  ;;  %v1458_v31 = vsel %vm1415_vm4, %v1456_v18, %v1457_v49  ;;  %v1464_v33 = vrot.slane %v21937_v56, 2 }
  0x7c   : > { %v1466_v58 = vrot.slane %v21926_v45, 2  ;;  %v1460_v59 = vsel %vm1415_vm4, %v1457_v49, %v1459_v25  ;;  %v1467_v34 = vrot.slane %v21939_v62, 2  ;;  %v1469_v35 = vrot.slane %v21955_v23, 2 }
  0x7d   : > { %v1463_v1 = vsel %vm1415_vm4, %v1461_v50, %v1462_v57  ;;  %v22184_v44 = vpack.c.bf16 %v1460_v59, %v1458_v31  ;;  %v1465_v39 = vsel %vm1415_vm4, %v1462_v57, %v1464_v33  ;;  %v1471_v41 = vrot.slane %v21969_v42, 2 }
  0x7e   : > { %v1472_v3 = vrot.slane %v22003_v60, 2  ;;  %v22189_v56 = vpack.c.bf16 %v1465_v39, %v1463_v1  ;;  %v1468_v45 = vsel %vm1415_vm4, %v1466_v58, %v1467_v34  ;;  %v1470_v10 = vsel %vm1415_vm4, %v1467_v34, %v1469_v35 }
  0x7f   : > { %v1474_v20 = vrot.slane %v26636_v61, 2  ;;  %v22196_v62 = vpack.c.bf16 %v22116_v28, %v22105_v36  ;;  %v22198_v23 = vpack.c.bf16 %v1470_v10, %v1468_v45  ;;  %v26637_v60 = vrot.slane %v22056_v8, 1 }
  0x80   : > { %v1473_v51 = vsel %vm1415_vm4, %v1471_v41, %v1472_v3  ;;  %v26638_v26 = vrot.slane %v22036_v5, 1  ;;  %v26639_v16 = vrot.slane %v22058_v15, 1  ;;  %v936_v28 = vrot.slane %v22092_v21, 1 }
  0x81   : > { %v1475_v42 = vsel %vm1415_vm4, %v1472_v3, %v1474_v20  ;;  %v26640_v12 = vmov %v26637_v60  ;;  %v1476_v18 = vrot.slane %v22021_v43, 2  ;;  %v1477_v49 = vrot.slane %v22032_v38, 2 }
  0x82   : > { %v927_v11 = vsel %vm859_vm3, %v26638_v26, %v26637_v60  ;;  %v929_v17 = vsel %vm859_vm3, %v26640_v12, %v26639_v16  ;;  %v22212_v36 = vpack.c.bf16 %v1475_v42, %v1473_v51  ;;  %18027 = vmatmul.mubr.msk.bf16.gmra.mrb[20].mxu0 %vm469_vm1, %v22102_v7  ;;  %v1479_v24 = vrot.slane %v22034_v4, 2  ;;  %v15855_v26 = vld [vmem:[%s26513_s1 + $0x6] sm:$0x3]  ;;  %v26647_v16 = vld [vmem:[#allocation15_spill] sm:$0xff] }
  0x83   : > { %18030 = vmatprep.mubr.msk.bf16.mxu0 %vm469_vm1, %v22196_v62  ;;  %v938_v25 = vrot.slane %v787_v6, 1  ;;  %v1481_v50 = vrot.slane %v22036_v5, 2  ;;  %v1482_v57 = vrot.slane %v22056_v8, 2  ;;  %v1484_v31 = vrot.slane %v22058_v15, 2  ;;  %v26648_v12 = vld [vmem:[#allocation19_spill] sm:$0xff] }
  0x84   : > { %v932_v43 = vsel %vm859_vm3, %v930_v22, %v931_v32  ;;  %v26641_v38 = vrot.slane %v22078_v14, 1  ;;  %v1478_v33 = vsel %vm1415_vm4, %v1476_v18, %v1477_v49  ;;  %v1480_v5 = vsel %vm1415_vm4, %v1477_v49, %v1479_v24  ;;  %v26651_v18 = vld [vmem:[#allocation22_spill] sm:$0xff]  ;;  %v26652_v49 = vld [vmem:[#allocation24_spill] sm:$0xff]  ;;  %v26653_v24 = vld [vmem:[#allocation25_spill] sm:$0xff] }
  0x85   : > { %v22237_v58 = vpack.c.bf16 %v1480_v5, %v1478_v33  ;;  %v1483_v8 = vsel %vm1415_vm4, %v1481_v50, %v1482_v57  ;;  %v1485_v15 = vsel %vm1415_vm4, %v1482_v57, %v1484_v31  ;;  %v22241_v59 = vpack.c.bf16 %v929_v17, %v927_v11  ;;  %v26646_v11 = vld [vmem:[#allocation11_spill] sm:$0xff]  ;;  %v26649_v17 = vld [vmem:[#allocation20_spill] sm:$0xff]  ;;  %v26657_v31 = vld [vmem:[#allocation29_spill] sm:$0xff] }
  0x86   : > { %v934_v4 = vsel %vm859_vm3, %v931_v32, %v26641_v38  ;;  %v22243_v1 = vpack.c.bf16 %v1485_v15, %v1483_v8  ;;  %v26642_v32 = vrot.slane %v22087_v53, 1  ;;  %v1486_v35 = vrot.slane %v22066_v13, 2  ;;  %v26655_v50 = vld [vmem:[#allocation27_spill] sm:$0xff]  ;;  %v26656_v57 = vld [vmem:[#allocation28_spill] sm:$0xff]  ;;  %v26658_v33 = vld [vmem:[#allocation10_spill] sm:$0xff] }
  0x87   : > { %v22245_v22 = vpack.c.bf16 %v934_v4, %v932_v43  ;;  %v1487_v39 = vrot.slane %v22074_v47, 2  ;;  %v1489_v41 = vrot.slane %v22078_v14, 2  ;;  %v939_v3 = vsel %vm859_vm3, %v936_v28, %v938_v25  ;;  %v26654_v25 = vld [vmem:[#allocation26_spill] sm:$0xff]  ;;  %v705_v43 = vld [vmem:[%s21762_s22 + $0xf0] sm:$0xff]  ;;  %v706_v38 = vld [vmem:[%s21762_s22 + $0xf8] sm:$0xff] }
  0x88   : > { %v937_v34 = vsel %vm859_vm3, %v26642_v32, %v936_v28  ;;  %v1491_v45 = vrot.slane %v22087_v53, 2  ;;  %v1492_v10 = vrot.slane %v22092_v21, 2  ;;  %v1494_v61 = vrot.slane %v787_v6, 2  ;;  %v26643_v53 = vld [vmem:[#allocation8_spill] sm:$0xff]  ;;  %v26644_v21 = vld [vmem:[#allocation7_spill] sm:$0xff]  ;;  %v26650_v28 = vld [vmem:[#allocation21_spill] sm:$0xff] }
  0x89   : > { %v1488_v20 = vsel %vm1415_vm4, %v1486_v35, %v1487_v39  ;;  %v1490_v51 = vsel %vm1415_vm4, %v1487_v39, %v1489_v41  ;;  %v22266_v14 = vpack.c.bf16 %v939_v3, %v937_v34  ;;  %v26645_v6 = vpack.c.bf16 %v26643_v53, %v26644_v21  ;;  %738 = vst.msk [vmem:[#allocation2 + $0x181] sm:$0xff] %vm469_vm1, %v705_v43  ;;  %v26659_v5 = vld [vmem:[#allocation9_spill] sm:$0xff]  ;;  %v15872_v15 = vld [vmem:[%s26513_s1 + $0x8] sm:$0x3]  ;;  %v15889_v34 = vld [vmem:[%s26513_s1 + $0xa] sm:$0x3] }
  0x8a   : > { %18031 = vmatmul.mubr.msk.bf16.gmra.mrb[24].mxu0 %vm469_vm1, %v22241_v59  ;;  %v22262_v42 = vpack.c.bf16 %v1490_v51, %v1488_v20  ;;  %v1493_v13 = vsel %vm1415_vm4, %v1491_v45, %v1492_v10  ;;  %v1495_v47 = vsel %vm1415_vm4, %v1492_v10, %v1494_v61  ;;  %739 = vst.msk [vmem:[#allocation2 + $0x189] sm:$0xff] %vm469_vm1, %v706_v38  ;;  %v1797_v4 = vsel %vm1038_vm0, %v15855_v26, 0  ;;  %v15906_v21 = vld [vmem:[%s26513_s1 + $0xc] sm:$0x3] }
  0x8b   : > { %18034 = vmatprep.mubr.msk.bf16.mxu0 %vm469_vm1, %v22245_v22  ;;  %v22268_v60 = vpack.c.bf16 %v1495_v47, %v1493_v13  ;;  %v26660_v8 = vpack.c.bf16 %v26658_v33, %v26659_v5  ;;  %v2009_v32 = vsel %vm1038_vm0, %v15872_v15, 0  ;;  %v26661_v47 = vld [vmem:[#allocation12_spill] sm:$0xff]  ;;  %v2218_v53 = vsel %vm1038_vm0, %v15889_v34, 0  ;;  %v26666_v43 = vld [vmem:[#allocation18_spill] sm:$0xff] }
  0x90   : > { %v788_v35 = vld [vmem:[#allocation2 + $0x180] sm:$0xff] }
  0x91   : > { %v789_v39 = vld [vmem:[#allocation2 + $0x188] sm:$0xff]  ;;  %v2204_v41 = vrot.slane %v788_v35, 2  ;;  %v790_v45 = vld [vmem:[#allocation2 + $0x190] sm:$0x3]  ;;  %v1995_v38 = vrot.slane %v788_v35, 1 }
  0x92   : > { %18035 = vmatmul.mubr.msk.bf16.gmra.mrb[28].mxu0 %vm469_vm1, %v22266_v14  ;;  %v2205_v3 = vrot.slane %v789_v39, 2  ;;  %v2207_v61 = vrot.slane %v790_v45, 2  ;;  %v22391_v51 = vpack.c.bf16 %v789_v39, %v788_v35  ;;  %v1998_v33 = vrot.slane %v790_v45, 1  ;;  %v22481_v35 = vld [vmem:[%s26513_s1 + $0x10] sm:$0x3] }
  0x93   : > { %18040 = vmatprep.mubr.msk.bf16.mxu0 %vm469_vm1, %v26645_v6  ;;  %v26662_v6 = vld [vmem:[#allocation13_spill] sm:$0xff] }
  0x94   : > { %v2206_v10 = vsel %vm1415_vm4, %v2204_v41, %v2205_v3  ;;  %v2208_v20 = vsel %vm1415_vm4, %v2205_v3, %v2207_v61 }
  0x95   : > { %v22393_v13 = vpack.c.bf16 %v2208_v20, %v2206_v10 }
  0x9a   : > { %18041 = vmatmul.mubr.msk.bf16.vlgmr.msra.gmra.mrb[0].mxu0 %vm469_vm1, %v26646_v11 }
  0x9b   : > { %18073 = vmatpush3.bf16.msra.mxu0 %v26647_v16  ;;  %18044 = vmatprep.mubr.msk.bf16.mxu0 %vm469_vm1, %v26648_v12  ;;  %v26665_v16 = vld [vmem:[#allocation17_spill] sm:$0xff] }
  0x9c   : > { %21065 = vmatprep.subr.msk.bf16.mxu0 %vm1038_vm0, %v15855_v26  ;;  %v26663_v26 = vld [vmem:[#allocation14_spill] sm:$0xff] }
  0xa2   : > { %18045 = vmatmul.mubr.msk.bf16.gmra.mrb[4].mxu0 %vm469_vm1, %v26649_v17 }
  0xa3   : > { %18048 = vmatprep.mubr.msk.bf16.mxu0 %vm469_vm1, %v26650_v28 }
  0xaa   : > { %18049 = vmatmul.mubr.msk.bf16.gmra.mrb[8].mxu0 %vm469_vm1, %v26651_v18 }
  0xab   : > { %18052 = vmatprep.mubr.msk.bf16.mxu0 %vm469_vm1, %v26652_v49 }
  0xb2   : > { %18053 = vmatmul.mubr.msk.bf16.gmra.mrb[12].mxu0 %vm469_vm1, %v26653_v24 }
  0xb3   : > { %18056 = vmatprep.mubr.msk.bf16.mxu0 %vm469_vm1, %v26654_v25 }
  0xba   : > { %18057 = vmatmul.mubr.msk.bf16.gmra.mrb[16].mxu0 %vm469_vm1, %v26655_v50 }
  0xbb   : > { %18060 = vmatprep.mubr.msk.bf16.mxu0 %vm469_vm1, %v26656_v57 }
  0xc2   : > { %18061 = vmatmul.mubr.msk.bf16.gmra.mrb[20].mxu0 %vm469_vm1, %v26657_v31 }
  0xc3   : > { %18064 = vmatprep.mubr.msk.bf16.mxu0 %vm469_vm1, %v22096_v37 }
  0xca   : > { %18065 = vmatmul.mubr.msk.bf16.gmra.mrb[24].mxu0 %vm469_vm1, %v22100_v52 }
  0xcb   : > { %18068 = vmatprep.mubr.msk.bf16.mxu0 %vm469_vm1, %v22109_v48 }
  0xd2   : > { %18069 = vmatmul.mubr.msk.bf16.gmra.mrb[28].mxu0 %vm469_vm1, %v22113_v54 }
  0xd3   : > { %18074 = vmatprep.mubr.msk.bf16.mxu0 %vm469_vm1, %v26660_v8 }
  0xda   : > { %18075 = vmatmul.mubr.msk.bf16.vlgmr.msra.gmra.mrb[0].mxu0 %vm469_vm1, %v22119_v19 }
  0xdb   : > { %18107 = vmatpush3.bf16.msra.mxu0 %v1797_v4  ;;  %18078 = vmatprep.mubr.msk.bf16.mxu0 %vm469_vm1, %v22138_v40  ;;  %v1996_v4 = vrot.slane %v789_v39, 1 }
  0xdc   : > { %21066 = vmatprep.subr.msk.bf16.mxu0 %vm1038_vm0, %v15872_v15 }
  0xdd   : > { %v1997_v5 = vsel %vm859_vm3, %v1995_v38, %v1996_v4  ;;  %v1999_v8 = vsel %vm859_vm3, %v1996_v4, %v1998_v33 }
  0xde   : > { %v22434_v15 = vpack.c.bf16 %v1999_v8, %v1997_v5 }
  0xe2   : > { %18079 = vmatmul.mubr.msk.bf16.gmra.mrb[4].mxu0 %vm469_vm1, %v22143_v2 }
  0xe3   : > { %18082 = vmatprep.mubr.msk.bf16.mxu0 %vm469_vm1, %v22148_v63 }
  0xea   : > { %18083 = vmatmul.mubr.msk.bf16.gmra.mrb[8].mxu0 %vm469_vm1, %v22157_v46 }
  0xeb   : > { %18086 = vmatprep.mubr.msk.bf16.mxu0 %vm469_vm1, %v22162_v9 }
  0xf2   : > { %18087 = vmatmul.mubr.msk.bf16.gmra.mrb[12].mxu0 %vm469_vm1, %v22175_v30 }
  0xf3   : > { %18090 = vmatprep.mubr.msk.bf16.mxu0 %vm469_vm1, %v22184_v44 }
  0xfa   : > { %18091 = vmatmul.mubr.msk.bf16.gmra.mrb[16].mxu0 %vm469_vm1, %v22189_v56 }
  0xfb   : > { %18094 = vmatprep.mubr.msk.bf16.mxu0 %vm469_vm1, %v22198_v23 }
 0x102   : > { %18095 = vmatmul.mubr.msk.bf16.gmra.mrb[20].mxu0 %vm469_vm1, %v22212_v36 }
 0x103   : > { %18098 = vmatprep.mubr.msk.bf16.mxu0 %vm469_vm1, %v22237_v58 }
 0x10a   : > { %18099 = vmatmul.mubr.msk.bf16.gmra.mrb[24].mxu0 %vm469_vm1, %v22243_v1 }
 0x10b   : > { %18102 = vmatprep.mubr.msk.bf16.mxu0 %vm469_vm1, %v22262_v42 }
 0x112   : > { %18103 = vmatmul.mubr.msk.bf16.gmra.mrb[28].mxu0 %vm469_vm1, %v22268_v60 }
 0x113   : > { %18108 = vmatprep.mubr.msk.bf16.mxu0 %vm469_vm1, %v26646_v11  ;;  %v26664_v11 = vld [vmem:[#allocation16_spill] sm:$0xff] }
 0x11a   : > { %18109 = vmatmul.mubr.msk.bf16.vlgmr.msra.gmra.mrb[0].mxu0 %vm469_vm1, %v26648_v12 }
 0x11b   : > { %18141 = vmatpush3.bf16.msra.mxu0 %v2009_v32  ;;  %18112 = vmatprep.mubr.msk.bf16.mxu0 %vm469_vm1, %v26649_v17  ;;  %v2420_v32 = vsel %vm1038_vm0, %v15906_v21, 0 }
 0x11c   : > { %21067 = vmatprep.subr.msk.bf16.mxu0 %vm1038_vm0, %v15889_v34  ;;  %v15923_v34 = vld [vmem:[%s26513_s1 + $0xe] sm:$0x3] }
 0x122   : > { %18113 = vmatmul.mubr.msk.bf16.gmra.mrb[4].mxu0 %vm469_vm1, %v26650_v28 }
 0x123   : > { %18116 = vmatprep.mubr.msk.bf16.mxu0 %vm469_vm1, %v26651_v18 }
 0x12a   : > { %18117 = vmatmul.mubr.msk.bf16.gmra.mrb[8].mxu0 %vm469_vm1, %v26652_v49 }
 0x12b   : > { %18120 = vmatprep.mubr.msk.bf16.mxu0 %vm469_vm1, %v26653_v24 }
 0x132   : > { %18121 = vmatmul.mubr.msk.bf16.gmra.mrb[12].mxu0 %vm469_vm1, %v26654_v25 }
 0x133   : > { %18124 = vmatprep.mubr.msk.bf16.mxu0 %vm469_vm1, %v26655_v50 }
 0x13a   : > { %18125 = vmatmul.mubr.msk.bf16.gmra.mrb[16].mxu0 %vm469_vm1, %v26656_v57 }
 0x13b   : > { %18128 = vmatprep.mubr.msk.bf16.mxu0 %vm469_vm1, %v26657_v31 }
 0x142   : > { %18129 = vmatmul.mubr.msk.bf16.gmra.mrb[20].mxu0 %vm469_vm1, %v22096_v37 }
 0x143   : > { %18132 = vmatprep.mubr.msk.bf16.mxu0 %vm469_vm1, %v22100_v52 }
 0x14a   : > { %18133 = vmatmul.mubr.msk.bf16.gmra.mrb[24].mxu0 %vm469_vm1, %v22109_v48 }
 0x14b   : > { %18136 = vmatprep.mubr.msk.bf16.mxu0 %vm469_vm1, %v22113_v54 }
 0x152   : > { %18137 = vmatmul.mubr.msk.bf16.gmra.mrb[28].mxu0 %vm469_vm1, %v22391_v51 }
 0x153   : > { %18142 = vmatprep.mubr.msk.bf16.mxu0 %vm469_vm1, %v26661_v47 }
 0x15a   : > { %18143 = vmatmul.mubr.msk.bf16.vlgmr.msra.gmra.mrb[0].mxu0 %vm469_vm1, %v26662_v6 }
 0x15b   : > { %18175 = vmatpush3.bf16.msra.mxu0 %v2218_v53  ;;  %18146 = vmatprep.mubr.msk.bf16.mxu0 %vm469_vm1, %v26663_v26 }
 0x15c   : > { %21068 = vmatprep.subr.msk.bf16.mxu0 %vm1038_vm0, %v15906_v21 }
 0x162   : > { %18147 = vmatmul.mubr.msk.bf16.gmra.mrb[4].mxu0 %vm469_vm1, %v26664_v11 }
 0x163   : > { %18150 = vmatprep.mubr.msk.bf16.mxu0 %vm469_vm1, %v26665_v16 }
 0x16a   : > { %18151 = vmatmul.mubr.msk.bf16.gmra.mrb[8].mxu0 %vm469_vm1, %v26666_v43 }
 0x16b   : > { %18154 = vmatprep.mubr.msk.bf16.mxu0 %vm469_vm1, %v22080_v27 }
 0x172   : > { %18155 = vmatmul.mubr.msk.bf16.gmra.mrb[12].mxu0 %vm469_vm1, %v22082_v55 }
 0x173   : > { %18158 = vmatprep.mubr.msk.bf16.mxu0 %vm469_vm1, %v22084_v0 }
 0x17a   : > { %18159 = vmatmul.mubr.msk.bf16.gmra.mrb[16].mxu0 %vm469_vm1, %v22089_v29 }
 0x17b   : > { %18162 = vmatprep.mubr.msk.bf16.mxu0 %vm469_vm1, %v22102_v7 }
 0x182   : > { %18163 = vmatmul.mubr.msk.bf16.gmra.mrb[20].mxu0 %vm469_vm1, %v22196_v62 }
 0x183   : > { %18166 = vmatprep.mubr.msk.bf16.mxu0 %vm469_vm1, %v22241_v59 }
 0x18a   : > { %18167 = vmatmul.mubr.msk.bf16.gmra.mrb[24].mxu0 %vm469_vm1, %v22245_v22 }
 0x18b   : > { %18170 = vmatprep.mubr.msk.bf16.mxu0 %vm469_vm1, %v22266_v14 }
 0x192   : > { %18171 = vmatmul.mubr.msk.bf16.gmra.mrb[28].mxu0 %vm469_vm1, %v22434_v15 }
 0x193   : > { %18176 = vmatprep.mubr.msk.bf16.mxu0 %vm469_vm1, %v22119_v19  ;;  %v2632_v19 = vsel %vm1038_vm0, %v15923_v34, 0 }
 0x19a   : > { %18177 = vmatmul.mubr.msk.bf16.vlgmr.msra.gmra.mrb[0].mxu0 %vm469_vm1, %v22138_v40 }
 0x19b   : > { %18209 = vmatpush3.bf16.msra.mxu0 %v2420_v32  ;;  %18180 = vmatprep.mubr.msk.bf16.mxu0 %vm469_vm1, %v22143_v2 }
 0x19c   : > { %21069 = vmatprep.subr.msk.bf16.mxu0 %vm1038_vm0, %v15923_v34 }
 0x1a2   : > { %18181 = vmatmul.mubr.msk.bf16.gmra.mrb[4].mxu0 %vm469_vm1, %v22148_v63 }
 0x1a3   : > { %18184 = vmatprep.mubr.msk.bf16.mxu0 %vm469_vm1, %v22157_v46 }
 0x1aa   : > { %18185 = vmatmul.mubr.msk.bf16.gmra.mrb[8].mxu0 %vm469_vm1, %v22162_v9 }
 0x1ab   : > { %18188 = vmatprep.mubr.msk.bf16.mxu0 %vm469_vm1, %v22175_v30 }
 0x1b2   : > { %18189 = vmatmul.mubr.msk.bf16.gmra.mrb[12].mxu0 %vm469_vm1, %v22184_v44 }
 0x1b3   : > { %18192 = vmatprep.mubr.msk.bf16.mxu0 %vm469_vm1, %v22189_v56 }
 0x1ba   : > { %18193 = vmatmul.mubr.msk.bf16.gmra.mrb[16].mxu0 %vm469_vm1, %v22198_v23 }
 0x1bb   : > { %18196 = vmatprep.mubr.msk.bf16.mxu0 %vm469_vm1, %v22212_v36 }
 0x1c2   : > { %18197 = vmatmul.mubr.msk.bf16.gmra.mrb[20].mxu0 %vm469_vm1, %v22237_v58 }
 0x1c3   : > { %18200 = vmatprep.mubr.msk.bf16.mxu0 %vm469_vm1, %v22243_v1 }
 0x1ca   : > { %18201 = vmatmul.mubr.msk.bf16.gmra.mrb[24].mxu0 %vm469_vm1, %v22262_v42 }
 0x1cb   : > { %18204 = vmatprep.mubr.msk.bf16.mxu0 %vm469_vm1, %v22268_v60 }
 0x1d2   : > { %18205 = vmatmul.mubr.msk.bf16.gmra.mrb[28].mxu0 %vm469_vm1, %v22393_v13 }
 0x1d3   : > { %18210 = vmatprep.mubr.msk.bf16.mxu0 %vm469_vm1, %v26648_v12  ;;  %v22509_v12 = vld [vmem:[#allocation2 + $0x198] sm:$0xff] }
 0x1da   : > { %18211 = vmatmul.mubr.msk.bf16.vlgmr.msra.gmra.mrb[0].mxu0 %vm469_vm1, %v26649_v17  ;;  %v22511_v17 = vld [vmem:[#allocation2 + $0x1a0] sm:$0xff] }
 0x1db   : > { %18243 = vmatpush3.bf16.msra.mxu0 %v2632_v19  ;;  %18214 = vmatprep.mubr.msk.bf16.mxu0 %vm469_vm1, %v26650_v28  ;;  %v2827_v28 = vrot.slane %v22509_v12, 2 }
 0x1dc   : > { %21070 = vmatprep.subr.msk.bf16.mxu0 %vm1038_vm0, %v22481_v35 }
 0x1e2   : > { %18215 = vmatmul.mubr.msk.bf16.gmra.mrb[4].mxu0 %vm469_vm1, %v26651_v18  ;;  %v2828_v18 = vrot.slane %v22511_v17, 2 }
 0x1e3   : > { %18218 = vmatprep.mubr.msk.bf16.mxu0 %vm469_vm1, %v26652_v49  ;;  %v22517_v49 = vld [vmem:[#allocation2 + $0x1a8] sm:$0x3] }
 0x1ea   : > { %18219 = vmatmul.mubr.msk.bf16.gmra.mrb[8].mxu0 %vm469_vm1, %v26653_v24  ;;  %v2413_v24 = vpack.c.bf16 %v22511_v17, %v22509_v12 }
 0x1eb   : > { %18222 = vmatprep.mubr.msk.bf16.mxu0 %vm469_vm1, %v26654_v25 }
 0x1f2   : > { %18223 = vmatmul.mubr.msk.bf16.gmra.mrb[12].mxu0 %vm469_vm1, %v26655_v50  ;;  %v2841_v50 = vsel %vm1038_vm0, %v22481_v35, 0 }
 0x1f3   : > { %18226 = vmatprep.mubr.msk.bf16.mxu0 %vm469_vm1, %v26656_v57 }
 0x1fa   : > { %18227 = vmatmul.mubr.msk.bf16.gmra.mrb[16].mxu0 %vm469_vm1, %v26657_v31 }
 0x1fb   : > { %18230 = vmatprep.mubr.msk.bf16.mxu0 %vm469_vm1, %v22096_v37  ;;  %v22522_v37 = vsel %vm1415_vm4, %v2827_v28, %v2828_v18 }
 0x202   : > { %18231 = vmatmul.mubr.msk.bf16.gmra.mrb[20].mxu0 %vm469_vm1, %v22100_v52  ;;  %v2830_v52 = vrot.slane %v22517_v49, 2 }
 0x203   : > { %18234 = vmatprep.mubr.msk.bf16.mxu0 %vm469_vm1, %v22109_v48 }
 0x204   : > { %v22526_v48 = vsel %vm1415_vm4, %v2828_v18, %v2830_v52 }
 0x205   : > { %v2834_v25 = vpack.c.bf16 %v22526_v48, %v22522_v37 }
 0x20a   : > { %18235 = vmatmul.mubr.msk.bf16.gmra.mrb[24].mxu0 %vm469_vm1, %v22113_v54  ;;  %v22535_v54 = vld [vmem:[#allocation5] sm:$0xff] }
 0x20b   : > { %18238 = vmatprep.mubr.msk.bf16.mxu0 %vm469_vm1, %v22391_v51  ;;  %533 = vst.msk [vmem:[#allocation3 + $0x30] sm:$0xff] %vm525_vm5, %v22535_v54  ;;  %534 = vst.msk [vmem:[#allocation3 + $0x38] sm:$0xff] %vm525_vm5, %v22535_v54 }
 0x20c   : > { %526 = vst.msk [vmem:[#allocation3] sm:$0xff] %vm525_vm5, %v22535_v54  ;;  %527 = vst.msk [vmem:[#allocation3 + $0x8] sm:$0xff] %vm525_vm5, %v22535_v54 }
 0x20d   : > { %530 = vst.msk [vmem:[#allocation3 + $0x18] sm:$0xff] %vm525_vm5, %v22535_v54  ;;  %531 = vst.msk [vmem:[#allocation3 + $0x20] sm:$0xff] %vm525_vm5, %v22535_v54 }
 0x20e   : > { %536 = vst.msk [vmem:[#allocation3 + $0x48] sm:$0xff] %vm525_vm5, %v22535_v54  ;;  %537 = vst.msk [vmem:[#allocation3 + $0x50] sm:$0xff] %vm525_vm5, %v22535_v54 }
 0x20f   : > { %539 = vst.msk [vmem:[#allocation3 + $0x60] sm:$0xff] %vm525_vm5, %v22535_v54  ;;  %540 = vst.msk [vmem:[#allocation3 + $0x68] sm:$0xff] %vm525_vm5, %v22535_v54 }
 0x210   : > { %542 = vst.msk [vmem:[#allocation3 + $0x78] sm:$0xff] %vm525_vm5, %v22535_v54  ;;  %543 = vst.msk [vmem:[#allocation3 + $0x80] sm:$0xff] %vm525_vm5, %v22535_v54 }
 0x211   : > { %545 = vst.msk [vmem:[#allocation3 + $0x90] sm:$0xff] %vm525_vm5, %v22535_v54  ;;  %546 = vst.msk [vmem:[#allocation3 + $0x98] sm:$0xff] %vm525_vm5, %v22535_v54 }
 0x212   : > { %18239 = vmatmul.mubr.msk.bf16.gmra.mrb[28].mxu0 %vm469_vm1, %v2413_v24  ;;  %548 = vst.msk [vmem:[#allocation3 + $0xa8] sm:$0xff] %vm525_vm5, %v22535_v54  ;;  %549 = vst.msk [vmem:[#allocation3 + $0xb0] sm:$0xff] %vm525_vm5, %v22535_v54 }
 0x213   : > { %18244 = vmatprep.mubr.msk.bf16.mxu0 %vm469_vm1, %v26662_v6  ;;  %551 = vst.msk [vmem:[#allocation3 + $0xc0] sm:$0xff] %vm525_vm5, %v22535_v54  ;;  %552 = vst.msk [vmem:[#allocation3 + $0xc8] sm:$0xff] %vm525_vm5, %v22535_v54 }
 0x214   : > { %554 = vst.msk [vmem:[#allocation3 + $0xd8] sm:$0xff] %vm525_vm5, %v22535_v54  ;;  %555 = vst.msk [vmem:[#allocation3 + $0xe0] sm:$0xff] %vm525_vm5, %v22535_v54 }
 0x215   : > { %557 = vst.msk [vmem:[#allocation3 + $0xf0] sm:$0xff] %vm525_vm5, %v22535_v54  ;;  %558 = vst.msk [vmem:[#allocation3 + $0xf8] sm:$0xff] %vm525_vm5, %v22535_v54 }
 0x216   : > { %560 = vst.msk [vmem:[#allocation3 + $0x108] sm:$0xff] %vm525_vm5, %v22535_v54  ;;  %561 = vst.msk [vmem:[#allocation3 + $0x110] sm:$0xff] %vm525_vm5, %v22535_v54 }
 0x217   : > { %563 = vst.msk [vmem:[#allocation3 + $0x120] sm:$0xff] %vm525_vm5, %v22535_v54  ;;  %564 = vst.msk [vmem:[#allocation3 + $0x128] sm:$0xff] %vm525_vm5, %v22535_v54 }
 0x218   : > { %566 = vst.msk [vmem:[#allocation3 + $0x138] sm:$0xff] %vm525_vm5, %v22535_v54  ;;  %567 = vst.msk [vmem:[#allocation3 + $0x140] sm:$0xff] %vm525_vm5, %v22535_v54 }
 0x219   : > { %569 = vst.msk [vmem:[#allocation3 + $0x150] sm:$0xff] %vm525_vm5, %v22535_v54  ;;  %570 = vst.msk [vmem:[#allocation3 + $0x158] sm:$0xff] %vm525_vm5, %v22535_v54 }
 0x21a   : > { %572 = vst.msk [vmem:[#allocation3 + $0x168] sm:$0xff] %vm525_vm5, %v22535_v54  ;;  %573 = vst.msk [vmem:[#allocation3 + $0x170] sm:$0xff] %vm525_vm5, %v22535_v54  ;;  %18245 = vmatmul.mubr.msk.bf16.vlgmr.msra.gmra.mrb[0].mxu0 %vm469_vm1, %v26663_v26 }
 0x21b   : > { %575 = vst.msk [vmem:[#allocation3 + $0x180] sm:$0xff] %vm525_vm5, %v22535_v54  ;;  %576 = vst.msk [vmem:[#allocation3 + $0x188] sm:$0xff] %vm525_vm5, %v22535_v54  ;;  %18277 = vmatpush3.bf16.msra.mxu0 %v2841_v50  ;;  %18248 = vmatprep.mubr.msk.bf16.mxu0 %vm469_vm1, %v26664_v11 }
 0x21c   : > { %578 = vst.msk [vmem:[#allocation3 + $0x198] sm:$0xff] %vm525_vm5, %v22535_v54  ;;  %579 = vst.msk [vmem:[#allocation3 + $0x1a0] sm:$0xff] %vm525_vm5, %v22535_v54 }
 0x21d   : > { %581 = vst.msk [vmem:[#allocation4] sm:$0xff] %vm525_vm5, %v22535_v54  ;;  %583 = vst.msk [vmem:[#allocation4 + $0x10] sm:$0xff] %vm525_vm5, %v22535_v54 }
 0x21e   : > { %585 = vst.msk [vmem:[#allocation4 + $0x20] sm:$0xff] %vm525_vm5, %v22535_v54  ;;  %587 = vst.msk [vmem:[#allocation4 + $0x30] sm:$0xff] %vm525_vm5, %v22535_v54 }
 0x21f   : > { %589 = vst.msk [vmem:[#allocation4 + $0x40] sm:$0xff] %vm525_vm5, %v22535_v54  ;;  %591 = vst.msk [vmem:[#allocation4 + $0x50] sm:$0xff] %vm525_vm5, %v22535_v54 }
 0x220   : > { %593 = vst.msk [vmem:[#allocation4 + $0x60] sm:$0xff] %vm525_vm5, %v22535_v54  ;;  %595 = vst.msk [vmem:[#allocation4 + $0x70] sm:$0xff] %vm525_vm5, %v22535_v54 }
 0x221   : > { %597 = vst.msk [vmem:[#allocation4 + $0x80] sm:$0xff] %vm525_vm5, %v22535_v54  ;;  %599 = vst.msk [vmem:[#allocation4 + $0x90] sm:$0xff] %vm525_vm5, %v22535_v54 }
 0x222   : > { %18249 = vmatmul.mubr.msk.bf16.gmra.mrb[4].mxu0 %vm469_vm1, %v26665_v16  ;;  %535 = vst.msk [vmem:[#allocation3 + $0x40] sm:$0x3] %vm528_vm6, %v22535_v54  ;;  %529 = vst.msk [vmem:[#allocation3 + $0x10] sm:$0x3] %vm528_vm6, %v22535_v54 }
 0x223   : > { %18252 = vmatprep.mubr.msk.bf16.mxu0 %vm469_vm1, %v26666_v43  ;;  %532 = vst.msk [vmem:[#allocation3 + $0x28] sm:$0x3] %vm528_vm6, %v22535_v54  ;;  %538 = vst.msk [vmem:[#allocation3 + $0x58] sm:$0x3] %vm528_vm6, %v22535_v54 }
 0x224   : > { %541 = vst.msk [vmem:[#allocation3 + $0x70] sm:$0x3] %vm528_vm6, %v22535_v54  ;;  %544 = vst.msk [vmem:[#allocation3 + $0x88] sm:$0x3] %vm528_vm6, %v22535_v54 }
 0x225   : > { %547 = vst.msk [vmem:[#allocation3 + $0xa0] sm:$0x3] %vm528_vm6, %v22535_v54  ;;  %550 = vst.msk [vmem:[#allocation3 + $0xb8] sm:$0x3] %vm528_vm6, %v22535_v54 }
 0x226   : > { %553 = vst.msk [vmem:[#allocation3 + $0xd0] sm:$0x3] %vm528_vm6, %v22535_v54  ;;  %556 = vst.msk [vmem:[#allocation3 + $0xe8] sm:$0x3] %vm528_vm6, %v22535_v54 }
 0x227   : > { %559 = vst.msk [vmem:[#allocation3 + $0x100] sm:$0x3] %vm528_vm6, %v22535_v54  ;;  %562 = vst.msk [vmem:[#allocation3 + $0x118] sm:$0x3] %vm528_vm6, %v22535_v54 }
 0x228   : > { %565 = vst.msk [vmem:[#allocation3 + $0x130] sm:$0x3] %vm528_vm6, %v22535_v54  ;;  %568 = vst.msk [vmem:[#allocation3 + $0x148] sm:$0x3] %vm528_vm6, %v22535_v54 }
 0x229   : > { %571 = vst.msk [vmem:[#allocation3 + $0x160] sm:$0x3] %vm528_vm6, %v22535_v54  ;;  %574 = vst.msk [vmem:[#allocation3 + $0x178] sm:$0x3] %vm528_vm6, %v22535_v54 }
 0x22a   : > { %18253 = vmatmul.mubr.msk.bf16.gmra.mrb[8].mxu0 %vm469_vm1, %v22080_v27  ;;  %v2618_v27 = vrot.slane %v22509_v12, 1  ;;  %577 = vst.msk [vmem:[#allocation3 + $0x190] sm:$0x3] %vm528_vm6, %v22535_v54  ;;  %580 = vst.msk [vmem:[#allocation3 + $0x1a8] sm:$0x3] %vm528_vm6, %v22535_v54 }
 0x22b   : > { %18256 = vmatprep.mubr.msk.bf16.mxu0 %vm469_vm1, %v22082_v55  ;;  %v2619_v55 = vrot.slane %v22511_v17, 1  ;;  %582 = vst.msk [vmem:[#allocation4 + $0x8] sm:$0x3] %vm528_vm6, %v22535_v54  ;;  %584 = vst.msk [vmem:[#allocation4 + $0x18] sm:$0x3] %vm528_vm6, %v22535_v54 }
 0x22c   : > { %586 = vst.msk [vmem:[#allocation4 + $0x28] sm:$0x3] %vm528_vm6, %v22535_v54  ;;  %588 = vst.msk [vmem:[#allocation4 + $0x38] sm:$0x3] %vm528_vm6, %v22535_v54 }
 0x22d   : > { %590 = vst.msk [vmem:[#allocation4 + $0x48] sm:$0x3] %vm528_vm6, %v22535_v54  ;;  %592 = vst.msk [vmem:[#allocation4 + $0x58] sm:$0x3] %vm528_vm6, %v22535_v54 }
 0x22e   : > { %594 = vst.msk [vmem:[#allocation4 + $0x68] sm:$0x3] %vm528_vm6, %v22535_v54  ;;  %596 = vst.msk [vmem:[#allocation4 + $0x78] sm:$0x3] %vm528_vm6, %v22535_v54 }
 0x22f   : > { %598 = vst.msk [vmem:[#allocation4 + $0x88] sm:$0x3] %vm528_vm6, %v22535_v54  ;;  %600 = vst.msk [vmem:[#allocation4 + $0x98] sm:$0x3] %vm528_vm6, %v22535_v54 }
 0x232   : > { %18257 = vmatmul.mubr.msk.bf16.gmra.mrb[12].mxu0 %vm469_vm1, %v22084_v0  ;;  %v2621_v0 = vrot.slane %v22517_v49, 1 }
 0x233   : > { %18260 = vmatprep.mubr.msk.bf16.mxu0 %vm469_vm1, %v22089_v29  ;;  %v2620_v29 = vsel %vm859_vm3, %v2618_v27, %v2619_v55 }
 0x23a   : > { %18261 = vmatmul.mubr.msk.bf16.gmra.mrb[16].mxu0 %vm469_vm1, %v22102_v7  ;;  %v2622_v7 = vsel %vm859_vm3, %v2619_v55, %v2621_v0 }
 0x23b   : > { %18264 = vmatprep.mubr.msk.bf16.mxu0 %vm469_vm1, %v22196_v62  ;;  %v2625_v62 = vpack.c.bf16 %v2622_v7, %v2620_v29 }
 0x242   : > { %18265 = vmatmul.mubr.msk.bf16.gmra.mrb[20].mxu0 %vm469_vm1, %v22241_v59 }
 0x243   : > { %18268 = vmatprep.mubr.msk.bf16.mxu0 %vm469_vm1, %v22245_v22  ;;  %v22782_v22 = vld [vmem:[%s26515_s3] sm:$0xff]  }
 0x24a   : > { %18269 = vmatmul.mubr.msk.bf16.gmra.mrb[24].mxu0 %vm469_vm1, %v22266_v14 }
 0x24b   : > { %18272 = vmatprep.mubr.msk.bf16.mxu0 %vm469_vm1, %v22434_v15 }
 0x252   : > { %18273 = vmatmul.mubr.msk.bf16.gmra.mrb[28].mxu0 %vm469_vm1, %v2625_v62 }
 0x253   : > { %18278 = vmatprep.mubr.msk.bf16.mxu0 %vm469_vm1, %v22138_v40  ;;  %v21081_v40 = vld [vmem:[%s26515_s3 + $0x20] sm:$0xff]  }
 0x254   : > { %18310 = vmatprep.subr.bf16.mxu0 %v21081_v40  ;;  %19902 = vmatprep.subr.bf16.mxu1 %v21081_v40 }
 0x255   : > { %19906 = vmatpush3.bf16.msra.mxu1 %v21081_v40 }
 0x25a   : > { %18279 = vmatmul.mubr.msk.bf16.vlgmr.msra.gmra.mrb[0].mxu0 %vm469_vm1, %v22143_v2  ;;  %v21082_v2 = vld [vmem:[%s26515_s3 + $0x28] sm:$0xff]  }
 0x25b   : > { %18282 = vmatprep.mubr.msk.bf16.mxu0 %vm469_vm1, %v22148_v63  ;;  %18311 = vmatpush3.bf16.msra.mxu0 %v21081_v40  ;;  %v21083_v63 = vld [vmem:[%s26515_s3 + $0x30] sm:$0xff]  }
 0x25c   : > { %18312 = vmatprep.subr.bf16.mxu0 %v21082_v2  ;;  %19903 = vmatprep.subr.bf16.mxu1 %v21082_v2 }
 0x25d   : > { %19907 = vmatpush3.bf16.msra.mxu1 %v21082_v2 }
 0x25e   : > { %19904 = vmatprep.subr.bf16.mxu1 %v21083_v63 }
 0x25f   : > { %18313 = vmatpush3.bf16.msra.mxu0 %v21082_v2 }
 0x260   : > { %18314 = vmatprep.subr.bf16.mxu0 %v21083_v63 }
 0x261   : > { %19908 = vmatpush3.bf16.msra.mxu1 %v21083_v63 }
 0x262   : > { %18283 = vmatmul.mubr.msk.bf16.gmra.mrb[4].mxu0 %vm469_vm1, %v22157_v46  ;;  %v22764_v46 = vld [vmem:[#allocation3] sm:$0xff] }
 0x263   : > { %18286 = vmatprep.mubr.msk.bf16.mxu0 %vm469_vm1, %v22162_v9  ;;  %18315 = vmatpush3.bf16.msra.mxu0 %v21083_v63  ;;  %v22766_v9 = vld [vmem:[#allocation3 + $0x8] sm:$0xff] }
 0x26a   : > { %18287 = vmatmul.mubr.msk.bf16.gmra.mrb[8].mxu0 %vm469_vm1, %v22175_v30  ;;  %v22768_v30 = vld [vmem:[#allocation3 + $0x10] sm:$0x3] }
 0x26b   : > { %18290 = vmatprep.mubr.msk.bf16.mxu0 %vm469_vm1, %v22184_v44  ;;  %v21084_v44 = vld [vmem:[%s26515_s3 + $0x38] sm:$0xff]  }
 0x26c   : > { %18316 = vmatprep.subr.bf16.mxu0 %v21084_v44  ;;  %19905 = vmatprep.subr.bf16.mxu1 %v21084_v44 }
 0x26d   : > { %18317 = vmatpush3.bf16.msra.mxu0 %v21084_v44  ;;  %19909 = vmatpush3.bf16.msra.mxu1 %v21084_v44 }
 0x26e   : > { %18350 = vmatprep.subr.bf16.mxu1 %v22782_v22 }
 0x272   : > { %18291 = vmatmul.mubr.msk.bf16.gmra.mrb[12].mxu0 %vm469_vm1, %v22189_v56  ;;  %v3266_v56 = vrot.slane %v22764_v46, 1 }
 0x273   : > { %18294 = vmatprep.mubr.msk.bf16.mxu0 %vm469_vm1, %v22198_v23  ;;  %v3267_v23 = vrot.slane %v22766_v9, 1 }
 0x27a   : > { %18295 = vmatmul.mubr.msk.bf16.gmra.mrb[16].mxu0 %vm469_vm1, %v22212_v36  ;;  %v3269_v36 = vrot.slane %v22768_v30, 1 }
 0x27b   : > { %18298 = vmatprep.mubr.msk.bf16.mxu0 %vm469_vm1, %v22237_v58  ;;  %v3268_v58 = vsel %vm859_vm3, %v3266_v56, %v3267_v23 }
 0x27c   : > { %v3270_v59 = vsel %vm859_vm3, %v3267_v23, %v3269_v36 }
 0x282   : > { %18299 = vmatmul.mubr.msk.bf16.gmra.mrb[20].mxu0 %vm469_vm1, %v22243_v1  ;;  %v3378_v1 = vpack.c.bf16 %v3270_v59, %v3268_v58 }
 0x283   : > { %18302 = vmatprep.mubr.msk.bf16.mxu0 %vm469_vm1, %v22262_v42  ;;  %v22788_v42 = vld [vmem:[%s26514_s2] ss:$0 sm:$0xff] }
 0x28a   : > { %18303 = vmatmul.mubr.msk.bf16.gmra.mrb[24].mxu0 %vm469_vm1, %v22268_v60 }
 0x28b   : > { %18306 = vmatprep.mubr.msk.bf16.mxu0 %vm469_vm1, %v22393_v13 }
 0x292   : > { %18307 = vmatmul.mubr.msk.bf16.gmra.mrb[28].mxu0 %vm469_vm1, %v2834_v25 }
 0x293   : > { %18318 = vmatprep.mubr.msk.bf16.mxu0 %vm525_vm5, %v3378_v1 }
 0x32d   : > { %v18280_v14 = vpop.f32.mrb[0].mxu0 }
 0x32e   : > { %v3045_v60 = vadd.f32 %v18280_v14, %v22788_v42  ;;  %v2877_v57 = vpop.f32.mrb[1].mxu0 }
 0x32f   : > { %v3043_v31 = vadd.f32 %v22788_v42, %v2877_v57  ;;  %v18281_v39 = vpop.f32.mrb[2].mxu0 }
 0x330   : > { %v3077_v41 = vmax.f32 %v3045_v60, 0.0  ;;  %v3046_v3 = vadd.f32 %v18281_v39, %v22788_v42  ;;  %v2880_v45 = vpop.f32.mrb[3].mxu0 }
 0x331   : > { %v3075_v10 = vmax.f32 %v3043_v31, 0.0  ;;  %v3044_v61 = vadd.f32 %v22788_v42, %v2880_v45 }
 0x332   : > { %3110 = vst.msk [vmem:[#allocation3 + $0x31] sm:$0xff] %vm525_vm5, %v3077_v41  ;;  %v3078_v20 = vmax.f32 %v3046_v3, 0.0 }
 0x333   : > { %3108 = vst.msk [vmem:[#allocation3 + $0x19] sm:$0xff] %vm525_vm5, %v3075_v10  ;;  %v3076_v51 = vmax.f32 %v3044_v61, 0.0 }
 0x334   : > { %3111 = vst.msk [vmem:[#allocation3 + $0x39] sm:$0xff] %vm525_vm5, %v3078_v20 }
 0x335   : > { %3109 = vst.msk [vmem:[#allocation3 + $0x21] sm:$0xff] %vm525_vm5, %v3076_v51  ;;  %v18284_v13 = vpop.f32.mrb[4].mxu0 }
 0x336   : > { %v3049_v47 = vadd.f32 %v18284_v13, %v22788_v42  ;;  %v2893_v53 = vpop.f32.mrb[5].mxu0 }
 0x337   : > { %v3047_v21 = vadd.f32 %v22788_v42, %v2893_v53  ;;  %v18285_v6 = vpop.f32.mrb[6].mxu0 }
 0x338   : > { %v3081_v26 = vmax.f32 %v3049_v47, 0.0  ;;  %v3050_v11 = vadd.f32 %v18285_v6, %v22788_v42  ;;  %v2896_v16 = vpop.f32.mrb[7].mxu0 }
 0x339   : > { %v3079_v43 = vmax.f32 %v3047_v21, 0.0  ;;  %v3048_v38 = vadd.f32 %v22788_v42, %v2896_v16  ;;  %v22802_v4 = vld [vmem:[#allocation3 + $0x30] sm:$0xff] }
 0x33a   : > { %3114 = vst.msk [vmem:[#allocation3 + $0x61] sm:$0xff] %vm525_vm5, %v3081_v26  ;;  %v3082_v33 = vmax.f32 %v3050_v11, 0.0  ;;  %v22805_v5 = vld [vmem:[#allocation3 + $0x18] sm:$0xff]  ;;  %v3276_v35 = vrot.slane %v22802_v4, 1 }
 0x33b   : > { %3112 = vst.msk [vmem:[#allocation3 + $0x49] sm:$0xff] %vm525_vm5, %v3079_v43  ;;  %v3080_v8 = vmax.f32 %v3048_v38, 0.0  ;;  %v22808_v15 = vld [vmem:[#allocation3 + $0x38] sm:$0xff]  ;;  %v22810_v32 = vld [vmem:[#allocation3 + $0x40] sm:$0x3]  ;;  %v3271_v18 = vrot.slane %v22805_v5, 1 }
 0x33c   : > { %3115 = vst.msk [vmem:[#allocation3 + $0x69] sm:$0xff] %vm525_vm5, %v3082_v33  ;;  %v22813_v34 = vld [vmem:[#allocation3 + $0x20] sm:$0xff]  ;;  %v22815_v19 = vld [vmem:[#allocation3 + $0x28] sm:$0x3]  ;;  %v3277_v12 = vrot.slane %v22808_v15, 1  ;;  %v3279_v17 = vrot.slane %v22810_v32, 1 }
 0x33d   : > { %3113 = vst.msk [vmem:[#allocation3 + $0x51] sm:$0xff] %vm525_vm5, %v3080_v8  ;;  %v18288_v28 = vpop.f32.mrb[8].mxu0  ;;  %v3272_v49 = vrot.slane %v22813_v34, 1  ;;  %v3274_v37 = vrot.slane %v22815_v19, 1 }
 0x33e   : > { %v3053_v52 = vadd.f32 %v18288_v28, %v22788_v42  ;;  %v2909_v48 = vpop.f32.mrb[9].mxu0  ;;  %v3278_v24 = vsel %vm859_vm3, %v3276_v35, %v3277_v12  ;;  %v3280_v25 = vsel %vm859_vm3, %v3277_v12, %v3279_v17 }
 0x33f   : > { %v3051_v54 = vadd.f32 %v22788_v42, %v2909_v48  ;;  %v18289_v50 = vpop.f32.mrb[10].mxu0  ;;  %v3273_v27 = vsel %vm859_vm3, %v3271_v18, %v3272_v49  ;;  %v3275_v55 = vsel %vm859_vm3, %v3272_v49, %v3274_v37  ;;  %v22834_v63 = vpack.c.bf16 %v3280_v25, %v3278_v24 }
 0x340   : > { %v3085_v0 = vmax.f32 %v3053_v52, 0.0  ;;  %v3054_v29 = vadd.f32 %v18289_v50, %v22788_v42  ;;  %v2912_v7 = vpop.f32.mrb[11].mxu0  ;;  %v22831_v62 = vpack.c.bf16 %v3275_v55, %v3273_v27 }
 0x341   : > { %v3083_v40 = vmax.f32 %v3051_v54, 0.0  ;;  %v3052_v2 = vadd.f32 %v22788_v42, %v2912_v7  ;;  %26668 = vst [vmem:[#allocation8_spill] sm:$0xff] %v22834_v63  ;;  %v22836_v44 = vld [vmem:[#allocation3 + $0x60] sm:$0xff] }
 0x342   : > { %26667 = vst [vmem:[#allocation23_spill] sm:$0xff] %v22831_v62  ;;  %3118 = vst.msk [vmem:[#allocation3 + $0x91] sm:$0xff] %vm525_vm5, %v3085_v0  ;;  %v3086_v56 = vmax.f32 %v3054_v29, 0.0  ;;  %18319 = vmatmul.mubr.msk.bf16.vlgmr.msra.gmra.mrb[32].mxu0 %vm525_vm5, %v22831_v62  ;;  %v22841_v23 = vld [vmem:[#allocation3 + $0x48] sm:$0xff]  ;;  %v3286_v60 = vrot.slane %v22836_v44, 1  ;;  %v3870_v62 = vrot.slane %v22766_v9, 2 }
 0x343   : > { %3116 = vst.msk [vmem:[#allocation3 + $0x79] sm:$0xff] %vm525_vm5, %v3083_v40  ;;  %v3084_v36 = vmax.f32 %v3052_v2, 0.0  ;;  %18322 = vmatprep.mubr.msk.bf16.mxu0 %vm525_vm5, %v22834_v63  ;;  %v22846_v58 = vld [vmem:[#allocation3 + $0x68] sm:$0xff]  ;;  %v22848_v59 = vld [vmem:[#allocation3 + $0x70] sm:$0x3]  ;;  %v3281_v41 = vrot.slane %v22841_v23, 1 }
 0x344   : > { %3119 = vst.msk [vmem:[#allocation3 + $0x99] sm:$0xff] %vm525_vm5, %v3086_v56  ;;  %v22851_v1 = vld [vmem:[#allocation3 + $0x50] sm:$0xff]  ;;  %v22853_v14 = vld [vmem:[#allocation3 + $0x58] sm:$0x3]  ;;  %v3287_v57 = vrot.slane %v22846_v58, 1  ;;  %v3289_v31 = vrot.slane %v22848_v59, 1 }
 0x345   : > { %3117 = vst.msk [vmem:[#allocation3 + $0x81] sm:$0xff] %vm525_vm5, %v3084_v36  ;;  %v18292_v39 = vpop.f32.mrb[12].mxu0  ;;  %v3282_v3 = vrot.slane %v22851_v1, 1  ;;  %v3284_v45 = vrot.slane %v22853_v14, 1  ;;  %v3869_v63 = vrot.slane %v22764_v46, 2 }
 0x346   : > { %v3057_v10 = vadd.f32 %v18292_v39, %v22788_v42  ;;  %v2925_v61 = vpop.f32.mrb[13].mxu0  ;;  %v3288_v20 = vsel %vm859_vm3, %v3286_v60, %v3287_v57  ;;  %v3290_v51 = vsel %vm859_vm3, %v3287_v57, %v3289_v31 }
 0x347   : > { %v3055_v13 = vadd.f32 %v22788_v42, %v2925_v61  ;;  %v18293_v47 = vpop.f32.mrb[14].mxu0  ;;  %v3283_v53 = vsel %vm859_vm3, %v3281_v41, %v3282_v3  ;;  %v3285_v21 = vsel %vm859_vm3, %v3282_v3, %v3284_v45  ;;  %v22872_v33 = vpack.c.bf16 %v3290_v51, %v3288_v20 }
 0x348   : > { %v3089_v6 = vmax.f32 %v3057_v10, 0.0  ;;  %v3058_v26 = vadd.f32 %v18293_v47, %v22788_v42  ;;  %v2928_v11 = vpop.f32.mrb[15].mxu0  ;;  %v22869_v16 = vpack.c.bf16 %v3285_v21, %v3283_v53 }
 0x349   : > { %v3087_v43 = vmax.f32 %v3055_v13, 0.0  ;;  %v3056_v38 = vadd.f32 %v22788_v42, %v2928_v11  ;;  %26670 = vst [vmem:[#allocation11_spill] sm:$0xff] %v22872_v33  ;;  %v22874_v8 = vld [vmem:[#allocation3 + $0x90] sm:$0xff] }
 0x34a   : > { %26669 = vst [vmem:[#allocation7_spill] sm:$0xff] %v22869_v16  ;;  %3122 = vst.msk [vmem:[#allocation3 + $0xc1] sm:$0xff] %vm525_vm5, %v3089_v6  ;;  %v3090_v35 = vmax.f32 %v3058_v26, 0.0  ;;  %18323 = vmatmul.mubr.msk.bf16.gmra.mrb[36].mxu0 %vm525_vm5, %v22869_v16  ;;  %v22879_v12 = vld [vmem:[#allocation3 + $0x78] sm:$0xff]  ;;  %v3296_v52 = vrot.slane %v22874_v8, 1 }
 0x34b   : > { %3120 = vst.msk [vmem:[#allocation3 + $0xa9] sm:$0xff] %vm525_vm5, %v3087_v43  ;;  %v3088_v17 = vmax.f32 %v3056_v38, 0.0  ;;  %18326 = vmatprep.mubr.msk.bf16.mxu0 %vm525_vm5, %v22872_v33  ;;  %v22884_v28 = vld [vmem:[#allocation3 + $0x98] sm:$0xff]  ;;  %v22886_v18 = vld [vmem:[#allocation3 + $0xa0] sm:$0x3]  ;;  %v3291_v54 = vrot.slane %v22879_v12, 1 }
 0x34c   : > { %3123 = vst.msk [vmem:[#allocation3 + $0xc9] sm:$0xff] %vm525_vm5, %v3090_v35  ;;  %v22889_v49 = vld [vmem:[#allocation3 + $0x80] sm:$0xff]  ;;  %v22891_v37 = vld [vmem:[#allocation3 + $0x88] sm:$0x3]  ;;  %v3297_v48 = vrot.slane %v22884_v28, 1  ;;  %v3299_v24 = vrot.slane %v22886_v18, 1 }
 0x34d   : > { %3121 = vst.msk [vmem:[#allocation3 + $0xb1] sm:$0xff] %vm525_vm5, %v3088_v17  ;;  %v18296_v25 = vpop.f32.mrb[16].mxu0  ;;  %v3292_v50 = vrot.slane %v22889_v49, 1  ;;  %v3294_v27 = vrot.slane %v22891_v37, 1 }
 0x34e   : > { %v3061_v55 = vadd.f32 %v18296_v25, %v22788_v42  ;;  %v2941_v0 = vpop.f32.mrb[17].mxu0  ;;  %v3298_v29 = vsel %vm859_vm3, %v3296_v52, %v3297_v48  ;;  %v3300_v7 = vsel %vm859_vm3, %v3297_v48, %v3299_v24 }
 0x34f   : > { %v3059_v40 = vadd.f32 %v22788_v42, %v2941_v0  ;;  %v18297_v2 = vpop.f32.mrb[18].mxu0  ;;  %v3293_v56 = vsel %vm859_vm3, %v3291_v54, %v3292_v50  ;;  %v3295_v36 = vsel %vm859_vm3, %v3292_v50, %v3294_v27  ;;  %v22910_v45 = vpack.c.bf16 %v3300_v7, %v3298_v29 }
 0x350   : > { %v3093_v60 = vmax.f32 %v3061_v55, 0.0  ;;  %v3062_v57 = vadd.f32 %v18297_v2, %v22788_v42  ;;  %v2944_v31 = vpop.f32.mrb[19].mxu0  ;;  %v22907_v39 = vpack.c.bf16 %v3295_v36, %v3293_v56 }
 0x351   : > { %v3091_v41 = vmax.f32 %v3059_v40, 0.0  ;;  %v3060_v3 = vadd.f32 %v22788_v42, %v2944_v31  ;;  %26672 = vst [vmem:[#allocation19_spill] sm:$0xff] %v22910_v45  ;;  %v22912_v10 = vld [vmem:[#allocation3 + $0xc0] sm:$0xff] }
 0x352   : > { %26671 = vst [vmem:[#allocation15_spill] sm:$0xff] %v22907_v39  ;;  %3126 = vst.msk [vmem:[#allocation3 + $0xf1] sm:$0xff] %vm525_vm5, %v3093_v60  ;;  %v3094_v61 = vmax.f32 %v3062_v57, 0.0  ;;  %18327 = vmatmul.mubr.msk.bf16.gmra.mrb[40].mxu0 %vm525_vm5, %v22907_v39  ;;  %v22917_v20 = vld [vmem:[#allocation3 + $0xa8] sm:$0xff]  ;;  %v3306_v53 = vrot.slane %v22912_v10, 1 }
 0x353   : > { %3124 = vst.msk [vmem:[#allocation3 + $0xd9] sm:$0xff] %vm525_vm5, %v3091_v41  ;;  %v3092_v51 = vmax.f32 %v3060_v3, 0.0  ;;  %18330 = vmatprep.mubr.msk.bf16.mxu0 %vm525_vm5, %v22910_v45  ;;  %v22922_v13 = vld [vmem:[#allocation3 + $0xc8] sm:$0xff]  ;;  %v22924_v47 = vld [vmem:[#allocation3 + $0xd0] sm:$0x3]  ;;  %v3301_v38 = vrot.slane %v22917_v20, 1 }
 0x354   : > { %3127 = vst.msk [vmem:[#allocation3 + $0xf9] sm:$0xff] %vm525_vm5, %v3094_v61  ;;  %v3307_v21 = vrot.slane %v22922_v13, 1  ;;  %v3309_v6 = vrot.slane %v22924_v47, 1  ;;  %v22930_v26 = vld [vmem:[#allocation3 + $0xb0] sm:$0xff]  ;;  %v22932_v11 = vld [vmem:[#allocation3 + $0xb8] sm:$0x3] }
 0x355   : > { %3125 = vst.msk [vmem:[#allocation3 + $0xe1] sm:$0xff] %vm525_vm5, %v3092_v51  ;;  %v18300_v43 = vpop.f32.mrb[20].mxu0  ;;  %v3302_v35 = vrot.slane %v22930_v26, 1  ;;  %v3304_v17 = vrot.slane %v22932_v11, 1 }
 0x356   : > { %v3065_v52 = vadd.f32 %v18300_v43, %v22788_v42  ;;  %v2957_v48 = vpop.f32.mrb[21].mxu0  ;;  %v3308_v24 = vsel %vm859_vm3, %v3306_v53, %v3307_v21  ;;  %v3310_v25 = vsel %vm859_vm3, %v3307_v21, %v3309_v6 }
 0x357   : > { %v3063_v54 = vadd.f32 %v22788_v42, %v2957_v48  ;;  %v18301_v50 = vpop.f32.mrb[22].mxu0  ;;  %v22942_v27 = vpack.c.bf16 %v3310_v25, %v3308_v24  ;;  %v3303_v55 = vsel %vm859_vm3, %v3301_v38, %v3302_v35  ;;  %v3305_v0 = vsel %vm859_vm3, %v3302_v35, %v3304_v17 }
 0x358   : > { %v3097_v29 = vmax.f32 %v3065_v52, 0.0  ;;  %v3066_v7 = vadd.f32 %v18301_v50, %v22788_v42  ;;  %v2960_v40 = vpop.f32.mrb[23].mxu0  ;;  %v22947_v2 = vpack.c.bf16 %v3305_v0, %v3303_v55 }
 0x359   : > { %26673 = vst [vmem:[#allocation20_spill] sm:$0xff] %v22942_v27  ;;  %v3095_v56 = vmax.f32 %v3063_v54, 0.0  ;;  %v3064_v36 = vadd.f32 %v22788_v42, %v2960_v40  ;;  %18334 = vmatprep.mubr.msk.bf16.mxu1 %vm525_vm5, %v22942_v27  ;;  %v22952_v60 = vld [vmem:[#allocation3 + $0xf0] sm:$0xff] }
 0x35a   : > { %26674 = vst [vmem:[#allocation21_spill] sm:$0xff] %v22947_v2  ;;  %3130 = vst.msk [vmem:[#allocation3 + $0x121] sm:$0xff] %vm525_vm5, %v3097_v29  ;;  %v3098_v57 = vmax.f32 %v3066_v7, 0.0  ;;  %18331 = vmatmul.mubr.msk.bf16.gmra.mrb[44].mxu0 %vm525_vm5, %v22947_v2  ;;  %v22957_v31 = vld [vmem:[#allocation3 + $0xd8] sm:$0xff]  ;;  %v3316_v21 = vrot.slane %v22952_v60, 1 }
 0x35b   : > { %3128 = vst.msk [vmem:[#allocation3 + $0x109] sm:$0xff] %vm525_vm5, %v3095_v56  ;;  %v3096_v41 = vmax.f32 %v3064_v36, 0.0  ;;  %v22960_v3 = vld [vmem:[#allocation3 + $0xf8] sm:$0xff]  ;;  %v22962_v61 = vld [vmem:[#allocation3 + $0x100] sm:$0x3]  ;;  %v3311_v35 = vrot.slane %v22957_v31, 1 }
 0x35c   : > { %3131 = vst.msk [vmem:[#allocation3 + $0x129] sm:$0xff] %vm525_vm5, %v3098_v57  ;;  %v22965_v51 = vld [vmem:[#allocation3 + $0xe0] sm:$0xff]  ;;  %v22967_v53 = vld [vmem:[#allocation3 + $0xe8] sm:$0x3]  ;;  %v3317_v6 = vrot.slane %v22960_v3, 1  ;;  %v3319_v43 = vrot.slane %v22962_v61, 1 }
 0x35d   : > { %3129 = vst.msk [vmem:[#allocation3 + $0x111] sm:$0xff] %vm525_vm5, %v3096_v41  ;;  %v18304_v38 = vpop.f32.mrb[24].mxu0  ;;  %v3312_v17 = vrot.slane %v22965_v51, 1  ;;  %v3314_v52 = vrot.slane %v22967_v53, 1  ;;  %v21086_v57 = vld [vmem:[%s26515_s3 + $0x8] sm:$0xff]  }
 0x35e   : > { %v3069_v48 = vadd.f32 %v18304_v38, %v22788_v42  ;;  %v2973_v24 = vpop.f32.mrb[25].mxu0  ;;  %v3318_v25 = vsel %vm859_vm3, %v3316_v21, %v3317_v6  ;;  %v3320_v54 = vsel %vm859_vm3, %v3317_v6, %v3319_v43 }
 0x35f   : > { %v3067_v50 = vadd.f32 %v22788_v42, %v2973_v24  ;;  %v18305_v55 = vpop.f32.mrb[26].mxu0  ;;  %v3313_v0 = vsel %vm859_vm3, %v3311_v35, %v3312_v17  ;;  %v3315_v29 = vsel %vm859_vm3, %v3312_v17, %v3314_v52  ;;  %v22989_v6 = vpack.c.bf16 %v3320_v54, %v3318_v25  ;;  %v21087_v24 = vld [vmem:[%s26515_s3 + $0x10] sm:$0xff]  }
 0x360   : > { %v3101_v7 = vmax.f32 %v3069_v48, 0.0  ;;  %v3070_v40 = vadd.f32 %v18305_v55, %v22788_v42  ;;  %v2976_v56 = vpop.f32.mrb[27].mxu0  ;;  %v22983_v36 = vpack.c.bf16 %v3315_v29, %v3313_v0 }
 0x361   : > { %v3099_v41 = vmax.f32 %v3067_v50, 0.0  ;;  %v3068_v21 = vadd.f32 %v22788_v42, %v2976_v56  ;;  %26676 = vst [vmem:[#allocation24_spill] sm:$0xff] %v22989_v6  ;;  %v22991_v43 = vld [vmem:[#allocation3 + $0x120] sm:$0xff] }
 0x362   : > { %26675 = vst [vmem:[#allocation22_spill] sm:$0xff] %v22983_v36  ;;  %3134 = vst.msk [vmem:[#allocation3 + $0x151] sm:$0xff] %vm525_vm5, %v3101_v7  ;;  %v3102_v38 = vmax.f32 %v3070_v40, 0.0  ;;  %18335 = vmatmul.mubr.msk.bf16.vlgmr.msra.gmra.mrb[0].mxu1 %vm525_vm5, %v22983_v36  ;;  %v22996_v35 = vld [vmem:[#allocation3 + $0x108] sm:$0xff]  ;;  %v3326_v50 = vrot.slane %v22991_v43, 1 }
 0x363   : > { %3132 = vst.msk [vmem:[#allocation3 + $0x139] sm:$0xff] %vm525_vm5, %v3099_v41  ;;  %v3100_v17 = vmax.f32 %v3068_v21, 0.0  ;;  %18338 = vmatprep.mubr.msk.bf16.mxu1 %vm525_vm5, %v22989_v6  ;;  %18351 = vmatpush3.bf16.msra.mxu1 %v22782_v22  ;;  %v23002_v52 = vld [vmem:[#allocation3 + $0x128] sm:$0xff]  ;;  %v23004_v48 = vld [vmem:[#allocation3 + $0x130] sm:$0x3]  ;;  %v3321_v29 = vrot.slane %v22996_v35, 1 }
 0x364   : > { %3135 = vst.msk [vmem:[#allocation3 + $0x159] sm:$0xff] %vm525_vm5, %v3102_v38  ;;  %v23010_v25 = vld [vmem:[#allocation3 + $0x110] sm:$0xff]  ;;  %v23012_v54 = vld [vmem:[#allocation3 + $0x118] sm:$0x3]  ;;  %18352 = vmatprep.subr.bf16.mxu1 %v21086_v57  ;;  %v3327_v55 = vrot.slane %v23002_v52, 1  ;;  %v3329_v22 = vrot.slane %v23004_v48, 1 }
 0x365   : > { %3133 = vst.msk [vmem:[#allocation3 + $0x141] sm:$0xff] %vm525_vm5, %v3100_v17  ;;  %v18308_v0 = vpop.f32.mrb[28].mxu0  ;;  %v3322_v7 = vrot.slane %v23010_v25, 1  ;;  %v3324_v40 = vrot.slane %v23012_v54, 1 }
 0x366   : > { %v3073_v56 = vadd.f32 %v18308_v0, %v22788_v42  ;;  %v2989_v41 = vpop.f32.mrb[29].mxu0  ;;  %v3328_v21 = vsel %vm859_vm3, %v3326_v50, %v3327_v55  ;;  %v3330_v38 = vsel %vm859_vm3, %v3327_v55, %v3329_v22  ;;  %v21088_v50 = vld [vmem:[%s26515_s3 + $0x18] sm:$0xff]  }
 0x367   : > { %v3071_v6 = vadd.f32 %v22788_v42, %v2989_v41  ;;  %v18309_v36 = vpop.f32.mrb[30].mxu0  ;;  %v3323_v27 = vsel %vm859_vm3, %v3321_v29, %v3322_v7  ;;  %v3325_v17 = vsel %vm859_vm3, %v3322_v7, %v3324_v40  ;;  %18353 = vmatpush3.bf16.msra.mxu1 %v21086_v57  ;;  %v23034_v0 = vpack.c.bf16 %v3330_v38, %v3328_v21 }
 0x368   : > { %v3105_v2 = vmax.f32 %v3073_v56, 0.0  ;;  %v3074_v45 = vadd.f32 %v18309_v36, %v22788_v42  ;;  %v2992_v39 = vpop.f32.mrb[31].mxu0  ;;  %v23028_v33 = vpack.c.bf16 %v3325_v17, %v3323_v27  ;;  %18354 = vmatprep.subr.bf16.mxu1 %v21087_v24 }
 0x369   : > { %v3103_v55 = vmax.f32 %v3071_v6, 0.0  ;;  %v3072_v22 = vadd.f32 %v22788_v42, %v2992_v39  ;;  %26678 = vst [vmem:[#allocation26_spill] sm:$0xff] %v23034_v0  ;;  %v23036_v29 = vld [vmem:[#allocation3 + $0x150] sm:$0xff] }
 0x36a   : > { %26677 = vst [vmem:[#allocation25_spill] sm:$0xff] %v23028_v33  ;;  %3138 = vst.msk [vmem:[#allocation3 + $0x181] sm:$0xff] %vm525_vm5, %v3105_v2  ;;  %v3106_v57 = vmax.f32 %v3074_v45, 0.0  ;;  %18339 = vmatmul.mubr.msk.bf16.gmra.mrb[4].mxu1 %vm525_vm5, %v23028_v33  ;;  %v23041_v27 = vld [vmem:[#allocation3 + $0x138] sm:$0xff]  ;;  %v21089_v39 = vld [vmem:[%s26515_s3 + $0x40] sm:$0xff]   ;;  %v3336_v7 = vrot.slane %v23036_v29, 1  ;;  %v23173_v33 = vpack.c.bf16 %v23002_v52, %v22991_v43 }
 0x36b   : > { %3136 = vst.msk [vmem:[#allocation3 + $0x169] sm:$0xff] %vm525_vm5, %v3103_v55  ;;  %v3104_v36 = vmax.f32 %v3072_v22, 0.0  ;;  %18342 = vmatprep.mubr.msk.bf16.mxu1 %vm525_vm5, %v23034_v0  ;;  %v23046_v6 = vld [vmem:[#allocation3 + $0x158] sm:$0xff]  ;;  %v23048_v42 = vld [vmem:[#allocation3 + $0x160] sm:$0x3]  ;;  %18355 = vmatpush3.bf16.msra.mxu1 %v21087_v24  ;;  %v3331_v24 = vrot.slane %v23041_v27, 1 }
 0x36c   : > { %3139 = vst.msk [vmem:[#allocation3 + $0x189] sm:$0xff] %vm525_vm5, %v3106_v57  ;;  %v23054_v45 = vld [vmem:[#allocation3 + $0x140] sm:$0xff]  ;;  %v23056_v2 = vld [vmem:[#allocation3 + $0x148] sm:$0x3]  ;;  %v3337_v40 = vrot.slane %v23046_v6, 1  ;;  %v3339_v56 = vrot.slane %v23048_v42, 1  ;;  %18356 = vmatprep.subr.bf16.mxu1 %v21088_v50 }
 0x36d   : > { %3137 = vst.msk [vmem:[#allocation3 + $0x171] sm:$0xff] %vm525_vm5, %v3104_v36  ;;  %v3332_v41 = vrot.slane %v23054_v45, 1  ;;  %v3334_v21 = vrot.slane %v23056_v2, 1  ;;  %26686 = vst [vmem:[#allocation14_spill] sm:$0xff] %v23173_v33  ;;  %v23181_v16 = vpack.c.bf16 %v23054_v45, %v23041_v27 }
 0x36e   : > { %v3338_v38 = vsel %vm859_vm3, %v3336_v7, %v3337_v40  ;;  %v3340_v17 = vsel %vm859_vm3, %v3337_v40, %v3339_v56 }
 0x36f   : > { %v3333_v55 = vsel %vm859_vm3, %v3331_v24, %v3332_v41  ;;  %v3335_v22 = vsel %vm859_vm3, %v3332_v41, %v3334_v21  ;;  %18357 = vmatpush3.bf16.msra.mxu1 %v21088_v50  ;;  %v23071_v0 = vpack.c.bf16 %v3340_v17, %v3338_v38  ;;  %v3194_v38 = vpack.c.bf16 %v22766_v9, %v22764_v46 }
 0x370   : > { %v23069_v57 = vpack.c.bf16 %v3335_v22, %v3333_v55  ;;  %18390 = vmatprep.subr.bf16.mxu1 %v21089_v39  ;;  %v23097_v55 = vpack.c.bf16 %v22813_v34, %v22805_v5  ;;  %v21090_v22 = vld [vmem:[%s26515_s3 + $0x48] sm:$0xff]   ;;  %26687 = vst [vmem:[#allocation16_spill] sm:$0xff] %v23181_v16  ;;  %v3875_v9 = vrot.slane %v22813_v34, 2 }
 0x371   : > { %26680 = vst [vmem:[#allocation28_spill] sm:$0xff] %v23071_v0 }
 0x372   : > { %26679 = vst [vmem:[#allocation27_spill] sm:$0xff] %v23069_v57  ;;  %18343 = vmatmul.mubr.msk.bf16.gmra.mrb[8].mxu1 %vm525_vm5, %v23069_v57  ;;  %v23075_v36 = vld [vmem:[#allocation3 + $0x168] sm:$0xff]  ;;  %v23169_v57 = vpack.c.bf16 %v23010_v25, %v22996_v35 }
 0x373   : > { %18346 = vmatprep.mubr.msk.bf16.mxu1 %vm525_vm5, %v23071_v0  ;;  %v3341_v56 = vrot.slane %v23075_v36, 1  ;;  %v23161_v0 = vpack.c.bf16 %v22960_v3, %v22952_v60 }
 0x374   : > { %v23079_v7 = vld [vmem:[#allocation3 + $0x170] sm:$0xff]  ;;  %v23081_v40 = vld [vmem:[#allocation3 + $0x178] sm:$0x3]  ;;  %26685 = vst [vmem:[#allocation13_spill] sm:$0xff] %v23169_v57 }
 0x375   : > { %v3342_v50 = vrot.slane %v23079_v7, 1  ;;  %v3344_v24 = vrot.slane %v23081_v40, 1  ;;  %26684 = vst [vmem:[#allocation12_spill] sm:$0xff] %v23161_v0  ;;  %v23198_v46 = vpack.c.bf16 %v23079_v7, %v23075_v36 }
 0x377   : > { %v3343_v41 = vsel %vm859_vm3, %v3341_v56, %v3342_v50  ;;  %v3345_v21 = vsel %vm859_vm3, %v3342_v50, %v3344_v24  ;;  %v23104_v56 = vpack.c.bf16 %v22808_v15, %v22802_v4  ;;  %v21091_v50 = vld [vmem:[%s26515_s3 + $0x50] sm:$0xff]   ;;  %v23115_v24 = vpack.c.bf16 %v22851_v1, %v22841_v23 }
 0x378   : > { %v23090_v17 = vpack.c.bf16 %v3345_v21, %v3343_v41  ;;  %v21092_v41 = vld [vmem:[%s26515_s3 + $0x58] sm:$0xff]   ;;  %v23122_v21 = vpack.c.bf16 %v22846_v58, %v22836_v44 }
 0x37a   : > { %26681 = vst [vmem:[#allocation29_spill] sm:$0xff] %v23090_v17  ;;  %18347 = vmatmul.mubr.msk.bf16.gmra.mrb[12].mxu1 %vm525_vm5, %v23090_v17  ;;  %v23157_v17 = vpack.c.bf16 %v22965_v51, %v22957_v31 }
 0x37b   : > { %18358 = vmatprep.mubr.msk.bf16.mxu1 %vm525_vm5, %v3194_v38  ;;  %v23133_v38 = vpack.c.bf16 %v22889_v49, %v22879_v12 }
 0x37c   : > { %26683 = vst [vmem:[#allocation9_spill] sm:$0xff] %v23157_v17 }
 0x382   : > { %18359 = vmatmul.mubr.msk.bf16.vlgmr.msra.gmra.mrb[16].mxu1 %vm525_vm5, %v23097_v55 }
 0x383   : > { %18362 = vmatprep.mubr.msk.bf16.mxu1 %vm525_vm5, %v23104_v56  ;;  %18391 = vmatpush3.bf16.msra.mxu1 %v21089_v39  ;;  %v21093_v39 = vld [vmem:[%s26515_s3 + $0x60] sm:$0xff]  }
 0x384   : > { %18392 = vmatprep.subr.bf16.mxu1 %v21090_v22 }
 0x387   : > { %18393 = vmatpush3.bf16.msra.mxu1 %v21090_v22  ;;  %v23137_v22 = vpack.c.bf16 %v22884_v28, %v22874_v8 }
 0x388   : > { %18394 = vmatprep.subr.bf16.mxu1 %v21091_v50 }
 0x38a   : > { %18363 = vmatmul.mubr.msk.bf16.gmra.mrb[20].mxu1 %vm525_vm5, %v23115_v24 }
 0x38b   : > { %18366 = vmatprep.mubr.msk.bf16.mxu1 %vm525_vm5, %v23122_v21  ;;  %18395 = vmatpush3.bf16.msra.mxu1 %v21091_v50  ;;  %v23145_v50 = vpack.c.bf16 %v22930_v26, %v22917_v20 }
 0x38c   : > { %18396 = vmatprep.subr.bf16.mxu1 %v21092_v41 }
 0x38f   : > { %18397 = vmatpush3.bf16.msra.mxu1 %v21092_v41  ;;  %v23149_v41 = vpack.c.bf16 %v22922_v13, %v22912_v10 }
 0x390   : > { %18430 = vmatprep.subr.bf16.mxu1 %v21093_v39 }
 0x391   : > { %26682 = vst [vmem:[#allocation10_spill] sm:$0xff] %v23149_v41 }
 0x392   : > { %18367 = vmatmul.mubr.msk.bf16.gmra.mrb[24].mxu1 %vm525_vm5, %v23133_v38 }
 0x393   : > { %18370 = vmatprep.mubr.msk.bf16.mxu1 %vm525_vm5, %v23137_v22 }
 0x39a   : > { %18371 = vmatmul.mubr.msk.bf16.gmra.mrb[28].mxu1 %vm525_vm5, %v23145_v50 }
 0x39b   : > { %18374 = vmatprep.mubr.msk.bf16.mxu1 %vm525_vm5, %v23149_v41 }
 0x3a2   : > { %18375 = vmatmul.mubr.msk.bf16.gmra.mrb[0].mxu1 %vm525_vm5, %v23157_v17  ;;  %v23188_v17 = vpack.c.bf16 %v23046_v6, %v23036_v29 }
 0x3a3   : > { %18378 = vmatprep.mubr.msk.bf16.mxu1 %vm525_vm5, %v23161_v0  ;;  %v3872_v0 = vrot.slane %v22768_v30, 2  ;;  %v3877_v30 = vrot.slane %v22815_v19, 2 }
 0x3a4   : > { %26688 = vst [vmem:[#allocation17_spill] sm:$0xff] %v23188_v17 }
 0x3aa   : > { %18379 = vmatmul.mubr.msk.bf16.gmra.mrb[4].mxu1 %vm525_vm5, %v23169_v57  ;;  %v3873_v57 = vsel %vm1415_vm4, %v3870_v62, %v3872_v0  ;;  %v3878_v0 = vsel %vm1415_vm4, %v3875_v9, %v3877_v30 }
 0x3ab   : > { %18382 = vmatprep.mubr.msk.bf16.mxu1 %vm525_vm5, %v23173_v33  ;;  %v3871_v33 = vsel %vm1415_vm4, %v3869_v63, %v3870_v62  ;;  %v3874_v62 = vrot.slane %v22805_v5, 2  ;;  %v3879_v63 = vrot.slane %v22802_v4, 2  ;;  %v3885_v5 = vrot.slane %v22851_v1, 2  ;;  %v21095_v1 = vld [vmem:[%s26515_s3 + $0x70] sm:$0xff]  }
 0x3ac   : > { %v3981_v41 = vpack.c.bf16 %v3873_v57, %v3871_v33  ;;  %v3887_v4 = vrot.slane %v22853_v14, 2 }
 0x3ad   : > { %v3876_v33 = vsel %vm1415_vm4, %v3874_v62, %v3875_v9  ;;  %v3892_v9 = vrot.slane %v22848_v59, 2 }
 0x3ae   : > { %v23213_v57 = vpack.c.bf16 %v3878_v0, %v3876_v33  ;;  %v3888_v30 = vsel %vm1415_vm4, %v3885_v5, %v3887_v4  ;;  %v3900_v33 = vrot.slane %v22884_v28, 2  ;;  %v3902_v0 = vrot.slane %v22886_v18, 2 }
 0x3af   : > { %v3907_v4 = vrot.slane %v22932_v11, 2 }
 0x3b2   : > { %18383 = vmatmul.mubr.msk.bf16.gmra.mrb[8].mxu1 %vm525_vm5, %v23181_v16  ;;  %v3880_v16 = vrot.slane %v22808_v15, 2  ;;  %v21094_v15 = vld [vmem:[%s26515_s3 + $0x68] sm:$0xff]  }
 0x3b3   : > { %18386 = vmatprep.mubr.msk.bf16.mxu1 %vm525_vm5, %v23188_v17  ;;  %v3882_v17 = vrot.slane %v22810_v32, 2 }
 0x3b4   : > { %v3881_v34 = vsel %vm1415_vm4, %v3879_v63, %v3880_v16  ;;  %v3897_v63 = vrot.slane %v22891_v37, 2 }
 0x3b5   : > { %v3883_v19 = vsel %vm1415_vm4, %v3880_v16, %v3882_v17  ;;  %v3884_v16 = vrot.slane %v22841_v23, 2  ;;  %v3889_v17 = vrot.slane %v22836_v44, 2  ;;  %v21096_v44 = vld [vmem:[%s26515_s3 + $0x78] sm:$0xff]  }
 0x3b6   : > { %v23218_v32 = vpack.c.bf16 %v3883_v19, %v3881_v34  ;;  %v3894_v34 = vrot.slane %v22879_v12, 2  ;;  %v3899_v19 = vrot.slane %v22874_v8, 2  ;;  %v3905_v12 = vrot.slane %v22930_v26, 2 }
 0x3b7   : > { %v3886_v14 = vsel %vm1415_vm4, %v3884_v16, %v3885_v5  ;;  %v3904_v16 = vrot.slane %v22917_v20, 2  ;;  %v3922_v20 = vrot.slane %v22962_v61, 2  ;;  %v3925_v61 = vrot.slane %v23010_v25, 2 }
 0x3b8   : > { %v23237_v62 = vpack.c.bf16 %v3888_v30, %v3886_v14  ;;  %v3901_v18 = vsel %vm1415_vm4, %v3899_v19, %v3900_v33  ;;  %v3908_v26 = vsel %vm1415_vm4, %v3905_v12, %v3907_v4  ;;  %v3929_v19 = vrot.slane %v22991_v43, 2 }
 0x3b9   : > { %v3940_v43 = vrot.slane %v23046_v6, 2  ;;  %v3939_v4 = vrot.slane %v23036_v29, 2  ;;  %v3944_v29 = vrot.slane %v23075_v36, 2  ;;  %v21099_v36 = vld [vmem:[%s26515_s3 + $0x90] sm:$0xff]  }
 0x3ba   : > { %18387 = vmatmul.mubr.msk.bf16.gmra.mrb[12].mxu1 %vm525_vm5, %v23198_v46 }
 0x3bb   : > { %18398 = vmatprep.mubr.msk.bf16.mxu1 %vm525_vm5, %v3981_v41  ;;  %v3890_v41 = vrot.slane %v22846_v58, 2 }
 0x3bd   : > { %v3891_v58 = vsel %vm1415_vm4, %v3889_v17, %v3890_v41  ;;  %v3893_v59 = vsel %vm1415_vm4, %v3890_v41, %v3892_v9  ;;  %v3910_v41 = vrot.slane %v22922_v13, 2  ;;  %v3912_v9 = vrot.slane %v22924_v47, 2 }
 0x3be   : > { %v23242_v23 = vpack.c.bf16 %v3893_v59, %v3891_v58  ;;  %v3909_v17 = vrot.slane %v22912_v10, 2  ;;  %v3915_v47 = vrot.slane %v22965_v51, 2  ;;  %v3917_v58 = vrot.slane %v22967_v53, 2 }
 0x3bf   : > { %v3913_v14 = vsel %vm1415_vm4, %v3910_v41, %v3912_v9  ;;  %v3920_v10 = vrot.slane %v22960_v3, 2  ;;  %v3914_v59 = vrot.slane %v22957_v31, 2  ;;  %v3932_v31 = vrot.slane %v23004_v48, 2 }
 0x3c0   : > { %v3911_v11 = vsel %vm1415_vm4, %v3909_v17, %v3910_v41  ;;  %v3918_v51 = vsel %vm1415_vm4, %v3915_v47, %v3917_v58  ;;  %v3935_v48 = vrot.slane %v23054_v45, 2  ;;  %v3947_v17 = vrot.slane %v23081_v40, 2  ;;  %v21100_v40 = vld [vmem:[%s26515_s3 + $0x98] sm:$0xff]   ;;  %v26689_v58 = vld [vmem:[#allocation10_spill] sm:$0xff] }
 0x3c1   : > { %v23284_v13 = vpack.c.bf16 %v3913_v14, %v3911_v11 }
 0x3c2   : > { %18399 = vmatmul.mubr.msk.bf16.vlgmr.msra.gmra.mrb[16].mxu1 %vm525_vm5, %v23213_v57 }
 0x3c3   : > { %18402 = vmatprep.mubr.msk.bf16.mxu1 %vm525_vm5, %v23218_v32  ;;  %18431 = vmatpush3.bf16.msra.mxu1 %v21093_v39  ;;  %v3895_v39 = vrot.slane %v22889_v49, 2  ;;  %v23257_v49 = vld [vmem:[%s26515_s3 + $0x80] sm:$0xff]  }
 0x3c4   : > { %18432 = vmatprep.subr.bf16.mxu1 %v21094_v15 }
 0x3c5   : > { %v3896_v37 = vsel %vm1415_vm4, %v3894_v34, %v3895_v39  ;;  %v3898_v28 = vsel %vm1415_vm4, %v3895_v39, %v3897_v63  ;;  %v3916_v39 = vsel %vm1415_vm4, %v3914_v59, %v3915_v47  ;;  %v3923_v63 = vsel %vm1415_vm4, %v3920_v10, %v3922_v20 }
 0x3c6   : > { %v23263_v5 = vpack.c.bf16 %v3898_v28, %v3896_v37  ;;  %v3924_v34 = vrot.slane %v22996_v35, 2  ;;  %v3942_v35 = vrot.slane %v23048_v42, 2  ;;  %v3945_v42 = vrot.slane %v23079_v7, 2  ;;  %v21098_v7 = vld [vmem:[%s26515_s3 + $0x88] sm:$0xff]  }
 0x3c7   : > { %18433 = vmatpush3.bf16.msra.mxu1 %v21094_v15  ;;  %v3903_v15 = vsel %vm1415_vm4, %v3900_v33, %v3902_v0  ;;  %v23300_v33 = vpack.c.bf16 %v3918_v51, %v3916_v39  ;;  %v3927_v0 = vrot.slane %v23012_v54, 2  ;;  %v26691_v51 = vld [vmem:[#allocation12_spill] sm:$0xff] }
 0x3c8   : > { %18434 = vmatprep.subr.bf16.mxu1 %v21095_v1  ;;  %v23266_v8 = vpack.c.bf16 %v3903_v15, %v3901_v18  ;;  %v3926_v37 = vsel %vm1415_vm4, %v3924_v34, %v3925_v61  ;;  %v3937_v15 = vrot.slane %v23056_v2, 2  ;;  %v3941_v2 = vsel %vm1415_vm4, %v3939_v4, %v3940_v43  ;;  %v26697_v34 = vld [vmem:[#allocation16_spill] sm:$0xff] }
 0x3c9   : > { %v3928_v25 = vsel %vm1415_vm4, %v3925_v61, %v3927_v0  ;;  %v3943_v9 = vsel %vm1415_vm4, %v3940_v43, %v3942_v35  ;;  %v26703_v35 = vld [vmem:[#allocation23_spill] sm:$0xff]  ;;  %v26704_v4 = vld [vmem:[#allocation8_spill] sm:$0xff] }
 0x3ca   : > { %18403 = vmatmul.mubr.msk.bf16.gmra.mrb[20].mxu1 %vm525_vm5, %v23237_v62  ;;  %v23318_v18 = vpack.c.bf16 %v3928_v25, %v3926_v37  ;;  %v3938_v45 = vsel %vm1415_vm4, %v3935_v48, %v3937_v15  ;;  %v23338_v6 = vpack.c.bf16 %v3943_v9, %v3941_v2  ;;  %v23430_v15 = vld [vmem:[#allocation3 + $0x180] sm:$0xff]  ;;  %v21104_v2 = vld [vmem:[%s26515_s3 + $0xb8] sm:$0xff]  }
 0x3cb   : > { %18406 = vmatprep.mubr.msk.bf16.mxu1 %vm525_vm5, %v23242_v23  ;;  %18435 = vmatpush3.bf16.msra.mxu1 %v21095_v1  ;;  %v3906_v1 = vsel %vm1415_vm4, %v3904_v16, %v3905_v12  ;;  %v3934_v12 = vrot.slane %v23041_v27, 2  ;;  %v3946_v27 = vsel %vm1415_vm4, %v3944_v29, %v3945_v42  ;;  %v26706_v9 = vld [vmem:[#allocation11_spill] sm:$0xff] }
 0x3cc   : > { %18436 = vmatprep.subr.bf16.mxu1 %v21096_v44  ;;  %v23282_v30 = vpack.c.bf16 %v3908_v26, %v3906_v1  ;;  %v3948_v1 = vsel %vm1415_vm4, %v3945_v42, %v3947_v17  ;;  %v26707_v42 = vld [vmem:[#allocation15_spill] sm:$0xff]  ;;  %v21105_v17 = vld [vmem:[%s26515_s3 + $0xc0] sm:$0xff]  }
 0x3cd   : > { %v3936_v41 = vsel %vm1415_vm4, %v3934_v12, %v3935_v48  ;;  %v23349_v26 = vpack.c.bf16 %v3948_v1, %v3946_v27  ;;  %v23428_v48 = vld [vmem:[#allocation3 + $0x188] sm:$0xff]  ;;  %v21102_v12 = vld [vmem:[%s26515_s3 + $0xa8] sm:$0xff]   ;;  %v26708_v29 = vld [vmem:[#allocation19_spill] sm:$0xff] }
 0x3ce   : > { %v23336_v16 = vpack.c.bf16 %v3938_v45, %v3936_v41  ;;  %v23434_v43 = vpack.c.bf16 %v23428_v48, %v23430_v15  ;;  %v26705_v41 = vld [vmem:[#allocation7_spill] sm:$0xff]  ;;  %v26709_v27 = vld [vmem:[#allocation21_spill] sm:$0xff]  ;;  %v26710_v1 = vld [vmem:[#allocation20_spill] sm:$0xff] }
 0x3cf   : > { %18437 = vmatpush3.bf16.msra.mxu1 %v21096_v44  ;;  %v3919_v44 = vrot.slane %v22952_v60, 2  ;;  %v3930_v60 = vrot.slane %v23002_v52, 2  ;;  %v21103_v45 = vld [vmem:[%s26515_s3 + $0xb0] sm:$0xff]  }
 0x3d0   : > { %18470 = vmatprep.subr.bf16.mxu1 %v23257_v49 }
 0x3d1   : > { %v3921_v53 = vsel %vm1415_vm4, %v3919_v44, %v3920_v10  ;;  %v3931_v54 = vsel %vm1415_vm4, %v3929_v19, %v3930_v60  ;;  %v3933_v28 = vsel %vm1415_vm4, %v3930_v60, %v3932_v31  ;;  %v26690_v10 = vld [vmem:[#allocation9_spill] sm:$0xff]  ;;  %v26696_v31 = vld [vmem:[#allocation14_spill] sm:$0xff] }
 0x3d2   : > { %18407 = vmatmul.mubr.msk.bf16.gmra.mrb[24].mxu1 %vm525_vm5, %v23263_v5  ;;  %v23302_v3 = vpack.c.bf16 %v3923_v63, %v3921_v53  ;;  %v23320_v52 = vpack.c.bf16 %v3933_v28, %v3931_v54  ;;  %v26692_v53 = vld [vmem:[#allocation13_spill] sm:$0xff] }
 0x3d3   : > { %18410 = vmatprep.mubr.msk.bf16.mxu1 %vm525_vm5, %v23266_v8  ;;  %v26702_v28 = vld [vmem:[#allocation17_spill] sm:$0xff] }
 0x3da   : > { %18411 = vmatmul.mubr.msk.bf16.gmra.mrb[28].mxu1 %vm525_vm5, %v23282_v30 }
 0x3db   : > { %18414 = vmatprep.mubr.msk.bf16.mxu1 %vm525_vm5, %v23284_v13 }
 0x3e2   : > { %18415 = vmatmul.mubr.msk.bf16.gmra.mrb[0].mxu1 %vm525_vm5, %v23300_v33 }
 0x3e3   : > { %18418 = vmatprep.mubr.msk.bf16.mxu1 %vm525_vm5, %v23302_v3 }
 0x3ea   : > { %18419 = vmatmul.mubr.msk.bf16.gmra.mrb[4].mxu1 %vm525_vm5, %v23318_v18 }
 0x3eb   : > { %18422 = vmatprep.mubr.msk.bf16.mxu1 %vm525_vm5, %v23320_v52 }
 0x3f2   : > { %18423 = vmatmul.mubr.msk.bf16.gmra.mrb[8].mxu1 %vm525_vm5, %v23336_v16 }
 0x3f3   : > { %18426 = vmatprep.mubr.msk.bf16.mxu1 %vm525_vm5, %v23338_v6 }
 0x3fa   : > { %18427 = vmatmul.mubr.msk.bf16.gmra.mrb[12].mxu1 %vm525_vm5, %v23349_v26 }
 0x3fb   : > { %18438 = vmatprep.mubr.msk.bf16.mxu1 %vm525_vm5, %v23097_v55  ;;  %v21101_v55 = vld [vmem:[%s26515_s3 + $0xa0] sm:$0xff]  }
 0x402   : > { %18439 = vmatmul.mubr.msk.bf16.vlgmr.msra.gmra.mrb[16].mxu1 %vm525_vm5, %v23104_v56 }
 0x403   : > { %18442 = vmatprep.mubr.msk.bf16.mxu1 %vm525_vm5, %v23115_v24  ;;  %18471 = vmatpush3.bf16.msra.mxu1 %v23257_v49 }
 0x404   : > { %18472 = vmatprep.subr.bf16.mxu1 %v21098_v7 }
 0x407   : > { %18473 = vmatpush3.bf16.msra.mxu1 %v21098_v7  ;;  %v26711_v7 = vld [vmem:[#allocation22_spill] sm:$0xff] }
 0x408   : > { %18474 = vmatprep.subr.bf16.mxu1 %v21099_v36 }
 0x40a   : > { %18443 = vmatmul.mubr.msk.bf16.gmra.mrb[20].mxu1 %vm525_vm5, %v23122_v21 }
 0x40b   : > { %18446 = vmatprep.mubr.msk.bf16.mxu1 %vm525_vm5, %v23133_v38  ;;  %18475 = vmatpush3.bf16.msra.mxu1 %v21099_v36  ;;  %v26712_v36 = vld [vmem:[#allocation24_spill] sm:$0xff] }
 0x40c   : > { %18476 = vmatprep.subr.bf16.mxu1 %v21100_v40 }
 0x40f   : > { %18477 = vmatpush3.bf16.msra.mxu1 %v21100_v40  ;;  %v26713_v40 = vld [vmem:[#allocation25_spill] sm:$0xff] }
 0x410   : > { %18510 = vmatprep.subr.bf16.mxu1 %v21101_v55 }
 0x412   : > { %18447 = vmatmul.mubr.msk.bf16.gmra.mrb[24].mxu1 %vm525_vm5, %v23137_v22 }
 0x413   : > { %18450 = vmatprep.mubr.msk.bf16.mxu1 %vm525_vm5, %v23145_v50 }
 0x415   : > { %v23380_v49 = vpop.f32.mrb[32].mxu0 }
 0x416   : > { %v23382_v11 = vpop.f32.mrb[33].mxu0 }
 0x417   : > { %v23384_v14 = vpop.f32.mrb[34].mxu0 }
 0x418   : > { %v23386_v47 = vpop.f32.mrb[35].mxu0 }
 0x41a   : > { %18451 = vmatmul.mubr.msk.bf16.gmra.mrb[28].mxu1 %vm525_vm5, %v26689_v58 }
 0x41b   : > { %18454 = vmatprep.mubr.msk.bf16.mxu1 %vm525_vm5, %v26690_v10 }
 0x41d   : > { %v23392_v20 = vpop.f32.mrb[36].mxu0 }
 0x41e   : > { %v23394_v59 = vpop.f32.mrb[37].mxu0 }
 0x41f   : > { %v23396_v44 = vpop.f32.mrb[38].mxu0 }
 0x420   : > { %v23398_v39 = vpop.f32.mrb[39].mxu0 }
 0x422   : > { %18455 = vmatmul.mubr.msk.bf16.gmra.mrb[0].mxu1 %vm525_vm5, %v26691_v51 }
 0x423   : > { %18458 = vmatprep.mubr.msk.bf16.mxu1 %vm525_vm5, %v26692_v53 }
 0x425   : > { %v23404_v63 = vpop.f32.mrb[40].mxu0 }
 0x426   : > { %v23406_v61 = vpop.f32.mrb[41].mxu0 }
 0x427   : > { %26693 = vst [vmem:[#allocation18_spill] sm:$0xff] %v23406_v61  ;;  %v23408_v0 = vpop.f32.mrb[42].mxu0  ;;  %v21106_v61 = vld [vmem:[%s26515_s3 + $0xc8] sm:$0xff]  }
 0x428   : > { %26694 = vst [vmem:[#allocation10_spill] sm:$0xff] %v23408_v0  ;;  %v23410_v60 = vpop.f32.mrb[43].mxu0 }
 0x429   : > { %26695 = vst [vmem:[#allocation9_spill] sm:$0xff] %v23410_v60 }
 0x42a   : > { %18459 = vmatmul.mubr.msk.bf16.gmra.mrb[4].mxu1 %vm525_vm5, %v26696_v31 }
 0x42b   : > { %18462 = vmatprep.mubr.msk.bf16.mxu1 %vm525_vm5, %v26697_v34 }
 0x42d   : > { %v23416_v19 = vpop.f32.mrb[44].mxu0 }
 0x42e   : > { %26698 = vst [vmem:[#allocation12_spill] sm:$0xff] %v23416_v19  ;;  %v23418_v37 = vpop.f32.mrb[45].mxu0 }
 0x42f   : > { %26699 = vst [vmem:[#allocation13_spill] sm:$0xff] %v23418_v37  ;;  %v23420_v25 = vpop.f32.mrb[46].mxu0  ;;  %v4504_v37 = vrot.slane %v23430_v15, 1 }
 0x430   : > { %26700 = vst [vmem:[#allocation14_spill] sm:$0xff] %v23420_v25  ;;  %v23422_v54 = vpop.f32.mrb[47].mxu0  ;;  %v26717_v25 = vld [vmem:[#allocation29_spill] sm:$0xff] }
 0x431   : > { %26701 = vst [vmem:[#allocation16_spill] sm:$0xff] %v23422_v54  ;;  %v26716_v54 = vld [vmem:[#allocation28_spill] sm:$0xff] }
 0x432   : > { %18463 = vmatmul.mubr.msk.bf16.gmra.mrb[8].mxu1 %vm525_vm5, %v26702_v28 }
 0x433   : > { %18466 = vmatprep.mubr.msk.bf16.mxu1 %vm525_vm5, %v23198_v46 }
 0x43a   : > { %18467 = vmatmul.mubr.msk.bf16.gmra.mrb[12].mxu1 %vm525_vm5, %v23434_v43 }
 0x43b   : > { %18478 = vmatprep.mubr.msk.bf16.mxu1 %vm525_vm5, %v26703_v35  ;;  %v26715_v35 = vld [vmem:[#allocation27_spill] sm:$0xff] }
 0x442   : > { %18479 = vmatmul.mubr.msk.bf16.vlgmr.msra.gmra.mrb[16].mxu1 %vm525_vm5, %v26704_v4 }
 0x443   : > { %18482 = vmatprep.mubr.msk.bf16.mxu1 %vm525_vm5, %v26705_v41  ;;  %18511 = vmatpush3.bf16.msra.mxu1 %v21101_v55  ;;  %v26714_v55 = vld [vmem:[#allocation26_spill] sm:$0xff] }
 0x444   : > { %18512 = vmatprep.subr.bf16.mxu1 %v21102_v12 }
 0x447   : > { %18513 = vmatpush3.bf16.msra.mxu1 %v21102_v12  ;;  %v3190_v12 = vld [vmem:[#allocation3 + $0x190] sm:$0x3] }
 0x448   : > { %18514 = vmatprep.subr.bf16.mxu1 %v21103_v45 }
 0x44a   : > { %18483 = vmatmul.mubr.msk.bf16.gmra.mrb[20].mxu1 %vm525_vm5, %v26706_v9 }
 0x44b   : > { %18486 = vmatprep.mubr.msk.bf16.mxu1 %vm525_vm5, %v26707_v42  ;;  %18515 = vmatpush3.bf16.msra.mxu1 %v21103_v45  ;;  %v4505_v45 = vrot.slane %v23428_v48, 1 }
 0x44c   : > { %18516 = vmatprep.subr.bf16.mxu1 %v21104_v2 }
 0x44d   : > { %v4506_v19 = vsel %vm859_vm3, %v4504_v37, %v4505_v45  ;;  %v4744_v37 = vrot.slane %v3190_v12, 2 }
 0x44f   : > { %18517 = vmatpush3.bf16.msra.mxu1 %v21104_v2  ;;  %v4507_v2 = vrot.slane %v3190_v12, 1 }
 0x450   : > { %18550 = vmatprep.subr.bf16.mxu1 %v21105_v17 }
 0x451   : > { %v4508_v60 = vsel %vm859_vm3, %v4505_v45, %v4507_v2 }
 0x452   : > { %18487 = vmatmul.mubr.msk.bf16.gmra.mrb[24].mxu1 %vm525_vm5, %v26708_v29  ;;  %v23484_v0 = vpack.c.bf16 %v4508_v60, %v4506_v19  ;;  %v21107_v60 = vld [vmem:[%s26515_s3 + $0xd0] sm:$0xff]   ;;  %v21109_v19 = vld [vmem:[%s26515_s3 + $0xe0] sm:$0xff]  }
 0x453   : > { %18490 = vmatprep.mubr.msk.bf16.mxu1 %vm525_vm5, %v26709_v27 }
 0x45a   : > { %18491 = vmatmul.mubr.msk.bf16.gmra.mrb[28].mxu1 %vm525_vm5, %v26710_v1 }
 0x45b   : > { %18494 = vmatprep.mubr.msk.bf16.mxu1 %vm525_vm5, %v26711_v7 }
 0x462   : > { %18495 = vmatmul.mubr.msk.bf16.gmra.mrb[0].mxu1 %vm525_vm5, %v26712_v36 }
 0x463   : > { %18498 = vmatprep.mubr.msk.bf16.mxu1 %vm525_vm5, %v26713_v40 }
 0x46a   : > { %18499 = vmatmul.mubr.msk.bf16.gmra.mrb[4].mxu1 %vm525_vm5, %v26714_v55 }
 0x46b   : > { %18502 = vmatprep.mubr.msk.bf16.mxu1 %vm525_vm5, %v26715_v35 }
 0x472   : > { %18503 = vmatmul.mubr.msk.bf16.gmra.mrb[8].mxu1 %vm525_vm5, %v26716_v54 }
 0x473   : > { %18506 = vmatprep.mubr.msk.bf16.mxu1 %vm525_vm5, %v26717_v25 }
 0x47a   : > { %18507 = vmatmul.mubr.msk.bf16.gmra.mrb[12].mxu1 %vm525_vm5, %v23484_v0 }
 0x47b   : > { %18518 = vmatprep.mubr.msk.bf16.mxu1 %vm525_vm5, %v23213_v57  ;;  %v21108_v57 = vld [vmem:[%s26515_s3 + $0xd8] sm:$0xff]  }
 0x482   : > { %18519 = vmatmul.mubr.msk.bf16.vlgmr.msra.gmra.mrb[16].mxu1 %vm525_vm5, %v23218_v32 }
 0x483   : > { %18522 = vmatprep.mubr.msk.bf16.mxu1 %vm525_vm5, %v23237_v62  ;;  %18551 = vmatpush3.bf16.msra.mxu1 %v21105_v17  ;;  %v4741_v17 = vrot.slane %v23430_v15, 2  ;;  %v21111_v15 = vld [vmem:[%s26515_s3 + $0xf0] sm:$0xff]  }
 0x484   : > { %18552 = vmatprep.subr.bf16.mxu1 %v21106_v61 }
 0x487   : > { %18553 = vmatpush3.bf16.msra.mxu1 %v21106_v61  ;;  %v4742_v61 = vrot.slane %v23428_v48, 2  ;;  %v21110_v48 = vld [vmem:[%s26515_s3 + $0xe8] sm:$0xff]  }
 0x488   : > { %18554 = vmatprep.subr.bf16.mxu1 %v21107_v60 }
 0x489   : > { %v4743_v45 = vsel %vm1415_vm4, %v4741_v17, %v4742_v61  ;;  %v4745_v2 = vsel %vm1415_vm4, %v4742_v61, %v4744_v37 }
 0x48a   : > { %18523 = vmatmul.mubr.msk.bf16.gmra.mrb[20].mxu1 %vm525_vm5, %v23242_v23 }
 0x48b   : > { %18526 = vmatprep.mubr.msk.bf16.mxu1 %vm525_vm5, %v23263_v5  ;;  %18555 = vmatpush3.bf16.msra.mxu1 %v21107_v60  ;;  %v23534_v60 = vpack.c.bf16 %v4745_v2, %v4743_v45 }
 0x48c   : > { %18556 = vmatprep.subr.bf16.mxu1 %v21108_v57 }
 0x48f   : > { %18557 = vmatpush3.bf16.msra.mxu1 %v21108_v57 }
 0x490   : > { %18590 = vmatprep.subr.bf16.mxu1 %v21109_v19 }
 0x492   : > { %18527 = vmatmul.mubr.msk.bf16.gmra.mrb[24].mxu1 %vm525_vm5, %v23266_v8 }
 0x493   : > { %18530 = vmatprep.mubr.msk.bf16.mxu1 %vm525_vm5, %v23282_v30 }
 0x49a   : > { %18531 = vmatmul.mubr.msk.bf16.gmra.mrb[28].mxu1 %vm525_vm5, %v23284_v13 }
 0x49b   : > { %18534 = vmatprep.mubr.msk.bf16.mxu1 %vm525_vm5, %v23300_v33 }
 0x4a2   : > { %18535 = vmatmul.mubr.msk.bf16.gmra.mrb[0].mxu1 %vm525_vm5, %v23302_v3 }
 0x4a3   : > { %18538 = vmatprep.mubr.msk.bf16.mxu1 %vm525_vm5, %v23318_v18 }
 0x4aa   : > { %18539 = vmatmul.mubr.msk.bf16.gmra.mrb[4].mxu1 %vm525_vm5, %v23320_v52 }
 0x4ab   : > { %18542 = vmatprep.mubr.msk.bf16.mxu1 %vm525_vm5, %v23336_v16 }
 0x4b2   : > { %18543 = vmatmul.mubr.msk.bf16.gmra.mrb[8].mxu1 %vm525_vm5, %v23338_v6 }
 0x4b3   : > { %18546 = vmatprep.mubr.msk.bf16.mxu1 %vm525_vm5, %v23349_v26 }
 0x4ba   : > { %18547 = vmatmul.mubr.msk.bf16.gmra.mrb[12].mxu1 %vm525_vm5, %v23534_v60 }
 0x4bb   : > { %18558 = vmatprep.mubr.msk.bf16.mxu1 %vm525_vm5, %v23104_v56  ;;  %v21112_v56 = vld [vmem:[%s26515_s3 + $0xf8] sm:$0xff]  }
 0x4c2   : > { %18559 = vmatmul.mubr.msk.bf16.vlgmr.msra.gmra.mrb[16].mxu1 %vm525_vm5, %v23115_v24  ;;  %v21113_v24 = vld [vmem:[%s26515_s3 + $0x100] sm:$0xff]  }
 0x4c3   : > { %18562 = vmatprep.mubr.msk.bf16.mxu1 %vm525_vm5, %v23122_v21  ;;  %18591 = vmatpush3.bf16.msra.mxu1 %v21109_v19  ;;  %v3191_v21 = vld [vmem:[#allocation3 + $0x198] sm:$0xff] }
 0x4c4   : > { %18592 = vmatprep.subr.bf16.mxu1 %v21110_v48 }
 0x4c7   : > { %18593 = vmatpush3.bf16.msra.mxu1 %v21110_v48 }
 0x4c8   : > { %18594 = vmatprep.subr.bf16.mxu1 %v21111_v15 }
 0x4ca   : > { %18563 = vmatmul.mubr.msk.bf16.gmra.mrb[20].mxu1 %vm525_vm5, %v23133_v38  ;;  %v3192_v38 = vld [vmem:[#allocation3 + $0x1a0] sm:$0xff] }
 0x4cb   : > { %18566 = vmatprep.mubr.msk.bf16.mxu1 %vm525_vm5, %v23137_v22  ;;  %18595 = vmatpush3.bf16.msra.mxu1 %v21111_v15  ;;  %v5448_v22 = vrot.slane %v3191_v21, 2 }
 0x4cc   : > { %18596 = vmatprep.subr.bf16.mxu1 %v21112_v56 }
 0x4cf   : > { %18597 = vmatpush3.bf16.msra.mxu1 %v21112_v56 }
 0x4d0   : > { %18630 = vmatprep.subr.bf16.mxu1 %v21113_v24 }
 0x4d2   : > { %18567 = vmatmul.mubr.msk.bf16.gmra.mrb[24].mxu1 %vm525_vm5, %v23145_v50  ;;  %v5449_v50 = vrot.slane %v3192_v38, 2 }
 0x4d3   : > { %18570 = vmatprep.mubr.msk.bf16.mxu1 %vm525_vm5, %v26689_v58  ;;  %v3193_v58 = vld [vmem:[#allocation3 + $0x1a8] sm:$0x3] }
 0x4da   : > { %18571 = vmatmul.mubr.msk.bf16.gmra.mrb[28].mxu1 %vm525_vm5, %v26690_v10  ;;  %v5450_v10 = vsel %vm1415_vm4, %v5448_v22, %v5449_v50 }
 0x4db   : > { %18574 = vmatprep.mubr.msk.bf16.mxu1 %vm525_vm5, %v26691_v51  ;;  %v5451_v51 = vrot.slane %v3193_v58, 2 }
 0x4e2   : > { %18575 = vmatmul.mubr.msk.bf16.gmra.mrb[0].mxu1 %vm525_vm5, %v26692_v53  ;;  %v5452_v53 = vsel %vm1415_vm4, %v5449_v50, %v5451_v51 }
 0x4e3   : > { %18578 = vmatprep.mubr.msk.bf16.mxu1 %vm525_vm5, %v26696_v31  ;;  %v4978_v31 = vpack.c.bf16 %v3192_v38, %v3191_v21 }
 0x4ea   : > { %18579 = vmatmul.mubr.msk.bf16.gmra.mrb[4].mxu1 %vm525_vm5, %v26697_v34  ;;  %v5455_v34 = vpack.c.bf16 %v5452_v53, %v5450_v10 }
 0x4eb   : > { %18582 = vmatprep.mubr.msk.bf16.mxu1 %vm525_vm5, %v26702_v28  ;;  %v21115_v28 = vld [vmem:[%s26515_s3 + $0x110] sm:$0xff]  }
 0x4f2   : > { %18583 = vmatmul.mubr.msk.bf16.gmra.mrb[8].mxu1 %vm525_vm5, %v23198_v46  ;;  %v21114_v46 = vld [vmem:[%s26515_s3 + $0x108] sm:$0xff]  }
 0x4f3   : > { %18586 = vmatprep.mubr.msk.bf16.mxu1 %vm525_vm5, %v23434_v43  ;;  %v21116_v43 = vld [vmem:[%s26515_s3 + $0x118] sm:$0xff]  }
 0x4fa   : > { %18587 = vmatmul.mubr.msk.bf16.gmra.mrb[12].mxu1 %vm525_vm5, %v4978_v31 }
 0x4fb   : > { %18598 = vmatprep.mubr.msk.bf16.mxu1 %vm525_vm5, %v26704_v4  ;;  %v5211_v4 = vrot.slane %v3191_v21, 1 }
 0x502   : > { %18599 = vmatmul.mubr.msk.bf16.vlgmr.msra.gmra.mrb[16].mxu1 %vm525_vm5, %v26705_v41  ;;  %v5212_v41 = vrot.slane %v3192_v38, 1 }
 0x503   : > { %18602 = vmatprep.mubr.msk.bf16.mxu1 %vm525_vm5, %v26706_v9  ;;  %18631 = vmatpush3.bf16.msra.mxu1 %v21113_v24  ;;  %v5214_v9 = vrot.slane %v3193_v58, 1 }
 0x504   : > { %18632 = vmatprep.subr.bf16.mxu1 %v21114_v46 }
 0x507   : > { %18633 = vmatpush3.bf16.msra.mxu1 %v21114_v46 }
 0x508   : > { %18634 = vmatprep.subr.bf16.mxu1 %v21115_v28 }
 0x50a   : > { %18603 = vmatmul.mubr.msk.bf16.gmra.mrb[20].mxu1 %vm525_vm5, %v26707_v42  ;;  %v5213_v42 = vsel %vm859_vm3, %v5211_v4, %v5212_v41 }
 0x50b   : > { %18606 = vmatprep.mubr.msk.bf16.mxu1 %vm525_vm5, %v26708_v29  ;;  %18635 = vmatpush3.bf16.msra.mxu1 %v21115_v28  ;;  %v5215_v29 = vsel %vm859_vm3, %v5212_v41, %v5214_v9 }
 0x50c   : > { %18636 = vmatprep.subr.bf16.mxu1 %v21116_v43 }
 0x50f   : > { %18637 = vmatpush3.bf16.msra.mxu1 %v21116_v43 }
 0x512   : > { %18607 = vmatmul.mubr.msk.bf16.gmra.mrb[24].mxu1 %vm525_vm5, %v26709_v27  ;;  %v5218_v27 = vpack.c.bf16 %v5215_v29, %v5213_v42 }
 0x513   : > { %18610 = vmatprep.mubr.msk.bf16.mxu1 %vm525_vm5, %v26710_v1 }
 0x51a   : > { %18611 = vmatmul.mubr.msk.bf16.gmra.mrb[28].mxu1 %vm525_vm5, %v26711_v7 }
 0x51b   : > { %18614 = vmatprep.mubr.msk.bf16.mxu1 %vm525_vm5, %v26712_v36 }
 0x522   : > { %18615 = vmatmul.mubr.msk.bf16.gmra.mrb[0].mxu1 %vm525_vm5, %v26713_v40 }
 0x523   : > { %18618 = vmatprep.mubr.msk.bf16.mxu1 %vm525_vm5, %v26714_v55 }
 0x52a   : > { %18619 = vmatmul.mubr.msk.bf16.gmra.mrb[4].mxu1 %vm525_vm5, %v26715_v35 }
 0x52b   : > { %18622 = vmatprep.mubr.msk.bf16.mxu1 %vm525_vm5, %v26716_v54 }
 0x532   : > { %18623 = vmatmul.mubr.msk.bf16.gmra.mrb[8].mxu1 %vm525_vm5, %v26717_v25 }
 0x533   : > { %18626 = vmatprep.mubr.msk.bf16.mxu1 %vm525_vm5, %v23484_v0 }
 0x53a   : > { %18627 = vmatmul.mubr.msk.bf16.gmra.mrb[12].mxu1 %vm525_vm5, %v5218_v27 }
 0x53b   : > { %18638 = vmatprep.mubr.msk.bf16.mxu1 %vm525_vm5, %v23218_v32  ;;  %v21474_v32 = vmov 1983009808  }
 0x542   : > { %18639 = vmatmul.mubr.msk.bf16.vlgmr.msra.gmra.mrb[16].mxu1 %vm525_vm5, %v23237_v62  ;;  %v5790_v62 = vunpack.c.l.s4 %v21474_v32 }
 0x543   : > { %18642 = vmatprep.mubr.msk.bf16.mxu1 %vm525_vm5, %v23242_v23  ;;  %v5792_v23 = vlaneseq }
 0x54a   : > { %18643 = vmatmul.mubr.msk.bf16.gmra.mrb[20].mxu1 %vm525_vm5, %v23263_v5  ;;  %v5791_v5 = vunpack.c.0.s8 %v5790_v62 }
 0x54b   : > { %18646 = vmatprep.mubr.msk.bf16.mxu1 %vm525_vm5, %v23266_v8  ;;  %v5793_v8 = vshrl.u32 %v5792_v23, 7 }
 0x552   : > { %18647 = vmatmul.mubr.msk.bf16.gmra.mrb[24].mxu1 %vm525_vm5, %v23282_v30 }
 0x553   : > { %18650 = vmatprep.mubr.msk.bf16.mxu1 %vm525_vm5, %v23284_v13  ;;  %v23659_v13 = vld [vmem:[%s26516_s4] ss:$0 sm:$0xff] }
 0x55a   : > { %18651 = vmatmul.mubr.msk.bf16.gmra.mrb[28].mxu1 %vm525_vm5, %v23300_v33 }
 0x55b   : > { %18654 = vmatprep.mubr.msk.bf16.mxu1 %vm525_vm5, %v23302_v3 }
 0x562   : > { %18655 = vmatmul.mubr.msk.bf16.gmra.mrb[0].mxu1 %vm525_vm5, %v23318_v18 }
 0x563   : > { %18658 = vmatprep.mubr.msk.bf16.mxu1 %vm525_vm5, %v23320_v52 }
 0x56a   : > { %18659 = vmatmul.mubr.msk.bf16.gmra.mrb[4].mxu1 %vm525_vm5, %v23336_v16 }
 0x56b   : > { %18662 = vmatprep.mubr.msk.bf16.mxu1 %vm525_vm5, %v23338_v6  ;;  %v23664_v6 = vsub.s32 %v5791_v5, %v5793_v8 }
 0x572   : > { %18663 = vmatmul.mubr.msk.bf16.gmra.mrb[8].mxu1 %vm525_vm5, %v23349_v26 }
 0x573   : > { %18666 = vmatprep.mubr.msk.bf16.mxu1 %vm525_vm5, %v23534_v60 }
 0x57a   : > { %18667 = vmatmul.mubr.msk.bf16.gmra.mrb[12].mxu1 %vm525_vm5, %v5455_v34 }
 0x615   : > { %v18640_v30 = vpop.f32.mrb[16].mxu1 }
 0x616   : > { %v19910_v33 = vadd.f32 %v18640_v30, %v23380_v49  ;;  %v5526_v3 = vpop.f32.mrb[17].mxu1 }
 0x617   : > { %v19911_v18 = vadd.f32 %v5526_v3, %v23382_v11  ;;  %v18641_v52 = vpop.f32.mrb[18].mxu1 }
 0x618   : > { %v5694_v16 = vadd.f32 %v19910_v33, %v23659_v13  ;;  %v19912_v26 = vadd.f32 %v18641_v52, %v23384_v14  ;;  %v5529_v0 = vpop.f32.mrb[19].mxu1 }
 0x619   : > { %v5692_v25 = vadd.f32 %v19911_v18, %v23659_v13  ;;  %v19913_v54 = vadd.f32 %v5529_v0, %v23386_v47 }
 0x61a   : > { %v5726_v1 = vmax.f32 %v5694_v16, 0.0  ;;  %v5695_v7 = vadd.f32 %v19912_v26, %v23659_v13 }
 0x61b   : > { %v5724_v36 = vmax.f32 %v5692_v25, 0.0  ;;  %v5693_v49 = vadd.f32 %v19913_v54, %v23659_v13 }
 0x61c   : > { %v5822_v40 = vcombine.high %v5726_v1, %v5726_v1  ;;  %v5829_v11 = vrot.slane %v5726_v1, %v23664_v6  ;;  %v5727_v55 = vmax.f32 %v5695_v7, 0.0 }
 0x61d   : > { %v5788_v35 = vcombine.high %v5724_v36, %v5724_v36  ;;  %v5795_v12 = vrot.slane %v5724_v36, %v23664_v6  ;;  %v5725_v57 = vmax.f32 %v5693_v49, 0.0  ;;  %v18644_v14 = vpop.f32.mrb[20].mxu1 }
 0x61e   : > { %v5836_v19 = vrot.slane %v5822_v40, %v23664_v6  ;;  %v5837_v61 = vcombine.high %v5829_v11, %v5829_v11  ;;  %v6461_v47 = vsel %vm528_vm6, %v5829_v11, -inf  ;;  %v5839_v37 = vcombine.high %v5727_v55, %v5727_v55  ;;  %v5542_v17 = vpop.f32.mrb[21].mxu1 }
 0x61f   : > { %v5802_v45 = vrot.slane %v5788_v35, %v23664_v6  ;;  %v5803_v2 = vcombine.high %v5795_v12, %v5795_v12  ;;  %v6460_v60 = vsel %vm528_vm6, %v5795_v12, -inf  ;;  %v5846_v48 = vrot.slane %v5727_v55, %v23664_v6  ;;  %v23678_v15 = vpop.f32.mrb[22].mxu1 }
 0x620   : > { %v5838_v56 = vcombine.high %v5836_v19, %v5836_v19  ;;  %v6470_v24 = vsel %vm528_vm6, %v5837_v61, -inf  ;;  %v6479_v21 = vsel %vm528_vm6, %v5836_v19, -inf  ;;  %v6462_v38 = vmax.f32 %v6460_v60, %v6461_v47  ;;  %v23682_v22 = vpop.f32.mrb[23].mxu1 }
 0x621   : > { %v5804_v50 = vcombine.high %v5802_v45, %v5802_v45  ;;  %v6469_v58 = vsel %vm528_vm6, %v5803_v2, -inf  ;;  %v6478_v10 = vsel %vm528_vm6, %v5802_v45, -inf  ;;  %v5853_v51 = vrot.slane %v5839_v37, %v23664_v6 }
 0x622   : > { %v6488_v53 = vsel %vm528_vm6, %v5838_v56, -inf  ;;  %v6463_v31 = vrot.slane %v6462_v38, 4  ;;  %v6471_v34 = vmax.f32 %v6469_v58, %v6470_v24  ;;  %v6480_v46 = vmax.f32 %v6478_v10, %v6479_v21 }
 0x623   : > { %v6487_v28 = vsel %vm528_vm6, %v5804_v50, -inf  ;;  %v5854_v43 = vcombine.high %v5846_v48, %v5846_v48  ;;  %v5855_v4 = vcombine.high %v5853_v51, %v5853_v51  ;;  %v6497_v41 = vsel %vm528_vm6, %v5846_v48, -inf }
 0x624   : > { %v6464_v9 = vmax.f32 %v6462_v38, %v6463_v31  ;;  %v6472_v42 = vrot.slane %v6471_v34, 4  ;;  %v6481_v29 = vrot.slane %v6480_v46, 4  ;;  %v6489_v27 = vmax.f32 %v6487_v28, %v6488_v53  ;;  %v21117_v31 = vld [vmem:[%s26517_s5 + $0x20] sm:$0xff]  }
 0x625   : > { %v6506_v32 = vsel %vm528_vm6, %v5854_v43, -inf  ;;  %v6515_v62 = vsel %vm528_vm6, %v5853_v51, -inf  ;;  %v6524_v23 = vsel %vm528_vm6, %v5855_v4, -inf  ;;  %v5805_v5 = vcombine.high %v5725_v57, %v5725_v57  ;;  %v23693_v8 = vpop.f32.mrb[24].mxu1  ;;  %18670 = vmatprep.subr.bf16.mxu0 %v21117_v31 }
 0x626   : > { %v6465_v30 = vrot.slane %v6464_v9, 2  ;;  %v6473_v33 = vmax.f32 %v6471_v34, %v6472_v42  ;;  %v6482_v3 = vmax.f32 %v6480_v46, %v6481_v29  ;;  %v6490_v18 = vrot.slane %v6489_v27, 4  ;;  %v23695_v52 = vpop.f32.mrb[25].mxu1  ;;  %18671 = vmatpush3.bf16.msra.mxu0 %v21117_v31 }
 0x627   : > { %v5812_v16 = vrot.slane %v5725_v57, %v23664_v6  ;;  %v5819_v26 = vrot.slane %v5805_v5, %v23664_v6  ;;  %v19914_v0 = vadd.f32 %v18644_v14, %v23392_v20  ;;  %v19915_v25 = vadd.f32 %v5542_v17, %v23394_v59  ;;  %v23701_v54 = vpop.f32.mrb[26].mxu1 }
 0x628   : > { %v6466_v1 = vmax.f32 %v6464_v9, %v6465_v30  ;;  %v6474_v7 = vrot.slane %v6473_v33, 2  ;;  %v6483_v36 = vrot.slane %v6482_v3, 2  ;;  %v6491_v49 = vmax.f32 %v6489_v27, %v6490_v18  ;;  %v23703_v40 = vpop.f32.mrb[27].mxu1 }
 0x629   : > { %v5820_v11 = vcombine.high %v5812_v16, %v5812_v16  ;;  %v5821_v55 = vcombine.high %v5819_v26, %v5819_v26  ;;  %v6496_v35 = vsel %vm528_vm6, %v5812_v16, -inf  ;;  %v6514_v12 = vsel %vm528_vm6, %v5819_v26, -inf }
 0x62a   : > { %v6467_v57 = vrot.slane %v6466_v1, 1  ;;  %v6475_v19 = vmax.f32 %v6473_v33, %v6474_v7  ;;  %v6484_v61 = vmax.f32 %v6482_v3, %v6483_v36  ;;  %v6492_v20 = vrot.slane %v6491_v49, 2 }
 0x62b   : > { %v6498_v14 = vmax.f32 %v6496_v35, %v6497_v41  ;;  %v6505_v59 = vsel %vm528_vm6, %v5820_v11, -inf  ;;  %v6516_v47 = vmax.f32 %v6514_v12, %v6515_v62  ;;  %v6523_v37 = vsel %vm528_vm6, %v5821_v55, -inf }
 0x62c   : > { %v6468_v17 = vmax.f32 %v6466_v1, %v6467_v57  ;;  %v6476_v45 = vrot.slane %v6475_v19, 1  ;;  %v6485_v2 = vrot.slane %v6484_v61, 1  ;;  %v6493_v60 = vmax.f32 %v6491_v49, %v6492_v20 }
 0x62d   : > { %v6499_v48 = vrot.slane %v6498_v14, 4  ;;  %v6507_v56 = vmax.f32 %v6505_v59, %v6506_v32  ;;  %v6517_v24 = vrot.slane %v6516_v47, 4  ;;  %v6525_v21 = vmax.f32 %v6523_v37, %v6524_v23  ;;  %v23709_v38 = vpop.f32.mrb[28].mxu1 }
 0x62e   : > { %v6477_v50 = vmax.f32 %v6475_v19, %v6476_v45  ;;  %v6486_v58 = vmax.f32 %v6484_v61, %v6485_v2  ;;  %v6494_v10 = vrot.slane %v6493_v60, 1  ;;  %v5698_v51 = vadd.f32 %v19914_v0, %v23659_v13  ;;  %v23712_v53 = vpop.f32.mrb[29].mxu1 }
 0x62f   : > { %v6500_v34 = vmax.f32 %v6498_v14, %v6499_v48  ;;  %v6508_v46 = vrot.slane %v6507_v56, 4  ;;  %v6518_v28 = vmax.f32 %v6516_v47, %v6517_v24  ;;  %v6526_v43 = vrot.slane %v6525_v21, 4  ;;  %v23717_v4 = vpop.f32.mrb[30].mxu1 }
 0x630   : > { %v6495_v41 = vmax.f32 %v6493_v60, %v6494_v10  ;;  %v7101_v9 = vsel %vm7100_vm7, %v6477_v50, %v6468_v17  ;;  %v5730_v42 = vmax.f32 %v5698_v51, 0.0  ;;  %v5696_v29 = vadd.f32 %v19915_v25, %v23659_v13  ;;  %v23721_v27 = vpop.f32.mrb[31].mxu1 }
 0x631   : > { %v7103_v32 = vsel %vm7102_vm8, %v6486_v58, %v7101_v9  ;;  %v6501_v62 = vrot.slane %v6500_v34, 2  ;;  %v6509_v23 = vmax.f32 %v6507_v56, %v6508_v46  ;;  %v6519_v5 = vrot.slane %v6518_v28, 2 }
 0x632   : > { %v6527_v30 = vmax.f32 %v6525_v21, %v6526_v43  ;;  %v7105_v33 = vsel %vm7104_vm9, %v6495_v41, %v7103_v32  ;;  %v5890_v3 = vcombine.high %v5730_v42, %v5730_v42  ;;  %v5897_v18 = vrot.slane %v5730_v42, %v23664_v6 }
 0x633   : > { %v6502_v16 = vmax.f32 %v6500_v34, %v6501_v62  ;;  %v6510_v26 = vrot.slane %v6509_v23, 2  ;;  %v6520_v0 = vmax.f32 %v6518_v28, %v6519_v5  ;;  %v5728_v25 = vmax.f32 %v5696_v29, 0.0 }
 0x634   : > { %v6528_v1 = vrot.slane %v6527_v30, 2  ;;  %v5904_v7 = vrot.slane %v5890_v3, %v23664_v6  ;;  %v5905_v36 = vcombine.high %v5897_v18, %v5897_v18  ;;  %v6533_v49 = vsel %vm528_vm6, %v5897_v18, -inf }
 0x635   : > { %v6503_v11 = vrot.slane %v6502_v16, 1  ;;  %v6511_v55 = vmax.f32 %v6509_v23, %v6510_v26  ;;  %v6521_v35 = vrot.slane %v6520_v0, 1  ;;  %v5856_v12 = vcombine.high %v5728_v25, %v5728_v25  ;;  %v23728_v57 = vpop.f32.mrb[0].mxu1 }
 0x636   : > { %v6529_v19 = vmax.f32 %v6527_v30, %v6528_v1  ;;  %v5906_v61 = vcombine.high %v5904_v7, %v5904_v7  ;;  %v6542_v20 = vsel %vm528_vm6, %v5905_v36, -inf  ;;  %v6551_v14 = vsel %vm528_vm6, %v5904_v7, -inf  ;;  %v23732_v59 = vpop.f32.mrb[1].mxu1 }
 0x637   : > { %v6504_v47 = vmax.f32 %v6502_v16, %v6503_v11  ;;  %v6512_v37 = vrot.slane %v6511_v55, 1  ;;  %v6522_v17 = vmax.f32 %v6520_v0, %v6521_v35  ;;  %v5863_v45 = vrot.slane %v5728_v25, %v23664_v6  ;;  %v23735_v2 = vpop.f32.mrb[2].mxu1 }
 0x638   : > { %v6530_v60 = vrot.slane %v6529_v19, 1  ;;  %v6560_v48 = vsel %vm528_vm6, %v5906_v61, -inf  ;;  %v5870_v56 = vrot.slane %v5856_v12, %v23664_v6  ;;  %v19916_v24 = vadd.f32 %v23678_v15, %v23396_v44  ;;  %v23741_v21 = vpop.f32.mrb[3].mxu1 }
 0x639   : > { %v6513_v50 = vmax.f32 %v6511_v55, %v6512_v37  ;;  %v7107_v58 = vsel %vm7106_vm10, %v6504_v47, %v7105_v33  ;;  %v5871_v10 = vcombine.high %v5863_v45, %v5863_v45  ;;  %v6532_v51 = vsel %vm528_vm6, %v5863_v45, -inf }
 0x63a   : > { %v6531_v31 = vmax.f32 %v6529_v19, %v6530_v60  ;;  %v5872_v34 = vcombine.high %v5870_v56, %v5870_v56  ;;  %v6534_v46 = vmax.f32 %v6532_v51, %v6533_v49  ;;  %v6550_v28 = vsel %vm528_vm6, %v5870_v56, -inf }
 0x63b   : > { %v7109_v43 = vsel %vm7108_vm11, %v6513_v50, %v7107_v58  ;;  %v6541_v41 = vsel %vm528_vm6, %v5871_v10, -inf  ;;  %v6552_v9 = vmax.f32 %v6550_v28, %v6551_v14  ;;  %v5699_v44 = vadd.f32 %v19916_v24, %v23659_v13 }
 0x63c   : > { %v7111_v15 = vsel %vm7110_vm12, %v6522_v17, %v7109_v43  ;;  %v6535_v42 = vrot.slane %v6534_v46, 4  ;;  %v6543_v29 = vmax.f32 %v6541_v41, %v6542_v20  ;;  %v6559_v32 = vsel %vm528_vm6, %v5872_v34, -inf }
 0x63d   : > { %v7113_v62 = vsel %vm7112_vm13, %v6531_v31, %v7111_v15  ;;  %v6553_v23 = vrot.slane %v6552_v9, 4  ;;  %v6561_v5 = vmax.f32 %v6559_v32, %v6560_v48  ;;  %v5731_v30 = vmax.f32 %v5699_v44, 0.0  ;;  %v23752_v33 = vpop.f32.mrb[4].mxu1 }
 0x63e   : > { %7172 = vst.msk [vmem:[#allocation4 + $0x11] sm:$0xff] %vm525_vm5, %v7113_v62  ;;  %v6536_v3 = vmax.f32 %v6534_v46, %v6535_v42  ;;  %v6544_v18 = vrot.slane %v6543_v29, 4  ;;  %v19917_v16 = vadd.f32 %v23682_v22, %v23398_v39  ;;  %v19918_v26 = vadd.f32 %v23693_v8, %v23404_v63  ;;  %v23759_v0 = vpop.f32.mrb[5].mxu1  ;;  %v21118_v62 = vld [vmem:[%s26517_s5 + $0x28] sm:$0xff]  }
 0x63f   : > { %v6554_v25 = vmax.f32 %v6552_v9, %v6553_v23  ;;  %v6562_v1 = vrot.slane %v6561_v5, 4  ;;  %v5907_v7 = vcombine.high %v5731_v30, %v5731_v30  ;;  %v5914_v36 = vrot.slane %v5731_v30, %v23664_v6  ;;  %v23762_v49 = vpop.f32.mrb[6].mxu1  ;;  %18672 = vmatprep.subr.bf16.mxu0 %v21118_v62 }
 0x640   : > { %v6537_v11 = vrot.slane %v6536_v3, 2  ;;  %v6545_v55 = vmax.f32 %v6543_v29, %v6544_v18  ;;  %v5697_v35 = vadd.f32 %v19917_v16, %v23659_v13  ;;  %v5702_v12 = vadd.f32 %v19918_v26, %v23659_v13  ;;  %v23766_v19 = vpop.f32.mrb[7].mxu1  ;;  %18673 = vmatpush3.bf16.msra.mxu0 %v21118_v62 }
 0x641   : > { %v6555_v39 = vrot.slane %v6554_v25, 2  ;;  %v6563_v22 = vmax.f32 %v6561_v5, %v6562_v1  ;;  %v5921_v63 = vrot.slane %v5907_v7, %v23664_v6  ;;  %v5922_v8 = vcombine.high %v5914_v36, %v5914_v36 }
 0x642   : > { %v6538_v61 = vmax.f32 %v6536_v3, %v6537_v11  ;;  %v6546_v20 = vrot.slane %v6545_v55, 2  ;;  %v6569_v14 = vsel %vm528_vm6, %v5914_v36, -inf  ;;  %v5729_v47 = vmax.f32 %v5697_v35, 0.0 }
 0x643   : > { %v6556_v37 = vmax.f32 %v6554_v25, %v6555_v39  ;;  %v6564_v17 = vrot.slane %v6563_v22, 2  ;;  %v5923_v45 = vcombine.high %v5921_v63, %v5921_v63  ;;  %v6578_v60 = vsel %vm528_vm6, %v5922_v8, -inf }
 0x644   : > { %v6539_v48 = vrot.slane %v6538_v61, 1  ;;  %v6547_v56 = vmax.f32 %v6545_v55, %v6546_v20  ;;  %v6587_v24 = vsel %vm528_vm6, %v5921_v63, -inf  ;;  %v5873_v50 = vcombine.high %v5729_v47, %v5729_v47  ;;  %v21119_v63 = vld [vmem:[%s26517_s5 + $0x30] sm:$0xff]  }
 0x645   : > { %v6557_v58 = vrot.slane %v6556_v37, 1  ;;  %v6565_v10 = vmax.f32 %v6563_v22, %v6564_v17  ;;  %v6596_v51 = vsel %vm528_vm6, %v5923_v45, -inf  ;;  %v5880_v31 = vrot.slane %v5729_v47, %v23664_v6  ;;  %v23774_v34 = vpop.f32.mrb[8].mxu1  ;;  %18674 = vmatprep.subr.bf16.mxu0 %v21119_v63 }
 0x646   : > { %v6540_v46 = vmax.f32 %v6538_v61, %v6539_v48  ;;  %v6548_v28 = vrot.slane %v6547_v56, 1  ;;  %v5887_v43 = vrot.slane %v5873_v50, %v23664_v6  ;;  %v5734_v41 = vmax.f32 %v5702_v12, 0.0  ;;  %v23777_v9 = vpop.f32.mrb[9].mxu1  ;;  %18675 = vmatpush3.bf16.msra.mxu0 %v21119_v63 }
 0x647   : > { %v6558_v44 = vmax.f32 %v6556_v37, %v6557_v58  ;;  %v6566_v15 = vrot.slane %v6565_v10, 1  ;;  %v5888_v42 = vcombine.high %v5880_v31, %v5880_v31  ;;  %v6568_v29 = vsel %vm528_vm6, %v5880_v31, -inf  ;;  %v23780_v32 = vpop.f32.mrb[10].mxu1  ;;  %v26718_v31 = vld [vmem:[#allocation18_spill] sm:$0xff] }
 0x648   : > { %v6549_v23 = vmax.f32 %v6547_v56, %v6548_v28  ;;  %v5889_v5 = vcombine.high %v5887_v43, %v5887_v43  ;;  %v6570_v30 = vmax.f32 %v6568_v29, %v6569_v14  ;;  %v6586_v3 = vsel %vm528_vm6, %v5887_v43, -inf  ;;  %v23786_v18 = vpop.f32.mrb[11].mxu1 }
 0x649   : > { %v6567_v16 = vmax.f32 %v6565_v10, %v6566_v15  ;;  %v6577_v26 = vsel %vm528_vm6, %v5888_v42, -inf  ;;  %v6588_v25 = vmax.f32 %v6586_v3, %v6587_v24  ;;  %v5958_v1 = vcombine.high %v5734_v41, %v5734_v41 }
 0x64a   : > { %v7114_v7 = vsel %vm7100_vm7, %v6549_v23, %v6540_v46  ;;  %v6571_v36 = vrot.slane %v6570_v30, 4  ;;  %v6579_v11 = vmax.f32 %v6577_v26, %v6578_v60  ;;  %v6595_v55 = vsel %vm528_vm6, %v5889_v5, -inf  ;;  %v26720_v23 = vld [vmem:[#allocation9_spill] sm:$0xff]  ;;  %v26721_v26 = vld [vmem:[#allocation12_spill] sm:$0xff] }
 0x64b   : > { %v7115_v35 = vsel %vm7102_vm8, %v6558_v44, %v7114_v7  ;;  %v6589_v12 = vrot.slane %v6588_v25, 4  ;;  %v6597_v39 = vmax.f32 %v6595_v55, %v6596_v51  ;;  %v5965_v22 = vrot.slane %v5734_v41, %v23664_v6  ;;  %v26719_v44 = vld [vmem:[#allocation10_spill] sm:$0xff] }
 0x64c   : > { %v6572_v8 = vmax.f32 %v6570_v30, %v6571_v36  ;;  %v6580_v61 = vrot.slane %v6579_v11, 4  ;;  %v7116_v20 = vsel %vm7104_vm9, %v6567_v16, %v7115_v35  ;;  %v5972_v14 = vrot.slane %v5958_v1, %v23664_v6 }
 0x64d   : > { %v6590_v47 = vmax.f32 %v6588_v25, %v6589_v12  ;;  %v6598_v37 = vrot.slane %v6597_v39, 4  ;;  %v5973_v17 = vcombine.high %v5965_v22, %v5965_v22  ;;  %v6605_v45 = vsel %vm528_vm6, %v5965_v22, -inf  ;;  %v23800_v50 = vpop.f32.mrb[12].mxu1 }
 0x64e   : > { %v6573_v60 = vrot.slane %v6572_v8, 2  ;;  %v6581_v48 = vmax.f32 %v6579_v11, %v6580_v61  ;;  %v5974_v56 = vcombine.high %v5972_v14, %v5972_v14  ;;  %v6623_v24 = vsel %vm528_vm6, %v5972_v14, -inf }
 0x64f   : > { %v6591_v58 = vrot.slane %v6590_v47, 2  ;;  %v6599_v10 = vmax.f32 %v6597_v39, %v6598_v37  ;;  %v6614_v51 = vsel %vm528_vm6, %v5973_v17, -inf  ;;  %v19919_v46 = vadd.f32 %v23695_v52, %v26718_v31 }
 0x650   : > { %v6574_v28 = vmax.f32 %v6572_v8, %v6573_v60  ;;  %v6582_v43 = vrot.slane %v6581_v48, 2  ;;  %v6632_v41 = vsel %vm528_vm6, %v5974_v56, -inf  ;;  %v19920_v15 = vadd.f32 %v23701_v54, %v26719_v44  ;;  %v23815_v54 = vpop.f32.mrb[13].mxu1 }
 0x651   : > { %v6592_v42 = vmax.f32 %v6590_v47, %v6591_v58  ;;  %v6600_v29 = vrot.slane %v6599_v10, 2  ;;  %v5700_v62 = vadd.f32 %v19919_v46, %v23659_v13  ;;  %v19921_v5 = vadd.f32 %v23703_v40, %v26720_v23  ;;  %v23825_v31 = vpop.f32.mrb[14].mxu1 }
 0x652   : > { %v6575_v30 = vrot.slane %v6574_v28, 1  ;;  %v6583_v3 = vmax.f32 %v6581_v48, %v6582_v43  ;;  %v5703_v16 = vadd.f32 %v19920_v15, %v23659_v13  ;;  %v19922_v52 = vadd.f32 %v23709_v38, %v26721_v26 }
 0x653   : > { %v6593_v25 = vrot.slane %v6592_v42, 1  ;;  %v6601_v1 = vmax.f32 %v6599_v10, %v6600_v29  ;;  %v5732_v7 = vmax.f32 %v5700_v62, 0.0  ;;  %v5701_v36 = vadd.f32 %v19921_v5, %v23659_v13 }
 0x654   : > { %v6576_v11 = vmax.f32 %v6574_v28, %v6575_v30  ;;  %v6584_v55 = vrot.slane %v6583_v3, 1  ;;  %v5735_v35 = vmax.f32 %v5703_v16, 0.0  ;;  %v5706_v12 = vadd.f32 %v19922_v52, %v23659_v13 }
 0x655   : > { %v6594_v40 = vmax.f32 %v6592_v42, %v6593_v25  ;;  %v6602_v39 = vrot.slane %v6601_v1, 1  ;;  %v5924_v22 = vcombine.high %v5732_v7, %v5732_v7  ;;  %v5931_v63 = vrot.slane %v5732_v7, %v23664_v6 }
 0x656   : > { %v6585_v8 = vmax.f32 %v6583_v3, %v6584_v55  ;;  %v7117_v38 = vsel %vm7106_vm10, %v6576_v11, %v7116_v20  ;;  %v5975_v61 = vcombine.high %v5735_v35, %v5735_v35  ;;  %v5982_v14 = vrot.slane %v5735_v35, %v23664_v6  ;;  %v23837_v35 = vpop.f32.mrb[15].mxu1 }
 0x657   : > { %v6603_v47 = vmax.f32 %v6601_v1, %v6602_v39  ;;  %v5938_v37 = vrot.slane %v5924_v22, %v23664_v6  ;;  %v5939_v17 = vcombine.high %v5931_v63, %v5931_v63  ;;  %v6604_v60 = vsel %vm528_vm6, %v5931_v63, -inf }
 0x658   : > { %v7118_v48 = vsel %vm7108_vm11, %v6585_v8, %v7117_v38  ;;  %v6606_v56 = vmax.f32 %v6604_v60, %v6605_v45  ;;  %v5989_v58 = vrot.slane %v5975_v61, %v23664_v6  ;;  %v5990_v10 = vcombine.high %v5982_v14, %v5982_v14 }
 0x659   : > { %v7119_v46 = vsel %vm7110_vm12, %v6594_v40, %v7118_v48  ;;  %v5940_v20 = vcombine.high %v5938_v37, %v5938_v37  ;;  %v6613_v28 = vsel %vm528_vm6, %v5939_v17, -inf  ;;  %v6622_v43 = vsel %vm528_vm6, %v5938_v37, -inf }
 0x65a   : > { %v7120_v44 = vsel %vm7112_vm13, %v6603_v47, %v7119_v46  ;;  %v6607_v15 = vrot.slane %v6606_v56, 4  ;;  %v6615_v42 = vmax.f32 %v6613_v28, %v6614_v51  ;;  %v6624_v29 = vmax.f32 %v6622_v43, %v6623_v24 }
 0x65b   : > { %7173 = vst.msk [vmem:[#allocation4 + $0x21] sm:$0xff] %vm525_vm5, %v7120_v44  ;;  %v6631_v45 = vsel %vm528_vm6, %v5940_v20, -inf  ;;  %v5991_v62 = vcombine.high %v5989_v58, %v5989_v58  ;;  %v6641_v23 = vsel %vm528_vm6, %v5982_v14, -inf  ;;  %v6650_v5 = vsel %vm528_vm6, %v5990_v10, -inf }
 0x65c   : > { %v6608_v30 = vmax.f32 %v6606_v56, %v6607_v15  ;;  %v6616_v3 = vrot.slane %v6615_v42, 4  ;;  %v6625_v16 = vrot.slane %v6624_v29, 4  ;;  %v6633_v26 = vmax.f32 %v6631_v45, %v6632_v41  ;;  %v21120_v15 = vld [vmem:[%s26517_s5 + $0x38] sm:$0xff]  }
 0x65d   : > { %v6659_v52 = vsel %vm528_vm6, %v5989_v58, -inf  ;;  %v6668_v25 = vsel %vm528_vm6, %v5991_v62, -inf  ;;  %v5733_v1 = vmax.f32 %v5701_v36, 0.0  ;;  %v5738_v51 = vmax.f32 %v5706_v12, 0.0  ;;  %18676 = vmatprep.subr.bf16.mxu0 %v21120_v15 }
 0x65e   : > { %v6609_v24 = vrot.slane %v6608_v30, 2  ;;  %v6617_v7 = vmax.f32 %v6615_v42, %v6616_v3  ;;  %v6626_v11 = vmax.f32 %v6624_v29, %v6625_v16  ;;  %v6634_v55 = vrot.slane %v6633_v26, 4  ;;  %18677 = vmatpush3.bf16.msra.mxu0 %v21120_v15 }
 0x65f   : > { %v5941_v40 = vcombine.high %v5733_v1, %v5733_v1  ;;  %v5948_v39 = vrot.slane %v5733_v1, %v23664_v6  ;;  %v6026_v22 = vcombine.high %v5738_v51, %v5738_v51  ;;  %v6033_v63 = vrot.slane %v5738_v51, %v23664_v6 }
 0x660   : > { %v6610_v8 = vmax.f32 %v6608_v30, %v6609_v24  ;;  %v6618_v41 = vrot.slane %v6617_v7, 2  ;;  %v6627_v38 = vrot.slane %v6626_v11, 2  ;;  %v6635_v61 = vmax.f32 %v6633_v26, %v6634_v55 }
 0x661   : > { %v5955_v14 = vrot.slane %v5941_v40, %v23664_v6  ;;  %v5956_v36 = vcombine.high %v5948_v39, %v5948_v39  ;;  %v6640_v12 = vsel %vm528_vm6, %v5948_v39, -inf  ;;  %v6040_v47 = vrot.slane %v6026_v22, %v23664_v6 }
 0x662   : > { %v6611_v37 = vrot.slane %v6610_v8, 1  ;;  %v6619_v17 = vmax.f32 %v6617_v7, %v6618_v41  ;;  %v6628_v60 = vmax.f32 %v6626_v11, %v6627_v38  ;;  %v6636_v48 = vrot.slane %v6635_v61, 2 }
 0x663   : > { %v5957_v56 = vcombine.high %v5955_v14, %v5955_v14  ;;  %v6642_v58 = vmax.f32 %v6640_v12, %v6641_v23  ;;  %v6649_v10 = vsel %vm528_vm6, %v5956_v36, -inf  ;;  %v6658_v46 = vsel %vm528_vm6, %v5955_v14, -inf }
 0x664   : > { %v6612_v20 = vmax.f32 %v6610_v8, %v6611_v37  ;;  %v6620_v28 = vrot.slane %v6619_v17, 1  ;;  %v6629_v43 = vrot.slane %v6628_v60, 1  ;;  %v6637_v44 = vmax.f32 %v6635_v61, %v6636_v48 }
 0x665   : > { %v6643_v42 = vrot.slane %v6642_v58, 4  ;;  %v6651_v29 = vmax.f32 %v6649_v10, %v6650_v5  ;;  %v6660_v45 = vmax.f32 %v6658_v46, %v6659_v52  ;;  %v6667_v62 = vsel %vm528_vm6, %v5957_v56, -inf  ;;  %v26723_v56 = vld [vmem:[#allocation14_spill] sm:$0xff] }
 0x666   : > { %v6621_v30 = vmax.f32 %v6619_v17, %v6620_v28  ;;  %v6630_v3 = vmax.f32 %v6628_v60, %v6629_v43  ;;  %v6638_v23 = vrot.slane %v6637_v44, 1  ;;  %v6669_v16 = vmax.f32 %v6667_v62, %v6668_v25  ;;  %v26722_v60 = vld [vmem:[#allocation13_spill] sm:$0xff] }
 0x667   : > { %v6644_v26 = vmax.f32 %v6642_v58, %v6643_v42  ;;  %v6652_v1 = vrot.slane %v6651_v29, 4  ;;  %v6661_v51 = vrot.slane %v6660_v45, 4  ;;  %v6041_v24 = vcombine.high %v6033_v63, %v6033_v63 }
 0x668   : > { %v6639_v7 = vmax.f32 %v6637_v44, %v6638_v23  ;;  %v7121_v11 = vsel %vm7100_vm7, %v6621_v30, %v6612_v20  ;;  %v6670_v55 = vrot.slane %v6669_v16, 4  ;;  %v6042_v40 = vcombine.high %v6040_v47, %v6040_v47 }
 0x669   : > { %v7122_v5 = vsel %vm7102_vm8, %v6630_v3, %v7121_v11  ;;  %v6645_v52 = vrot.slane %v6644_v26, 2  ;;  %v6653_v39 = vmax.f32 %v6651_v29, %v6652_v1  ;;  %v6662_v22 = vmax.f32 %v6660_v45, %v6661_v51 }
 0x66a   : > { %v6671_v8 = vmax.f32 %v6669_v16, %v6670_v55  ;;  %v7123_v41 = vsel %vm7104_vm9, %v6639_v7, %v7122_v5  ;;  %v6677_v25 = vsel %vm528_vm6, %v6033_v63, -inf  ;;  %v6686_v38 = vsel %vm528_vm6, %v6041_v24, -inf  ;;  %v26724_v63 = vld [vmem:[#allocation16_spill] sm:$0xff] }
 0x66b   : > { %v6646_v61 = vmax.f32 %v6644_v26, %v6645_v52  ;;  %v6654_v14 = vrot.slane %v6653_v39, 2  ;;  %v6663_v36 = vrot.slane %v6662_v22, 2  ;;  %v6695_v12 = vsel %vm528_vm6, %v6040_v47, -inf }
 0x66c   : > { %v6672_v37 = vrot.slane %v6671_v8, 2  ;;  %v6704_v17 = vsel %vm528_vm6, %v6042_v40, -inf  ;;  %v19923_v48 = vadd.f32 %v23712_v53, %v26722_v60  ;;  %v19924_v58 = vadd.f32 %v23717_v4, %v26723_v56 }
 0x66d   : > { %v6647_v10 = vrot.slane %v6646_v61, 1  ;;  %v6655_v46 = vmax.f32 %v6653_v39, %v6654_v14  ;;  %v6664_v20 = vmax.f32 %v6662_v22, %v6663_v36  ;;  %v19925_v28 = vadd.f32 %v23721_v27, %v26724_v63 }
 0x66e   : > { %v6673_v43 = vmax.f32 %v6671_v8, %v6672_v37  ;;  %v5704_v44 = vadd.f32 %v19923_v48, %v23659_v13  ;;  %v5707_v47 = vadd.f32 %v19924_v58, %v23659_v13  ;;  %v5710_v15 = vadd.f32 %v23728_v57, %v23659_v13 }
 0x66f   : > { %v6648_v42 = vmax.f32 %v6646_v61, %v6647_v10  ;;  %v6656_v29 = vrot.slane %v6655_v46, 1  ;;  %v6665_v53 = vrot.slane %v6664_v20, 1  ;;  %v5705_v45 = vadd.f32 %v19925_v28, %v23659_v13 }
 0x670   : > { %v6674_v4 = vrot.slane %v6673_v43, 1  ;;  %v5736_v62 = vmax.f32 %v5704_v44, 0.0  ;;  %v5739_v30 = vmax.f32 %v5707_v47, 0.0  ;;  %v23868_v3 = vmax.f32 %v5710_v15, 0.0 }
 0x671   : > { %v6657_v23 = vmax.f32 %v6655_v46, %v6656_v29  ;;  %v6666_v27 = vmax.f32 %v6664_v20, %v6665_v53  ;;  %v7124_v16 = vsel %vm7106_vm10, %v6648_v42, %v7123_v41  ;;  %v5737_v26 = vmax.f32 %v5705_v45, 0.0 }
 0x672   : > { %v6675_v1 = vmax.f32 %v6673_v43, %v6674_v4  ;;  %v5992_v51 = vcombine.high %v5736_v62, %v5736_v62  ;;  %v5999_v24 = vrot.slane %v5736_v62, %v23664_v6  ;;  %v6043_v57 = vcombine.high %v5739_v30, %v5739_v30 }
 0x673   : > { %v7125_v7 = vsel %vm7108_vm11, %v6657_v23, %v7124_v16  ;;  %v6050_v11 = vrot.slane %v5739_v30, %v23664_v6  ;;  %v6009_v55 = vcombine.high %v5737_v26, %v5737_v26  ;;  %v6016_v40 = vrot.slane %v5737_v26, %v23664_v6 }
 0x674   : > { %v7126_v5 = vsel %vm7110_vm12, %v6666_v27, %v7125_v7  ;;  %v6006_v52 = vrot.slane %v5992_v51, %v23664_v6  ;;  %v6007_v39 = vcombine.high %v5999_v24, %v5999_v24  ;;  %v6676_v22 = vsel %vm528_vm6, %v5999_v24, -inf }
 0x675   : > { %v7127_v8 = vsel %vm7112_vm13, %v6675_v1, %v7126_v5  ;;  %v6678_v41 = vmax.f32 %v6676_v22, %v6677_v25  ;;  %v6057_v61 = vrot.slane %v6043_v57, %v23664_v6  ;;  %v6058_v14 = vcombine.high %v6050_v11, %v6050_v11 }
 0x676   : > { %7174 = vst.msk [vmem:[#allocation4 + $0x31] sm:$0xff] %vm525_vm5, %v7127_v8  ;;  %v6008_v36 = vcombine.high %v6006_v52, %v6006_v52  ;;  %v6685_v37 = vsel %vm528_vm6, %v6007_v39, -inf  ;;  %v6694_v60 = vsel %vm528_vm6, %v6006_v52, -inf  ;;  %v6713_v48 = vsel %vm528_vm6, %v6050_v11, -inf }
 0x677   : > { %v6679_v56 = vrot.slane %v6678_v41, 4  ;;  %v6687_v58 = vmax.f32 %v6685_v37, %v6686_v38  ;;  %v6696_v10 = vmax.f32 %v6694_v60, %v6695_v12  ;;  %v6059_v46 = vcombine.high %v6057_v61, %v6057_v61  ;;  %v23896_v60 = vld [vmem:[%s26517_s5] sm:$0xff]  }
 0x678   : > { %v6703_v20 = vsel %vm528_vm6, %v6008_v36, -inf  ;;  %v6722_v25 = vsel %vm528_vm6, %v6058_v14, -inf  ;;  %v6731_v63 = vsel %vm528_vm6, %v6057_v61, -inf  ;;  %v6023_v28 = vrot.slane %v6009_v55, %v23664_v6  ;;  %18686 = vmatprep.subr.bf16.mxu0 %v23896_v60 }
 0x679   : > { %v6680_v43 = vmax.f32 %v6678_v41, %v6679_v56  ;;  %v6688_v44 = vrot.slane %v6687_v58, 4  ;;  %v6697_v47 = vrot.slane %v6696_v10, 4  ;;  %v6705_v15 = vmax.f32 %v6703_v20, %v6704_v17 }
 0x67a   : > { %v6740_v42 = vsel %vm528_vm6, %v6059_v46, -inf  ;;  %v6024_v29 = vcombine.high %v6016_v40, %v6016_v40  ;;  %v6025_v53 = vcombine.high %v6023_v28, %v6023_v28  ;;  %v6712_v38 = vsel %vm528_vm6, %v6016_v40, -inf }
 0x67b   : > { %v6681_v12 = vrot.slane %v6680_v43, 2  ;;  %v6689_v45 = vmax.f32 %v6687_v58, %v6688_v44  ;;  %v6698_v4 = vmax.f32 %v6696_v10, %v6697_v47  ;;  %v6706_v62 = vrot.slane %v6705_v15, 4 }
 0x67c   : > { %v6714_v30 = vmax.f32 %v6712_v38, %v6713_v48  ;;  %v6721_v23 = vsel %vm528_vm6, %v6024_v29, -inf  ;;  %v6730_v27 = vsel %vm528_vm6, %v6023_v28, -inf  ;;  %v6739_v16 = vsel %vm528_vm6, %v6025_v53, -inf }
 0x67d   : > { %v6682_v26 = vmax.f32 %v6680_v43, %v6681_v12  ;;  %v6690_v1 = vrot.slane %v6689_v45, 2  ;;  %v6699_v17 = vrot.slane %v6698_v4, 2  ;;  %v6707_v51 = vmax.f32 %v6705_v15, %v6706_v62 }
 0x67e   : > { %v6715_v24 = vrot.slane %v6714_v30, 4  ;;  %v6723_v57 = vmax.f32 %v6721_v23, %v6722_v25  ;;  %v6732_v7 = vmax.f32 %v6730_v27, %v6731_v63  ;;  %v6741_v11 = vmax.f32 %v6739_v16, %v6740_v42 }
 0x67f   : > { %v6683_v55 = vrot.slane %v6682_v26, 1  ;;  %v6691_v40 = vmax.f32 %v6689_v45, %v6690_v1  ;;  %v6700_v5 = vmax.f32 %v6698_v4, %v6699_v17  ;;  %v6708_v52 = vrot.slane %v6707_v51, 2 }
 0x680   : > { %v6716_v39 = vmax.f32 %v6714_v30, %v6715_v24  ;;  %v6724_v22 = vrot.slane %v6723_v57, 4  ;;  %v6733_v8 = vrot.slane %v6732_v7, 4  ;;  %v6742_v41 = vrot.slane %v6741_v11, 4 }
 0x681   : > { %v6684_v61 = vmax.f32 %v6682_v26, %v6683_v55  ;;  %v6692_v14 = vrot.slane %v6691_v40, 1  ;;  %v6701_v36 = vrot.slane %v6700_v5, 1  ;;  %v6709_v37 = vmax.f32 %v6707_v51, %v6708_v52 }
 0x682   : > { %v6717_v48 = vrot.slane %v6716_v39, 2  ;;  %v6725_v56 = vmax.f32 %v6723_v57, %v6724_v22  ;;  %v6734_v58 = vmax.f32 %v6732_v7, %v6733_v8  ;;  %v6743_v10 = vmax.f32 %v6741_v11, %v6742_v41  ;;  %v23921_v22 = vld [vmem:[%s26516_s4] ss:$0 sm:$0xff] }
 0x683   : > { %v6693_v46 = vmax.f32 %v6691_v40, %v6692_v14  ;;  %v6702_v20 = vmax.f32 %v6700_v5, %v6701_v36  ;;  %v6710_v25 = vrot.slane %v6709_v37, 1  ;;  %v6094_v63 = vcombine.high %v23868_v3, %v23868_v3 }
 0x684   : > { %v6718_v28 = vmax.f32 %v6716_v39, %v6717_v48  ;;  %v6726_v43 = vrot.slane %v6725_v56, 2  ;;  %v6735_v44 = vrot.slane %v6734_v58, 2  ;;  %v6744_v47 = vrot.slane %v6743_v10, 2 }
 0x685   : > { %v6711_v15 = vmax.f32 %v6709_v37, %v6710_v25  ;;  %v7128_v42 = vsel %vm7100_vm7, %v6693_v46, %v6684_v61  ;;  %v6101_v29 = vrot.slane %v23868_v3, %v23664_v6  ;;  %v6108_v53 = vrot.slane %v6094_v63, %v23664_v6 }
 0x686   : > { %v7129_v38 = vsel %vm7102_vm8, %v6702_v20, %v7128_v42  ;;  %v6719_v12 = vrot.slane %v6718_v28, 1  ;;  %v6727_v45 = vmax.f32 %v6725_v56, %v6726_v43  ;;  %v6736_v4 = vmax.f32 %v6734_v58, %v6735_v44 }
 0x687   : > { %v6745_v62 = vmax.f32 %v6743_v10, %v6744_v47  ;;  %v7130_v30 = vsel %vm7104_vm9, %v6711_v15, %v7129_v38  ;;  %v6109_v23 = vcombine.high %v6101_v29, %v6101_v29  ;;  %v6110_v27 = vcombine.high %v6108_v53, %v6108_v53 }
 0x688   : > { %v6720_v16 = vmax.f32 %v6718_v28, %v6719_v12  ;;  %v6728_v26 = vrot.slane %v6727_v45, 1  ;;  %v6737_v1 = vrot.slane %v6736_v4, 1  ;;  %v6749_v17 = vsel %vm528_vm6, %v6101_v29, -inf }
 0x689   : > { %v6746_v51 = vrot.slane %v6745_v62, 1  ;;  %v6758_v3 = vsel %vm528_vm6, %v6109_v23, -inf  ;;  %v6767_v24 = vsel %vm528_vm6, %v6108_v53, -inf  ;;  %v6776_v57 = vsel %vm528_vm6, %v6110_v27, -inf }
 0x68a   : > { %v6729_v7 = vmax.f32 %v6727_v45, %v6728_v26  ;;  %v6738_v11 = vmax.f32 %v6736_v4, %v6737_v1  ;;  %v7131_v55 = vsel %vm7106_vm10, %v6720_v16, %v7130_v30  ;;  %v5708_v40 = vadd.f32 %v23659_v13, %v23732_v59 }
 0x68b   : > { %v6747_v5 = vmax.f32 %v6745_v62, %v6746_v51  ;;  %v5711_v52 = vadd.f32 %v23735_v2, %v23659_v13  ;;  %v5709_v39 = vadd.f32 %v23659_v13, %v23741_v21  ;;  %v5714_v8 = vadd.f32 %v23921_v22, %v23752_v33 }
 0x68c   : > { %v7132_v41 = vsel %vm7108_vm11, %v6729_v7, %v7131_v55  ;;  %v5740_v61 = vmax.f32 %v5708_v40, 0.0  ;;  %v5712_v59 = vadd.f32 %v23921_v22, %v23759_v0  ;;  %v23930_v2 = vadd.f32 %v23921_v22, %v23762_v49 }
 0x68d   : > { %v7133_v13 = vsel %vm7110_vm12, %v6738_v11, %v7132_v41  ;;  %v5743_v21 = vmax.f32 %v5711_v52, 0.0  ;;  %v5741_v14 = vmax.f32 %v5709_v39, 0.0  ;;  %v23933_v36 = vmax.f32 %v5714_v8, 0.0 }
 0x68e   : > { %v7134_v37 = vsel %vm7112_vm13, %v6747_v5, %v7133_v13  ;;  %v6060_v48 = vcombine.high %v5740_v61, %v5740_v61  ;;  %v6067_v33 = vrot.slane %v5740_v61, %v23664_v6  ;;  %v23937_v56 = vmax.f32 %v5712_v59, 0.0 }
 0x68f   : > { %7175 = vst.msk [vmem:[#allocation4 + $0x41] sm:$0xff] %vm525_vm5, %v7134_v37  ;;  %v6111_v0 = vcombine.high %v5743_v21, %v5743_v21  ;;  %v6118_v58 = vrot.slane %v5743_v21, %v23664_v6  ;;  %v6077_v49 = vcombine.high %v5741_v14, %v5741_v14  ;;  %v6084_v10 = vrot.slane %v5741_v14, %v23664_v6 }
 0x690   : > { %v6074_v46 = vrot.slane %v6060_v48, %v23664_v6  ;;  %v6075_v20 = vcombine.high %v6067_v33, %v6067_v33  ;;  %v6748_v25 = vsel %vm528_vm6, %v6067_v33, -inf  ;;  %v6162_v63 = vcombine.high %v23933_v36, %v23933_v36 }
 0x691   : > { %v6750_v28 = vmax.f32 %v6748_v25, %v6749_v17  ;;  %v6125_v43 = vrot.slane %v6111_v0, %v23664_v6  ;;  %v6126_v44 = vcombine.high %v6118_v58, %v6118_v58  ;;  %v6785_v47 = vsel %vm528_vm6, %v6118_v58, -inf }
 0x692   : > { %v6076_v15 = vcombine.high %v6074_v46, %v6074_v46  ;;  %v6757_v42 = vsel %vm528_vm6, %v6075_v20, -inf  ;;  %v6766_v29 = vsel %vm528_vm6, %v6074_v46, -inf  ;;  %v6091_v53 = vrot.slane %v6077_v49, %v23664_v6 }
 0x693   : > { %v6751_v38 = vrot.slane %v6750_v28, 4  ;;  %v6759_v12 = vmax.f32 %v6757_v42, %v6758_v3  ;;  %v6768_v45 = vmax.f32 %v6766_v29, %v6767_v24  ;;  %v6127_v4 = vcombine.high %v6125_v43, %v6125_v43 }
 0x694   : > { %v6775_v62 = vsel %vm528_vm6, %v6076_v15, -inf  ;;  %v6794_v30 = vsel %vm528_vm6, %v6126_v44, -inf  ;;  %v6803_v23 = vsel %vm528_vm6, %v6125_v43, -inf  ;;  %v6092_v27 = vcombine.high %v6084_v10, %v6084_v10 }
 0x695   : > { %v6752_v16 = vmax.f32 %v6750_v28, %v6751_v38  ;;  %v6760_v26 = vrot.slane %v6759_v12, 4  ;;  %v6769_v1 = vrot.slane %v6768_v45, 4  ;;  %v6777_v17 = vmax.f32 %v6775_v62, %v6776_v57 }
 0x696   : > { %v6812_v51 = vsel %vm528_vm6, %v6127_v4, -inf  ;;  %v6093_v7 = vcombine.high %v6091_v53, %v6091_v53  ;;  %v6784_v11 = vsel %vm528_vm6, %v6084_v10, -inf  ;;  %v6793_v3 = vsel %vm528_vm6, %v6092_v27, -inf }
 0x697   : > { %v6753_v24 = vrot.slane %v6752_v16, 2  ;;  %v6761_v55 = vmax.f32 %v6759_v12, %v6760_v26  ;;  %v6770_v40 = vmax.f32 %v6768_v45, %v6769_v1  ;;  %v6778_v5 = vrot.slane %v6777_v17, 4 }
 0x698   : > { %v6786_v52 = vmax.f32 %v6784_v11, %v6785_v47  ;;  %v6795_v39 = vmax.f32 %v6793_v3, %v6794_v30  ;;  %v6802_v8 = vsel %vm528_vm6, %v6091_v53, -inf  ;;  %v6811_v41 = vsel %vm528_vm6, %v6093_v7, -inf }
 0x699   : > { %v6754_v61 = vmax.f32 %v6752_v16, %v6753_v24  ;;  %v6762_v59 = vrot.slane %v6761_v55, 2  ;;  %v6771_v57 = vrot.slane %v6770_v40, 2  ;;  %v6779_v13 = vmax.f32 %v6777_v17, %v6778_v5 }
 0x69a   : > { %v6787_v21 = vrot.slane %v6786_v52, 4  ;;  %v6796_v14 = vrot.slane %v6795_v39, 4  ;;  %v6804_v37 = vmax.f32 %v6802_v8, %v6803_v23  ;;  %v6813_v48 = vmax.f32 %v6811_v41, %v6812_v51 }
 0x69b   : > { %v6755_v33 = vrot.slane %v6754_v61, 1  ;;  %v6763_v0 = vmax.f32 %v6761_v55, %v6762_v59  ;;  %v6772_v58 = vmax.f32 %v6770_v40, %v6771_v57  ;;  %v6780_v49 = vrot.slane %v6779_v13, 2 }
 0x69c   : > { %v6788_v10 = vmax.f32 %v6786_v52, %v6787_v21  ;;  %v6797_v46 = vmax.f32 %v6795_v39, %v6796_v14  ;;  %v6805_v20 = vrot.slane %v6804_v37, 4  ;;  %v6814_v25 = vrot.slane %v6813_v48, 4 }
 0x69d   : > { %v6756_v28 = vmax.f32 %v6754_v61, %v6755_v33  ;;  %v6764_v43 = vrot.slane %v6763_v0, 1  ;;  %v6773_v44 = vrot.slane %v6772_v58, 1  ;;  %v6781_v47 = vmax.f32 %v6779_v13, %v6780_v49 }
 0x69e   : > { %v6789_v15 = vrot.slane %v6788_v10, 2  ;;  %v6798_v42 = vrot.slane %v6797_v46, 2  ;;  %v6806_v29 = vmax.f32 %v6804_v37, %v6805_v20  ;;  %v6815_v53 = vmax.f32 %v6813_v48, %v6814_v25 }
 0x69f   : > { %v6765_v38 = vmax.f32 %v6763_v0, %v6764_v43  ;;  %v6774_v12 = vmax.f32 %v6772_v58, %v6773_v44  ;;  %v6782_v45 = vrot.slane %v6781_v47, 1  ;;  %v6169_v4 = vrot.slane %v23933_v36, %v23664_v6 }
 0x6a0   : > { %v6790_v62 = vmax.f32 %v6788_v10, %v6789_v15  ;;  %v6799_v30 = vmax.f32 %v6797_v46, %v6798_v42  ;;  %v6807_v23 = vrot.slane %v6806_v29, 2  ;;  %v6816_v27 = vrot.slane %v6815_v53, 2 }
 0x6a1   : > { %v6783_v16 = vmax.f32 %v6781_v47, %v6782_v45  ;;  %v7135_v26 = vsel %vm7100_vm7, %v6765_v38, %v6756_v28  ;;  %v6176_v1 = vrot.slane %v6162_v63, %v23664_v6  ;;  %v6177_v17 = vcombine.high %v6169_v4, %v6169_v4 }
 0x6a2   : > { %v7136_v51 = vsel %vm7102_vm8, %v6774_v12, %v7135_v26  ;;  %v6791_v7 = vrot.slane %v6790_v62, 1  ;;  %v6800_v11 = vrot.slane %v6799_v30, 1  ;;  %v6808_v3 = vmax.f32 %v6806_v29, %v6807_v23 }
 0x6a3   : > { %v6817_v24 = vmax.f32 %v6815_v53, %v6816_v27  ;;  %v7137_v55 = vsel %vm7104_vm9, %v6783_v16, %v7136_v51  ;;  %v6178_v40 = vcombine.high %v6176_v1, %v6176_v1  ;;  %v6821_v5 = vsel %vm528_vm6, %v6169_v4, -inf  ;;  %v23993_v27 = vld [vmem:[#allocation4] sm:$0xff]  ;;  %v23995_v16 = vld [vmem:[#allocation4 + $0x8] sm:$0x3] }
 0x6a4   : > { %v6792_v52 = vmax.f32 %v6790_v62, %v6791_v7  ;;  %v6801_v39 = vmax.f32 %v6799_v30, %v6800_v11  ;;  %v6809_v8 = vrot.slane %v6808_v3, 1  ;;  %v6830_v41 = vsel %vm528_vm6, %v6177_v17, -inf }
 0x6a5   : > { %v6818_v61 = vrot.slane %v6817_v24, 1  ;;  %v6839_v36 = vsel %vm528_vm6, %v6176_v1, -inf  ;;  %v6848_v63 = vsel %vm528_vm6, %v6178_v40, -inf  ;;  %v6128_v59 = vcombine.high %v23937_v56, %v23937_v56 }
 0x6a6   : > { %v6810_v57 = vmax.f32 %v6808_v3, %v6809_v8  ;;  %v7138_v13 = vsel %vm7106_vm10, %v6792_v52, %v7137_v55  ;;  %v6135_v21 = vrot.slane %v23937_v56, %v23664_v6  ;;  %v5747_v14 = vmax.f32 %v23930_v2, 0.0 }
 0x6a7   : > { %v6819_v37 = vmax.f32 %v6817_v24, %v6818_v61  ;;  %v7139_v48 = vsel %vm7108_vm11, %v6801_v39, %v7138_v13  ;;  %v6142_v33 = vrot.slane %v6128_v59, %v23664_v6  ;;  %v5713_v0 = vadd.f32 %v23921_v22, %v23766_v19 }
 0x6a8   : > { %v7140_v58 = vsel %vm7110_vm12, %v6810_v57, %v7139_v48  ;;  %v6143_v49 = vcombine.high %v6135_v21, %v6135_v21  ;;  %v6820_v10 = vsel %vm528_vm6, %v6135_v21, -inf  ;;  %v6179_v46 = vcombine.high %v5747_v14, %v5747_v14 }
 0x6a9   : > { %v7141_v20 = vsel %vm7112_vm13, %v6819_v37, %v7140_v58  ;;  %v6144_v25 = vcombine.high %v6142_v33, %v6142_v33  ;;  %v6822_v56 = vmax.f32 %v6820_v10, %v6821_v5  ;;  %v6838_v2 = vsel %vm528_vm6, %v6142_v33, -inf }
 0x6aa   : > { %7176 = vst.msk [vmem:[#allocation4 + $0x51] sm:$0xff] %vm525_vm5, %v7141_v20  ;;  %v6829_v28 = vsel %vm528_vm6, %v6143_v49, -inf  ;;  %v6840_v43 = vmax.f32 %v6838_v2, %v6839_v36  ;;  %v6186_v44 = vrot.slane %v5747_v14, %v23664_v6  ;;  %v6193_v19 = vrot.slane %v6179_v46, %v23664_v6 }
 0x6ab   : > { %v6823_v47 = vrot.slane %v6822_v56, 4  ;;  %v6831_v15 = vmax.f32 %v6829_v28, %v6830_v41  ;;  %v6847_v42 = vsel %vm528_vm6, %v6144_v25, -inf  ;;  %v5745_v29 = vmax.f32 %v5713_v0, 0.0  ;;  %v24007_v25 = vld [vmem:[#allocation4 + $0x10] sm:$0xff] }
 0x6ac   : > { %v6841_v53 = vrot.slane %v6840_v43, 4  ;;  %v6849_v38 = vmax.f32 %v6847_v42, %v6848_v63  ;;  %v6194_v12 = vcombine.high %v6186_v44, %v6186_v44  ;;  %v6195_v45 = vcombine.high %v6193_v19, %v6193_v19 }
 0x6ad   : > { %v6824_v4 = vmax.f32 %v6822_v56, %v6823_v47  ;;  %v6832_v62 = vrot.slane %v6831_v15, 4  ;;  %v6857_v30 = vsel %vm528_vm6, %v6186_v44, -inf  ;;  %v6875_v23 = vsel %vm528_vm6, %v6193_v19, -inf  ;;  %v24009_v56 = vld [vmem:[#allocation4 + $0x18] sm:$0x3] }
 0x6ae   : > { %v6842_v26 = vmax.f32 %v6840_v43, %v6841_v53  ;;  %v6850_v1 = vrot.slane %v6849_v38, 4  ;;  %v6866_v17 = vsel %vm528_vm6, %v6194_v12, -inf  ;;  %v6884_v51 = vsel %vm528_vm6, %v6195_v45, -inf }
 0x6af   : > { %v6825_v7 = vrot.slane %v6824_v4, 2  ;;  %v6833_v11 = vmax.f32 %v6831_v15, %v6832_v62  ;;  %v6145_v3 = vcombine.high %v5745_v29, %v5745_v29  ;;  %v6152_v24 = vrot.slane %v5745_v29, %v23664_v6 }
 0x6b0   : > { %v6843_v55 = vrot.slane %v6842_v26, 2  ;;  %v6851_v40 = vmax.f32 %v6849_v38, %v6850_v1  ;;  %v7228_v5 = vrot.slane %v23993_v27, 1  ;;  %v7229_v52 = vrot.slane %v23995_v16, 1 }
 0x6b1   : > { %v6826_v39 = vmax.f32 %v6824_v4, %v6825_v7  ;;  %v6834_v8 = vrot.slane %v6833_v11, 2  ;;  %v6159_v41 = vrot.slane %v6145_v3, %v23664_v6  ;;  %v6160_v61 = vcombine.high %v6152_v24, %v6152_v24 }
 0x6b2   : > { %v6844_v36 = vmax.f32 %v6842_v26, %v6843_v55  ;;  %v6852_v63 = vrot.slane %v6851_v40, 2  ;;  %v6856_v59 = vsel %vm528_vm6, %v6152_v24, -inf  ;;  %v7230_v57 = vsel %vm859_vm3, %v7228_v5, %v7229_v52 }
 0x6b3   : > { %v6827_v13 = vrot.slane %v6826_v39, 1  ;;  %v6835_v21 = vmax.f32 %v6833_v11, %v6834_v8  ;;  %v6161_v14 = vcombine.high %v6159_v41, %v6159_v41  ;;  %v6858_v37 = vmax.f32 %v6856_v59, %v6857_v30 }
 0x6b4   : > { %v6845_v48 = vrot.slane %v6844_v36, 1  ;;  %v6853_v33 = vmax.f32 %v6851_v40, %v6852_v63  ;;  %v6865_v0 = vsel %vm528_vm6, %v6160_v61, -inf  ;;  %v6874_v58 = vsel %vm528_vm6, %v6159_v41, -inf }
 0x6b5   : > { %v6828_v49 = vmax.f32 %v6826_v39, %v6827_v13  ;;  %v6836_v10 = vrot.slane %v6835_v21, 1  ;;  %v6859_v46 = vrot.slane %v6858_v37, 4  ;;  %v6867_v20 = vmax.f32 %v6865_v0, %v6866_v17 }
 0x6b6   : > { %v6846_v2 = vmax.f32 %v6844_v36, %v6845_v48  ;;  %v6854_v28 = vrot.slane %v6853_v33, 1  ;;  %v6876_v43 = vmax.f32 %v6874_v58, %v6875_v23  ;;  %v6883_v44 = vsel %vm528_vm6, %v6161_v14, -inf }
 0x6b7   : > { %v6837_v19 = vmax.f32 %v6835_v21, %v6836_v10  ;;  %v6860_v47 = vmax.f32 %v6858_v37, %v6859_v46  ;;  %v6868_v15 = vrot.slane %v6867_v20, 4  ;;  %v6885_v42 = vmax.f32 %v6883_v44, %v6884_v51 }
 0x6b8   : > { %v6855_v29 = vmax.f32 %v6853_v33, %v6854_v28  ;;  %v6877_v53 = vrot.slane %v6876_v43, 4  ;;  %v7231_v38 = vrot.slane %v24007_v25, 1  ;;  %v7232_v12 = vrot.slane %v24009_v56, 1 }
 0x6b9   : > { %v7142_v45 = vsel %vm7100_vm7, %v6837_v19, %v6828_v49  ;;  %v6861_v4 = vrot.slane %v6860_v47, 2  ;;  %v6869_v62 = vmax.f32 %v6867_v20, %v6868_v15  ;;  %v6886_v30 = vrot.slane %v6885_v42, 4 }
 0x6ba   : > { %v7143_v26 = vsel %vm7102_vm8, %v6846_v2, %v7142_v45  ;;  %v6878_v23 = vmax.f32 %v6876_v43, %v6877_v53  ;;  %v24017_v1 = vsel %vm859_vm3, %v7231_v38, %v7232_v12  ;;  %v5718_v17 = vadd.f32 %v23921_v22, %v23774_v34 }
 0x6bb   : > { %v6862_v51 = vmax.f32 %v6860_v47, %v6861_v4  ;;  %v6870_v7 = vrot.slane %v6869_v62, 2  ;;  %v6887_v11 = vmax.f32 %v6885_v42, %v6886_v30  ;;  %v7144_v3 = vsel %vm7104_vm9, %v6855_v29, %v7143_v26 }
 0x6bc   : > { %v6879_v24 = vrot.slane %v6878_v23, 2  ;;  %v7260_v55 = vpack.c.bf16 %v24017_v1, %v7230_v57  ;;  %v5750_v40 = vmax.f32 %v5718_v17, 0.0  ;;  %v5716_v5 = vadd.f32 %v23921_v22, %v23777_v9 }
 0x6bd   : > { %v6863_v52 = vrot.slane %v6862_v51, 1  ;;  %v6871_v39 = vmax.f32 %v6869_v62, %v6870_v7  ;;  %v6888_v8 = vrot.slane %v6887_v11, 2  ;;  %v5719_v41 = vadd.f32 %v23921_v22, %v23780_v32 }
 0x6be   : > { %v6880_v61 = vmax.f32 %v6878_v23, %v6879_v24  ;;  %18678 = vmatprep.mubr.msk.bf16.mxu0 %vm525_vm5, %v7260_v55  ;;  %v6230_v34 = vcombine.high %v5750_v40, %v5750_v40  ;;  %v6237_v36 = vrot.slane %v5750_v40, %v23664_v6  ;;  %v5748_v63 = vmax.f32 %v5716_v5, 0.0 }
 0x6bf   : > { %v6864_v59 = vmax.f32 %v6862_v51, %v6863_v52  ;;  %v6872_v13 = vrot.slane %v6871_v39, 1  ;;  %v6889_v57 = vmax.f32 %v6887_v11, %v6888_v8  ;;  %v5751_v21 = vmax.f32 %v5719_v41, 0.0 }
 0x6c0   : > { %v6881_v14 = vrot.slane %v6880_v61, 1  ;;  %v6244_v9 = vrot.slane %v6230_v34, %v23664_v6  ;;  %v6245_v37 = vcombine.high %v6237_v36, %v6237_v36  ;;  %v6893_v48 = vsel %vm528_vm6, %v6237_v36, -inf }
 0x6c1   : > { %v6873_v33 = vmax.f32 %v6871_v39, %v6872_v13  ;;  %v6890_v0 = vrot.slane %v6889_v57, 1  ;;  %v7145_v32 = vsel %vm7106_vm10, %v6864_v59, %v7144_v3  ;;  %v6196_v58 = vcombine.high %v5748_v63, %v5748_v63 }
 0x6c2   : > { %v6882_v49 = vmax.f32 %v6880_v61, %v6881_v14  ;;  %v6246_v10 = vcombine.high %v6244_v9, %v6244_v9  ;;  %v6902_v46 = vsel %vm528_vm6, %v6245_v37, -inf  ;;  %v6911_v20 = vsel %vm528_vm6, %v6244_v9, -inf }
 0x6c3   : > { %v6891_v2 = vmax.f32 %v6889_v57, %v6890_v0  ;;  %v7146_v28 = vsel %vm7108_vm11, %v6873_v33, %v7145_v32  ;;  %v6203_v43 = vrot.slane %v5748_v63, %v23664_v6  ;;  %v6210_v44 = vrot.slane %v6196_v58, %v23664_v6 }
 0x6c4   : > { %v7147_v19 = vsel %vm7110_vm12, %v6882_v49, %v7146_v28  ;;  %v6920_v47 = vsel %vm528_vm6, %v6246_v10, -inf  ;;  %v6247_v15 = vcombine.high %v5751_v21, %v5751_v21  ;;  %v6254_v42 = vrot.slane %v5751_v21, %v23664_v6 }
 0x6c5   : > { %v7148_v29 = vsel %vm7112_vm13, %v6891_v2, %v7147_v19  ;;  %v6211_v53 = vcombine.high %v6203_v43, %v6203_v43  ;;  %v6212_v38 = vcombine.high %v6210_v44, %v6210_v44  ;;  %v6892_v12 = vsel %vm528_vm6, %v6203_v43, -inf }
 0x6c6   : > { %7177 = vst.msk [vmem:[#allocation4 + $0x61] sm:$0xff] %vm525_vm5, %v7148_v29  ;;  %v6894_v45 = vmax.f32 %v6892_v12, %v6893_v48  ;;  %v6910_v4 = vsel %vm528_vm6, %v6210_v44, -inf  ;;  %v6261_v62 = vrot.slane %v6247_v15, %v23664_v6  ;;  %v6262_v30 = vcombine.high %v6254_v42, %v6254_v42 }
 0x6c7   : > { %v6901_v26 = vsel %vm528_vm6, %v6211_v53, -inf  ;;  %v6912_v23 = vmax.f32 %v6910_v4, %v6911_v20  ;;  %v6919_v17 = vsel %vm528_vm6, %v6212_v38, -inf  ;;  %v6929_v51 = vsel %vm528_vm6, %v6254_v42, -inf }
 0x6c8   : > { %v6895_v7 = vrot.slane %v6894_v45, 4  ;;  %v6903_v11 = vmax.f32 %v6901_v26, %v6902_v46  ;;  %v6921_v3 = vmax.f32 %v6919_v17, %v6920_v47  ;;  %v6263_v24 = vcombine.high %v6261_v62, %v6261_v62 }
 0x6c9   : > { %v6913_v55 = vrot.slane %v6912_v23, 4  ;;  %v6938_v40 = vsel %vm528_vm6, %v6262_v30, -inf  ;;  %v6947_v5 = vsel %vm528_vm6, %v6261_v62, -inf  ;;  %v5717_v52 = vadd.f32 %v23921_v22, %v23786_v18 }
 0x6ca   : > { %v6896_v39 = vmax.f32 %v6894_v45, %v6895_v7  ;;  %v6904_v8 = vrot.slane %v6903_v11, 4  ;;  %v6922_v41 = vrot.slane %v6921_v3, 4  ;;  %v6956_v61 = vsel %vm528_vm6, %v6263_v24, -inf }
 0x6cb   : > { %v6914_v34 = vmax.f32 %v6912_v23, %v6913_v55  ;;  %v5749_v36 = vmax.f32 %v5717_v52, 0.0  ;;  %v5722_v63 = vadd.f32 %v23921_v22, %v23800_v50  ;;  %v5720_v59 = vadd.f32 %v23921_v22, %v23815_v54 }
 0x6cc   : > { %v6897_v13 = vrot.slane %v6896_v39, 2  ;;  %v6905_v57 = vmax.f32 %v6903_v11, %v6904_v8  ;;  %v6923_v21 = vmax.f32 %v6921_v3, %v6922_v41  ;;  %v24059_v14 = vadd.f32 %v23921_v22, %v23825_v31 }
 0x6cd   : > { %v6915_v18 = vrot.slane %v6914_v34, 2  ;;  %v6213_v9 = vcombine.high %v5749_v36, %v5749_v36  ;;  %v6220_v37 = vrot.slane %v5749_v36, %v23664_v6  ;;  %v5754_v48 = vmax.f32 %v5722_v63, 0.0 }
 0x6ce   : > { %v6898_v33 = vmax.f32 %v6896_v39, %v6897_v13  ;;  %v6906_v0 = vrot.slane %v6905_v57, 2  ;;  %v6924_v32 = vrot.slane %v6923_v21, 2  ;;  %v5752_v58 = vmax.f32 %v5720_v59, 0.0 }
 0x6cf   : > { %v6916_v50 = vmax.f32 %v6914_v34, %v6915_v18  ;;  %v6227_v49 = vrot.slane %v6213_v9, %v23664_v6  ;;  %v6228_v54 = vcombine.high %v6220_v37, %v6220_v37  ;;  %v6928_v10 = vsel %vm528_vm6, %v6220_v37, -inf }
 0x6d0   : > { %v6899_v46 = vrot.slane %v6898_v33, 1  ;;  %v6907_v20 = vmax.f32 %v6905_v57, %v6906_v0  ;;  %v6925_v2 = vmax.f32 %v6923_v21, %v6924_v32  ;;  %v6930_v31 = vmax.f32 %v6928_v10, %v6929_v51 }
 0x6d1   : > { %v6917_v28 = vrot.slane %v6916_v50, 1  ;;  %v6229_v43 = vcombine.high %v6227_v49, %v6227_v49  ;;  %v6937_v44 = vsel %vm528_vm6, %v6228_v54, -inf  ;;  %v6946_v19 = vsel %vm528_vm6, %v6227_v49, -inf }
 0x6d2   : > { %v6900_v47 = vmax.f32 %v6898_v33, %v6899_v46  ;;  %v6908_v15 = vrot.slane %v6907_v20, 1  ;;  %v6926_v42 = vrot.slane %v6925_v2, 1  ;;  %v6931_v29 = vrot.slane %v6930_v31, 4 }
 0x6d3   : > { %v6918_v53 = vmax.f32 %v6916_v50, %v6917_v28  ;;  %v6939_v38 = vmax.f32 %v6937_v44, %v6938_v40  ;;  %v6948_v12 = vmax.f32 %v6946_v19, %v6947_v5  ;;  %v6955_v45 = vsel %vm528_vm6, %v6229_v43, -inf }
 0x6d4   : > { %v6909_v4 = vmax.f32 %v6907_v20, %v6908_v15  ;;  %v6927_v62 = vmax.f32 %v6925_v2, %v6926_v42  ;;  %v6932_v30 = vmax.f32 %v6930_v31, %v6931_v29  ;;  %v6957_v26 = vmax.f32 %v6955_v45, %v6956_v61 }
 0x6d5   : > { %v6940_v23 = vrot.slane %v6939_v38, 4  ;;  %v6949_v17 = vrot.slane %v6948_v12, 4  ;;  %v6298_v51 = vcombine.high %v5754_v48, %v5754_v48  ;;  %v6305_v7 = vrot.slane %v5754_v48, %v23664_v6 }
 0x6d6   : > { %v7149_v11 = vsel %vm7100_vm7, %v6909_v4, %v6900_v47  ;;  %v6933_v3 = vrot.slane %v6932_v30, 2  ;;  %v6958_v24 = vrot.slane %v6957_v26, 4  ;;  %v6264_v55 = vcombine.high %v5752_v58, %v5752_v58 }
 0x6d7   : > { %v7150_v52 = vsel %vm7102_vm8, %v6918_v53, %v7149_v11  ;;  %v6941_v40 = vmax.f32 %v6939_v38, %v6940_v23  ;;  %v6950_v5 = vmax.f32 %v6948_v12, %v6949_v17  ;;  %v6312_v39 = vrot.slane %v6298_v51, %v23664_v6 }
 0x6d8   : > { %v6934_v8 = vmax.f32 %v6932_v30, %v6933_v3  ;;  %v6959_v41 = vmax.f32 %v6957_v26, %v6958_v24  ;;  %v7151_v61 = vsel %vm7104_vm9, %v6927_v62, %v7150_v52  ;;  %v6313_v34 = vcombine.high %v6305_v7, %v6305_v7 }
 0x6d9   : > { %v6942_v36 = vrot.slane %v6941_v40, 2  ;;  %v6951_v63 = vrot.slane %v6950_v5, 2  ;;  %v6314_v59 = vcombine.high %v6312_v39, %v6312_v39  ;;  %v6965_v13 = vsel %vm528_vm6, %v6305_v7, -inf }
 0x6da   : > { %v6935_v57 = vrot.slane %v6934_v8, 1  ;;  %v6960_v21 = vrot.slane %v6959_v41, 2  ;;  %v6974_v18 = vsel %vm528_vm6, %v6313_v34, -inf  ;;  %v6983_v9 = vsel %vm528_vm6, %v6312_v39, -inf }
 0x6db   : > { %v6943_v37 = vmax.f32 %v6941_v40, %v6942_v36  ;;  %v6952_v48 = vmax.f32 %v6950_v5, %v6951_v63  ;;  %v6992_v33 = vsel %vm528_vm6, %v6314_v59, -inf  ;;  %v6271_v0 = vrot.slane %v5752_v58, %v23664_v6  ;;  %v24091_v40 = vld [vmem:[#allocation4 + $0x20] sm:$0xff]  ;;  %v24093_v5 = vld [vmem:[#allocation4 + $0x28] sm:$0x3] }
 0x6dc   : > { %v6936_v32 = vmax.f32 %v6934_v8, %v6935_v57  ;;  %v6961_v50 = vmax.f32 %v6959_v41, %v6960_v21  ;;  %v6278_v49 = vrot.slane %v6264_v55, %v23664_v6  ;;  %v5755_v54 = vmax.f32 %v24059_v14, 0.0  ;;  %v24101_v57 = vld [vmem:[#allocation4 + $0x38] sm:$0x3] }
 0x6dd   : > { %v6944_v10 = vrot.slane %v6943_v37, 1  ;;  %v6953_v46 = vrot.slane %v6952_v48, 1  ;;  %v6279_v20 = vcombine.high %v6271_v0, %v6271_v0  ;;  %v6964_v2 = vsel %vm528_vm6, %v6271_v0, -inf }
 0x6de   : > { %v6962_v31 = vrot.slane %v6961_v50, 1  ;;  %v7152_v28 = vsel %vm7106_vm10, %v6936_v32, %v7151_v61  ;;  %v6280_v43 = vcombine.high %v6278_v49, %v6278_v49  ;;  %v6966_v44 = vmax.f32 %v6964_v2, %v6965_v13  ;;  %v24099_v13 = vld [vmem:[#allocation4 + $0x30] sm:$0xff] }
 0x6df   : > { %v6945_v19 = vmax.f32 %v6943_v37, %v6944_v10  ;;  %v6954_v47 = vmax.f32 %v6952_v48, %v6953_v46  ;;  %v6973_v58 = vsel %vm528_vm6, %v6279_v20, -inf  ;;  %v6982_v15 = vsel %vm528_vm6, %v6278_v49, -inf }
 0x6e0   : > { %v6963_v42 = vmax.f32 %v6961_v50, %v6962_v31  ;;  %v6967_v29 = vrot.slane %v6966_v44, 4  ;;  %v6975_v53 = vmax.f32 %v6973_v58, %v6974_v18  ;;  %v6984_v14 = vmax.f32 %v6982_v15, %v6983_v9  ;;  %v24106_v50 = vld [vmem:[#allocation4 + $0x40] sm:$0xff]  ;;  %v24113_v31 = vld [vmem:[#allocation4 + $0x48] sm:$0x3] }
 0x6e1   : > { %v7153_v38 = vsel %vm7108_vm11, %v6945_v19, %v7152_v28  ;;  %v6991_v12 = vsel %vm528_vm6, %v6280_v43, -inf  ;;  %v6315_v45 = vcombine.high %v5755_v54, %v5755_v54  ;;  %v6322_v4 = vrot.slane %v5755_v54, %v23664_v6 }
 0x6e2   : > { %v7154_v62 = vsel %vm7110_vm12, %v6954_v47, %v7153_v38  ;;  %v6968_v30 = vmax.f32 %v6966_v44, %v6967_v29  ;;  %v6976_v26 = vrot.slane %v6975_v53, 4  ;;  %v6985_v23 = vrot.slane %v6984_v14, 4  ;;  %v21122_v29 = vld [vmem:[%s26517_s5 + $0x8] sm:$0xff]  }
 0x6e3   : > { %v7155_v17 = vsel %vm7112_vm13, %v6963_v42, %v7154_v62  ;;  %v6993_v51 = vmax.f32 %v6991_v12, %v6992_v33  ;;  %v6329_v7 = vrot.slane %v6315_v45, %v23664_v6  ;;  %v6330_v11 = vcombine.high %v6322_v4, %v6322_v4 }
 0x6e4   : > { %7178 = vst.msk [vmem:[#allocation4 + $0x71] sm:$0xff] %vm525_vm5, %v7155_v17  ;;  %v6969_v3 = vrot.slane %v6968_v30, 2  ;;  %v6977_v24 = vmax.f32 %v6975_v53, %v6976_v26  ;;  %v6986_v55 = vmax.f32 %v6984_v14, %v6985_v23  ;;  %v7001_v52 = vsel %vm528_vm6, %v6322_v4, -inf }
 0x6e5   : > { %v6994_v39 = vrot.slane %v6993_v51, 4  ;;  %v6331_v8 = vcombine.high %v6329_v7, %v6329_v7  ;;  %v7010_v41 = vsel %vm528_vm6, %v6330_v11, -inf  ;;  %v7019_v61 = vsel %vm528_vm6, %v6329_v7, -inf  ;;  %v24138_v7 = vld [vmem:[#allocation4 + $0x58] sm:$0x3] }
 0x6e6   : > { %v6970_v34 = vmax.f32 %v6968_v30, %v6969_v3  ;;  %v6978_v36 = vrot.slane %v6977_v24, 2  ;;  %v6987_v63 = vrot.slane %v6986_v55, 2  ;;  %v5721_v59 = vadd.f32 %v23921_v22, %v23837_v35  ;;  %v24134_v30 = vld [vmem:[#allocation4 + $0x50] sm:$0xff] }
 0x6e7   : > { %v6995_v21 = vmax.f32 %v6993_v51, %v6994_v39  ;;  %v7028_v18 = vsel %vm528_vm6, %v6331_v8, -inf  ;;  %v7234_v9 = vrot.slane %v24091_v40, 1  ;;  %v7235_v37 = vrot.slane %v24093_v5, 1  ;;  %v21123_v39 = vld [vmem:[%s26517_s5 + $0x10] sm:$0xff]  }
 0x6e8   : > { %v6971_v48 = vrot.slane %v6970_v34, 1  ;;  %v6979_v33 = vmax.f32 %v6977_v24, %v6978_v36  ;;  %v6988_v0 = vmax.f32 %v6986_v55, %v6987_v63  ;;  %v5753_v32 = vmax.f32 %v5721_v59, 0.0  ;;  %v24142_v55 = vld [vmem:[#allocation4 + $0x60] sm:$0xff] }
 0x6e9   : > { %v6996_v49 = vrot.slane %v6995_v21, 2  ;;  %v24109_v35 = vsel %vm859_vm3, %v7234_v9, %v7235_v37  ;;  %v7237_v22 = vrot.slane %v24099_v13, 1  ;;  %v7238_v54 = vrot.slane %v24101_v57, 1 }
 0x6ea   : > { %v6972_v10 = vmax.f32 %v6970_v34, %v6971_v48  ;;  %v6980_v46 = vrot.slane %v6979_v33, 1  ;;  %v6989_v20 = vrot.slane %v6988_v0, 1  ;;  %v6281_v2 = vcombine.high %v5753_v32, %v5753_v32 }
 0x6eb   : > { %v6997_v28 = vmax.f32 %v6995_v21, %v6996_v49  ;;  %v6288_v43 = vrot.slane %v5753_v32, %v23664_v6  ;;  %v24117_v44 = vsel %vm859_vm3, %v7237_v22, %v7238_v54  ;;  %v7240_v19 = vrot.slane %v24106_v50, 1  ;;  %v24157_v48 = vld [vmem:[#allocation4 + $0x78] sm:$0x3] }
 0x6ec   : > { %v6981_v47 = vmax.f32 %v6979_v33, %v6980_v46  ;;  %v6990_v58 = vmax.f32 %v6988_v0, %v6989_v20  ;;  %v6295_v15 = vrot.slane %v6281_v2, %v23664_v6  ;;  %v24123_v42 = vpack.c.bf16 %v24117_v44, %v24109_v35  ;;  %v21124_v54 = vld [vmem:[%s26517_s5 + $0x18] sm:$0xff]  }
 0x6ed   : > { %v6998_v53 = vrot.slane %v6997_v28, 1  ;;  %v6296_v14 = vcombine.high %v6288_v43, %v6288_v43  ;;  %v7000_v38 = vsel %vm528_vm6, %v6288_v43, -inf  ;;  %v7241_v12 = vrot.slane %v24113_v31, 1 }
 0x6ee   : > { %v7156_v45 = vsel %vm7100_vm7, %v6981_v47, %v6972_v10  ;;  %v6297_v4 = vcombine.high %v6295_v15, %v6295_v15  ;;  %v7002_v62 = vmax.f32 %v7000_v38, %v7001_v52  ;;  %v7018_v6 = vsel %vm528_vm6, %v6295_v15, -inf  ;;  %18679 = vmatmul.mubr.msk.bf16.vlgmr.msra.gmra.mrb[48].mxu0 %vm525_vm5, %v24123_v42  ;;  %v24144_v52 = vld [vmem:[#allocation4 + $0x68] sm:$0x3] }
 0x6ef   : > { %v6999_v26 = vmax.f32 %v6997_v28, %v6998_v53  ;;  %v7157_v23 = vsel %vm7102_vm8, %v6990_v58, %v7156_v45  ;;  %v7009_v17 = vsel %vm528_vm6, %v6296_v14, -inf  ;;  %v7020_v51 = vmax.f32 %v7018_v6, %v7019_v61  ;;  %18687 = vmatpush3.bf16.msra.mxu0 %v23896_v60  ;;  %v24151_v60 = vld [vmem:[#allocation4 + $0x70] sm:$0xff]  ;;  %v21125_v45 = vld [vmem:[%s26517_s5 + $0x40] sm:$0xff]  }
 0x6f0   : > { %v7003_v11 = vrot.slane %v7002_v62, 4  ;;  %v7011_v3 = vmax.f32 %v7009_v17, %v7010_v41  ;;  %v7027_v24 = vsel %vm528_vm6, %v6297_v4, -inf  ;;  %18688 = vmatprep.subr.bf16.mxu0 %v21122_v29  ;;  %v7243_v36 = vrot.slane %v24134_v30, 1  ;;  %v21154_v17 = vld [vmem:[%s26519_s7 + $0x48] sm:$0xff]  }
 0x6f1   : > { %v7021_v8 = vrot.slane %v7020_v51, 4  ;;  %v7029_v34 = vmax.f32 %v7027_v24, %v7028_v18  ;;  %v7158_v61 = vsel %vm7104_vm9, %v6999_v26, %v7157_v23  ;;  %v24154_v59 = vsel %vm859_vm3, %v7240_v19, %v7241_v12  ;;  %v21153_v23 = vld [vmem:[%s26519_s7 + $0x40] sm:$0xff]  }
 0x6f2   : > { %v7004_v41 = vmax.f32 %v7002_v62, %v7003_v11  ;;  %v7012_v63 = vrot.slane %v7011_v3, 4  ;;  %v7244_v21 = vrot.slane %v24138_v7, 1  ;;  %v7246_v18 = vrot.slane %v24142_v55, 1  ;;  %18814 = vmatprep.subr.bf16.mxu1 %v21153_v23 }
 0x6f3   : > { %v7022_v9 = vmax.f32 %v7020_v51, %v7021_v8  ;;  %v7030_v37 = vrot.slane %v7029_v34, 4  ;;  %18689 = vmatpush3.bf16.msra.mxu0 %v21122_v29  ;;  %v7247_v33 = vrot.slane %v24144_v52, 1  ;;  %v7249_v22 = vrot.slane %v24151_v60, 1  ;;  %18815 = vmatpush3.bf16.msra.mxu1 %v21153_v23 }
 0x6f4   : > { %v7005_v0 = vrot.slane %v7004_v41, 2  ;;  %v7013_v32 = vmax.f32 %v7011_v3, %v7012_v63  ;;  %v24162_v49 = vsel %vm859_vm3, %v7243_v36, %v7244_v21  ;;  %18690 = vmatprep.subr.bf16.mxu0 %v21123_v39  ;;  %v7250_v43 = vrot.slane %v24157_v48, 1  ;;  %18816 = vmatprep.subr.bf16.mxu1 %v21154_v17  ;;  %v21126_v36 = vld [vmem:[%s26517_s5 + $0x48] sm:$0xff]  }
 0x6f5   : > { %v7023_v10 = vrot.slane %v7022_v9, 2  ;;  %v7031_v46 = vmax.f32 %v7029_v34, %v7030_v37  ;;  %v24170_v20 = vpack.c.bf16 %v24162_v49, %v24154_v59  ;;  %v24176_v29 = vsel %vm859_vm3, %v7246_v18, %v7247_v33  ;;  %v21156_v33 = vld [vmem:[%s26519_s7 + $0x58] sm:$0xff]  }
 0x6f6   : > { %v7006_v2 = vmax.f32 %v7004_v41, %v7005_v0  ;;  %v7014_v28 = vrot.slane %v7013_v32, 2  ;;  %v24179_v53 = vsel %vm859_vm3, %v7249_v22, %v7250_v43  ;;  %v7200_v6 = vpack.c.bf16 %v24007_v25, %v23993_v27  ;;  %v21155_v41 = vld [vmem:[%s26519_s7 + $0x50] sm:$0xff]   ;;  %v21128_v22 = vld [vmem:[%s26517_s5 + $0x58] sm:$0xff]   ;;  %v21158_v43 = vld [vmem:[%s26519_s7 + $0x68] sm:$0xff]  }
 0x6f7   : > { %v7024_v19 = vmax.f32 %v7022_v9, %v7023_v10  ;;  %v7032_v47 = vrot.slane %v7031_v46, 2  ;;  %18682 = vmatprep.mubr.msk.bf16.mxu0 %vm525_vm5, %v24170_v20  ;;  %18691 = vmatpush3.bf16.msra.mxu0 %v21123_v39  ;;  %v24183_v12 = vpack.c.bf16 %v24179_v53, %v24176_v29  ;;  %v24216_v63 = vpack.c.bf16 %v24134_v30, %v24106_v50  ;;  %v21127_v0 = vld [vmem:[%s26517_s5 + $0x50] sm:$0xff]  }
 0x6f8   : > { %v7007_v58 = vrot.slane %v7006_v2, 1  ;;  %v7015_v15 = vmax.f32 %v7013_v32, %v7014_v28  ;;  %18692 = vmatprep.subr.bf16.mxu0 %v21124_v54  ;;  %18817 = vmatpush3.bf16.msra.mxu1 %v21154_v17  ;;  %v7475_v21 = vrot.slane %v23993_v27, 2  ;;  %v7476_v9 = vrot.slane %v23995_v16, 2  ;;  %v21131_v17 = vld [vmem:[%s26517_s5 + $0x70] sm:$0xff]  }
 0x6f9   : > { %v7025_v14 = vrot.slane %v7024_v19, 1  ;;  %v7033_v38 = vmax.f32 %v7031_v46, %v7032_v47  ;;  %18683 = vmatmul.mubr.msk.bf16.gmra.mrb[52].mxu0 %vm525_vm5, %v24183_v12  ;;  %v7478_v37 = vrot.slane %v24007_v25, 2  ;;  %v7479_v18 = vrot.slane %v24009_v56, 2  ;;  %18818 = vmatprep.subr.bf16.mxu1 %v21155_v41  ;;  %v21157_v56 = vld [vmem:[%s26519_s7 + $0x60] sm:$0xff]  }
 0x6fa   : > { %v7008_v4 = vmax.f32 %v7006_v2, %v7007_v58  ;;  %v7016_v62 = vrot.slane %v7015_v15, 1  ;;  %18694 = vmatprep.mubr.msk.bf16.mxu0 %vm525_vm5, %v7200_v6  ;;  %v7477_v27 = vsel %vm1415_vm4, %v7475_v21, %v7476_v9  ;;  %v24241_v32 = vpack.c.bf16 %v24151_v60, %v24142_v55  ;;  %v21129_v47 = vld [vmem:[%s26517_s5 + $0x60] sm:$0xff]  }
 0x6fb   : > { %v7034_v26 = vrot.slane %v7033_v38, 1  ;;  %18693 = vmatpush3.bf16.msra.mxu0 %v21124_v54  ;;  %v7026_v3 = vmax.f32 %v7024_v19, %v7025_v14  ;;  %v24234_v16 = vsel %vm1415_vm4, %v7478_v37, %v7479_v18  ;;  %v7484_v10 = vrot.slane %v24099_v13, 2  ;;  %v21141_v37 = vld [vmem:[%s26517_s5 + $0xc0] sm:$0xff]   ;;  %v21142_v18 = vld [vmem:[%s26517_s5 + $0xc8] sm:$0xff]  }
 0x6fc   : > { %v7017_v51 = vmax.f32 %v7015_v15, %v7016_v62  ;;  %v7159_v11 = vsel %vm7106_vm10, %v7008_v4, %v7158_v61  ;;  %18702 = vmatprep.subr.bf16.mxu0 %v21125_v45  ;;  %v24206_v61 = vpack.c.bf16 %v24099_v13, %v24091_v40  ;;  %18819 = vmatpush3.bf16.msra.mxu1 %v21155_v41  ;;  %v7485_v46 = vrot.slane %v24101_v57, 2 }
 0x6fd   : > { %v7035_v24 = vmax.f32 %v7033_v38, %v7034_v26  ;;  %18820 = vmatprep.subr.bf16.mxu1 %v21156_v33  ;;  %v7507_v54 = vpack.c.bf16 %v24234_v16, %v7477_v27  ;;  %v7490_v2 = vrot.slane %v24134_v30, 2  ;;  %v7491_v28 = vrot.slane %v24138_v7, 2 }
 0x6fe   : > { %v7160_v39 = vsel %vm7108_vm11, %v7017_v51, %v7159_v11  ;;  %v7481_v19 = vrot.slane %v24091_v40, 2  ;;  %v7482_v57 = vrot.slane %v24093_v5, 2  ;;  %v7487_v58 = vrot.slane %v24106_v50, 2 }
 0x6ff   : > { %v7161_v8 = vsel %vm7110_vm12, %v7026_v3, %v7160_v39  ;;  %v7488_v7 = vrot.slane %v24113_v31, 2  ;;  %v24265_v15 = vsel %vm1415_vm4, %v7484_v10, %v7485_v46  ;;  %v24268_v14 = vsel %vm1415_vm4, %v7490_v2, %v7491_v28  ;;  %v21130_v31 = vld [vmem:[%s26517_s5 + $0x68] sm:$0xff]   ;;  %v21145_v10 = vld [vmem:[%s26517_s5 + $0xe0] sm:$0xff]   ;;  %v7198_v2 = vld [vmem:[#allocation4 + $0x90] sm:$0xff] }
 0x700   : > { %v7162_v34 = vsel %vm7112_vm13, %v7035_v24, %v7161_v8  ;;  %18821 = vmatpush3.bf16.msra.mxu1 %v21156_v33  ;;  %v24271_v5 = vsel %vm1415_vm4, %v7481_v19, %v7482_v57  ;;  %v7496_v62 = vrot.slane %v24151_v60, 2  ;;  %v7497_v6 = vrot.slane %v24157_v48, 2  ;;  %v21133_v24 = vld [vmem:[%s26517_s5 + $0x80] sm:$0xff]   ;;  %v21135_v8 = vld [vmem:[%s26517_s5 + $0x90] sm:$0xff]   ;;  %v21146_v46 = vld [vmem:[%s26517_s5 + $0xe8] sm:$0xff]  }
 0x701   : > { %7179 = vst.msk [vmem:[#allocation4 + $0x81] sm:$0xff] %vm525_vm5, %v7162_v34  ;;  %18695 = vmatmul.mubr.msk.bf16.vlgmr.msra.gmra.mrb[48].mxu0 %vm525_vm5, %v24206_v61  ;;  %18822 = vmatprep.subr.bf16.mxu1 %v21157_v56  ;;  %v24275_v38 = vpack.c.bf16 %v24265_v15, %v24271_v5  ;;  %v7493_v26 = vrot.slane %v24142_v55, 2  ;;  %v7494_v23 = vrot.slane %v24144_v52, 2  ;;  %v21132_v52 = vld [vmem:[%s26517_s5 + $0x78] sm:$0xff]   ;;  %v7629_v3 = vpack.c.bf16 %v24091_v40, %v24007_v25  ;;  %v21134_v25 = vld [vmem:[%s26517_s5 + $0x88] sm:$0xff]  }
 0x702   : > { %18698 = vmatprep.mubr.msk.bf16.mxu0 %vm525_vm5, %v24216_v63  ;;  %18703 = vmatpush3.bf16.msra.mxu0 %v21125_v45  ;;  %v24278_v45 = vsel %vm1415_vm4, %v7487_v58, %v7488_v7  ;;  %v24299_v51 = vsel %vm1415_vm4, %v7496_v62, %v7497_v6  ;;  %v7630_v39 = vpack.c.bf16 %v24106_v50, %v24099_v13  ;;  %v21136_v50 = vld [vmem:[%s26517_s5 + $0x98] sm:$0xff]   ;;  %v21150_v19 = vld [vmem:[%s26517_s5 + $0x108] sm:$0xff]   ;;  %v8117_v57 = vrot.slane %v7198_v2, 1 }
 0x703   : > { %18704 = vmatprep.subr.bf16.mxu0 %v21126_v36  ;;  %v24285_v4 = vpack.c.bf16 %v24268_v14, %v24278_v45  ;;  %v24302_v48 = vsel %vm1415_vm4, %v7493_v26, %v7494_v23  ;;  %v7631_v40 = vpack.c.bf16 %v24142_v55, %v24134_v30  ;;  %v7757_v30 = vpack.c.bf16 %v24109_v35, %v24017_v1  ;;  %v21137_v55 = vld [vmem:[%s26517_s5 + $0xa0] sm:$0xff]   ;;  %v21138_v1 = vld [vmem:[%s26517_s5 + $0xa8] sm:$0xff]  }
 0x704   : > { %18823 = vmatpush3.bf16.msra.mxu1 %v21157_v56  ;;  %v24306_v11 = vpack.c.bf16 %v24299_v51, %v24302_v48  ;;  %v7759_v35 = vpack.c.bf16 %v24176_v29, %v24162_v49  ;;  %v21140_v29 = vld [vmem:[%s26517_s5 + $0xb8] sm:$0xff]   ;;  %v7883_v9 = vpack.c.bf16 %v24271_v5, %v24234_v16  ;;  %v7885_v33 = vpack.c.bf16 %v24302_v48, %v24268_v14  ;;  %v21143_v16 = vld [vmem:[%s26517_s5 + $0xd0] sm:$0xff]  }
 0x705   : > { %18824 = vmatprep.subr.bf16.mxu1 %v21158_v43 }
 0x706   : > { %18705 = vmatpush3.bf16.msra.mxu0 %v21126_v36 }
 0x707   : > { %18706 = vmatprep.subr.bf16.mxu0 %v21127_v0 }
 0x708   : > { %18825 = vmatpush3.bf16.msra.mxu1 %v21158_v43  ;;  %v24331_v34 = vld [vmem:[#allocation4 + $0x80] sm:$0xff]  ;;  %v7197_v36 = vld [vmem:[#allocation4 + $0x88] sm:$0x3]  ;;  %v21148_v43 = vld [vmem:[%s26517_s5 + $0xf8] sm:$0xff]  }
 0x709   : > { %18699 = vmatmul.mubr.msk.bf16.gmra.mrb[52].mxu0 %vm525_vm5, %v24241_v32  ;;  %v7632_v13 = vpack.c.bf16 %v24331_v34, %v24151_v60  ;;  %v7758_v60 = vpack.c.bf16 %v24154_v59, %v24117_v44  ;;  %v7753_v41 = vrot.slane %v24331_v34, 1  ;;  %v7754_v21 = vrot.slane %v7197_v36, 1  ;;  %v21139_v44 = vld [vmem:[%s26517_s5 + $0xb0] sm:$0xff]  }
 0x70a   : > { %18707 = vmatpush3.bf16.msra.mxu0 %v21127_v0  ;;  %18710 = vmatprep.mubr.msk.bf16.mxu0 %vm525_vm5, %v7507_v54  ;;  %v7879_v0 = vrot.slane %v24331_v34, 2  ;;  %v7880_v27 = vrot.slane %v7197_v36, 2  ;;  %v21144_v54 = vld [vmem:[%s26517_s5 + $0xd8] sm:$0xff]   ;;  %v8005_v28 = vpack.c.bf16 %v7198_v2, %v24331_v34 }
 0x70b   : > { %18708 = vmatprep.subr.bf16.mxu0 %v21128_v22  ;;  %v24359_v59 = vsel %vm859_vm3, %v7753_v41, %v7754_v21 }
 0x70c   : > { %v7760_v49 = vpack.c.bf16 %v24359_v59, %v24179_v53  ;;  %v7884_v53 = vpack.c.bf16 %v24278_v45, %v24265_v15  ;;  %v7881_v56 = vsel %vm1415_vm4, %v7879_v0, %v7880_v27  ;;  %v21152_v15 = vld [vmem:[%s26517_s5 + $0x118] sm:$0xff]   ;;  %v21159_v45 = vld [vmem:[%s26519_s7 + $0x70] sm:$0xff]  }
 0x70d   : > { %18826 = vmatprep.subr.bf16.mxu1 %v21159_v45 }
 0x70e   : > { %18709 = vmatpush3.bf16.msra.mxu0 %v21128_v22  ;;  %v7886_v22 = vpack.c.bf16 %v7881_v56, %v24299_v51  ;;  %18827 = vmatpush3.bf16.msra.mxu1 %v21159_v45 }
 0x70f   : > { %18718 = vmatprep.subr.bf16.mxu0 %v21129_v47 }
 0x711   : > { %18711 = vmatmul.mubr.msk.bf16.vlgmr.msra.gmra.mrb[48].mxu0 %vm525_vm5, %v24275_v38 }
 0x712   : > { %18714 = vmatprep.mubr.msk.bf16.mxu0 %vm525_vm5, %v24285_v4  ;;  %18719 = vmatpush3.bf16.msra.mxu0 %v21129_v47 }
 0x713   : > { %18720 = vmatprep.subr.bf16.mxu0 %v21130_v31 }
 0x716   : > { %18721 = vmatpush3.bf16.msra.mxu0 %v21130_v31  ;;  %v24450_v31 = vld [vmem:[%s26519_s7] sm:$0xff]  }
 0x717   : > { %18722 = vmatprep.subr.bf16.mxu0 %v21131_v17 }
 0x719   : > { %18715 = vmatmul.mubr.msk.bf16.gmra.mrb[52].mxu0 %vm525_vm5, %v24306_v11 }
 0x71a   : > { %18723 = vmatpush3.bf16.msra.mxu0 %v21131_v17  ;;  %18726 = vmatprep.mubr.msk.bf16.mxu0 %vm525_vm5, %v7629_v3 }
 0x71b   : > { %18724 = vmatprep.subr.bf16.mxu0 %v21132_v52 }
 0x71e   : > { %18725 = vmatpush3.bf16.msra.mxu0 %v21132_v52 }
 0x71f   : > { %18734 = vmatprep.subr.bf16.mxu0 %v21133_v24 }
 0x721   : > { %18727 = vmatmul.mubr.msk.bf16.vlgmr.msra.gmra.mrb[48].mxu0 %vm525_vm5, %v7630_v39 }
 0x722   : > { %18730 = vmatprep.mubr.msk.bf16.mxu0 %vm525_vm5, %v7631_v40  ;;  %18735 = vmatpush3.bf16.msra.mxu0 %v21133_v24 }
 0x723   : > { %18736 = vmatprep.subr.bf16.mxu0 %v21134_v25 }
 0x726   : > { %18737 = vmatpush3.bf16.msra.mxu0 %v21134_v25  ;;  %v24456_v25 = vld [vmem:[#allocation5 + $0x8] sm:$0x3] }
 0x727   : > { %18738 = vmatprep.subr.bf16.mxu0 %v21135_v8  ;;  %v8434_v36 = vrot.slane %v24456_v25, 1 }
 0x729   : > { %18731 = vmatmul.mubr.msk.bf16.gmra.mrb[52].mxu0 %vm525_vm5, %v7632_v13 }
 0x72a   : > { %18739 = vmatpush3.bf16.msra.mxu0 %v21135_v8  ;;  %18742 = vmatprep.mubr.msk.bf16.mxu0 %vm525_vm5, %v7757_v30  ;;  %v24458_v30 = vld [vmem:[#allocation5] sm:$0xff] }
 0x72b   : > { %18740 = vmatprep.subr.bf16.mxu0 %v21136_v50 }
 0x72e   : > { %18741 = vmatpush3.bf16.msra.mxu0 %v21136_v50 }
 0x72f   : > { %18750 = vmatprep.subr.bf16.mxu0 %v21137_v55 }
 0x731   : > { %18743 = vmatmul.mubr.msk.bf16.vlgmr.msra.gmra.mrb[48].mxu0 %vm525_vm5, %v7758_v60 }
 0x732   : > { %18746 = vmatprep.mubr.msk.bf16.mxu0 %vm525_vm5, %v7759_v35  ;;  %18751 = vmatpush3.bf16.msra.mxu0 %v21137_v55  ;;  %v24461_v55 = vrot.slane %v24458_v30, 1 }
 0x733   : > { %18752 = vmatprep.subr.bf16.mxu0 %v21138_v1 }
 0x734   : > { %v8435_v0 = vsel %vm859_vm3, %v24461_v55, %v8434_v36 }
 0x736   : > { %18753 = vmatpush3.bf16.msra.mxu0 %v21138_v1 }
 0x737   : > { %18754 = vmatprep.subr.bf16.mxu0 %v21139_v44 }
 0x739   : > { %18747 = vmatmul.mubr.msk.bf16.gmra.mrb[52].mxu0 %vm525_vm5, %v7760_v49  ;;  %v24466_v49 = vld [vmem:[#allocation5 + $0x98] sm:$0x3] }
 0x73a   : > { %18755 = vmatpush3.bf16.msra.mxu0 %v21139_v44  ;;  %18758 = vmatprep.mubr.msk.bf16.mxu0 %vm525_vm5, %v7883_v9 }
 0x73b   : > { %18756 = vmatprep.subr.bf16.mxu0 %v21140_v29 }
 0x73e   : > { %18757 = vmatpush3.bf16.msra.mxu0 %v21140_v29 }
 0x73f   : > { %18766 = vmatprep.subr.bf16.mxu0 %v21141_v37 }
 0x741   : > { %18759 = vmatmul.mubr.msk.bf16.vlgmr.msra.gmra.mrb[48].mxu0 %vm525_vm5, %v7884_v53 }
 0x742   : > { %18762 = vmatprep.mubr.msk.bf16.mxu0 %vm525_vm5, %v7885_v33  ;;  %18767 = vmatpush3.bf16.msra.mxu0 %v21141_v37 }
 0x743   : > { %18768 = vmatprep.subr.bf16.mxu0 %v21142_v18 }
 0x746   : > { %18769 = vmatpush3.bf16.msra.mxu0 %v21142_v18 }
 0x747   : > { %18770 = vmatprep.subr.bf16.mxu0 %v21143_v16 }
 0x749   : > { %18763 = vmatmul.mubr.msk.bf16.gmra.mrb[52].mxu0 %vm525_vm5, %v7886_v22 }
 0x74a   : > { %18771 = vmatpush3.bf16.msra.mxu0 %v21143_v16  ;;  %18774 = vmatprep.mubr.msk.bf16.mxu0 %vm525_vm5, %v24206_v61  ;;  %v21147_v61 = vld [vmem:[%s26517_s5 + $0xf0] sm:$0xff]  }
 0x74b   : > { %18772 = vmatprep.subr.bf16.mxu0 %v21144_v54 }
 0x74e   : > { %18773 = vmatpush3.bf16.msra.mxu0 %v21144_v54 }
 0x74f   : > { %18782 = vmatprep.subr.bf16.mxu0 %v21145_v10 }
 0x751   : > { %18775 = vmatmul.mubr.msk.bf16.vlgmr.msra.gmra.mrb[48].mxu0 %vm525_vm5, %v24216_v63  ;;  %v21149_v63 = vld [vmem:[%s26517_s5 + $0x100] sm:$0xff]  }
 0x752   : > { %18778 = vmatprep.mubr.msk.bf16.mxu0 %vm525_vm5, %v24241_v32  ;;  %18783 = vmatpush3.bf16.msra.mxu0 %v21145_v10  ;;  %v7199_v32 = vld [vmem:[#allocation4 + $0x98] sm:$0x3] }
 0x753   : > { %18784 = vmatprep.subr.bf16.mxu0 %v21146_v46  ;;  %v8118_v47 = vrot.slane %v7199_v32, 1 }
 0x755   : > { %v8119_v58 = vsel %vm859_vm3, %v8117_v57, %v8118_v47 }
 0x756   : > { %18785 = vmatpush3.bf16.msra.mxu0 %v21146_v46  ;;  %v8121_v7 = vpack.c.bf16 %v8119_v58, %v24359_v59 }
 0x757   : > { %18786 = vmatprep.subr.bf16.mxu0 %v21147_v61 }
 0x759   : > { %18779 = vmatmul.mubr.msk.bf16.gmra.mrb[52].mxu0 %vm525_vm5, %v8005_v28 }
 0x75a   : > { %18787 = vmatpush3.bf16.msra.mxu0 %v21147_v61  ;;  %18790 = vmatprep.mubr.msk.bf16.mxu0 %vm525_vm5, %v24123_v42  ;;  %v21151_v42 = vld [vmem:[%s26517_s5 + $0x110] sm:$0xff]  }
 0x75b   : > { %18788 = vmatprep.subr.bf16.mxu0 %v21148_v43 }
 0x75e   : > { %18789 = vmatpush3.bf16.msra.mxu0 %v21148_v43 }
 0x75f   : > { %18798 = vmatprep.subr.bf16.mxu0 %v21149_v63 }
 0x761   : > { %18791 = vmatmul.mubr.msk.bf16.vlgmr.msra.gmra.mrb[48].mxu0 %vm525_vm5, %v24170_v20  ;;  %v8231_v20 = vrot.slane %v7198_v2, 2  ;;  %v8712_v2 = vrot.slane %v24458_v30, 2 }
 0x762   : > { %18794 = vmatprep.mubr.msk.bf16.mxu0 %vm525_vm5, %v24183_v12  ;;  %18799 = vmatpush3.bf16.msra.mxu0 %v21149_v63  ;;  %v8232_v12 = vrot.slane %v7199_v32, 2  ;;  %v9464_v32 = vrot.slane %v24466_v49, 1 }
 0x763   : > { %18800 = vmatprep.subr.bf16.mxu0 %v21150_v19 }
 0x764   : > { %v8233_v14 = vsel %vm1415_vm4, %v8231_v20, %v8232_v12 }
 0x765   : > { %v8235_v5 = vpack.c.bf16 %v8233_v14, %v7881_v56  ;;  %v21162_v14 = vld [vmem:[%s26519_s7 + $0x8] sm:$0xff]  }
 0x766   : > { %18801 = vmatpush3.bf16.msra.mxu0 %v21150_v19 }
 0x767   : > { %18802 = vmatprep.subr.bf16.mxu0 %v21151_v42 }
 0x769   : > { %18795 = vmatmul.mubr.msk.bf16.gmra.mrb[52].mxu0 %vm525_vm5, %v8121_v7 }
 0x76a   : > { %18803 = vmatpush3.bf16.msra.mxu0 %v21151_v42  ;;  %18806 = vmatprep.mubr.msk.bf16.mxu0 %vm525_vm5, %v24275_v38  ;;  %v21160_v38 = vld [vmem:[%s26519_s7 + $0x78] sm:$0xff]  }
 0x76b   : > { %18804 = vmatprep.subr.bf16.mxu0 %v21152_v15  ;;  %18828 = vmatprep.subr.bf16.mxu1 %v21160_v38 }
 0x76c   : > { %18829 = vmatpush3.bf16.msra.mxu1 %v21160_v38  ;;  %v9607_v38 = vrot.slane %v24466_v49, 2 }
 0x76d   : > { %18838 = vmatprep.subr.bf16.mxu1 %v24450_v31 }
 0x76e   : > { %18805 = vmatpush3.bf16.msra.mxu0 %v21152_v15 }
 0x771   : > { %18807 = vmatmul.mubr.msk.bf16.vlgmr.msra.gmra.mrb[48].mxu0 %vm525_vm5, %v24285_v4  ;;  %v16339_v4 = vld [vmem:[%s26518_s6] ss:$0 sm:$0xff] }
 0x772   : > { %18810 = vmatprep.mubr.msk.bf16.mxu0 %vm525_vm5, %v24306_v11 }
 0x779   : > { %18811 = vmatmul.mubr.msk.bf16.gmra.mrb[52].mxu0 %vm525_vm5, %v8235_v5 }
 0x844   : > { %v18808_v62 = vpop.f32.mrb[48].mxu0 }
 0x845   : > { %v8354_v6 = vadd.f32 %v18808_v62, %v16339_v4  ;;  %v8306_v26 = vpop.f32.mrb[49].mxu0 }
 0x846   : > { %v8352_v23 = vadd.f32 %v16339_v4, %v8306_v26  ;;  %v18809_v17 = vpop.f32.mrb[50].mxu0 }
 0x847   : > { %v8362_v51 = vmax.f32 %v8354_v6, 0.0  ;;  %v8355_v48 = vadd.f32 %v18809_v17, %v16339_v4  ;;  %v8309_v11 = vpop.f32.mrb[51].mxu0  ;;  %v24520_v17 = vsel %vm859_vm3, %v24461_v55, %v9464_v32 }
 0x848   : > { %v8360_v52 = vmax.f32 %v8352_v23, 0.0  ;;  %v8353_v3 = vadd.f32 %v16339_v4, %v8309_v11 }
 0x849   : > { %8371 = vst [vmem:[#allocation5 + $0x31] sm:$0xff] %v8362_v51  ;;  %v8363_v24 = vmax.f32 %v8355_v48, 0.0 }
 0x84a   : > { %8369 = vst [vmem:[#allocation5 + $0x11] sm:$0xff] %v8360_v52  ;;  %v8361_v39 = vmax.f32 %v8353_v3, 0.0 }
 0x84b   : > { %8372 = vst [vmem:[#allocation5 + $0x41] sm:$0xff] %v8363_v24 }
 0x84c   : > { %8370 = vst [vmem:[#allocation5 + $0x21] sm:$0xff] %v8361_v39  ;;  %v18812_v40 = vpop.f32.mrb[52].mxu0 }
 0x84d   : > { %v8358_v8 = vadd.f32 %v18812_v40, %v16339_v4  ;;  %v8322_v34 = vpop.f32.mrb[53].mxu0 }
 0x84e   : > { %v8356_v13 = vadd.f32 %v16339_v4, %v8322_v34  ;;  %v18813_v50 = vpop.f32.mrb[54].mxu0 }
 0x84f   : > { %v8366_v60 = vmax.f32 %v8358_v8, 0.0  ;;  %v8359_v1 = vadd.f32 %v18813_v50, %v16339_v4  ;;  %v8325_v35 = vpop.f32.mrb[55].mxu0 }
 0x850   : > { %v8364_v41 = vmax.f32 %v8356_v13, 0.0  ;;  %v8357_v21 = vadd.f32 %v16339_v4, %v8325_v35  ;;  %v24464_v44 = vld [vmem:[#allocation5 + $0x30] sm:$0xff]  ;;  %v8384_v59 = vld [vmem:[#allocation5 + $0x38] sm:$0x3] }
 0x851   : > { %8375 = vst [vmem:[#allocation5 + $0x71] sm:$0xff] %v8366_v60  ;;  %v8367_v29 = vmax.f32 %v8359_v1, 0.0  ;;  %v24468_v9 = vld [vmem:[#allocation5 + $0x10] sm:$0xff]  ;;  %v24470_v37 = vld [vmem:[#allocation5 + $0x18] sm:$0x3]  ;;  %v8442_v53 = vrot.slane %v24464_v44, 1 }
 0x852   : > { %v8443_v18 = vrot.slane %v8384_v59, 1  ;;  %8373 = vst [vmem:[#allocation5 + $0x51] sm:$0xff] %v8364_v41  ;;  %v8365_v33 = vmax.f32 %v8357_v21, 0.0  ;;  %v8436_v27 = vrot.slane %v24468_v9, 1  ;;  %v8437_v16 = vrot.slane %v24470_v37, 1  ;;  %v24477_v56 = vld [vmem:[#allocation5 + $0x40] sm:$0xff] }
 0x853   : > { %v8386_v22 = vld [vmem:[#allocation5 + $0x48] sm:$0x3]  ;;  %8376 = vst [vmem:[#allocation5 + $0x81] sm:$0xff] %v8367_v29  ;;  %v24479_v54 = vld [vmem:[#allocation5 + $0x20] sm:$0xff]  ;;  %v8445_v46 = vrot.slane %v24477_v56, 1  ;;  %v8721_v20 = vrot.slane %v24464_v44, 2  ;;  %v8397_v60 = vpack.c.bf16 %v24468_v9, %v24458_v30 }
 0x854   : > { %v8382_v10 = vld [vmem:[#allocation5 + $0x28] sm:$0x3]  ;;  %v8446_v61 = vrot.slane %v8386_v22, 1  ;;  %8374 = vst [vmem:[#allocation5 + $0x61] sm:$0xff] %v8365_v33  ;;  %v24484_v28 = vsel %vm859_vm3, %v8436_v27, %v8437_v16  ;;  %v8439_v43 = vrot.slane %v24479_v54, 1  ;;  %v24490_v57 = vsel %vm859_vm3, %v8442_v53, %v8443_v18  ;;  %v21163_v13 = vld [vmem:[%s26519_s7 + $0x10] sm:$0xff]  }
 0x855   : > { %v8440_v63 = vrot.slane %v8382_v10, 1  ;;  %v8465_v19 = vpack.c.bf16 %v24484_v28, %v8435_v0  ;;  %v8718_v42 = vrot.slane %v24479_v54, 2  ;;  %v8719_v15 = vrot.slane %v8382_v10, 2 }
 0x856   : > { %v24493_v47 = vsel %vm859_vm3, %v8445_v46, %v8446_v61  ;;  %v8722_v5 = vrot.slane %v8384_v59, 2  ;;  %v8724_v45 = vrot.slane %v24477_v56, 2  ;;  %v8725_v26 = vrot.slane %v8386_v22, 2 }
 0x857   : > { %v24497_v58 = vsel %vm859_vm3, %v8439_v43, %v8440_v63  ;;  %v9035_v7 = vpack.c.bf16 %v24493_v47, %v24490_v57  ;;  %18830 = vmatprep.mubr.bf16.mxu1 %v8465_v19  ;;  %v24514_v6 = vsel %vm1415_vm4, %v8718_v42, %v8719_v15  ;;  %v8886_v23 = vpack.c.bf16 %v24479_v54, %v24468_v9  ;;  %v21164_v43 = vld [vmem:[%s26519_s7 + $0x18] sm:$0xff]  }
 0x858   : > { %v24504_v12 = vpack.c.bf16 %v24490_v57, %v24497_v58  ;;  %v24511_v4 = vld [vmem:[#allocation5 + $0x70] sm:$0xff]  ;;  %v8392_v62 = vld [vmem:[#allocation5 + $0x78] sm:$0x3]  ;;  %v8715_v52 = vrot.slane %v24468_v9, 2  ;;  %v8716_v3 = vrot.slane %v24470_v37, 2  ;;  %v24529_v24 = vsel %vm1415_vm4, %v8721_v20, %v8722_v5 }
 0x859   : > { %v24523_v51 = vld [vmem:[#allocation5 + $0x50] sm:$0xff]  ;;  %v8388_v48 = vld [vmem:[#allocation5 + $0x58] sm:$0x3]  ;;  %v8454_v11 = vrot.slane %v24511_v4, 1  ;;  %v8455_v8 = vrot.slane %v8392_v62, 1  ;;  %v24535_v34 = vpack.c.bf16 %v24529_v24, %v24514_v6  ;;  %v8733_v35 = vrot.slane %v24511_v4, 2 }
 0x85a   : > { %18831 = vmatmul.mubr.bf16.vlgmr.msra.gmra.mrb[32].mxu1 %v24504_v12  ;;  %v8448_v39 = vrot.slane %v24523_v51, 1  ;;  %v8449_v40 = vrot.slane %v8388_v48, 1  ;;  %v8727_v1 = vrot.slane %v24523_v51, 2  ;;  %v8728_v29 = vrot.slane %v8388_v48, 2  ;;  %v24553_v37 = vld [vmem:[#allocation5 + $0x80] sm:$0xff]  ;;  %v21184_v9 = vld [vmem:[%s26519_s7 + $0xf8] sm:$0xff]  }
 0x85b   : > { %18839 = vmatpush3.bf16.msra.mxu1 %v24450_v31  ;;  %v24540_v50 = vld [vmem:[#allocation5 + $0x60] sm:$0xff]  ;;  %v8390_v36 = vld [vmem:[#allocation5 + $0x68] sm:$0x3]  ;;  %v24545_v31 = vsel %vm1415_vm4, %v8724_v45, %v8725_v26  ;;  %v24560_v18 = vsel %vm1415_vm4, %v8715_v52, %v8716_v3  ;;  %v24569_v16 = vsel %vm859_vm3, %v8454_v11, %v8455_v8  ;;  %v8734_v10 = vrot.slane %v8392_v62, 2  ;;  %v21196_v57 = vld [vmem:[%s26519_s7 + $0x158] sm:$0xff]  }
 0x85c   : > { %18840 = vmatprep.subr.bf16.mxu1 %v21162_v14  ;;  %v24550_v41 = vsel %vm859_vm3, %v8448_v39, %v8449_v40  ;;  %v8451_v21 = vrot.slane %v24540_v50, 1  ;;  %v8452_v59 = vrot.slane %v8390_v36, 1  ;;  %v9181_v33 = vpack.c.bf16 %v24545_v31, %v24529_v24  ;;  %v8394_v46 = vld [vmem:[#allocation5 + $0x88] sm:$0x3]  ;;  %v21165_v39 = vld [vmem:[%s26519_s7 + $0x20] sm:$0xff]   ;;  %v21204_v24 = vld [vmem:[%s26519_s7 + $0x198] sm:$0xff]  }
 0x85d   : > { %v24557_v53 = vpack.c.bf16 %v24550_v41, %v24493_v47  ;;  %v8730_v0 = vrot.slane %v24540_v50, 2  ;;  %v8731_v22 = vrot.slane %v8390_v36, 2  ;;  %v8887_v63 = vpack.c.bf16 %v24477_v56, %v24464_v44  ;;  %v21167_v36 = vld [vmem:[%s26519_s7 + $0x30] sm:$0xff]   ;;  %v21197_v47 = vld [vmem:[%s26519_s7 + $0x160] sm:$0xff]  }
 0x85e   : > { %v24566_v27 = vsel %vm859_vm3, %v8451_v21, %v8452_v59  ;;  %v8888_v32 = vpack.c.bf16 %v24540_v50, %v24523_v51  ;;  %v9030_v19 = vrot.slane %v24553_v37, 1  ;;  %v24585_v42 = vsel %vm1415_vm4, %v8727_v1, %v8728_v29  ;;  %v21169_v1 = vld [vmem:[%s26519_s7 + $0x80] sm:$0xff]   ;;  %v21170_v21 = vld [vmem:[%s26519_s7 + $0x88] sm:$0xff]  }
 0x85f   : > { %18841 = vmatpush3.bf16.msra.mxu1 %v21162_v14  ;;  %18834 = vmatprep.mubr.bf16.mxu1 %v24557_v53  ;;  %v24574_v61 = vpack.c.bf16 %v24569_v16, %v24566_v27  ;;  %v24588_v15 = vsel %vm1415_vm4, %v8730_v0, %v8731_v22  ;;  %v24591_v20 = vsel %vm1415_vm4, %v8733_v35, %v8734_v10  ;;  %v9031_v62 = vrot.slane %v8394_v46, 1  ;;  %v21171_v0 = vld [vmem:[%s26519_s7 + $0x90] sm:$0xff]  }
 0x860   : > { %18842 = vmatprep.subr.bf16.mxu1 %v21163_v13  ;;  %v9034_v14 = vpack.c.bf16 %v24497_v58, %v24484_v28  ;;  %v24598_v5 = vpack.c.bf16 %v24591_v20, %v24588_v15  ;;  %v9036_v45 = vpack.c.bf16 %v24566_v27, %v24550_v41  ;;  %v9180_v26 = vpack.c.bf16 %v24514_v6, %v24560_v18  ;;  %v21192_v28 = vld [vmem:[%s26519_s7 + $0x138] sm:$0xff]   ;;  %v21193_v58 = vld [vmem:[%s26519_s7 + $0x140] sm:$0xff]   ;;  %v21199_v41 = vld [vmem:[%s26519_s7 + $0x170] sm:$0xff]  }
 0x861   : > { %v9182_v48 = vpack.c.bf16 %v24588_v15, %v24585_v42  ;;  %v9176_v11 = vrot.slane %v24553_v37, 2  ;;  %v9177_v52 = vrot.slane %v8394_v46, 2  ;;  %v24612_v3 = vsel %vm1415_vm4, %v8712_v2, %v9607_v38  ;;  %v21166_v38 = vld [vmem:[%s26519_s7 + $0x28] sm:$0xff]   ;;  %v21200_v6 = vld [vmem:[%s26519_s7 + $0x178] sm:$0xff]  }
 0x862   : > { %18835 = vmatmul.mubr.bf16.gmra.mrb[36].mxu1 %v24574_v61  ;;  %v24618_v40 = vsel %vm859_vm3, %v9030_v19, %v9031_v62  ;;  %v24641_v35 = vpack.c.bf16 %v24464_v44, %v24479_v54  ;;  %v24648_v59 = vpack.c.bf16 %v24523_v51, %v24477_v56  ;;  %v8713_v29 = vrot.slane %v24456_v25, 2  ;;  %v21172_v25 = vld [vmem:[%s26519_s7 + $0x98] sm:$0xff]   ;;  %v21175_v19 = vld [vmem:[%s26519_s7 + $0xb0] sm:$0xff]   ;;  %v21185_v54 = vld [vmem:[%s26519_s7 + $0x100] sm:$0xff]  }
 0x863   : > { %18843 = vmatpush3.bf16.msra.mxu1 %v21163_v13  ;;  %18854 = vmatprep.mubr.bf16.mxu1 %v8397_v60  ;;  %v24621_v8 = vsel %vm1415_vm4, %v9176_v11, %v9177_v52  ;;  %v9467_v13 = vpack.c.bf16 %v24520_v17, %v24618_v40  ;;  %v21168_v60 = vld [vmem:[%s26519_s7 + $0x38] sm:$0xff]   ;;  %v24661_v10 = vpack.c.bf16 %v24511_v4, %v24540_v50  ;;  %v21177_v11 = vld [vmem:[%s26519_s7 + $0xc0] sm:$0xff]   ;;  %v21178_v52 = vld [vmem:[%s26519_s7 + $0xc8] sm:$0xff]  }
 0x864   : > { %18844 = vmatprep.subr.bf16.mxu1 %v21164_v43  ;;  %v9610_v49 = vpack.c.bf16 %v24612_v3, %v24621_v8  ;;  %v8714_v22 = vsel %vm1415_vm4, %v8712_v2, %v8713_v29  ;;  %v21173_v2 = vld [vmem:[%s26519_s7 + $0xa0] sm:$0xff]   ;;  %v21176_v62 = vld [vmem:[%s26519_s7 + $0xb8] sm:$0xff]   ;;  %v21187_v29 = vld [vmem:[%s26519_s7 + $0x110] sm:$0xff]  }
 0x865   : > { %v8744_v46 = vpack.c.bf16 %v24560_v18, %v8714_v22  ;;  %v21188_v44 = vld [vmem:[%s26519_s7 + $0x118] sm:$0xff]   ;;  %v21189_v56 = vld [vmem:[%s26519_s7 + $0x120] sm:$0xff]   ;;  %v21191_v51 = vld [vmem:[%s26519_s7 + $0x130] sm:$0xff]  }
 0x866   : > { %v21194_v50 = vld [vmem:[%s26519_s7 + $0x148] sm:$0xff]   ;;  %v21201_v18 = vld [vmem:[%s26519_s7 + $0x180] sm:$0xff]   ;;  %v21208_v15 = vld [vmem:[%s26519_s7 + $0x1b8] sm:$0xff]  }
 0x867   : > { %18845 = vmatpush3.bf16.msra.mxu1 %v21164_v43  ;;  %v21174_v43 = vld [vmem:[%s26519_s7 + $0xa8] sm:$0xff]   ;;  %v21217_v22 = vld [vmem:[%s26519_s7 + $0x200] sm:$0xff]   ;;  %v21223_v17 = vld [vmem:[%s26519_s7 + $0x230] sm:$0xff]  }
 0x868   : > { %18846 = vmatprep.subr.bf16.mxu1 %v21165_v39  ;;  %v21202_v27 = vld [vmem:[%s26519_s7 + $0x188] sm:$0xff]  }
 0x86b   : > { %18847 = vmatpush3.bf16.msra.mxu1 %v21165_v39  ;;  %v24688_v39 = vpack.c.bf16 %v24585_v42, %v24545_v31  ;;  %v21205_v31 = vld [vmem:[%s26519_s7 + $0x1a0] sm:$0xff]   ;;  %v21207_v42 = vld [vmem:[%s26519_s7 + $0x1b0] sm:$0xff]  }
 0x86c   : > { %18848 = vmatprep.subr.bf16.mxu1 %v21166_v38 }
 0x86f   : > { %18849 = vmatpush3.bf16.msra.mxu1 %v21166_v38  ;;  %v21179_v38 = vld [vmem:[%s26519_s7 + $0xd0] sm:$0xff]  }
 0x870   : > { %18850 = vmatprep.subr.bf16.mxu1 %v21167_v36 }
 0x873   : > { %18851 = vmatpush3.bf16.msra.mxu1 %v21167_v36  ;;  %v21180_v36 = vld [vmem:[%s26519_s7 + $0xd8] sm:$0xff]  }
 0x874   : > { %18852 = vmatprep.subr.bf16.mxu1 %v21168_v60 }
 0x877   : > { %18853 = vmatpush3.bf16.msra.mxu1 %v21168_v60  ;;  %v21181_v60 = vld [vmem:[%s26519_s7 + $0xe0] sm:$0xff]  }
 0x878   : > { %18862 = vmatprep.subr.bf16.mxu1 %v21169_v1 }
 0x87a   : > { %18855 = vmatmul.mubr.bf16.vlgmr.msra.gmra.mrb[32].mxu1 %v24641_v35 }
 0x87b   : > { %18858 = vmatprep.mubr.bf16.mxu1 %v24648_v59  ;;  %18863 = vmatpush3.bf16.msra.mxu1 %v21169_v1  ;;  %v21182_v1 = vld [vmem:[%s26519_s7 + $0xe8] sm:$0xff]  }
 0x87c   : > { %18864 = vmatprep.subr.bf16.mxu1 %v21170_v21 }
 0x87f   : > { %18865 = vmatpush3.bf16.msra.mxu1 %v21170_v21  ;;  %v21183_v21 = vld [vmem:[%s26519_s7 + $0xf0] sm:$0xff]  }
 0x880   : > { %18866 = vmatprep.subr.bf16.mxu1 %v21171_v0 }
 0x882   : > { %18859 = vmatmul.mubr.bf16.gmra.mrb[36].mxu1 %v24661_v10 }
 0x883   : > { %18867 = vmatpush3.bf16.msra.mxu1 %v21171_v0  ;;  %18878 = vmatprep.mubr.bf16.mxu1 %v8744_v46  ;;  %v8889_v0 = vpack.c.bf16 %v24553_v37, %v24511_v4  ;;  %v21190_v4 = vld [vmem:[%s26519_s7 + $0x128] sm:$0xff]   ;;  %v21220_v46 = vld [vmem:[%s26519_s7 + $0x218] sm:$0xff]  }
 0x884   : > { %18868 = vmatprep.subr.bf16.mxu1 %v21172_v25 }
 0x887   : > { %18869 = vmatpush3.bf16.msra.mxu1 %v21172_v25  ;;  %v21219_v25 = vld [vmem:[%s26519_s7 + $0x210] sm:$0xff]  }
 0x888   : > { %18870 = vmatprep.subr.bf16.mxu1 %v21173_v2 }
 0x88b   : > { %18871 = vmatpush3.bf16.msra.mxu1 %v21173_v2 }
 0x88c   : > { %18872 = vmatprep.subr.bf16.mxu1 %v21174_v43 }
 0x88f   : > { %18873 = vmatpush3.bf16.msra.mxu1 %v21174_v43 }
 0x890   : > { %18874 = vmatprep.subr.bf16.mxu1 %v21175_v19 }
 0x893   : > { %18875 = vmatpush3.bf16.msra.mxu1 %v21175_v19 }
 0x894   : > { %18876 = vmatprep.subr.bf16.mxu1 %v21176_v62 }
 0x897   : > { %18877 = vmatpush3.bf16.msra.mxu1 %v21176_v62 }
 0x898   : > { %18886 = vmatprep.subr.bf16.mxu1 %v21177_v11 }
 0x89a   : > { %18879 = vmatmul.mubr.bf16.vlgmr.msra.gmra.mrb[32].mxu1 %v24535_v34 }
 0x89b   : > { %18882 = vmatprep.mubr.bf16.mxu1 %v24688_v39  ;;  %18887 = vmatpush3.bf16.msra.mxu1 %v21177_v11 }
 0x89c   : > { %18888 = vmatprep.subr.bf16.mxu1 %v21178_v52 }
 0x89f   : > { %18889 = vmatpush3.bf16.msra.mxu1 %v21178_v52 }
 0x8a0   : > { %18890 = vmatprep.subr.bf16.mxu1 %v21179_v38 }
 0x8a2   : > { %18883 = vmatmul.mubr.bf16.gmra.mrb[36].mxu1 %v24598_v5 }
 0x8a3   : > { %18891 = vmatpush3.bf16.msra.mxu1 %v21179_v38  ;;  %18902 = vmatprep.mubr.bf16.mxu1 %v8886_v23  ;;  %v21186_v23 = vld [vmem:[%s26519_s7 + $0x108] sm:$0xff]  }
 0x8a4   : > { %18892 = vmatprep.subr.bf16.mxu1 %v21180_v36 }
 0x8a7   : > { %18893 = vmatpush3.bf16.msra.mxu1 %v21180_v36 }
 0x8a8   : > { %18894 = vmatprep.subr.bf16.mxu1 %v21181_v60 }
 0x8ab   : > { %18895 = vmatpush3.bf16.msra.mxu1 %v21181_v60 }
 0x8ac   : > { %18896 = vmatprep.subr.bf16.mxu1 %v21182_v1 }
 0x8af   : > { %18897 = vmatpush3.bf16.msra.mxu1 %v21182_v1 }
 0x8b0   : > { %18898 = vmatprep.subr.bf16.mxu1 %v21183_v21 }
 0x8b3   : > { %18899 = vmatpush3.bf16.msra.mxu1 %v21183_v21 }
 0x8b4   : > { %18900 = vmatprep.subr.bf16.mxu1 %v21184_v9 }
 0x8b7   : > { %18901 = vmatpush3.bf16.msra.mxu1 %v21184_v9 }
 0x8b8   : > { %18910 = vmatprep.subr.bf16.mxu1 %v21185_v54 }
 0x8ba   : > { %18903 = vmatmul.mubr.bf16.vlgmr.msra.gmra.mrb[32].mxu1 %v8887_v63  ;;  %v21195_v63 = vld [vmem:[%s26519_s7 + $0x150] sm:$0xff]  }
 0x8bb   : > { %18906 = vmatprep.mubr.bf16.mxu1 %v8888_v32  ;;  %18911 = vmatpush3.bf16.msra.mxu1 %v21185_v54  ;;  %v9037_v32 = vpack.c.bf16 %v24618_v40, %v24569_v16  ;;  %v21203_v16 = vld [vmem:[%s26519_s7 + $0x190] sm:$0xff]   ;;  %v9772_v40 = vld [vmem:[%s26525_s13] sm:$0xff] }
 0x8bc   : > { %18912 = vmatprep.subr.bf16.mxu1 %v21186_v23  ;;  %19046 = vmatprep.mubr.msk.f32.mxu0 %vm525_vm5, %v9772_v40  ;;  %v9799_v40 = vld [vmem:[%s26525_s13 + $0xd8] sm:$0xff] }
 0x8bf   : > { %18913 = vmatpush3.bf16.msra.mxu1 %v21186_v23 }
 0x8c0   : > { %18914 = vmatprep.subr.bf16.mxu1 %v21187_v29 }
 0x8c2   : > { %18907 = vmatmul.mubr.bf16.gmra.mrb[36].mxu1 %v8889_v0 }
 0x8c3   : > { %18915 = vmatpush3.bf16.msra.mxu1 %v21187_v29  ;;  %18926 = vmatprep.mubr.bf16.mxu1 %v9034_v14  ;;  %v9183_v14 = vpack.c.bf16 %v24621_v8, %v24591_v20  ;;  %v21209_v20 = vld [vmem:[%s26519_s7 + $0x1c0] sm:$0xff]  }
 0x8c4   : > { %18916 = vmatprep.subr.bf16.mxu1 %v21188_v44 }
 0x8c7   : > { %18917 = vmatpush3.bf16.msra.mxu1 %v21188_v44 }
 0x8c8   : > { %18918 = vmatprep.subr.bf16.mxu1 %v21189_v56 }
 0x8cb   : > { %18919 = vmatpush3.bf16.msra.mxu1 %v21189_v56 }
 0x8cc   : > { %18920 = vmatprep.subr.bf16.mxu1 %v21190_v4 }
 0x8cf   : > { %18921 = vmatpush3.bf16.msra.mxu1 %v21190_v4 }
 0x8d0   : > { %18922 = vmatprep.subr.bf16.mxu1 %v21191_v51 }
 0x8d3   : > { %18923 = vmatpush3.bf16.msra.mxu1 %v21191_v51 }
 0x8d4   : > { %18924 = vmatprep.subr.bf16.mxu1 %v21192_v28 }
 0x8d7   : > { %18925 = vmatpush3.bf16.msra.mxu1 %v21192_v28 }
 0x8d8   : > { %18934 = vmatprep.subr.bf16.mxu1 %v21193_v58 }
 0x8da   : > { %18927 = vmatmul.mubr.bf16.vlgmr.msra.gmra.mrb[32].mxu1 %v9035_v7  ;;  %v21198_v7 = vld [vmem:[%s26519_s7 + $0x168] sm:$0xff]  }
 0x8db   : > { %18930 = vmatprep.mubr.bf16.mxu1 %v9036_v45  ;;  %18935 = vmatpush3.bf16.msra.mxu1 %v21193_v58  ;;  %v21210_v45 = vld [vmem:[%s26519_s7 + $0x1c8] sm:$0xff]  }
 0x8dc   : > { %18936 = vmatprep.subr.bf16.mxu1 %v21194_v50 }
 0x8df   : > { %18937 = vmatpush3.bf16.msra.mxu1 %v21194_v50 }
 0x8e0   : > { %18938 = vmatprep.subr.bf16.mxu1 %v21195_v63 }
 0x8e2   : > { %18931 = vmatmul.mubr.bf16.gmra.mrb[36].mxu1 %v9037_v32  ;;  %v9773_v32 = vld [vmem:[%s26525_s13 + $0x8] sm:$0xff] }
 0x8e3   : > { %18939 = vmatpush3.bf16.msra.mxu1 %v21195_v63  ;;  %18950 = vmatprep.mubr.bf16.mxu1 %v9180_v26  ;;  %v21211_v26 = vld [vmem:[%s26519_s7 + $0x1d0] sm:$0xff]   ;;  %v21225_v63 = vld [vmem:[%s26521_s9 + $0x40] sm:$0xff]  }
 0x8e4   : > { %18940 = vmatprep.subr.bf16.mxu1 %v21196_v57 }
 0x8e7   : > { %18941 = vmatpush3.bf16.msra.mxu1 %v21196_v57  ;;  %v9774_v57 = vld [vmem:[%s26525_s13 + $0x10] sm:$0xff] }
 0x8e8   : > { %18942 = vmatprep.subr.bf16.mxu1 %v21197_v47 }
 0x8eb   : > { %18943 = vmatpush3.bf16.msra.mxu1 %v21197_v47  ;;  %v21226_v47 = vld [vmem:[%s26521_s9 + $0x48] sm:$0xff]  }
 0x8ec   : > { %18944 = vmatprep.subr.bf16.mxu1 %v21198_v7 }
 0x8ef   : > { %18945 = vmatpush3.bf16.msra.mxu1 %v21198_v7  ;;  %v9775_v7 = vld [vmem:[%s26525_s13 + $0x18] sm:$0xff] }
 0x8f0   : > { %18946 = vmatprep.subr.bf16.mxu1 %v21199_v41 }
 0x8f3   : > { %18947 = vmatpush3.bf16.msra.mxu1 %v21199_v41  ;;  %v9776_v41 = vld [vmem:[%s26525_s13 + $0x20] sm:$0xff] }
 0x8f4   : > { %18948 = vmatprep.subr.bf16.mxu1 %v21200_v6 }
 0x8f7   : > { %18949 = vmatpush3.bf16.msra.mxu1 %v21200_v6  ;;  %v21227_v6 = vld [vmem:[%s26521_s9 + $0x50] sm:$0xff]  }
 0x8f8   : > { %18958 = vmatprep.subr.bf16.mxu1 %v21201_v18 }
 0x8fa   : > { %18951 = vmatmul.mubr.bf16.vlgmr.msra.gmra.mrb[32].mxu1 %v9181_v33  ;;  %v21206_v33 = vld [vmem:[%s26519_s7 + $0x1a8] sm:$0xff]  }
 0x8fb   : > { %18954 = vmatprep.mubr.bf16.mxu1 %v9182_v48  ;;  %18959 = vmatpush3.bf16.msra.mxu1 %v21201_v18  ;;  %v9322_v48 = vpack.c.bf16 %v24458_v30, %v24553_v37  ;;  %v21214_v30 = vld [vmem:[%s26519_s7 + $0x1e8] sm:$0xff]   ;;  %v21215_v37 = vld [vmem:[%s26519_s7 + $0x1f0] sm:$0xff]  }
 0x8fc   : > { %18960 = vmatprep.subr.bf16.mxu1 %v21202_v27  ;;  %v9777_v18 = vld [vmem:[%s26525_s13 + $0x28] sm:$0xff] }
 0x8ff   : > { %18961 = vmatpush3.bf16.msra.mxu1 %v21202_v27  ;;  %v9778_v27 = vld [vmem:[%s26525_s13 + $0x30] sm:$0xff] }
 0x900   : > { %18962 = vmatprep.subr.bf16.mxu1 %v21203_v16 }
 0x902   : > { %18955 = vmatmul.mubr.bf16.gmra.mrb[36].mxu1 %v9183_v14  ;;  %v9779_v14 = vld [vmem:[%s26525_s13 + $0x38] sm:$0xff] }
 0x903   : > { %18963 = vmatpush3.bf16.msra.mxu1 %v21203_v16  ;;  %18974 = vmatprep.mubr.bf16.mxu1 %v24641_v35  ;;  %v21212_v35 = vld [vmem:[%s26519_s7 + $0x1d8] sm:$0xff]  }
 0x904   : > { %18964 = vmatprep.subr.bf16.mxu1 %v21204_v24  ;;  %v21228_v16 = vld [vmem:[%s26521_s9 + $0x58] sm:$0xff]  }
 0x907   : > { %18965 = vmatpush3.bf16.msra.mxu1 %v21204_v24  ;;  %v9780_v24 = vld [vmem:[%s26525_s13 + $0x40] sm:$0xff] }
 0x908   : > { %18966 = vmatprep.subr.bf16.mxu1 %v21205_v31 }
 0x90b   : > { %18967 = vmatpush3.bf16.msra.mxu1 %v21205_v31  ;;  %v21229_v31 = vld [vmem:[%s26521_s9 + $0x60] sm:$0xff]  }
 0x90c   : > { %18968 = vmatprep.subr.bf16.mxu1 %v21206_v33 }
 0x90f   : > { %18969 = vmatpush3.bf16.msra.mxu1 %v21206_v33  ;;  %v9781_v33 = vld [vmem:[%s26525_s13 + $0x48] sm:$0xff] }
 0x910   : > { %18970 = vmatprep.subr.bf16.mxu1 %v21207_v42 }
 0x913   : > { %18971 = vmatpush3.bf16.msra.mxu1 %v21207_v42  ;;  %v9782_v42 = vld [vmem:[%s26525_s13 + $0x50] sm:$0xff] }
 0x914   : > { %18972 = vmatprep.subr.bf16.mxu1 %v21208_v15 }
 0x917   : > { %18973 = vmatpush3.bf16.msra.mxu1 %v21208_v15  ;;  %v21230_v15 = vld [vmem:[%s26521_s9 + $0x68] sm:$0xff]  }
 0x918   : > { %18982 = vmatprep.subr.bf16.mxu1 %v21209_v20 }
 0x91a   : > { %18975 = vmatmul.mubr.bf16.vlgmr.msra.gmra.mrb[32].mxu1 %v24648_v59  ;;  %v21213_v59 = vld [vmem:[%s26519_s7 + $0x1e0] sm:$0xff]  }
 0x91b   : > { %18978 = vmatprep.mubr.bf16.mxu1 %v24661_v10  ;;  %18983 = vmatpush3.bf16.msra.mxu1 %v21209_v20  ;;  %v21218_v10 = vld [vmem:[%s26519_s7 + $0x208] sm:$0xff]   ;;  %v9783_v20 = vld [vmem:[%s26525_s13 + $0x58] sm:$0xff] }
 0x91c   : > { %18984 = vmatprep.subr.bf16.mxu1 %v21210_v45 }
 0x91f   : > { %18985 = vmatpush3.bf16.msra.mxu1 %v21210_v45  ;;  %v9784_v45 = vld [vmem:[%s26525_s13 + $0x60] sm:$0xff] }
 0x920   : > { %18986 = vmatprep.subr.bf16.mxu1 %v21211_v26 }
 0x922   : > { %18979 = vmatmul.mubr.bf16.gmra.mrb[36].mxu1 %v9322_v48  ;;  %v9785_v48 = vld [vmem:[%s26525_s13 + $0x68] sm:$0xff] }
 0x923   : > { %18987 = vmatpush3.bf16.msra.mxu1 %v21211_v26  ;;  %18998 = vmatprep.mubr.bf16.mxu1 %v24504_v12  ;;  %v21216_v12 = vld [vmem:[%s26519_s7 + $0x1f8] sm:$0xff]   ;;  %v21231_v26 = vld [vmem:[%s26521_s9 + $0x70] sm:$0xff]  }
 0x924   : > { %18988 = vmatprep.subr.bf16.mxu1 %v21212_v35 }
 0x927   : > { %18989 = vmatpush3.bf16.msra.mxu1 %v21212_v35  ;;  %v9786_v35 = vld [vmem:[%s26525_s13 + $0x70] sm:$0xff] }
 0x928   : > { %18990 = vmatprep.subr.bf16.mxu1 %v21213_v59 }
 0x92b   : > { %18991 = vmatpush3.bf16.msra.mxu1 %v21213_v59  ;;  %v9787_v59 = vld [vmem:[%s26525_s13 + $0x78] sm:$0xff] }
 0x92c   : > { %18992 = vmatprep.subr.bf16.mxu1 %v21214_v30 }
 0x92f   : > { %18993 = vmatpush3.bf16.msra.mxu1 %v21214_v30  ;;  %v9788_v30 = vld [vmem:[%s26525_s13 + $0x80] sm:$0xff] }
 0x930   : > { %18994 = vmatprep.subr.bf16.mxu1 %v21215_v37 }
 0x933   : > { %18995 = vmatpush3.bf16.msra.mxu1 %v21215_v37  ;;  %v9789_v37 = vld [vmem:[%s26525_s13 + $0x88] sm:$0xff] }
 0x934   : > { %18996 = vmatprep.subr.bf16.mxu1 %v21216_v12 }
 0x937   : > { %18997 = vmatpush3.bf16.msra.mxu1 %v21216_v12  ;;  %v9790_v12 = vld [vmem:[%s26525_s13 + $0x90] sm:$0xff] }
 0x938   : > { %19006 = vmatprep.subr.bf16.mxu1 %v21217_v22 }
 0x93a   : > { %18999 = vmatmul.mubr.bf16.vlgmr.msra.gmra.mrb[32].mxu1 %v24557_v53  ;;  %v21221_v53 = vld [vmem:[%s26519_s7 + $0x220] sm:$0xff]  }
 0x93b   : > { %19002 = vmatprep.mubr.bf16.mxu1 %v24574_v61  ;;  %19007 = vmatpush3.bf16.msra.mxu1 %v21217_v22  ;;  %v21222_v61 = vld [vmem:[%s26519_s7 + $0x228] sm:$0xff]   ;;  %v9791_v22 = vld [vmem:[%s26525_s13 + $0x98] sm:$0xff] }
 0x93c   : > { %19008 = vmatprep.subr.bf16.mxu1 %v21218_v10 }
 0x93f   : > { %19009 = vmatpush3.bf16.msra.mxu1 %v21218_v10  ;;  %v9792_v10 = vld [vmem:[%s26525_s13 + $0xa0] sm:$0xff] }
 0x940   : > { %19010 = vmatprep.subr.bf16.mxu1 %v21219_v25 }
 0x942   : > { %19003 = vmatmul.mubr.bf16.gmra.mrb[36].mxu1 %v9467_v13  ;;  %v16540_v13 = vld [vmem:[%s26520_s8] ss:$0 sm:$0xff] }
 0x943   : > { %19011 = vmatpush3.bf16.msra.mxu1 %v21219_v25  ;;  %19022 = vmatprep.mubr.bf16.mxu1 %v24535_v34  ;;  %v21224_v34 = vld [vmem:[%s26519_s7 + $0x238] sm:$0xff]   ;;  %v9793_v25 = vld [vmem:[%s26525_s13 + $0xa8] sm:$0xff] }
 0x944   : > { %19012 = vmatprep.subr.bf16.mxu1 %v21220_v46 }
 0x947   : > { %19013 = vmatpush3.bf16.msra.mxu1 %v21220_v46  ;;  %v9794_v46 = vld [vmem:[%s26525_s13 + $0xb0] sm:$0xff] }
 0x948   : > { %19014 = vmatprep.subr.bf16.mxu1 %v21221_v53 }
 0x94b   : > { %19015 = vmatpush3.bf16.msra.mxu1 %v21221_v53  ;;  %v9795_v53 = vld [vmem:[%s26525_s13 + $0xb8] sm:$0xff] }
 0x94c   : > { %19016 = vmatprep.subr.bf16.mxu1 %v21222_v61 }
 0x94f   : > { %19017 = vmatpush3.bf16.msra.mxu1 %v21222_v61  ;;  %v9796_v61 = vld [vmem:[%s26525_s13 + $0xc0] sm:$0xff] }
 0x950   : > { %19018 = vmatprep.subr.bf16.mxu1 %v21223_v17 }
 0x953   : > { %19019 = vmatpush3.bf16.msra.mxu1 %v21223_v17  ;;  %v9797_v17 = vld [vmem:[%s26525_s13 + $0xc8] sm:$0xff] }
 0x954   : > { %19020 = vmatprep.subr.bf16.mxu1 %v21224_v34 }
 0x957   : > { %19021 = vmatpush3.bf16.msra.mxu1 %v21224_v34  ;;  %v9798_v34 = vld [vmem:[%s26525_s13 + $0xd0] sm:$0xff] }
 0x95a   : > { %19023 = vmatmul.mubr.bf16.vlgmr.msra.gmra.mrb[32].mxu1 %v24688_v39 }
 0x95b   : > { %19026 = vmatprep.mubr.bf16.mxu1 %v24598_v5 }
 0x962   : > { %19027 = vmatmul.mubr.bf16.gmra.mrb[36].mxu1 %v9610_v49 }
 0xa2d   : > { %v19024_v2 = vpop.f32.mrb[32].mxu1 }
 0xa2e   : > { %v9758_v43 = vadd.f32 %v19024_v2, %v16540_v13  ;;  %v9710_v19 = vpop.f32.mrb[33].mxu1  ;;  %v9801_v2 = vld [vmem:[%s26525_s13 + $0xe8] sm:$0xff] }
 0xa2f   : > { %v9756_v62 = vadd.f32 %v16540_v13, %v9710_v19  ;;  %v19025_v11 = vpop.f32.mrb[34].mxu1  ;;  %v9802_v19 = vld [vmem:[%s26525_s13 + $0xf0] sm:$0xff] }
 0xa30   : > { %v9759_v5 = vadd.f32 %v19025_v11, %v16540_v13  ;;  %v9713_v52 = vpop.f32.mrb[35].mxu1  ;;  %v9766_v3 = vmax.f32 %v9758_v43, 0.0  ;;  %v21232_v43 = vld [vmem:[%s26521_s9 + $0x78] sm:$0xff]   ;;  %v25036_v11 = vld [vmem:[#allocation6 + $0x10] sm:$0x3] }
 0xa31   : > { %v9757_v39 = vadd.f32 %v16540_v13, %v9713_v52  ;;  %v9764_v49 = vmax.f32 %v9756_v62, 0.0  ;;  %v9803_v62 = vld [vmem:[%s26525_s13 + $0xf8] sm:$0xff]  ;;  %v21233_v52 = vld [vmem:[%s26521_s9] sm:$0xff]  }
 0xa32   : > { %v9767_v8 = vmax.f32 %v9759_v5, 0.0  ;;  %v10295_v5 = vrot.slane %v25036_v11, 1 }
 0xa33   : > { %v9765_v38 = vmax.f32 %v9757_v39, 0.0 }
 0xa34   : > { %v19890_v36 = vpack.c.bf16 %v9767_v8, %v9766_v3  ;;  %v10296_v39 = vsel %vm859_vm3, %v24461_v55, %v10295_v5 }
 0xa35   : > { %v19886_v60 = vpack.c.bf16 %v9765_v38, %v9764_v49  ;;  %v19028_v1 = vpop.f32.mrb[36].mxu1  ;;  %v10404_v3 = vpack.c.bf16 %v10296_v39, %v24461_v55 }
 0xa36   : > { %v9762_v21 = vadd.f32 %v19028_v1, %v16540_v13  ;;  %v9726_v9 = vpop.f32.mrb[37].mxu1 }
 0xa37   : > { %v9760_v54 = vadd.f32 %v16540_v13, %v9726_v9  ;;  %v19029_v23 = vpop.f32.mrb[38].mxu1  ;;  %19887 = vmatprep.subr.bf16.mxu0 %v19886_v60 }
 0xa38   : > { %v9763_v29 = vadd.f32 %v19029_v23, %v16540_v13  ;;  %v9729_v0 = vpop.f32.mrb[39].mxu1  ;;  %19889 = vmatpush3.bf16.msra.mxu0 %v19886_v60  ;;  %v9770_v56 = vmax.f32 %v9762_v21, 0.0 }
 0xa39   : > { %v9761_v44 = vadd.f32 %v16540_v13, %v9729_v0  ;;  %19891 = vmatprep.subr.bf16.mxu0 %v19890_v36  ;;  %v9768_v51 = vmax.f32 %v9760_v54, 0.0  ;;  %v9800_v13 = vld [vmem:[%s26525_s13 + $0xe0] sm:$0xff] }
 0xa3a   : > { %v9771_v4 = vmax.f32 %v9763_v29, 0.0 }
 0xa3b   : > { %v9769_v28 = vmax.f32 %v9761_v44, 0.0 }
 0xa3c   : > { %v19898_v58 = vpack.c.bf16 %v9771_v4, %v9770_v56  ;;  %19893 = vmatpush3.bf16.msra.mxu0 %v19890_v36 }
 0xa3d   : > { %v19894_v50 = vpack.c.bf16 %v9769_v28, %v9768_v51 }
 0xa3f   : > { %19895 = vmatprep.subr.bf16.mxu0 %v19894_v50 }
 0xa40   : > { %19897 = vmatpush3.bf16.msra.mxu0 %v19894_v50 }
 0xa41   : > { %19899 = vmatprep.subr.bf16.mxu0 %v19898_v58 }
 0xa44   : > { %19901 = vmatpush3.bf16.msra.mxu0 %v19898_v58 }
 0xa45   : > { %19094 = vmatprep.subr.bf16.mxu0 %v21225_v63 }
 0xa47   : > { %19047 = vmatmul.mubr.msk.f32.vlgmr.msra.gmra.mrb[56].mxu0 %vm525_vm5, %v9773_v32 }
 0xa48   : > { %19049 = vmatprep.mubr.msk.f32.mxu0 %vm525_vm5, %v9774_v57  ;;  %19095 = vmatpush3.bf16.msra.mxu0 %v21225_v63 }
 0xa49   : > { %19096 = vmatprep.subr.bf16.mxu0 %v21226_v47 }
 0xa4b   : > { %19050 = vmatmul.mubr.msk.f32.gmra.mrb[58].mxu0 %vm525_vm5, %v9775_v7 }
 0xa4c   : > { %19052 = vmatprep.mubr.msk.f32.mxu0 %vm525_vm5, %v9776_v41  ;;  %19097 = vmatpush3.bf16.msra.mxu0 %v21226_v47  ;;  %v21234_v41 = vld [vmem:[%s26521_s9 + $0x8] sm:$0xff]  }
 0xa4d   : > { %19098 = vmatprep.subr.bf16.mxu0 %v21227_v6 }
 0xa4f   : > { %19053 = vmatmul.mubr.msk.f32.gmra.mrb[60].mxu0 %vm525_vm5, %v9777_v18 }
 0xa50   : > { %19055 = vmatprep.mubr.msk.f32.mxu0 %vm525_vm5, %v9778_v27  ;;  %19099 = vmatpush3.bf16.msra.mxu0 %v21227_v6 }
 0xa51   : > { %19100 = vmatprep.subr.bf16.mxu0 %v21228_v16 }
 0xa53   : > { %19056 = vmatmul.mubr.msk.f32.gmra.mrb[62].mxu0 %vm525_vm5, %v9779_v14 }
 0xa54   : > { %19058 = vmatprep.mubr.msk.f32.mxu0 %vm525_vm5, %v9780_v24  ;;  %19101 = vmatpush3.bf16.msra.mxu0 %v21228_v16 }
 0xa55   : > { %19102 = vmatprep.subr.bf16.mxu0 %v21229_v31 }
 0xa57   : > { %19059 = vmatmul.mubr.msk.f32.gmra.mrb[64].mxu0 %vm525_vm5, %v9781_v33 }
 0xa58   : > { %19061 = vmatprep.mubr.msk.f32.mxu0 %vm525_vm5, %v9782_v42  ;;  %19103 = vmatpush3.bf16.msra.mxu0 %v21229_v31 }
 0xa59   : > { %19104 = vmatprep.subr.bf16.mxu0 %v21230_v15 }
 0xa5b   : > { %19062 = vmatmul.mubr.msk.f32.gmra.mrb[66].mxu0 %vm525_vm5, %v9783_v20 }
 0xa5c   : > { %19064 = vmatprep.mubr.msk.f32.mxu0 %vm525_vm5, %v9784_v45  ;;  %19105 = vmatpush3.bf16.msra.mxu0 %v21230_v15 }
 0xa5d   : > { %19106 = vmatprep.subr.bf16.mxu0 %v21231_v26 }
 0xa5f   : > { %19065 = vmatmul.mubr.msk.f32.gmra.mrb[68].mxu0 %vm525_vm5, %v9785_v48 }
 0xa60   : > { %19067 = vmatprep.mubr.msk.f32.mxu0 %vm525_vm5, %v9786_v35  ;;  %19107 = vmatpush3.bf16.msra.mxu0 %v21231_v26 }
 0xa61   : > { %19108 = vmatprep.subr.bf16.mxu0 %v21232_v43 }
 0xa63   : > { %19068 = vmatmul.mubr.msk.f32.gmra.mrb[70].mxu0 %vm525_vm5, %v9787_v59 }
 0xa64   : > { %19070 = vmatprep.mubr.msk.f32.mxu0 %vm525_vm5, %v9788_v30  ;;  %19109 = vmatpush3.bf16.msra.mxu0 %v21232_v43 }
 0xa65   : > { %19142 = vmatprep.subr.bf16.mxu0 %v21233_v52 }
 0xa67   : > { %19071 = vmatmul.mubr.msk.f32.gmra.mrb[72].mxu0 %vm525_vm5, %v9789_v37 }
 0xa68   : > { %19073 = vmatprep.mubr.msk.f32.mxu0 %vm525_vm5, %v9790_v12  ;;  %v21235_v12 = vld [vmem:[%s26521_s9 + $0x10] sm:$0xff]  }
 0xa6b   : > { %19074 = vmatmul.mubr.msk.f32.gmra.mrb[74].mxu0 %vm525_vm5, %v9791_v22 }
 0xa6c   : > { %19076 = vmatprep.mubr.msk.f32.mxu0 %vm525_vm5, %v9792_v10 }
 0xa6f   : > { %19077 = vmatmul.mubr.msk.f32.gmra.mrb[76].mxu0 %vm525_vm5, %v9793_v25 }
 0xa70   : > { %19079 = vmatprep.mubr.msk.f32.mxu0 %vm525_vm5, %v9794_v46 }
 0xa73   : > { %19080 = vmatmul.mubr.msk.f32.gmra.mrb[78].mxu0 %vm525_vm5, %v9795_v53 }
 0xa74   : > { %19082 = vmatprep.mubr.msk.f32.mxu0 %vm525_vm5, %v9796_v61 }
 0xa77   : > { %19083 = vmatmul.mubr.msk.f32.gmra.mrb[80].mxu0 %vm525_vm5, %v9797_v17 }
 0xa78   : > { %19085 = vmatprep.mubr.msk.f32.mxu0 %vm525_vm5, %v9798_v34 }
 0xa7b   : > { %19086 = vmatmul.mubr.msk.f32.gmra.mrb[82].mxu0 %vm525_vm5, %v9799_v40 }
 0xa7c   : > { %19088 = vmatprep.mubr.msk.f32.mxu0 %vm525_vm5, %v9800_v13 }
 0xa7f   : > { %19089 = vmatmul.mubr.msk.f32.gmra.mrb[84].mxu0 %vm525_vm5, %v9801_v2 }
 0xa80   : > { %19091 = vmatprep.mubr.msk.f32.mxu0 %vm525_vm5, %v9802_v19 }
 0xa83   : > { %19092 = vmatmul.mubr.msk.f32.gmra.mrb[86].mxu0 %vm525_vm5, %v9803_v62 }
 0xa84   : > { %19110 = vmatprep.mubr.bf16.mxu0 %v10404_v3 }
 0xb1a   : > { %v19048_v8 = vpop.f32.mrb[56].mxu0 }
 0xb1b   : > { %10127 = vst [vmem:[#allocation6 + $0x21] sm:$0xff] %v19048_v8  ;;  %v9966_v49 = vpop.f32.mrb[57].mxu0  ;;  %v21236_v8 = vld [vmem:[%s26521_s9 + $0x18] sm:$0xff]  }
 0xb1c   : > { %10126 = vst [vmem:[#allocation6 + $0x19] sm:$0xff] %v9966_v49 }
 0xb1e   : > { %v19051_v38 = vpop.f32.mrb[58].mxu0 }
 0xb1f   : > { %10129 = vst [vmem:[#allocation6 + $0x39] sm:$0xff] %v19051_v38  ;;  %v9976_v36 = vpop.f32.mrb[59].mxu0 }
 0xb20   : > { %10128 = vst [vmem:[#allocation6 + $0x31] sm:$0xff] %v9976_v36 }
 0xb22   : > { %v19054_v60 = vpop.f32.mrb[60].mxu0  ;;  %v10163_v1 = vld [vmem:[#allocation6 + $0x28] sm:$0x3] }
 0xb23   : > { %10131 = vst [vmem:[#allocation6 + $0x51] sm:$0xff] %v19054_v60  ;;  %v9986_v21 = vpop.f32.mrb[61].mxu0  ;;  %v10161_v9 = vld [vmem:[#allocation6 + $0x18] sm:$0xff]  ;;  %v10162_v54 = vld [vmem:[#allocation6 + $0x20] sm:$0xff]  ;;  %v10300_v23 = vrot.slane %v10163_v1, 1  ;;  %v10863_v29 = vrot.slane %v10163_v1, 2 }
 0xb24   : > { %10130 = vst [vmem:[#allocation6 + $0x49] sm:$0xff] %v9986_v21  ;;  %v10297_v0 = vrot.slane %v10161_v9, 1  ;;  %v10298_v55 = vrot.slane %v10162_v54, 1  ;;  %v25045_v44 = vpack.c.bf16 %v10162_v54, %v10161_v9  ;;  %v10860_v56 = vrot.slane %v10161_v9, 2 }
 0xb25   : > { %v10861_v4 = vrot.slane %v10162_v54, 2 }
 0xb26   : > { %v19057_v51 = vpop.f32.mrb[62].mxu0  ;;  %v10299_v28 = vsel %vm859_vm3, %v10297_v0, %v10298_v55  ;;  %v10301_v58 = vsel %vm859_vm3, %v10298_v55, %v10300_v23  ;;  %v10166_v50 = vld [vmem:[#allocation6 + $0x40] sm:$0x3] }
 0xb27   : > { %10133 = vst [vmem:[#allocation6 + $0x69] sm:$0xff] %v19057_v51  ;;  %v9996_v63 = vpop.f32.mrb[63].mxu0  ;;  %v25049_v32 = vpack.c.bf16 %v10301_v58, %v10299_v28  ;;  %v10164_v57 = vld [vmem:[#allocation6 + $0x30] sm:$0xff]  ;;  %v10165_v47 = vld [vmem:[#allocation6 + $0x38] sm:$0xff]  ;;  %v10305_v7 = vrot.slane %v10166_v50, 1  ;;  %v10862_v6 = vsel %vm1415_vm4, %v10860_v56, %v10861_v4  ;;  %v10864_v18 = vsel %vm1415_vm4, %v10861_v4, %v10863_v29 }
 0xb28   : > { %10132 = vst [vmem:[#allocation6 + $0x61] sm:$0xff] %v9996_v63  ;;  %v10302_v27 = vrot.slane %v10164_v57, 1  ;;  %v10303_v16 = vrot.slane %v10165_v47, 1  ;;  %v25056_v14 = vpack.c.bf16 %v10165_v47, %v10164_v57  ;;  %v25058_v24 = vpack.c.bf16 %v10864_v18, %v10862_v6  ;;  %v21237_v63 = vld [vmem:[%s26521_s9 + $0x20] sm:$0xff]  }
 0xb29   : > { %19111 = vmatmul.mubr.bf16.vlgmr.msra.gmra.mrb[88].mxu0 %v25049_v32  ;;  %v10865_v31 = vrot.slane %v10164_v57, 2  ;;  %v10866_v33 = vrot.slane %v10165_v47, 2  ;;  %v10868_v42 = vrot.slane %v10166_v50, 2 }
 0xb2a   : > { %v19060_v15 = vpop.f32.mrb[64].mxu0  ;;  %19143 = vmatpush3.bf16.msra.mxu0 %v21233_v52  ;;  %v10304_v20 = vsel %vm859_vm3, %v10302_v27, %v10303_v16  ;;  %v10306_v45 = vsel %vm859_vm3, %v10303_v16, %v10305_v7  ;;  %v10169_v26 = vld [vmem:[#allocation6 + $0x58] sm:$0x3] }
 0xb2b   : > { %10135 = vst [vmem:[#allocation6 + $0x81] sm:$0xff] %v19060_v15  ;;  %v10006_v48 = vpop.f32.mrb[65].mxu0  ;;  %v25063_v35 = vpack.c.bf16 %v10306_v45, %v10304_v20  ;;  %v10167_v59 = vld [vmem:[#allocation6 + $0x48] sm:$0xff]  ;;  %v10168_v30 = vld [vmem:[#allocation6 + $0x50] sm:$0xff]  ;;  %v10310_v37 = vrot.slane %v10169_v26, 1  ;;  %19144 = vmatprep.subr.bf16.mxu0 %v21234_v41  ;;  %v10867_v22 = vsel %vm1415_vm4, %v10865_v31, %v10866_v33  ;;  %v10869_v10 = vsel %vm1415_vm4, %v10866_v33, %v10868_v42 }
 0xb2c   : > { %10134 = vst [vmem:[#allocation6 + $0x79] sm:$0xff] %v10006_v48  ;;  %v10307_v25 = vrot.slane %v10167_v59, 1  ;;  %v10308_v46 = vrot.slane %v10168_v30, 1  ;;  %v25070_v53 = vpack.c.bf16 %v10168_v30, %v10167_v59  ;;  %v25072_v61 = vpack.c.bf16 %v10869_v10, %v10867_v22 }
 0xb2d   : > { %19114 = vmatprep.mubr.bf16.mxu0 %v25063_v35  ;;  %v10870_v17 = vrot.slane %v10167_v59, 2  ;;  %v10871_v34 = vrot.slane %v10168_v30, 2  ;;  %v10873_v40 = vrot.slane %v10169_v26, 2 }
 0xb2e   : > { %v19063_v13 = vpop.f32.mrb[66].mxu0  ;;  %v10309_v2 = vsel %vm859_vm3, %v10307_v25, %v10308_v46  ;;  %v10311_v43 = vsel %vm859_vm3, %v10308_v46, %v10310_v37  ;;  %19145 = vmatpush3.bf16.msra.mxu0 %v21234_v41  ;;  %v10172_v19 = vld [vmem:[#allocation6 + $0x70] sm:$0x3]  ;;  %v21238_v37 = vld [vmem:[%s26521_s9 + $0x28] sm:$0xff]  }
 0xb2f   : > { %10137 = vst [vmem:[#allocation6 + $0x99] sm:$0xff] %v19063_v13  ;;  %v10016_v62 = vpop.f32.mrb[67].mxu0  ;;  %v25077_v5 = vpack.c.bf16 %v10311_v43, %v10309_v2  ;;  %v10170_v52 = vld [vmem:[#allocation6 + $0x60] sm:$0xff]  ;;  %v10171_v39 = vld [vmem:[#allocation6 + $0x68] sm:$0xff]  ;;  %v10315_v3 = vrot.slane %v10172_v19, 1  ;;  %19146 = vmatprep.subr.bf16.mxu0 %v21235_v12  ;;  %v10872_v49 = vsel %vm1415_vm4, %v10870_v17, %v10871_v34  ;;  %v10874_v38 = vsel %vm1415_vm4, %v10871_v34, %v10873_v40 }
 0xb30   : > { %10136 = vst [vmem:[#allocation6 + $0x91] sm:$0xff] %v10016_v62  ;;  %v10312_v36 = vrot.slane %v10170_v52, 1  ;;  %v10313_v60 = vrot.slane %v10171_v39, 1  ;;  %v25084_v1 = vpack.c.bf16 %v10171_v39, %v10170_v52  ;;  %v25086_v21 = vpack.c.bf16 %v10874_v38, %v10872_v49  ;;  %v21239_v38 = vld [vmem:[%s26521_s9 + $0x30] sm:$0xff]  }
 0xb31   : > { %19115 = vmatmul.mubr.bf16.gmra.mrb[92].mxu0 %v25077_v5  ;;  %v10875_v9 = vrot.slane %v10170_v52, 2  ;;  %v10876_v54 = vrot.slane %v10171_v39, 2  ;;  %v10878_v23 = vrot.slane %v10172_v19, 2 }
 0xb32   : > { %v19066_v29 = vpop.f32.mrb[68].mxu0  ;;  %v10314_v0 = vsel %vm859_vm3, %v10312_v36, %v10313_v60  ;;  %v10316_v55 = vsel %vm859_vm3, %v10313_v60, %v10315_v3  ;;  %v10175_v56 = vld [vmem:[#allocation6 + $0x88] sm:$0x3]  ;;  %19147 = vmatpush3.bf16.msra.mxu0 %v21235_v12 }
 0xb33   : > { %10139 = vst [vmem:[#allocation6 + $0xb1] sm:$0xff] %v19066_v29  ;;  %v10026_v4 = vpop.f32.mrb[69].mxu0  ;;  %v25091_v51 = vpack.c.bf16 %v10316_v55, %v10314_v0  ;;  %v10173_v28 = vld [vmem:[#allocation6 + $0x78] sm:$0xff]  ;;  %v10174_v58 = vld [vmem:[#allocation6 + $0x80] sm:$0xff]  ;;  %v10320_v50 = vrot.slane %v10175_v56, 1  ;;  %19148 = vmatprep.subr.bf16.mxu0 %v21236_v8  ;;  %v10877_v57 = vsel %vm1415_vm4, %v10875_v9, %v10876_v54  ;;  %v10879_v47 = vsel %vm1415_vm4, %v10876_v54, %v10878_v23 }
 0xb34   : > { %10138 = vst [vmem:[#allocation6 + $0xa9] sm:$0xff] %v10026_v4  ;;  %v10317_v7 = vrot.slane %v10173_v28, 1  ;;  %v10318_v41 = vrot.slane %v10174_v58, 1  ;;  %v25098_v6 = vpack.c.bf16 %v10174_v58, %v10173_v28  ;;  %v25100_v18 = vpack.c.bf16 %v10879_v47, %v10877_v57 }
 0xb35   : > { %19118 = vmatprep.mubr.bf16.mxu0 %v25091_v51  ;;  %v10880_v27 = vrot.slane %v10173_v28, 2  ;;  %v10881_v16 = vrot.slane %v10174_v58, 2  ;;  %v10883_v31 = vrot.slane %v10175_v56, 2 }
 0xb36   : > { %v19069_v33 = vpop.f32.mrb[70].mxu0  ;;  %v10319_v42 = vsel %vm859_vm3, %v10317_v7, %v10318_v41  ;;  %v10321_v15 = vsel %vm859_vm3, %v10318_v41, %v10320_v50  ;;  %v10178_v20 = vld [vmem:[#allocation6 + $0xa0] sm:$0x3]  ;;  %19149 = vmatpush3.bf16.msra.mxu0 %v21236_v8 }
 0xb37   : > { %10141 = vst [vmem:[#allocation6 + $0xc9] sm:$0xff] %v19069_v33  ;;  %v10036_v45 = vpop.f32.mrb[71].mxu0  ;;  %v25105_v26 = vpack.c.bf16 %v10321_v15, %v10319_v42  ;;  %v10176_v48 = vld [vmem:[#allocation6 + $0x90] sm:$0xff]  ;;  %v10177_v59 = vld [vmem:[#allocation6 + $0x98] sm:$0xff]  ;;  %v10325_v30 = vrot.slane %v10178_v20, 1  ;;  %19150 = vmatprep.subr.bf16.mxu0 %v21237_v63  ;;  %v10882_v12 = vsel %vm1415_vm4, %v10880_v27, %v10881_v16  ;;  %v10884_v22 = vsel %vm1415_vm4, %v10881_v16, %v10883_v31 }
 0xb38   : > { %10140 = vst [vmem:[#allocation6 + $0xc1] sm:$0xff] %v10036_v45  ;;  %v10322_v10 = vrot.slane %v10176_v48, 1  ;;  %v10323_v25 = vrot.slane %v10177_v59, 1  ;;  %v25112_v46 = vpack.c.bf16 %v10177_v59, %v10176_v48  ;;  %v25114_v17 = vpack.c.bf16 %v10884_v22, %v10882_v12  ;;  %v21240_v27 = vld [vmem:[%s26521_s9 + $0x38] sm:$0xff]  }
 0xb39   : > { %19119 = vmatmul.mubr.bf16.gmra.mrb[96].mxu0 %v25105_v26  ;;  %v10885_v34 = vrot.slane %v10176_v48, 2  ;;  %v10886_v40 = vrot.slane %v10177_v59, 2  ;;  %v10888_v13 = vrot.slane %v10178_v20, 2 }
 0xb3a   : > { %v19072_v2 = vpop.f32.mrb[72].mxu0  ;;  %v10324_v43 = vsel %vm859_vm3, %v10322_v10, %v10323_v25  ;;  %v10326_v19 = vsel %vm859_vm3, %v10323_v25, %v10325_v30  ;;  %v10181_v62 = vld [vmem:[#allocation6 + $0xb8] sm:$0x3]  ;;  %19151 = vmatpush3.bf16.msra.mxu0 %v21237_v63 }
 0xb3b   : > { %10143 = vst [vmem:[#allocation6 + $0xe1] sm:$0xff] %v19072_v2  ;;  %v10046_v52 = vpop.f32.mrb[73].mxu0  ;;  %v25119_v39 = vpack.c.bf16 %v10326_v19, %v10324_v43  ;;  %v10179_v3 = vld [vmem:[#allocation6 + $0xa8] sm:$0xff]  ;;  %v10180_v8 = vld [vmem:[#allocation6 + $0xb0] sm:$0xff]  ;;  %v10330_v49 = vrot.slane %v10181_v62, 1  ;;  %19152 = vmatprep.subr.bf16.mxu0 %v21238_v37  ;;  %v10887_v36 = vsel %vm1415_vm4, %v10885_v34, %v10886_v40  ;;  %v10889_v60 = vsel %vm1415_vm4, %v10886_v40, %v10888_v13  ;;  %v25152_v2 = vld [vmem:[%s26521_s9 + $0x80] sm:$0xff]  }
 0xb3c   : > { %10142 = vst [vmem:[#allocation6 + $0xd9] sm:$0xff] %v10046_v52  ;;  %v10327_v9 = vrot.slane %v10179_v3, 1  ;;  %v10328_v54 = vrot.slane %v10180_v8, 1  ;;  %v25126_v23 = vpack.c.bf16 %v10180_v8, %v10179_v3  ;;  %v25128_v29 = vpack.c.bf16 %v10889_v60, %v10887_v36 }
 0xb3d   : > { %19122 = vmatprep.mubr.bf16.mxu0 %v25119_v39  ;;  %v10890_v0 = vrot.slane %v10179_v3, 2  ;;  %v10891_v55 = vrot.slane %v10180_v8, 2  ;;  %v10893_v56 = vrot.slane %v10181_v62, 2 }
 0xb3e   : > { %v19075_v4 = vpop.f32.mrb[74].mxu0  ;;  %v10329_v28 = vsel %vm859_vm3, %v10327_v9, %v10328_v54  ;;  %v10331_v58 = vsel %vm859_vm3, %v10328_v54, %v10330_v49  ;;  %v10184_v50 = vld [vmem:[#allocation6 + $0xd0] sm:$0x3]  ;;  %19153 = vmatpush3.bf16.msra.mxu0 %v21238_v37 }
 0xb3f   : > { %10145 = vst [vmem:[#allocation6 + $0xf9] sm:$0xff] %v19075_v4  ;;  %v10056_v63 = vpop.f32.mrb[75].mxu0  ;;  %v25133_v57 = vpack.c.bf16 %v10331_v58, %v10329_v28  ;;  %v10182_v47 = vld [vmem:[#allocation6 + $0xc0] sm:$0xff]  ;;  %v10183_v7 = vld [vmem:[#allocation6 + $0xc8] sm:$0xff]  ;;  %v10335_v41 = vrot.slane %v10184_v50, 1  ;;  %19154 = vmatprep.subr.bf16.mxu0 %v21239_v38  ;;  %v10892_v16 = vsel %vm1415_vm4, %v10890_v0, %v10891_v55  ;;  %v10894_v31 = vsel %vm1415_vm4, %v10891_v55, %v10893_v56 }
 0xb40   : > { %10144 = vst [vmem:[#allocation6 + $0xf1] sm:$0xff] %v10056_v63  ;;  %v10332_v33 = vrot.slane %v10182_v47, 1  ;;  %v10333_v42 = vrot.slane %v10183_v7, 1  ;;  %v25140_v15 = vpack.c.bf16 %v10183_v7, %v10182_v47  ;;  %v25142_v20 = vpack.c.bf16 %v10894_v31, %v10892_v16 }
 0xb41   : > { %19123 = vmatmul.mubr.bf16.gmra.mrb[100].mxu0 %v25133_v57  ;;  %v10895_v45 = vrot.slane %v10182_v47, 2  ;;  %v10896_v48 = vrot.slane %v10183_v7, 2  ;;  %v10898_v59 = vrot.slane %v10184_v50, 2 }
 0xb42   : > { %v19078_v30 = vpop.f32.mrb[76].mxu0  ;;  %v10334_v37 = vsel %vm859_vm3, %v10332_v33, %v10333_v42  ;;  %v10336_v12 = vsel %vm859_vm3, %v10333_v42, %v10335_v41  ;;  %v10187_v22 = vld [vmem:[#allocation6 + $0xe8] sm:$0x3]  ;;  %19155 = vmatpush3.bf16.msra.mxu0 %v21239_v38 }
 0xb43   : > { %10147 = vst [vmem:[#allocation6 + $0x111] sm:$0xff] %v19078_v30  ;;  %v10066_v10 = vpop.f32.mrb[77].mxu0  ;;  %v25147_v25 = vpack.c.bf16 %v10336_v12, %v10334_v37  ;;  %v10185_v34 = vld [vmem:[#allocation6 + $0xd8] sm:$0xff]  ;;  %v10186_v40 = vld [vmem:[#allocation6 + $0xe0] sm:$0xff]  ;;  %v10340_v13 = vrot.slane %v10187_v22, 1  ;;  %19156 = vmatprep.subr.bf16.mxu0 %v21240_v27  ;;  %v10897_v43 = vsel %vm1415_vm4, %v10895_v45, %v10896_v48  ;;  %v10899_v19 = vsel %vm1415_vm4, %v10896_v48, %v10898_v59 }
 0xb44   : > { %10146 = vst [vmem:[#allocation6 + $0x109] sm:$0xff] %v10066_v10  ;;  %v10337_v62 = vrot.slane %v10185_v34, 1  ;;  %v10338_v52 = vrot.slane %v10186_v40, 1  ;;  %v25156_v3 = vpack.c.bf16 %v10186_v40, %v10185_v34  ;;  %v25158_v8 = vpack.c.bf16 %v10899_v19, %v10897_v43 }
 0xb45   : > { %19126 = vmatprep.mubr.bf16.mxu0 %v25147_v25  ;;  %v10900_v49 = vrot.slane %v10185_v34, 2  ;;  %v10901_v38 = vrot.slane %v10186_v40, 2  ;;  %v10903_v36 = vrot.slane %v10187_v22, 2 }
 0xb46   : > { %v19081_v60 = vpop.f32.mrb[78].mxu0  ;;  %v10339_v9 = vsel %vm859_vm3, %v10337_v62, %v10338_v52  ;;  %v10341_v54 = vsel %vm859_vm3, %v10338_v52, %v10340_v13  ;;  %v10190_v0 = vld [vmem:[#allocation6 + $0x100] sm:$0x3]  ;;  %19157 = vmatpush3.bf16.msra.mxu0 %v21240_v27 }
 0xb47   : > { %10149 = vst [vmem:[#allocation6 + $0x129] sm:$0xff] %v19081_v60  ;;  %v10076_v55 = vpop.f32.mrb[79].mxu0  ;;  %v25163_v56 = vpack.c.bf16 %v10341_v54, %v10339_v9  ;;  %v10188_v4 = vld [vmem:[#allocation6 + $0xf0] sm:$0xff]  ;;  %v10189_v28 = vld [vmem:[#allocation6 + $0xf8] sm:$0xff]  ;;  %v10345_v58 = vrot.slane %v10190_v0, 1  ;;  %19190 = vmatprep.subr.bf16.mxu0 %v25152_v2  ;;  %v10902_v50 = vsel %vm1415_vm4, %v10900_v49, %v10901_v38  ;;  %v10904_v63 = vsel %vm1415_vm4, %v10901_v38, %v10903_v36 }
 0xb48   : > { %10148 = vst [vmem:[#allocation6 + $0x121] sm:$0xff] %v10076_v55  ;;  %v10342_v47 = vrot.slane %v10188_v4, 1  ;;  %v10343_v7 = vrot.slane %v10189_v28, 1  ;;  %v25168_v41 = vpack.c.bf16 %v10189_v28, %v10188_v4  ;;  %v25170_v16 = vpack.c.bf16 %v10904_v63, %v10902_v50 }
 0xb49   : > { %19127 = vmatmul.mubr.bf16.gmra.mrb[104].mxu0 %v25163_v56  ;;  %v10905_v27 = vrot.slane %v10188_v4, 2  ;;  %v10906_v31 = vrot.slane %v10189_v28, 2  ;;  %v10908_v33 = vrot.slane %v10190_v0, 2 }
 0xb4a   : > { %v19084_v42 = vpop.f32.mrb[80].mxu0  ;;  %v10344_v45 = vsel %vm859_vm3, %v10342_v47, %v10343_v7  ;;  %v10346_v48 = vsel %vm859_vm3, %v10343_v7, %v10345_v58  ;;  %v10193_v59 = vld [vmem:[#allocation6 + $0x118] sm:$0x3] }
 0xb4b   : > { %10151 = vst [vmem:[#allocation6 + $0x141] sm:$0xff] %v19084_v42  ;;  %v10086_v30 = vpop.f32.mrb[81].mxu0  ;;  %v25175_v37 = vpack.c.bf16 %v10346_v48, %v10344_v45  ;;  %v10191_v12 = vld [vmem:[#allocation6 + $0x108] sm:$0xff]  ;;  %v10192_v22 = vld [vmem:[#allocation6 + $0x110] sm:$0xff]  ;;  %v10350_v10 = vrot.slane %v10193_v59, 1  ;;  %v10907_v34 = vsel %vm1415_vm4, %v10905_v27, %v10906_v31  ;;  %v10909_v40 = vsel %vm1415_vm4, %v10906_v31, %v10908_v33 }
 0xb4c   : > { %10150 = vst [vmem:[#allocation6 + $0x139] sm:$0xff] %v10086_v30  ;;  %v10347_v13 = vrot.slane %v10191_v12, 1  ;;  %v10348_v43 = vrot.slane %v10192_v22, 1  ;;  %v25179_v19 = vpack.c.bf16 %v10192_v22, %v10191_v12  ;;  %v25181_v62 = vpack.c.bf16 %v10909_v40, %v10907_v34 }
 0xb4d   : > { %19130 = vmatprep.mubr.bf16.mxu0 %v25175_v37  ;;  %v10910_v52 = vrot.slane %v10191_v12, 2  ;;  %v10911_v49 = vrot.slane %v10192_v22, 2  ;;  %v10913_v38 = vrot.slane %v10193_v59, 2 }
 0xb4e   : > { %v19087_v36 = vpop.f32.mrb[82].mxu0  ;;  %v10349_v60 = vsel %vm859_vm3, %v10347_v13, %v10348_v43  ;;  %v10351_v9 = vsel %vm859_vm3, %v10348_v43, %v10350_v10  ;;  %v10196_v54 = vld [vmem:[#allocation6 + $0x130] sm:$0x3] }
 0xb4f   : > { %10153 = vst [vmem:[#allocation6 + $0x159] sm:$0xff] %v19087_v36  ;;  %v10096_v0 = vpop.f32.mrb[83].mxu0  ;;  %v25186_v55 = vpack.c.bf16 %v10351_v9, %v10349_v60  ;;  %v10194_v4 = vld [vmem:[#allocation6 + $0x120] sm:$0xff]  ;;  %v10195_v28 = vld [vmem:[#allocation6 + $0x128] sm:$0xff]  ;;  %v10355_v58 = vrot.slane %v10196_v54, 1  ;;  %v10912_v50 = vsel %vm1415_vm4, %v10910_v52, %v10911_v49  ;;  %v10914_v63 = vsel %vm1415_vm4, %v10911_v49, %v10913_v38 }
 0xb50   : > { %10152 = vst [vmem:[#allocation6 + $0x151] sm:$0xff] %v10096_v0  ;;  %v10352_v47 = vrot.slane %v10194_v4, 1  ;;  %v10353_v7 = vrot.slane %v10195_v28, 1  ;;  %v25190_v27 = vpack.c.bf16 %v10195_v28, %v10194_v4  ;;  %v25192_v31 = vpack.c.bf16 %v10914_v63, %v10912_v50 }
 0xb51   : > { %19131 = vmatmul.mubr.bf16.gmra.mrb[108].mxu0 %v25186_v55  ;;  %v10915_v33 = vrot.slane %v10194_v4, 2  ;;  %v10916_v42 = vrot.slane %v10195_v28, 2  ;;  %v10918_v45 = vrot.slane %v10196_v54, 2 }
 0xb52   : > { %v19090_v48 = vpop.f32.mrb[84].mxu0  ;;  %v10354_v59 = vsel %vm859_vm3, %v10352_v47, %v10353_v7  ;;  %v10356_v30 = vsel %vm859_vm3, %v10353_v7, %v10355_v58  ;;  %v10199_v12 = vld [vmem:[#allocation6 + $0x148] sm:$0x3] }
 0xb53   : > { %10155 = vst [vmem:[#allocation6 + $0x171] sm:$0xff] %v19090_v48  ;;  %v10106_v22 = vpop.f32.mrb[85].mxu0  ;;  %v25197_v10 = vpack.c.bf16 %v10356_v30, %v10354_v59  ;;  %v10197_v34 = vld [vmem:[#allocation6 + $0x138] sm:$0xff]  ;;  %v10198_v40 = vld [vmem:[#allocation6 + $0x140] sm:$0xff]  ;;  %v10360_v13 = vrot.slane %v10199_v12, 1  ;;  %v10917_v43 = vsel %vm1415_vm4, %v10915_v33, %v10916_v42  ;;  %v10919_v52 = vsel %vm1415_vm4, %v10916_v42, %v10918_v45 }
 0xb54   : > { %10154 = vst [vmem:[#allocation6 + $0x169] sm:$0xff] %v10106_v22  ;;  %v10357_v49 = vrot.slane %v10197_v34, 1  ;;  %v10358_v38 = vrot.slane %v10198_v40, 1  ;;  %v25201_v36 = vpack.c.bf16 %v10198_v40, %v10197_v34  ;;  %v25203_v60 = vpack.c.bf16 %v10919_v52, %v10917_v43 }
 0xb55   : > { %19134 = vmatprep.mubr.bf16.mxu0 %v25197_v10  ;;  %v10920_v9 = vrot.slane %v10197_v34, 2  ;;  %v10921_v54 = vrot.slane %v10198_v40, 2  ;;  %v10923_v0 = vrot.slane %v10199_v12, 2 }
 0xb56   : > { %v10359_v4 = vsel %vm859_vm3, %v10357_v49, %v10358_v38  ;;  %v10361_v28 = vsel %vm859_vm3, %v10358_v38, %v10360_v13  ;;  %v10202_v58 = vld [vmem:[#allocation6 + $0x160] sm:$0x3] }
 0xb57   : > { %v25208_v50 = vpack.c.bf16 %v10361_v28, %v10359_v4  ;;  %v10200_v63 = vld [vmem:[#allocation6 + $0x150] sm:$0xff]  ;;  %v10201_v47 = vld [vmem:[#allocation6 + $0x158] sm:$0xff]  ;;  %v10365_v7 = vrot.slane %v10202_v58, 1  ;;  %v10922_v33 = vsel %vm1415_vm4, %v10920_v9, %v10921_v54  ;;  %v10924_v42 = vsel %vm1415_vm4, %v10921_v54, %v10923_v0 }
 0xb58   : > { %v10362_v45 = vrot.slane %v10200_v63, 1  ;;  %v10363_v48 = vrot.slane %v10201_v47, 1  ;;  %v25212_v59 = vpack.c.bf16 %v10201_v47, %v10200_v63  ;;  %v25214_v30 = vpack.c.bf16 %v10924_v42, %v10922_v33 }
 0xb59   : > { %19135 = vmatmul.mubr.bf16.gmra.mrb[112].mxu0 %v25208_v50  ;;  %v10925_v12 = vrot.slane %v10200_v63, 2  ;;  %v10926_v22 = vrot.slane %v10201_v47, 2  ;;  %v10928_v34 = vrot.slane %v10202_v58, 2 }
 0xb5a   : > { %v10364_v40 = vsel %vm859_vm3, %v10362_v45, %v10363_v48  ;;  %v10366_v13 = vsel %vm859_vm3, %v10363_v48, %v10365_v7  ;;  %v10205_v43 = vld [vmem:[#allocation6 + $0x178] sm:$0x3]  ;;  %v25230_v48 = vld [vmem:[#allocation5] sm:$0xff] }
 0xb5b   : > { %v25219_v52 = vpack.c.bf16 %v10366_v13, %v10364_v40  ;;  %v10203_v49 = vld [vmem:[#allocation6 + $0x168] sm:$0xff]  ;;  %v10204_v38 = vld [vmem:[#allocation6 + $0x170] sm:$0xff]  ;;  %v10370_v9 = vrot.slane %v10205_v43, 1  ;;  %v10927_v54 = vsel %vm1415_vm4, %v10925_v12, %v10926_v22  ;;  %v10929_v0 = vsel %vm1415_vm4, %v10926_v22, %v10928_v34 }
 0xb5c   : > { %v10367_v4 = vrot.slane %v10203_v49, 1  ;;  %v10368_v28 = vrot.slane %v10204_v38, 1  ;;  %v25223_v33 = vpack.c.bf16 %v10204_v38, %v10203_v49  ;;  %v25225_v63 = vpack.c.bf16 %v10929_v0, %v10927_v54  ;;  %v19093_v54 = vpop.f32.mrb[86].mxu0 }
 0xb5d   : > { %19138 = vmatprep.mubr.bf16.mxu0 %v25219_v52  ;;  %v10930_v58 = vrot.slane %v10203_v49, 2  ;;  %v10931_v47 = vrot.slane %v10204_v38, 2  ;;  %v10933_v7 = vrot.slane %v10205_v43, 2  ;;  %v25234_v12 = vpack.c.bf16 %v25230_v48, %v25230_v48  ;;  %v21242_v43 = vld [vmem:[%s26521_s9 + $0x88] sm:$0xff]   ;;  %v21243_v49 = vld [vmem:[%s26521_s9 + $0x90] sm:$0xff]   ;;  %v21244_v38 = vld [vmem:[%s26521_s9 + $0x98] sm:$0xff]  }
 0xb5e   : > { %v10369_v42 = vsel %vm859_vm3, %v10367_v4, %v10368_v28  ;;  %v10371_v45 = vsel %vm859_vm3, %v10368_v28, %v10370_v9  ;;  %v21246_v9 = vld [vmem:[%s26521_s9 + $0xa8] sm:$0xff]   ;;  %10157 = vst [vmem:[#allocation6 + $0x189] sm:$0xff] %v19093_v54  ;;  %v10116_v0 = vpop.f32.mrb[87].mxu0  ;;  %v21247_v4 = vld [vmem:[%s26521_s9 + $0xb0] sm:$0xff]   ;;  %v21248_v28 = vld [vmem:[%s26521_s9 + $0xb8] sm:$0xff]  }
 0xb5f   : > { %v25236_v22 = vpack.c.bf16 %v10371_v45, %v10369_v42  ;;  %v10932_v34 = vsel %vm1415_vm4, %v10930_v58, %v10931_v47  ;;  %v10934_v40 = vsel %vm1415_vm4, %v10931_v47, %v10933_v7  ;;  %10156 = vst [vmem:[#allocation6 + $0x181] sm:$0xff] %v10116_v0  ;;  %v21249_v58 = vld [vmem:[%s26521_s9 + $0xc0] sm:$0xff]   ;;  %v25282_v47 = vrot.slane %v25230_v48, 2 }
 0xb60   : > { %v25240_v13 = vpack.c.bf16 %v10934_v40, %v10932_v34  ;;  %v10858_v7 = vrot.slane %v25036_v11, 2  ;;  %v21250_v34 = vld [vmem:[%s26521_s9 + $0xc8] sm:$0xff]   ;;  %v21251_v11 = vld [vmem:[%s26521_s9 + $0xd0] sm:$0xff]   ;;  %v21253_v54 = vld [vmem:[%s26521_s9 + $0xe0] sm:$0xff]  }
 0xb61   : > { %19139 = vmatmul.mubr.bf16.gmra.mrb[116].mxu0 %v25236_v22 }
 0xb62   : > { %19158 = vmatprep.mubr.bf16.mxu0 %v25234_v12  ;;  %v10859_v42 = vsel %vm1415_vm4, %v25282_v47, %v10858_v7  ;;  %v21254_v7 = vld [vmem:[%s26521_s9 + $0xe8] sm:$0xff]  }
 0xb63   : > { %v10967_v45 = vpack.c.bf16 %v10859_v42, %v25282_v47  ;;  %v21255_v42 = vld [vmem:[%s26521_s9 + $0xf0] sm:$0xff]  }
 0xb66   : > { %v25299_v40 = vld [vmem:[#allocation6 + $0x180] sm:$0xff] }
 0xb69   : > { %19159 = vmatmul.mubr.bf16.vlgmr.msra.gmra.mrb[88].mxu0 %v25045_v44 }
 0xb6a   : > { %19162 = vmatprep.mubr.bf16.mxu0 %v25056_v14  ;;  %19191 = vmatpush3.bf16.msra.mxu0 %v25152_v2  ;;  %v21245_v2 = vld [vmem:[%s26521_s9 + $0xa0] sm:$0xff]  }
 0xb6b   : > { %19192 = vmatprep.subr.bf16.mxu0 %v21242_v43 }
 0xb6e   : > { %19193 = vmatpush3.bf16.msra.mxu0 %v21242_v43  ;;  %v25301_v43 = vld [vmem:[#allocation6 + $0x188] sm:$0xff] }
 0xb6f   : > { %19194 = vmatprep.subr.bf16.mxu0 %v21243_v49 }
 0xb71   : > { %19163 = vmatmul.mubr.bf16.gmra.mrb[92].mxu0 %v25070_v53 }
 0xb72   : > { %19166 = vmatprep.mubr.bf16.mxu0 %v25084_v1  ;;  %19195 = vmatpush3.bf16.msra.mxu0 %v21243_v49  ;;  %v21252_v49 = vld [vmem:[%s26521_s9 + $0xd8] sm:$0xff]  }
 0xb73   : > { %19196 = vmatprep.subr.bf16.mxu0 %v21244_v38 }
 0xb76   : > { %19197 = vmatpush3.bf16.msra.mxu0 %v21244_v38  ;;  %v11769_v38 = vrot.slane %v25299_v40, 2 }
 0xb77   : > { %19198 = vmatprep.subr.bf16.mxu0 %v21245_v2 }
 0xb79   : > { %19167 = vmatmul.mubr.bf16.gmra.mrb[96].mxu0 %v25098_v6 }
 0xb7a   : > { %19170 = vmatprep.mubr.bf16.mxu0 %v25112_v46  ;;  %19199 = vmatpush3.bf16.msra.mxu0 %v21245_v2  ;;  %v11770_v2 = vrot.slane %v25301_v43, 2 }
 0xb7b   : > { %19200 = vmatprep.subr.bf16.mxu0 %v21246_v9 }
 0xb7e   : > { %19201 = vmatpush3.bf16.msra.mxu0 %v21246_v9  ;;  %v25310_v9 = vld [vmem:[#allocation6 + $0x190] sm:$0x3] }
 0xb7f   : > { %19202 = vmatprep.subr.bf16.mxu0 %v21247_v4  ;;  %v11772_v0 = vrot.slane %v25310_v9, 2 }
 0xb81   : > { %19171 = vmatmul.mubr.bf16.gmra.mrb[100].mxu0 %v25126_v23 }
 0xb82   : > { %19174 = vmatprep.mubr.bf16.mxu0 %v25140_v15  ;;  %19203 = vmatpush3.bf16.msra.mxu0 %v21247_v4  ;;  %v11771_v4 = vsel %vm1415_vm4, %v11769_v38, %v11770_v2  ;;  %v21261_v38 = vld [vmem:[%s26521_s9 + $0x120] sm:$0xff]  }
 0xb83   : > { %19204 = vmatprep.subr.bf16.mxu0 %v21248_v28 }
 0xb86   : > { %19205 = vmatpush3.bf16.msra.mxu0 %v21248_v28  ;;  %v11773_v28 = vsel %vm1415_vm4, %v11770_v2, %v11772_v0  ;;  %v21262_v2 = vld [vmem:[%s26521_s9 + $0x128] sm:$0xff]   ;;  %v21264_v0 = vld [vmem:[%s26521_s9 + $0x138] sm:$0xff]  }
 0xb87   : > { %19238 = vmatprep.subr.bf16.mxu0 %v21249_v58 }
 0xb89   : > { %19175 = vmatmul.mubr.bf16.gmra.mrb[104].mxu0 %v25156_v3 }
 0xb8a   : > { %19178 = vmatprep.mubr.bf16.mxu0 %v25168_v41 }
 0xb91   : > { %19179 = vmatmul.mubr.bf16.gmra.mrb[108].mxu0 %v25179_v19 }
 0xb92   : > { %19182 = vmatprep.mubr.bf16.mxu0 %v25190_v27 }
 0xb99   : > { %19183 = vmatmul.mubr.bf16.gmra.mrb[112].mxu0 %v25201_v36 }
 0xb9a   : > { %19186 = vmatprep.mubr.bf16.mxu0 %v25212_v59 }
 0xba1   : > { %19187 = vmatmul.mubr.bf16.gmra.mrb[116].mxu0 %v25223_v33 }
 0xba2   : > { %19206 = vmatprep.mubr.bf16.mxu0 %v10967_v45  ;;  %v21256_v45 = vld [vmem:[%s26521_s9 + $0xf8] sm:$0xff]  }
 0xba9   : > { %19207 = vmatmul.mubr.bf16.vlgmr.msra.gmra.mrb[88].mxu0 %v25058_v24 }
 0xbaa   : > { %19210 = vmatprep.mubr.bf16.mxu0 %v25072_v61  ;;  %19239 = vmatpush3.bf16.msra.mxu0 %v21249_v58  ;;  %v25318_v58 = vpack.c.bf16 %v11773_v28, %v11771_v4  ;;  %v21265_v4 = vld [vmem:[%s26521_s9 + $0x140] sm:$0xff]   ;;  %v25384_v28 = vpack.c.bf16 %v25301_v43, %v25299_v40 }
 0xbab   : > { %19240 = vmatprep.subr.bf16.mxu0 %v21250_v34 }
 0xbae   : > { %19241 = vmatpush3.bf16.msra.mxu0 %v21250_v34  ;;  %v21257_v34 = vld [vmem:[%s26521_s9 + $0x100] sm:$0xff]  }
 0xbaf   : > { %19242 = vmatprep.subr.bf16.mxu0 %v21251_v11 }
 0xbb1   : > { %19211 = vmatmul.mubr.bf16.gmra.mrb[92].mxu0 %v25086_v21 }
 0xbb2   : > { %19214 = vmatprep.mubr.bf16.mxu0 %v25100_v18  ;;  %19243 = vmatpush3.bf16.msra.mxu0 %v21251_v11  ;;  %v21258_v11 = vld [vmem:[%s26521_s9 + $0x108] sm:$0xff]  }
 0xbb3   : > { %19244 = vmatprep.subr.bf16.mxu0 %v21252_v49 }
 0xbb6   : > { %19245 = vmatpush3.bf16.msra.mxu0 %v21252_v49  ;;  %v21259_v49 = vld [vmem:[%s26521_s9 + $0x110] sm:$0xff]  }
 0xbb7   : > { %19246 = vmatprep.subr.bf16.mxu0 %v21253_v54 }
 0xbb9   : > { %19215 = vmatmul.mubr.bf16.gmra.mrb[96].mxu0 %v25114_v17 }
 0xbba   : > { %19218 = vmatprep.mubr.bf16.mxu0 %v25128_v29  ;;  %19247 = vmatpush3.bf16.msra.mxu0 %v21253_v54  ;;  %v21263_v54 = vld [vmem:[%s26521_s9 + $0x130] sm:$0xff]  }
 0xbbb   : > { %19248 = vmatprep.subr.bf16.mxu0 %v21254_v7 }
 0xbbe   : > { %19249 = vmatpush3.bf16.msra.mxu0 %v21254_v7  ;;  %v21266_v7 = vld [vmem:[%s26521_s9 + $0x148] sm:$0xff]  }
 0xbbf   : > { %19250 = vmatprep.subr.bf16.mxu0 %v21255_v42 }
 0xbc1   : > { %19219 = vmatmul.mubr.bf16.gmra.mrb[100].mxu0 %v25142_v20 }
 0xbc2   : > { %19222 = vmatprep.mubr.bf16.mxu0 %v25158_v8  ;;  %19251 = vmatpush3.bf16.msra.mxu0 %v21255_v42  ;;  %v21267_v42 = vld [vmem:[%s26521_s9 + $0x150] sm:$0xff]  }
 0xbc3   : > { %19252 = vmatprep.subr.bf16.mxu0 %v21256_v45 }
 0xbc6   : > { %19253 = vmatpush3.bf16.msra.mxu0 %v21256_v45  ;;  %v21269_v45 = vld [vmem:[%s26521_s9 + $0x160] sm:$0xff]  }
 0xbc7   : > { %19286 = vmatprep.subr.bf16.mxu0 %v21257_v34 }
 0xbc9   : > { %19223 = vmatmul.mubr.bf16.gmra.mrb[104].mxu0 %v25170_v16 }
 0xbca   : > { %19226 = vmatprep.mubr.bf16.mxu0 %v25181_v62 }
 0xbd1   : > { %19227 = vmatmul.mubr.bf16.gmra.mrb[108].mxu0 %v25192_v31 }
 0xbd2   : > { %19230 = vmatprep.mubr.bf16.mxu0 %v25203_v60 }
 0xbd9   : > { %19231 = vmatmul.mubr.bf16.gmra.mrb[112].mxu0 %v25214_v30 }
 0xbda   : > { %19234 = vmatprep.mubr.bf16.mxu0 %v25225_v63 }
 0xbe1   : > { %19235 = vmatmul.mubr.bf16.gmra.mrb[116].mxu0 %v25240_v13 }
 0xbe2   : > { %19254 = vmatprep.mubr.bf16.mxu0 %v25045_v44  ;;  %v21260_v44 = vld [vmem:[%s26521_s9 + $0x118] sm:$0xff]  }
 0xbe9   : > { %19255 = vmatmul.mubr.bf16.vlgmr.msra.gmra.mrb[88].mxu0 %v25056_v14 }
 0xbea   : > { %19258 = vmatprep.mubr.bf16.mxu0 %v25070_v53  ;;  %19287 = vmatpush3.bf16.msra.mxu0 %v21257_v34  ;;  %v21270_v34 = vld [vmem:[%s26521_s9 + $0x168] sm:$0xff]  }
 0xbeb   : > { %19288 = vmatprep.subr.bf16.mxu0 %v21258_v11 }
 0xbee   : > { %19289 = vmatpush3.bf16.msra.mxu0 %v21258_v11  ;;  %v21271_v11 = vld [vmem:[%s26521_s9 + $0x170] sm:$0xff]  }
 0xbef   : > { %19290 = vmatprep.subr.bf16.mxu0 %v21259_v49 }
 0xbf1   : > { %19259 = vmatmul.mubr.bf16.gmra.mrb[92].mxu0 %v25084_v1 }
 0xbf2   : > { %19262 = vmatprep.mubr.bf16.mxu0 %v25098_v6  ;;  %19291 = vmatpush3.bf16.msra.mxu0 %v21259_v49  ;;  %v21272_v49 = vld [vmem:[%s26521_s9 + $0x178] sm:$0xff]  }
 0xbf3   : > { %19292 = vmatprep.subr.bf16.mxu0 %v21260_v44 }
 0xbf6   : > { %19293 = vmatpush3.bf16.msra.mxu0 %v21260_v44  ;;  %v21273_v44 = vld [vmem:[%s26521_s9 + $0x180] sm:$0xff]  }
 0xbf7   : > { %19294 = vmatprep.subr.bf16.mxu0 %v21261_v38 }
 0xbf9   : > { %19263 = vmatmul.mubr.bf16.gmra.mrb[96].mxu0 %v25112_v46 }
 0xbfa   : > { %19266 = vmatprep.mubr.bf16.mxu0 %v25126_v23  ;;  %19295 = vmatpush3.bf16.msra.mxu0 %v21261_v38  ;;  %v11503_v38 = vrot.slane %v25299_v40, 1  ;;  %v21274_v40 = vld [vmem:[%s26521_s9 + $0x188] sm:$0xff]  }
 0xbfb   : > { %19296 = vmatprep.subr.bf16.mxu0 %v21262_v2 }
 0xbfe   : > { %19297 = vmatpush3.bf16.msra.mxu0 %v21262_v2  ;;  %v11504_v2 = vrot.slane %v25301_v43, 1  ;;  %v21275_v43 = vld [vmem:[%s26521_s9 + $0x190] sm:$0xff]  }
 0xbff   : > { %19298 = vmatprep.subr.bf16.mxu0 %v21263_v54 }
 0xc01   : > { %19267 = vmatmul.mubr.bf16.gmra.mrb[100].mxu0 %v25140_v15 }
 0xc02   : > { %19270 = vmatprep.mubr.bf16.mxu0 %v25156_v3  ;;  %19299 = vmatpush3.bf16.msra.mxu0 %v21263_v54  ;;  %v11506_v54 = vrot.slane %v25310_v9, 1  ;;  %v21277_v9 = vld [vmem:[%s26521_s9 + $0x1a0] sm:$0xff]  }
 0xc03   : > { %19300 = vmatprep.subr.bf16.mxu0 %v21264_v0 }
 0xc06   : > { %19301 = vmatpush3.bf16.msra.mxu0 %v21264_v0  ;;  %v11505_v0 = vsel %vm859_vm3, %v11503_v38, %v11504_v2 }
 0xc07   : > { %19334 = vmatprep.subr.bf16.mxu0 %v21265_v4 }
 0xc09   : > { %19271 = vmatmul.mubr.bf16.gmra.mrb[104].mxu0 %v25168_v41 }
 0xc0a   : > { %19274 = vmatprep.mubr.bf16.mxu0 %v25179_v19 }
 0xc11   : > { %19275 = vmatmul.mubr.bf16.gmra.mrb[108].mxu0 %v25190_v27 }
 0xc12   : > { %19278 = vmatprep.mubr.bf16.mxu0 %v25201_v36 }
 0xc19   : > { %19279 = vmatmul.mubr.bf16.gmra.mrb[112].mxu0 %v25212_v59 }
 0xc1a   : > { %19282 = vmatprep.mubr.bf16.mxu0 %v25223_v33 }
 0xc21   : > { %19283 = vmatmul.mubr.bf16.gmra.mrb[116].mxu0 %v25384_v28 }
 0xc22   : > { %19302 = vmatprep.mubr.bf16.mxu0 %v25049_v32  ;;  %v21268_v32 = vld [vmem:[%s26521_s9 + $0x158] sm:$0xff]  }
 0xc29   : > { %19303 = vmatmul.mubr.bf16.vlgmr.msra.gmra.mrb[88].mxu0 %v25063_v35 }
 0xc2a   : > { %19306 = vmatprep.mubr.bf16.mxu0 %v25077_v5  ;;  %19335 = vmatpush3.bf16.msra.mxu0 %v21265_v4  ;;  %v11507_v4 = vsel %vm859_vm3, %v11504_v2, %v11506_v54 }
 0xc2b   : > { %19336 = vmatprep.subr.bf16.mxu0 %v21266_v7 }
 0xc2e   : > { %19337 = vmatpush3.bf16.msra.mxu0 %v21266_v7  ;;  %v25431_v7 = vpack.c.bf16 %v11507_v4, %v11505_v0 }
 0xc2f   : > { %19338 = vmatprep.subr.bf16.mxu0 %v21267_v42 }
 0xc31   : > { %19307 = vmatmul.mubr.bf16.gmra.mrb[92].mxu0 %v25091_v51 }
 0xc32   : > { %19310 = vmatprep.mubr.bf16.mxu0 %v25105_v26  ;;  %19339 = vmatpush3.bf16.msra.mxu0 %v21267_v42  ;;  %v21278_v42 = vld [vmem:[%s26521_s9 + $0x1a8] sm:$0xff]  }
 0xc33   : > { %19340 = vmatprep.subr.bf16.mxu0 %v21268_v32 }
 0xc36   : > { %19341 = vmatpush3.bf16.msra.mxu0 %v21268_v32  ;;  %v21279_v32 = vld [vmem:[%s26521_s9 + $0x1b0] sm:$0xff]  }
 0xc37   : > { %19342 = vmatprep.subr.bf16.mxu0 %v21269_v45 }
 0xc39   : > { %19311 = vmatmul.mubr.bf16.gmra.mrb[96].mxu0 %v25119_v39 }
 0xc3a   : > { %19314 = vmatprep.mubr.bf16.mxu0 %v25133_v57  ;;  %19343 = vmatpush3.bf16.msra.mxu0 %v21269_v45  ;;  %v21280_v45 = vld [vmem:[%s26521_s9 + $0x1b8] sm:$0xff]  }
 0xc3b   : > { %19344 = vmatprep.subr.bf16.mxu0 %v21270_v34 }
 0xc3e   : > { %19345 = vmatpush3.bf16.msra.mxu0 %v21270_v34  ;;  %v21281_v34 = vld [vmem:[%s26521_s9 + $0x1c0] sm:$0xff]  }
 0xc3f   : > { %19346 = vmatprep.subr.bf16.mxu0 %v21271_v11 }
 0xc41   : > { %19315 = vmatmul.mubr.bf16.gmra.mrb[100].mxu0 %v25147_v25 }
 0xc42   : > { %19318 = vmatprep.mubr.bf16.mxu0 %v25163_v56  ;;  %19347 = vmatpush3.bf16.msra.mxu0 %v21271_v11  ;;  %v21282_v11 = vld [vmem:[%s26521_s9 + $0x1c8] sm:$0xff]  }
 0xc43   : > { %19348 = vmatprep.subr.bf16.mxu0 %v21272_v49 }
 0xc46   : > { %19349 = vmatpush3.bf16.msra.mxu0 %v21272_v49  ;;  %v21283_v49 = vld [vmem:[%s26521_s9 + $0x1d0] sm:$0xff]  }
 0xc47   : > { %19382 = vmatprep.subr.bf16.mxu0 %v21273_v44 }
 0xc49   : > { %19319 = vmatmul.mubr.bf16.gmra.mrb[104].mxu0 %v25175_v37 }
 0xc4a   : > { %19322 = vmatprep.mubr.bf16.mxu0 %v25186_v55 }
 0xc51   : > { %19323 = vmatmul.mubr.bf16.gmra.mrb[108].mxu0 %v25197_v10 }
 0xc52   : > { %19326 = vmatprep.mubr.bf16.mxu0 %v25208_v50 }
 0xc59   : > { %19327 = vmatmul.mubr.bf16.gmra.mrb[112].mxu0 %v25219_v52 }
 0xc5a   : > { %19330 = vmatprep.mubr.bf16.mxu0 %v25236_v22 }
 0xc61   : > { %19331 = vmatmul.mubr.bf16.gmra.mrb[116].mxu0 %v25431_v7 }
 0xc62   : > { %19350 = vmatprep.mubr.bf16.mxu0 %v25058_v24  ;;  %v21276_v24 = vld [vmem:[%s26521_s9 + $0x198] sm:$0xff]  }
 0xc69   : > { %19351 = vmatmul.mubr.bf16.vlgmr.msra.gmra.mrb[88].mxu0 %v25072_v61 }
 0xc6a   : > { %19354 = vmatprep.mubr.bf16.mxu0 %v25086_v21  ;;  %19383 = vmatpush3.bf16.msra.mxu0 %v21273_v44 }
 0xc6b   : > { %19384 = vmatprep.subr.bf16.mxu0 %v21274_v40 }
 0xc6e   : > { %19385 = vmatpush3.bf16.msra.mxu0 %v21274_v40 }
 0xc6f   : > { %19386 = vmatprep.subr.bf16.mxu0 %v21275_v43 }
 0xc71   : > { %19355 = vmatmul.mubr.bf16.gmra.mrb[92].mxu0 %v25100_v18 }
 0xc72   : > { %19358 = vmatprep.mubr.bf16.mxu0 %v25114_v17  ;;  %19387 = vmatpush3.bf16.msra.mxu0 %v21275_v43 }
 0xc73   : > { %19388 = vmatprep.subr.bf16.mxu0 %v21276_v24 }
 0xc76   : > { %19389 = vmatpush3.bf16.msra.mxu0 %v21276_v24 }
 0xc77   : > { %19390 = vmatprep.subr.bf16.mxu0 %v21277_v9 }
 0xc79   : > { %19359 = vmatmul.mubr.bf16.gmra.mrb[96].mxu0 %v25128_v29 }
 0xc7a   : > { %19362 = vmatprep.mubr.bf16.mxu0 %v25142_v20  ;;  %19391 = vmatpush3.bf16.msra.mxu0 %v21277_v9 }
 0xc7b   : > { %19392 = vmatprep.subr.bf16.mxu0 %v21278_v42 }
 0xc7e   : > { %19393 = vmatpush3.bf16.msra.mxu0 %v21278_v42 }
 0xc7f   : > { %19394 = vmatprep.subr.bf16.mxu0 %v21279_v32 }
 0xc81   : > { %19363 = vmatmul.mubr.bf16.gmra.mrb[100].mxu0 %v25158_v8 }
 0xc82   : > { %19366 = vmatprep.mubr.bf16.mxu0 %v25170_v16  ;;  %19395 = vmatpush3.bf16.msra.mxu0 %v21279_v32 }
 0xc83   : > { %19396 = vmatprep.subr.bf16.mxu0 %v21280_v45 }
 0xc86   : > { %19397 = vmatpush3.bf16.msra.mxu0 %v21280_v45 }
 0xc87   : > { %19430 = vmatprep.subr.bf16.mxu0 %v21281_v34 }
 0xc89   : > { %19367 = vmatmul.mubr.bf16.gmra.mrb[104].mxu0 %v25181_v62 }
 0xc8a   : > { %19370 = vmatprep.mubr.bf16.mxu0 %v25192_v31 }
 0xc91   : > { %19371 = vmatmul.mubr.bf16.gmra.mrb[108].mxu0 %v25203_v60 }
 0xc92   : > { %19374 = vmatprep.mubr.bf16.mxu0 %v25214_v30 }
 0xc99   : > { %19375 = vmatmul.mubr.bf16.gmra.mrb[112].mxu0 %v25225_v63 }
 0xc9a   : > { %19378 = vmatprep.mubr.bf16.mxu0 %v25240_v13 }
 0xca1   : > { %19379 = vmatmul.mubr.bf16.gmra.mrb[116].mxu0 %v25318_v58 }
 0xca2   : > { %19398 = vmatprep.mubr.bf16.mxu0 %v25056_v14  ;;  %v21284_v14 = vld [vmem:[%s26521_s9 + $0x1d8] sm:$0xff]  }
 0xca9   : > { %19399 = vmatmul.mubr.bf16.vlgmr.msra.gmra.mrb[88].mxu0 %v25070_v53  ;;  %v21285_v53 = vld [vmem:[%s26521_s9 + $0x1e0] sm:$0xff]  }
 0xcaa   : > { %19402 = vmatprep.mubr.bf16.mxu0 %v25084_v1  ;;  %19431 = vmatpush3.bf16.msra.mxu0 %v21281_v34  ;;  %v21286_v1 = vld [vmem:[%s26521_s9 + $0x1e8] sm:$0xff]  }
 0xcab   : > { %19432 = vmatprep.subr.bf16.mxu0 %v21282_v11 }
 0xcae   : > { %19433 = vmatpush3.bf16.msra.mxu0 %v21282_v11 }
 0xcaf   : > { %19434 = vmatprep.subr.bf16.mxu0 %v21283_v49 }
 0xcb1   : > { %19403 = vmatmul.mubr.bf16.gmra.mrb[92].mxu0 %v25098_v6  ;;  %v21287_v6 = vld [vmem:[%s26521_s9 + $0x1f0] sm:$0xff]  }
 0xcb2   : > { %19406 = vmatprep.mubr.bf16.mxu0 %v25112_v46  ;;  %19435 = vmatpush3.bf16.msra.mxu0 %v21283_v49  ;;  %v21288_v46 = vld [vmem:[%s26521_s9 + $0x1f8] sm:$0xff]  }
 0xcb3   : > { %19436 = vmatprep.subr.bf16.mxu0 %v21284_v14 }
 0xcb6   : > { %19437 = vmatpush3.bf16.msra.mxu0 %v21284_v14 }
 0xcb7   : > { %19438 = vmatprep.subr.bf16.mxu0 %v21285_v53 }
 0xcb9   : > { %19407 = vmatmul.mubr.bf16.gmra.mrb[96].mxu0 %v25126_v23  ;;  %v21289_v23 = vld [vmem:[%s26521_s9 + $0x200] sm:$0xff]  }
 0xcba   : > { %19410 = vmatprep.mubr.bf16.mxu0 %v25140_v15  ;;  %19439 = vmatpush3.bf16.msra.mxu0 %v21285_v53  ;;  %v21290_v15 = vld [vmem:[%s26521_s9 + $0x208] sm:$0xff]  }
 0xcbb   : > { %19440 = vmatprep.subr.bf16.mxu0 %v21286_v1 }
 0xcbe   : > { %19441 = vmatpush3.bf16.msra.mxu0 %v21286_v1 }
 0xcbf   : > { %19442 = vmatprep.subr.bf16.mxu0 %v21287_v6 }
 0xcc1   : > { %19411 = vmatmul.mubr.bf16.gmra.mrb[100].mxu0 %v25156_v3  ;;  %v21291_v3 = vld [vmem:[%s26521_s9 + $0x210] sm:$0xff]  }
 0xcc2   : > { %19414 = vmatprep.mubr.bf16.mxu0 %v25168_v41  ;;  %19443 = vmatpush3.bf16.msra.mxu0 %v21287_v6 }
 0xcc3   : > { %19444 = vmatprep.subr.bf16.mxu0 %v21288_v46 }
 0xcc6   : > { %19445 = vmatpush3.bf16.msra.mxu0 %v21288_v46 }
 0xcc7   : > { %19478 = vmatprep.subr.bf16.mxu0 %v21289_v23 }
 0xcc9   : > { %19415 = vmatmul.mubr.bf16.gmra.mrb[104].mxu0 %v25179_v19  ;;  %v25584_v19 = vld [vmem:[#allocation3 + $0x8] sm:$0xff] }
 0xcca   : > { %19418 = vmatprep.mubr.bf16.mxu0 %v25190_v27  ;;  %v13059_v27 = vrot.slane %v25584_v19, 1 }
 0xcd1   : > { %19419 = vmatmul.mubr.bf16.gmra.mrb[108].mxu0 %v25201_v36 }
 0xcd2   : > { %19422 = vmatprep.mubr.bf16.mxu0 %v25212_v59  ;;  %v25603_v59 = vld [vmem:[%s26522_s10] ss:$0 sm:$0xff] }
 0xcd9   : > { %19423 = vmatmul.mubr.bf16.gmra.mrb[112].mxu0 %v25223_v33 }
 0xcda   : > { %19426 = vmatprep.mubr.bf16.mxu0 %v25384_v28 }
 0xce1   : > { %19427 = vmatmul.mubr.bf16.gmra.mrb[116].mxu0 %v25234_v12 }
 0xce2   : > { %19446 = vmatprep.mubr.bf16.mxu0 %v25063_v35  ;;  %v21292_v35 = vld [vmem:[%s26521_s9 + $0x218] sm:$0xff]  }
 0xce9   : > { %19447 = vmatmul.mubr.bf16.vlgmr.msra.gmra.mrb[88].mxu0 %v25077_v5  ;;  %v21293_v5 = vld [vmem:[%s26521_s9 + $0x220] sm:$0xff]  }
 0xcea   : > { %19450 = vmatprep.mubr.bf16.mxu0 %v25091_v51  ;;  %19479 = vmatpush3.bf16.msra.mxu0 %v21289_v23  ;;  %v21294_v51 = vld [vmem:[%s26521_s9 + $0x228] sm:$0xff]  }
 0xceb   : > { %19480 = vmatprep.subr.bf16.mxu0 %v21290_v15 }
 0xcee   : > { %19481 = vmatpush3.bf16.msra.mxu0 %v21290_v15 }
 0xcef   : > { %19482 = vmatprep.subr.bf16.mxu0 %v21291_v3 }
 0xcf1   : > { %19451 = vmatmul.mubr.bf16.gmra.mrb[92].mxu0 %v25105_v26  ;;  %v21295_v26 = vld [vmem:[%s26521_s9 + $0x230] sm:$0xff]  }
 0xcf2   : > { %19454 = vmatprep.mubr.bf16.mxu0 %v25119_v39  ;;  %19483 = vmatpush3.bf16.msra.mxu0 %v21291_v3  ;;  %v21296_v39 = vld [vmem:[%s26521_s9 + $0x238] sm:$0xff]  }
 0xcf3   : > { %19484 = vmatprep.subr.bf16.mxu0 %v21292_v35 }
 0xcf6   : > { %19485 = vmatpush3.bf16.msra.mxu0 %v21292_v35 }
 0xcf7   : > { %19486 = vmatprep.subr.bf16.mxu0 %v21293_v5 }
 0xcf9   : > { %19455 = vmatmul.mubr.bf16.gmra.mrb[96].mxu0 %v25133_v57  ;;  %v10211_v57 = vld [vmem:[#allocation6 + $0x1a8] sm:$0x3] }
 0xcfa   : > { %19458 = vmatprep.mubr.bf16.mxu0 %v25147_v25  ;;  %19487 = vmatpush3.bf16.msra.mxu0 %v21293_v5  ;;  %v12297_v25 = vrot.slane %v25230_v48, 1  ;;  %v12300_v41 = vrot.slane %v10211_v57, 1 }
 0xcfb   : > { %19488 = vmatprep.subr.bf16.mxu0 %v21294_v51 }
 0xcfe   : > { %19489 = vmatpush3.bf16.msra.mxu0 %v21294_v51 }
 0xcff   : > { %19490 = vmatprep.subr.bf16.mxu0 %v21295_v26 }
 0xd01   : > { %19459 = vmatmul.mubr.bf16.gmra.mrb[100].mxu0 %v25163_v56  ;;  %v12301_v56 = vsel %vm859_vm3, %v12297_v25, %v12300_v41 }
 0xd02   : > { %19462 = vmatprep.mubr.bf16.mxu0 %v25175_v37  ;;  %19491 = vmatpush3.bf16.msra.mxu0 %v21295_v26  ;;  %v12304_v37 = vpack.c.bf16 %v12301_v56, %v12297_v25 }
 0xd03   : > { %19492 = vmatprep.subr.bf16.mxu0 %v21296_v39 }
 0xd06   : > { %19493 = vmatpush3.bf16.msra.mxu0 %v21296_v39 }
 0xd09   : > { %19463 = vmatmul.mubr.bf16.gmra.mrb[104].mxu0 %v25186_v55 }
 0xd0a   : > { %19466 = vmatprep.mubr.bf16.mxu0 %v25197_v10  ;;  %v25594_v10 = vld [vmem:[%s26523_s11] sm:$0xff]  }
 0xd11   : > { %19467 = vmatmul.mubr.bf16.gmra.mrb[108].mxu0 %v25208_v50 }
 0xd12   : > { %19470 = vmatprep.mubr.bf16.mxu0 %v25219_v52 }
 0xd19   : > { %19471 = vmatmul.mubr.bf16.gmra.mrb[112].mxu0 %v25236_v22 }
 0xd1a   : > { %19474 = vmatprep.mubr.bf16.mxu0 %v25431_v7 }
 0xd21   : > { %19475 = vmatmul.mubr.bf16.gmra.mrb[116].mxu0 %v12304_v37 }
 0xd22   : > { %19494 = vmatprep.mubr.bf16.mxu0 %v25072_v61  ;;  %v12566_v61 = vrot.slane %v10211_v57, 2 }
 0xd29   : > { %19495 = vmatmul.mubr.bf16.vlgmr.msra.gmra.mrb[88].mxu0 %v25086_v21  ;;  %v12567_v21 = vsel %vm1415_vm4, %v25282_v47, %v12566_v61 }
 0xd2a   : > { %19498 = vmatprep.mubr.bf16.mxu0 %v25100_v18  ;;  %v12570_v18 = vpack.c.bf16 %v12567_v21, %v25282_v47 }
 0xd31   : > { %19499 = vmatmul.mubr.bf16.gmra.mrb[92].mxu0 %v25114_v17  ;;  %v21297_v17 = vld [vmem:[%s26523_s11 + $0x20] sm:$0xff]  }
 0xd32   : > { %19502 = vmatprep.mubr.bf16.mxu0 %v25128_v29  ;;  %19526 = vmatprep.subr.bf16.mxu1 %v21297_v17  ;;  %v21298_v29 = vld [vmem:[%s26523_s11 + $0x28] sm:$0xff]  }
 0xd33   : > { %19527 = vmatpush3.bf16.msra.mxu1 %v21297_v17 }
 0xd34   : > { %19528 = vmatprep.subr.bf16.mxu1 %v21298_v29 }
 0xd37   : > { %19529 = vmatpush3.bf16.msra.mxu1 %v21298_v29 }
 0xd39   : > { %19503 = vmatmul.mubr.bf16.gmra.mrb[96].mxu0 %v25142_v20  ;;  %v21299_v20 = vld [vmem:[%s26523_s11 + $0x30] sm:$0xff]  }
 0xd3a   : > { %19506 = vmatprep.mubr.bf16.mxu0 %v25158_v8  ;;  %19530 = vmatprep.subr.bf16.mxu1 %v21299_v20  ;;  %v21300_v8 = vld [vmem:[%s26523_s11 + $0x38] sm:$0xff]  }
 0xd3b   : > { %19531 = vmatpush3.bf16.msra.mxu1 %v21299_v20 }
 0xd3c   : > { %19532 = vmatprep.subr.bf16.mxu1 %v21300_v8 }
 0xd3f   : > { %19533 = vmatpush3.bf16.msra.mxu1 %v21300_v8  ;;  %v21302_v8 = vld [vmem:[%s26523_s11 + $0x8] sm:$0xff]  }
 0xd40   : > { %19566 = vmatprep.subr.bf16.mxu1 %v25594_v10 }
 0xd41   : > { %19507 = vmatmul.mubr.bf16.gmra.mrb[100].mxu0 %v25170_v16  ;;  %v25582_v16 = vld [vmem:[#allocation3] sm:$0xff] }
 0xd42   : > { %19510 = vmatprep.mubr.bf16.mxu0 %v25181_v62  ;;  %v25586_v62 = vld [vmem:[#allocation3 + $0x10] sm:$0x3]  ;;  %v13058_v55 = vrot.slane %v25582_v16, 1 }
 0xd44   : > { %v13060_v36 = vsel %vm859_vm3, %v13058_v55, %v13059_v27 }
 0xd49   : > { %19511 = vmatmul.mubr.bf16.gmra.mrb[104].mxu0 %v25192_v31  ;;  %v13061_v31 = vrot.slane %v25586_v62, 1 }
 0xd4a   : > { %19514 = vmatprep.mubr.bf16.mxu0 %v25203_v60 }
 0xd4b   : > { %v13062_v60 = vsel %vm859_vm3, %v13059_v27, %v13061_v31 }
 0xd4c   : > { %v13170_v50 = vpack.c.bf16 %v13062_v60, %v13060_v36 }
 0xd4e   : > { %19534 = vmatprep.mubr.msk.bf16.mxu1 %vm525_vm5, %v13170_v50 }
 0xd51   : > { %19515 = vmatmul.mubr.bf16.gmra.mrb[108].mxu0 %v25214_v30 }
 0xd52   : > { %19518 = vmatprep.mubr.bf16.mxu0 %v25225_v63 }
 0xd59   : > { %19519 = vmatmul.mubr.bf16.gmra.mrb[112].mxu0 %v25240_v13 }
 0xd5a   : > { %19522 = vmatprep.mubr.bf16.mxu0 %v25318_v58 }
 0xd61   : > { %19523 = vmatmul.mubr.bf16.gmra.mrb[116].mxu0 %v12570_v18 }
 0xdfc   : > { %v19496_v30 = vpop.f32.mrb[88].mxu0 }
 0xdfd   : > { %v12838_v52 = vadd.f32 %v19496_v30, %v25603_v59  ;;  %v12670_v33 = vpop.f32.mrb[89].mxu0 }
 0xdfe   : > { %v12836_v63 = vadd.f32 %v25603_v59, %v12670_v33  ;;  %v19497_v48 = vpop.f32.mrb[90].mxu0 }
 0xdff   : > { %v12870_v12 = vmax.f32 %v12838_v52, 0.0  ;;  %v12839_v22 = vadd.f32 %v19497_v48, %v25603_v59  ;;  %v12673_v13 = vpop.f32.mrb[91].mxu0 }
 0xe00   : > { %v12868_v47 = vmax.f32 %v12836_v63, 0.0  ;;  %v12837_v58 = vadd.f32 %v25603_v59, %v12673_v13 }
 0xe01   : > { %12902 = vst.msk [vmem:[#allocation3 + $0x31] sm:$0xff] %vm525_vm5, %v12870_v12  ;;  %v12871_v28 = vmax.f32 %v12839_v22, 0.0 }
 0xe02   : > { %12900 = vst.msk [vmem:[#allocation3 + $0x19] sm:$0xff] %vm525_vm5, %v12868_v47  ;;  %v12869_v44 = vmax.f32 %v12837_v58, 0.0 }
 0xe03   : > { %12903 = vst.msk [vmem:[#allocation3 + $0x39] sm:$0xff] %vm525_vm5, %v12871_v28 }
 0xe04   : > { %12901 = vst.msk [vmem:[#allocation3 + $0x21] sm:$0xff] %vm525_vm5, %v12869_v44  ;;  %v19500_v38 = vpop.f32.mrb[92].mxu0 }
 0xe05   : > { %v12842_v2 = vadd.f32 %v19500_v38, %v25603_v59  ;;  %v12686_v54 = vpop.f32.mrb[93].mxu0 }
 0xe06   : > { %v12840_v0 = vadd.f32 %v25603_v59, %v12686_v54  ;;  %v19501_v4 = vpop.f32.mrb[94].mxu0  ;;  %v21303_v54 = vld [vmem:[%s26523_s11 + $0x10] sm:$0xff]  }
 0xe07   : > { %v12874_v7 = vmax.f32 %v12842_v2, 0.0  ;;  %v12843_v40 = vadd.f32 %v19501_v4, %v25603_v59  ;;  %v12689_v43 = vpop.f32.mrb[95].mxu0 }
 0xe08   : > { %v12872_v24 = vmax.f32 %v12840_v0, 0.0  ;;  %v12841_v9 = vadd.f32 %v25603_v59, %v12689_v43  ;;  %v25617_v42 = vld [vmem:[#allocation3 + $0x30] sm:$0xff] }
 0xe09   : > { %12906 = vst.msk [vmem:[#allocation3 + $0x61] sm:$0xff] %vm525_vm5, %v12874_v7  ;;  %v12875_v32 = vmax.f32 %v12843_v40, 0.0  ;;  %v12935_v45 = vld [vmem:[#allocation3 + $0x18] sm:$0xff]  ;;  %v13068_v1 = vrot.slane %v25617_v42, 1  ;;  %v13671_v63 = vrot.slane %v25617_v42, 2 }
 0xe0a   : > { %12904 = vst.msk [vmem:[#allocation3 + $0x49] sm:$0xff] %vm525_vm5, %v12872_v24  ;;  %v12873_v34 = vmax.f32 %v12841_v9, 0.0  ;;  %v25621_v11 = vld [vmem:[#allocation3 + $0x38] sm:$0xff]  ;;  %v25623_v49 = vld [vmem:[#allocation3 + $0x40] sm:$0x3]  ;;  %v13063_v3 = vrot.slane %v12935_v45, 1 }
 0xe0b   : > { %12907 = vst.msk [vmem:[#allocation3 + $0x69] sm:$0xff] %vm525_vm5, %v12875_v32  ;;  %v12936_v14 = vld [vmem:[#allocation3 + $0x20] sm:$0xff]  ;;  %v12937_v53 = vld [vmem:[#allocation3 + $0x28] sm:$0x3]  ;;  %v13069_v6 = vrot.slane %v25621_v11, 1  ;;  %v13071_v46 = vrot.slane %v25623_v49, 1  ;;  %v25631_v23 = vpack.c.bf16 %v25621_v11, %v25617_v42 }
 0xe0c   : > { %12905 = vst.msk [vmem:[#allocation3 + $0x51] sm:$0xff] %vm525_vm5, %v12873_v34  ;;  %v19504_v15 = vpop.f32.mrb[96].mxu0  ;;  %v13064_v35 = vrot.slane %v12936_v14, 1  ;;  %v13066_v5 = vrot.slane %v12937_v53, 1  ;;  %v25634_v51 = vpack.c.bf16 %v12936_v14, %v12935_v45  ;;  %v13666_v55 = vrot.slane %v12935_v45, 2 }
 0xe0d   : > { %v12846_v26 = vadd.f32 %v19504_v15, %v25603_v59  ;;  %v12702_v39 = vpop.f32.mrb[97].mxu0  ;;  %v13070_v57 = vsel %vm859_vm3, %v13068_v1, %v13069_v6  ;;  %v13072_v25 = vsel %vm859_vm3, %v13069_v6, %v13071_v46  ;;  %v13667_v60 = vrot.slane %v12936_v14, 2 }
 0xe0e   : > { %v12844_v41 = vadd.f32 %v25603_v59, %v12702_v39  ;;  %v19505_v56 = vpop.f32.mrb[98].mxu0  ;;  %v13065_v37 = vsel %vm859_vm3, %v13063_v3, %v13064_v35  ;;  %v13067_v61 = vsel %vm859_vm3, %v13064_v35, %v13066_v5  ;;  %v25642_v21 = vpack.c.bf16 %v13072_v25, %v13070_v57 }
 0xe0f   : > { %v12878_v18 = vmax.f32 %v12846_v26, 0.0  ;;  %v12847_v17 = vadd.f32 %v19505_v56, %v25603_v59  ;;  %v12705_v29 = vpop.f32.mrb[99].mxu0  ;;  %v25645_v20 = vpack.c.bf16 %v13067_v61, %v13065_v37  ;;  %v13669_v50 = vrot.slane %v12937_v53, 2 }
 0xe10   : > { %v12876_v27 = vmax.f32 %v12844_v41, 0.0  ;;  %v12845_v31 = vadd.f32 %v25603_v59, %v12705_v29  ;;  %v25651_v36 = vld [vmem:[#allocation3 + $0x60] sm:$0xff]  ;;  %v13672_v48 = vrot.slane %v25621_v11, 2  ;;  %v13668_v58 = vsel %vm1415_vm4, %v13666_v55, %v13667_v60 }
 0xe11   : > { %12910 = vst.msk [vmem:[#allocation3 + $0x91] sm:$0xff] %vm525_vm5, %v12878_v18  ;;  %v12879_v30 = vmax.f32 %v12847_v17, 0.0  ;;  %19535 = vmatmul.mubr.msk.bf16.vlgmr.msra.gmra.mrb[40].mxu1 %vm525_vm5, %v25645_v20  ;;  %v25656_v52 = vld [vmem:[#allocation3 + $0x48] sm:$0xff]  ;;  %v13078_v33 = vrot.slane %v25651_v36, 1  ;;  %v13670_v28 = vsel %vm1415_vm4, %v13667_v60, %v13669_v50  ;;  %v13674_v11 = vrot.slane %v25623_v49, 2 }
 0xe12   : > { %12908 = vst.msk [vmem:[#allocation3 + $0x79] sm:$0xff] %vm525_vm5, %v12876_v27  ;;  %v12877_v12 = vmax.f32 %v12845_v31, 0.0  ;;  %19538 = vmatprep.mubr.msk.bf16.mxu1 %vm525_vm5, %v25642_v21  ;;  %19567 = vmatpush3.bf16.msra.mxu1 %v25594_v10  ;;  %v13073_v22 = vrot.slane %v25656_v52, 1  ;;  %v25666_v13 = vld [vmem:[#allocation3 + $0x68] sm:$0xff]  ;;  %v25668_v47 = vld [vmem:[#allocation3 + $0x70] sm:$0x3]  ;;  %v25686_v4 = vpack.c.bf16 %v13670_v28, %v13668_v58  ;;  %v13673_v9 = vsel %vm1415_vm4, %v13671_v63, %v13672_v48 }
 0xe13   : > { %12911 = vst.msk [vmem:[#allocation3 + $0x99] sm:$0xff] %vm525_vm5, %v12879_v30  ;;  %v25673_v44 = vld [vmem:[#allocation3 + $0x50] sm:$0xff]  ;;  %v25675_v38 = vld [vmem:[#allocation3 + $0x58] sm:$0x3]  ;;  %v13079_v2 = vrot.slane %v25666_v13, 1  ;;  %v13081_v10 = vrot.slane %v25668_v47, 1  ;;  %19568 = vmatprep.subr.bf16.mxu1 %v21302_v8  ;;  %v25684_v0 = vpack.c.bf16 %v25666_v13, %v25651_v36  ;;  %v13675_v26 = vsel %vm1415_vm4, %v13672_v48, %v13674_v11 }
 0xe14   : > { %12909 = vst.msk [vmem:[#allocation3 + $0x81] sm:$0xff] %vm525_vm5, %v12877_v12  ;;  %v19508_v7 = vpop.f32.mrb[100].mxu0  ;;  %v13074_v40 = vrot.slane %v25673_v44, 1  ;;  %v13076_v43 = vrot.slane %v25675_v38, 1  ;;  %v25693_v24 = vpack.c.bf16 %v25673_v44, %v25656_v52  ;;  %v21304_v49 = vld [vmem:[%s26523_s11 + $0x18] sm:$0xff]   ;;  %v25715_v41 = vpack.c.bf16 %v13675_v26, %v13673_v9  ;;  %v25745_v63 = vld [vmem:[%s26523_s11 + $0x40] sm:$0xff]  }
 0xe15   : > { %v12850_v42 = vadd.f32 %v19508_v7, %v25603_v59  ;;  %v12718_v32 = vpop.f32.mrb[101].mxu0  ;;  %v13080_v45 = vsel %vm859_vm3, %v13078_v33, %v13079_v2  ;;  %v13082_v34 = vsel %vm859_vm3, %v13079_v2, %v13081_v10  ;;  %v13676_v56 = vrot.slane %v25656_v52, 2 }
 0xe16   : > { %v12848_v14 = vadd.f32 %v25603_v59, %v12718_v32  ;;  %v19509_v53 = vpop.f32.mrb[102].mxu0  ;;  %v13075_v1 = vsel %vm859_vm3, %v13073_v22, %v13074_v40  ;;  %v13077_v6 = vsel %vm859_vm3, %v13074_v40, %v13076_v43  ;;  %v25703_v46 = vpack.c.bf16 %v13082_v34, %v13080_v45  ;;  %19569 = vmatpush3.bf16.msra.mxu1 %v21302_v8 }
 0xe17   : > { %v12882_v15 = vmax.f32 %v12850_v42, 0.0  ;;  %v12851_v3 = vadd.f32 %v19509_v53, %v25603_v59  ;;  %v12721_v35 = vpop.f32.mrb[103].mxu0  ;;  %v25706_v5 = vpack.c.bf16 %v13077_v6, %v13075_v1  ;;  %19570 = vmatprep.subr.bf16.mxu1 %v21303_v54  ;;  %v13677_v17 = vrot.slane %v25673_v44, 2 }
 0xe18   : > { %v12880_v39 = vmax.f32 %v12848_v14, 0.0  ;;  %v12849_v57 = vadd.f32 %v25603_v59, %v12721_v35  ;;  %v25713_v25 = vld [vmem:[#allocation3 + $0x90] sm:$0xff]  ;;  %v13679_v29 = vrot.slane %v25675_v38, 2  ;;  %v13681_v60 = vrot.slane %v25651_v36, 2 }
 0xe19   : > { %12914 = vst.msk [vmem:[#allocation3 + $0xc1] sm:$0xff] %vm525_vm5, %v12882_v15  ;;  %v12883_v37 = vmax.f32 %v12851_v3, 0.0  ;;  %19539 = vmatmul.mubr.msk.bf16.gmra.mrb[44].mxu1 %vm525_vm5, %v25706_v5  ;;  %v25721_v61 = vld [vmem:[#allocation3 + $0x78] sm:$0xff]  ;;  %v13088_v18 = vrot.slane %v25713_v25, 1  ;;  %v13678_v36 = vsel %vm1415_vm4, %v13676_v56, %v13677_v17  ;;  %v13682_v53 = vrot.slane %v25666_v13, 2 }
 0xe1a   : > { %12912 = vst.msk [vmem:[#allocation3 + $0xa9] sm:$0xff] %vm525_vm5, %v12880_v39  ;;  %v12881_v8 = vmax.f32 %v12849_v57, 0.0  ;;  %19542 = vmatprep.mubr.msk.bf16.mxu1 %vm525_vm5, %v25703_v46  ;;  %v13083_v55 = vrot.slane %v25721_v61, 1  ;;  %v25730_v27 = vld [vmem:[#allocation3 + $0x98] sm:$0xff]  ;;  %v25732_v31 = vld [vmem:[#allocation3 + $0xa0] sm:$0x3]  ;;  %19571 = vmatpush3.bf16.msra.mxu1 %v21303_v54  ;;  %v13680_v44 = vsel %vm1415_vm4, %v13677_v17, %v13679_v29 }
 0xe1b   : > { %12915 = vst.msk [vmem:[#allocation3 + $0xc9] sm:$0xff] %vm525_vm5, %v12883_v37  ;;  %v25736_v50 = vld [vmem:[#allocation3 + $0x80] sm:$0xff]  ;;  %v25738_v30 = vld [vmem:[#allocation3 + $0x88] sm:$0x3]  ;;  %v13089_v52 = vrot.slane %v25730_v27, 1  ;;  %v13091_v33 = vrot.slane %v25732_v31, 1  ;;  %19572 = vmatprep.subr.bf16.mxu1 %v21304_v49  ;;  %v25749_v48 = vpack.c.bf16 %v25730_v27, %v25713_v25  ;;  %v25763_v7 = vpack.c.bf16 %v13680_v44, %v13678_v36 }
 0xe1c   : > { %12913 = vst.msk [vmem:[#allocation3 + $0xb1] sm:$0xff] %vm525_vm5, %v12881_v8  ;;  %v19512_v12 = vpop.f32.mrb[104].mxu0  ;;  %v13084_v22 = vrot.slane %v25736_v50, 1  ;;  %v13086_v58 = vrot.slane %v25738_v30, 1  ;;  %v25757_v28 = vpack.c.bf16 %v25736_v50, %v25721_v61  ;;  %v13684_v3 = vrot.slane %v25668_v47, 2 }
 0xe1d   : > { %v12854_v38 = vadd.f32 %v19512_v12, %v25603_v59  ;;  %v12734_v2 = vpop.f32.mrb[105].mxu0  ;;  %v13090_v10 = vsel %vm859_vm3, %v13088_v18, %v13089_v52  ;;  %v13092_v54 = vsel %vm859_vm3, %v13089_v52, %v13091_v33  ;;  %v13686_v35 = vrot.slane %v25721_v61, 2 }
 0xe1e   : > { %v12852_v40 = vadd.f32 %v25603_v59, %v12734_v2  ;;  %v19513_v43 = vpop.f32.mrb[106].mxu0  ;;  %v13085_v9 = vsel %vm859_vm3, %v13083_v55, %v13084_v22  ;;  %v13087_v42 = vsel %vm859_vm3, %v13084_v22, %v13086_v58  ;;  %v25768_v32 = vpack.c.bf16 %v13092_v54, %v13090_v10  ;;  %19573 = vmatpush3.bf16.msra.mxu1 %v21304_v49 }
 0xe1f   : > { %v12886_v45 = vmax.f32 %v12854_v38, 0.0  ;;  %v12855_v34 = vadd.f32 %v19513_v43, %v25603_v59  ;;  %v12737_v11 = vpop.f32.mrb[107].mxu0  ;;  %v25771_v14 = vpack.c.bf16 %v13087_v42, %v13085_v9  ;;  %19606 = vmatprep.subr.bf16.mxu1 %v25745_v63  ;;  %v13683_v13 = vsel %vm1415_vm4, %v13681_v60, %v13682_v53 }
 0xe20   : > { %v12884_v1 = vmax.f32 %v12852_v40, 0.0  ;;  %v12853_v6 = vadd.f32 %v25603_v59, %v12737_v11  ;;  %v25776_v15 = vld [vmem:[#allocation3 + $0xc0] sm:$0xff]  ;;  %v13687_v57 = vrot.slane %v25736_v50, 2  ;;  %v13685_v18 = vsel %vm1415_vm4, %v13682_v53, %v13684_v3 }
 0xe21   : > { %12918 = vst.msk [vmem:[#allocation3 + $0xf1] sm:$0xff] %vm525_vm5, %v12886_v45  ;;  %v12887_v49 = vmax.f32 %v12855_v34, 0.0  ;;  %19543 = vmatmul.mubr.msk.bf16.gmra.mrb[48].mxu1 %vm525_vm5, %v25771_v14  ;;  %v25783_v26 = vld [vmem:[#allocation3 + $0xa8] sm:$0xff]  ;;  %v13098_v39 = vrot.slane %v25776_v15, 1  ;;  %v13689_v17 = vrot.slane %v25738_v30, 2  ;;  %v25809_v52 = vpack.c.bf16 %v13685_v18, %v13683_v13 }
 0xe22   : > { %12916 = vst.msk [vmem:[#allocation3 + $0xd9] sm:$0xff] %vm525_vm5, %v12884_v1  ;;  %v12885_v56 = vmax.f32 %v12853_v6, 0.0  ;;  %19546 = vmatprep.mubr.msk.bf16.mxu1 %vm525_vm5, %v25768_v32  ;;  %v13093_v47 = vrot.slane %v25783_v26, 1  ;;  %v25792_v37 = vld [vmem:[#allocation3 + $0xc8] sm:$0xff]  ;;  %v25794_v61 = vld [vmem:[#allocation3 + $0xd0] sm:$0x3]  ;;  %v13688_v22 = vsel %vm1415_vm4, %v13686_v35, %v13687_v57 }
 0xe23   : > { %12919 = vst.msk [vmem:[#allocation3 + $0xf9] sm:$0xff] %vm525_vm5, %v12887_v49  ;;  %v25799_v29 = vld [vmem:[#allocation3 + $0xb0] sm:$0xff]  ;;  %v25801_v8 = vld [vmem:[#allocation3 + $0xb8] sm:$0x3]  ;;  %v13099_v55 = vrot.slane %v25792_v37, 1  ;;  %v13101_v60 = vrot.slane %v25794_v61, 1  ;;  %v25807_v50 = vpack.c.bf16 %v25792_v37, %v25776_v15  ;;  %v13690_v10 = vsel %vm1415_vm4, %v13687_v57, %v13689_v17 }
 0xe24   : > { %12917 = vst.msk [vmem:[#allocation3 + $0xe1] sm:$0xff] %vm525_vm5, %v12885_v56  ;;  %v19516_v33 = vpop.f32.mrb[108].mxu0  ;;  %v13094_v30 = vrot.slane %v25799_v29, 1  ;;  %v13096_v36 = vrot.slane %v25801_v8, 1  ;;  %v25816_v12 = vpack.c.bf16 %v25799_v29, %v25783_v26  ;;  %v25831_v1 = vpack.c.bf16 %v13690_v10, %v13688_v22 }
 0xe25   : > { %v12858_v58 = vadd.f32 %v19516_v33, %v25603_v59  ;;  %v12750_v44 = vpop.f32.mrb[109].mxu0  ;;  %v13100_v38 = vsel %vm859_vm3, %v13098_v39, %v13099_v55  ;;  %v13102_v2 = vsel %vm859_vm3, %v13099_v55, %v13101_v60  ;;  %v13691_v49 = vrot.slane %v25713_v25, 2 }
 0xe26   : > { %v12856_v54 = vadd.f32 %v25603_v59, %v12750_v44  ;;  %v19517_v40 = vpop.f32.mrb[110].mxu0  ;;  %v13095_v43 = vsel %vm859_vm3, %v13093_v47, %v13094_v30  ;;  %v13097_v9 = vsel %vm859_vm3, %v13094_v30, %v13096_v36  ;;  %v25826_v42 = vpack.c.bf16 %v13102_v2, %v13100_v38 }
 0xe27   : > { %v12890_v45 = vmax.f32 %v12858_v58, 0.0  ;;  %v12859_v34 = vadd.f32 %v19517_v40, %v25603_v59  ;;  %v12753_v11 = vpop.f32.mrb[111].mxu0  ;;  %v25829_v53 = vpack.c.bf16 %v13097_v9, %v13095_v43  ;;  %v13692_v39 = vrot.slane %v25730_v27, 2 }
 0xe28   : > { %26725 = vst [vmem:[#allocation17_spill] sm:$0xff] %v25826_v42  ;;  %v12888_v6 = vmax.f32 %v12856_v54, 0.0  ;;  %v12857_v3 = vadd.f32 %v25603_v59, %v12753_v11  ;;  %v25834_v35 = vld [vmem:[#allocation3 + $0xf0] sm:$0xff]  ;;  %v13694_v47 = vrot.slane %v25732_v31, 2  ;;  %v13696_v18 = vrot.slane %v25783_v26, 2 }
 0xe29   : > { %26726 = vst [vmem:[#allocation23_spill] sm:$0xff] %v25829_v53  ;;  %12922 = vst.msk [vmem:[#allocation3 + $0x121] sm:$0xff] %vm525_vm5, %v12890_v45  ;;  %v12891_v13 = vmax.f32 %v12859_v34, 0.0  ;;  %19547 = vmatmul.mubr.msk.bf16.gmra.mrb[52].mxu1 %vm525_vm5, %v25829_v53  ;;  %v25841_v57 = vld [vmem:[#allocation3 + $0xd8] sm:$0xff]  ;;  %v13108_v56 = vrot.slane %v25834_v35, 1  ;;  %v13693_v60 = vsel %vm1415_vm4, %v13691_v49, %v13692_v39  ;;  %v13697_v33 = vrot.slane %v25799_v29, 2 }
 0xe2a   : > { %12920 = vst.msk [vmem:[#allocation3 + $0x109] sm:$0xff] %vm525_vm5, %v12888_v6  ;;  %v12889_v17 = vmax.f32 %v12857_v3, 0.0  ;;  %19550 = vmatprep.mubr.msk.bf16.mxu1 %vm525_vm5, %v25826_v42  ;;  %v13103_v25 = vrot.slane %v25841_v57, 1  ;;  %v25850_v27 = vld [vmem:[#allocation3 + $0xf8] sm:$0xff]  ;;  %v25852_v55 = vld [vmem:[#allocation3 + $0x100] sm:$0x3]  ;;  %v13695_v58 = vsel %vm1415_vm4, %v13692_v39, %v13694_v47 }
 0xe2b   : > { %12923 = vst.msk [vmem:[#allocation3 + $0x129] sm:$0xff] %vm525_vm5, %v12891_v13  ;;  %v25857_v31 = vld [vmem:[#allocation3 + $0xe0] sm:$0xff]  ;;  %v25859_v26 = vld [vmem:[#allocation3 + $0xe8] sm:$0x3]  ;;  %v13109_v30 = vrot.slane %v25850_v27, 1  ;;  %v13111_v36 = vrot.slane %v25852_v55, 1  ;;  %v25865_v22 = vpack.c.bf16 %v25850_v27, %v25834_v35  ;;  %v25875_v10 = vpack.c.bf16 %v13695_v58, %v13693_v60 }
 0xe2c   : > { %12921 = vst.msk [vmem:[#allocation3 + $0x111] sm:$0xff] %vm525_vm5, %v12889_v17  ;;  %v19520_v44 = vpop.f32.mrb[112].mxu0  ;;  %v13104_v29 = vrot.slane %v25857_v31, 1  ;;  %v13106_v38 = vrot.slane %v25859_v26, 1  ;;  %v25873_v2 = vpack.c.bf16 %v25857_v31, %v25841_v57  ;;  %v13698_v45 = vsel %vm1415_vm4, %v13696_v18, %v13697_v33 }
 0xe2d   : > { %v12862_v54 = vadd.f32 %v19520_v44, %v25603_v59  ;;  %v12766_v40 = vpop.f32.mrb[113].mxu0  ;;  %v13110_v43 = vsel %vm859_vm3, %v13108_v56, %v13109_v30  ;;  %v13112_v9 = vsel %vm859_vm3, %v13109_v30, %v13111_v36  ;;  %v13699_v56 = vrot.slane %v25801_v8, 2 }
 0xe2e   : > { %v12860_v34 = vadd.f32 %v25603_v59, %v12766_v40  ;;  %v19521_v11 = vpop.f32.mrb[114].mxu0  ;;  %v13105_v6 = vsel %vm859_vm3, %v13103_v25, %v13104_v29  ;;  %v13107_v3 = vsel %vm859_vm3, %v13104_v29, %v13106_v38  ;;  %v25884_v49 = vpack.c.bf16 %v13112_v9, %v13110_v43 }
 0xe2f   : > { %v12894_v39 = vmax.f32 %v12862_v54, 0.0  ;;  %v12863_v13 = vadd.f32 %v19521_v11, %v25603_v59  ;;  %v12769_v47 = vpop.f32.mrb[115].mxu0  ;;  %v25887_v17 = vpack.c.bf16 %v13107_v3, %v13105_v6  ;;  %v13701_v36 = vrot.slane %v25776_v15, 2 }
 0xe30   : > { %26727 = vst [vmem:[#allocation8_spill] sm:$0xff] %v25884_v49  ;;  %v12892_v60 = vmax.f32 %v12860_v34, 0.0  ;;  %v12861_v18 = vadd.f32 %v25603_v59, %v12769_v47  ;;  %v25891_v30 = vld [vmem:[#allocation3 + $0x120] sm:$0xff]  ;;  %v13702_v25 = vrot.slane %v25792_v37, 2  ;;  %v13700_v8 = vsel %vm1415_vm4, %v13697_v33, %v13699_v56 }
 0xe31   : > { %26728 = vst [vmem:[#allocation7_spill] sm:$0xff] %v25887_v17  ;;  %12926 = vst.msk [vmem:[#allocation3 + $0x151] sm:$0xff] %vm525_vm5, %v12894_v39  ;;  %v12895_v58 = vmax.f32 %v12863_v13, 0.0  ;;  %19551 = vmatmul.mubr.msk.bf16.gmra.mrb[56].mxu1 %vm525_vm5, %v25887_v17  ;;  %v25898_v44 = vld [vmem:[#allocation3 + $0x108] sm:$0xff]  ;;  %v13118_v29 = vrot.slane %v25891_v30, 1  ;;  %v13704_v38 = vrot.slane %v25794_v61, 2  ;;  %v25911_v43 = vpack.c.bf16 %v13700_v8, %v13698_v45 }
 0xe32   : > { %12924 = vst.msk [vmem:[#allocation3 + $0x139] sm:$0xff] %vm525_vm5, %v12892_v60  ;;  %v12893_v54 = vmax.f32 %v12861_v18, 0.0  ;;  %19554 = vmatprep.mubr.msk.bf16.mxu1 %vm525_vm5, %v25884_v49  ;;  %v13113_v15 = vrot.slane %v25898_v44, 1  ;;  %v25907_v37 = vld [vmem:[#allocation3 + $0x128] sm:$0xff]  ;;  %v25909_v40 = vld [vmem:[#allocation3 + $0x130] sm:$0x3]  ;;  %v13703_v9 = vsel %vm1415_vm4, %v13701_v36, %v13702_v25 }
 0xe33   : > { %12927 = vst.msk [vmem:[#allocation3 + $0x159] sm:$0xff] %vm525_vm5, %v12895_v58  ;;  %v25915_v33 = vld [vmem:[#allocation3 + $0x110] sm:$0xff]  ;;  %v25917_v61 = vld [vmem:[#allocation3 + $0x118] sm:$0x3]  ;;  %v13119_v34 = vrot.slane %v25907_v37, 1  ;;  %v13121_v11 = vrot.slane %v25909_v40, 1  ;;  %v25923_v6 = vpack.c.bf16 %v25907_v37, %v25891_v30  ;;  %v13705_v3 = vsel %vm1415_vm4, %v13702_v25, %v13704_v38 }
 0xe34   : > { %12925 = vst.msk [vmem:[#allocation3 + $0x141] sm:$0xff] %vm525_vm5, %v12893_v54  ;;  %v19524_v45 = vpop.f32.mrb[116].mxu0  ;;  %v13114_v39 = vrot.slane %v25915_v33, 1  ;;  %v13116_v13 = vrot.slane %v25917_v61, 1  ;;  %v25931_v47 = vpack.c.bf16 %v25915_v33, %v25898_v44  ;;  %v25933_v56 = vpack.c.bf16 %v13705_v3, %v13703_v9 }
 0xe35   : > { %v12866_v60 = vadd.f32 %v19524_v45, %v25603_v59  ;;  %v12782_v18 = vpop.f32.mrb[117].mxu0  ;;  %v13120_v36 = vsel %vm859_vm3, %v13118_v29, %v13119_v34  ;;  %v13122_v25 = vsel %vm859_vm3, %v13119_v34, %v13121_v11  ;;  %v13706_v58 = vrot.slane %v25841_v57, 2 }
 0xe36   : > { %v12864_v8 = vadd.f32 %v25603_v59, %v12782_v18  ;;  %v19525_v38 = vpop.f32.mrb[118].mxu0  ;;  %v13115_v54 = vsel %vm859_vm3, %v13113_v15, %v13114_v39  ;;  %v13117_v49 = vsel %vm859_vm3, %v13114_v39, %v13116_v13  ;;  %v25942_v17 = vpack.c.bf16 %v13122_v25, %v13120_v36 }
 0xe37   : > { %v12898_v9 = vmax.f32 %v12866_v60, 0.0  ;;  %v12867_v3 = vadd.f32 %v19525_v38, %v25603_v59  ;;  %v12785_v45 = vpop.f32.mrb[119].mxu0  ;;  %v25945_v42 = vpack.c.bf16 %v13117_v49, %v13115_v54  ;;  %v13707_v29 = vrot.slane %v25857_v31, 2 }
 0xe38   : > { %26729 = vst [vmem:[#allocation11_spill] sm:$0xff] %v25942_v17  ;;  %v12896_v34 = vmax.f32 %v12864_v8, 0.0  ;;  %v12865_v57 = vadd.f32 %v25603_v59, %v12785_v45  ;;  %v25949_v11 = vld [vmem:[#allocation3 + $0x150] sm:$0xff]  ;;  %v13709_v18 = vrot.slane %v25859_v26, 2  ;;  %v13711_v15 = vrot.slane %v25834_v35, 2 }
 0xe39   : > { %26730 = vst [vmem:[#allocation15_spill] sm:$0xff] %v25945_v42  ;;  %12930 = vst.msk [vmem:[#allocation3 + $0x181] sm:$0xff] %vm525_vm5, %v12898_v9  ;;  %v12899_v39 = vmax.f32 %v12867_v3, 0.0  ;;  %19555 = vmatmul.mubr.msk.bf16.gmra.mrb[60].mxu1 %vm525_vm5, %v25945_v42  ;;  %v12971_v13 = vld [vmem:[#allocation3 + $0x138] sm:$0xff]  ;;  %v13128_v49 = vrot.slane %v25949_v11, 1  ;;  %v13708_v31 = vsel %vm1415_vm4, %v13706_v58, %v13707_v29  ;;  %v13712_v60 = vrot.slane %v25850_v27, 2 }
 0xe3a   : > { %12928 = vst.msk [vmem:[#allocation3 + $0x169] sm:$0xff] %vm525_vm5, %v12896_v34  ;;  %v12897_v59 = vmax.f32 %v12865_v57, 0.0  ;;  %19558 = vmatprep.mubr.msk.bf16.mxu1 %vm525_vm5, %v25942_v17  ;;  %v13123_v35 = vrot.slane %v12971_v13, 1  ;;  %v25962_v26 = vld [vmem:[#allocation3 + $0x158] sm:$0xff]  ;;  %v25964_v36 = vld [vmem:[#allocation3 + $0x160] sm:$0x3]  ;;  %v13710_v25 = vsel %vm1415_vm4, %v13707_v29, %v13709_v18 }
 0xe3b   : > { %v13714_v8 = vrot.slane %v25852_v55, 2  ;;  %12931 = vst.msk [vmem:[#allocation3 + $0x189] sm:$0xff] %vm525_vm5, %v12899_v39  ;;  %v12972_v58 = vld [vmem:[#allocation3 + $0x140] sm:$0xff]  ;;  %v12973_v38 = vld [vmem:[#allocation3 + $0x148] sm:$0x3]  ;;  %v13129_v27 = vrot.slane %v25962_v26, 1  ;;  %v25973_v9 = vpack.c.bf16 %v25962_v26, %v25949_v11  ;;  %v25975_v3 = vpack.c.bf16 %v13710_v25, %v13708_v31 }
 0xe3c   : > { %v13131_v54 = vrot.slane %v25964_v36, 1  ;;  %12929 = vst.msk [vmem:[#allocation3 + $0x171] sm:$0xff] %vm525_vm5, %v12897_v59  ;;  %v13124_v45 = vrot.slane %v12972_v58, 1  ;;  %v13126_v29 = vrot.slane %v12973_v38, 1  ;;  %v25978_v34 = vpack.c.bf16 %v12972_v58, %v12971_v13 }
 0xe3d   : > { %v13713_v55 = vsel %vm1415_vm4, %v13711_v15, %v13712_v60  ;;  %v13130_v57 = vsel %vm859_vm3, %v13128_v49, %v13129_v27  ;;  %v13715_v39 = vsel %vm1415_vm4, %v13712_v60, %v13714_v8  ;;  %v13716_v17 = vrot.slane %v25898_v44, 2 }
 0xe3e   : > { %v13132_v18 = vsel %vm859_vm3, %v13129_v27, %v13131_v54  ;;  %v13125_v42 = vsel %vm859_vm3, %v13123_v35, %v13124_v45  ;;  %v13127_v31 = vsel %vm859_vm3, %v13124_v45, %v13126_v29  ;;  %v25989_v59 = vpack.c.bf16 %v13715_v39, %v13713_v55 }
 0xe3f   : > { %v25987_v25 = vpack.c.bf16 %v13132_v18, %v13130_v57  ;;  %v25991_v53 = vpack.c.bf16 %v13127_v31, %v13125_v42  ;;  %v13717_v15 = vrot.slane %v25915_v33, 2  ;;  %v13719_v49 = vrot.slane %v25917_v61, 2 }
 0xe40   : > { %v13721_v27 = vrot.slane %v25891_v30, 2  ;;  %v13722_v60 = vrot.slane %v25907_v37, 2  ;;  %v13724_v44 = vrot.slane %v25909_v40, 2  ;;  %v13726_v8 = vrot.slane %v12971_v13, 2 }
 0xe41   : > { %v13727_v35 = vrot.slane %v12972_v58, 2  ;;  %19559 = vmatmul.mubr.msk.bf16.gmra.mrb[64].mxu1 %vm525_vm5, %v25991_v53  ;;  %v12977_v54 = vld [vmem:[#allocation3 + $0x168] sm:$0xff]  ;;  %v13718_v45 = vsel %vm1415_vm4, %v13716_v17, %v13717_v15  ;;  %v13720_v42 = vsel %vm1415_vm4, %v13717_v15, %v13719_v49  ;;  %v13729_v29 = vrot.slane %v12973_v38, 2 }
 0xe42   : > { %v13731_v33 = vrot.slane %v25949_v11, 2  ;;  %19562 = vmatprep.mubr.msk.bf16.mxu1 %vm525_vm5, %v25987_v25  ;;  %v13133_v30 = vrot.slane %v12977_v54, 1  ;;  %v26005_v37 = vpack.c.bf16 %v13720_v42, %v13718_v45  ;;  %v13723_v40 = vsel %vm1415_vm4, %v13721_v27, %v13722_v60  ;;  %v26024_v45 = vld [vmem:[#allocation3 + $0x180] sm:$0xff]  ;;  %v26026_v42 = vld [vmem:[#allocation3 + $0x188] sm:$0xff] }
 0xe43   : > { %v13725_v61 = vsel %vm1415_vm4, %v13722_v60, %v13724_v44  ;;  %v12978_v13 = vld [vmem:[#allocation3 + $0x170] sm:$0xff]  ;;  %v12979_v58 = vld [vmem:[#allocation3 + $0x178] sm:$0x3]  ;;  %v13728_v17 = vsel %vm1415_vm4, %v13726_v8, %v13727_v35  ;;  %v13730_v38 = vsel %vm1415_vm4, %v13727_v35, %v13729_v29  ;;  %v13732_v11 = vrot.slane %v25962_v26, 2 }
 0xe44   : > { %v26009_v55 = vpack.c.bf16 %v13725_v61, %v13723_v40  ;;  %v13134_v57 = vrot.slane %v12978_v13, 1  ;;  %v13136_v18 = vrot.slane %v12979_v58, 1  ;;  %v26014_v39 = vpack.c.bf16 %v12978_v13, %v12977_v54  ;;  %v26028_v29 = vld [vmem:[#allocation3 + $0x190] sm:$0x3] }
 0xe45   : > { %v26016_v31 = vpack.c.bf16 %v13730_v38, %v13728_v17  ;;  %v13733_v15 = vsel %vm1415_vm4, %v13731_v33, %v13732_v11  ;;  %v13734_v49 = vrot.slane %v25964_v36, 2  ;;  %v13736_v27 = vrot.slane %v12977_v54, 2 }
 0xe46   : > { %v13737_v60 = vrot.slane %v12978_v13, 2  ;;  %v13135_v44 = vsel %vm859_vm3, %v13133_v30, %v13134_v57  ;;  %v13137_v8 = vsel %vm859_vm3, %v13134_v57, %v13136_v18  ;;  %v12986_v35 = vpack.c.bf16 %v25584_v19, %v25582_v16  ;;  %v21306_v18 = vld [vmem:[%s26523_s11 + $0x48] sm:$0xff]  }
 0xe47   : > { %v13739_v26 = vrot.slane %v12979_v58, 2  ;;  %v26030_v40 = vpack.c.bf16 %v13137_v8, %v13135_v44  ;;  %v13735_v36 = vsel %vm1415_vm4, %v13732_v11, %v13734_v49  ;;  %v14533_v13 = vrot.slane %v26024_v45, 2  ;;  %v21308_v49 = vld [vmem:[%s26523_s11 + $0x58] sm:$0xff]  }
 0xe48   : > { %v13738_v54 = vsel %vm1415_vm4, %v13736_v27, %v13737_v60  ;;  %v26034_v33 = vpack.c.bf16 %v13735_v36, %v13733_v15  ;;  %v14534_v58 = vrot.slane %v26026_v42, 2  ;;  %v14536_v17 = vrot.slane %v26028_v29, 2  ;;  %v21307_v15 = vld [vmem:[%s26523_s11 + $0x50] sm:$0xff]   ;;  %v21313_v36 = vld [vmem:[%s26523_s11 + $0x80] sm:$0xff]  }
 0xe49   : > { %v13740_v30 = vsel %vm1415_vm4, %v13737_v60, %v13739_v26  ;;  %19563 = vmatmul.mubr.msk.bf16.gmra.mrb[68].mxu1 %vm525_vm5, %v26030_v40  ;;  %v13661_v27 = vrot.slane %v25582_v16, 2  ;;  %v13662_v60 = vrot.slane %v25584_v19, 2  ;;  %v13664_v44 = vrot.slane %v25586_v62, 2  ;;  %v21310_v16 = vld [vmem:[%s26523_s11 + $0x68] sm:$0xff]   ;;  %v21311_v19 = vld [vmem:[%s26523_s11 + $0x70] sm:$0xff]   ;;  %v21312_v62 = vld [vmem:[%s26523_s11 + $0x78] sm:$0xff]  }
 0xe4a   : > { %v26039_v61 = vpack.c.bf16 %v13740_v30, %v13738_v54  ;;  %19574 = vmatprep.mubr.msk.bf16.mxu1 %vm525_vm5, %v12986_v35  ;;  %v14535_v38 = vsel %vm1415_vm4, %v14533_v13, %v14534_v58  ;;  %v14537_v11 = vsel %vm1415_vm4, %v14534_v58, %v14536_v17  ;;  %v21314_v54 = vld [vmem:[%s26523_s11 + $0x88] sm:$0xff]   ;;  %v21315_v30 = vld [vmem:[%s26523_s11 + $0x90] sm:$0xff]   ;;  %v21317_v13 = vld [vmem:[%s26523_s11 + $0xa0] sm:$0xff]   ;;  %v26184_v58 = vpack.c.bf16 %v26026_v42, %v26024_v45 }
 0xe4b   : > { %v26047_v57 = vpack.c.bf16 %v14537_v11, %v14535_v38  ;;  %v13663_v8 = vsel %vm1415_vm4, %v13661_v27, %v13662_v60  ;;  %v13665_v35 = vsel %vm1415_vm4, %v13662_v60, %v13664_v44  ;;  %v21318_v17 = vld [vmem:[%s26523_s11 + $0xa8] sm:$0xff]   ;;  %v21319_v38 = vld [vmem:[%s26523_s11 + $0xb0] sm:$0xff]   ;;  %v21321_v11 = vld [vmem:[%s26523_s11 + $0xc0] sm:$0xff]   ;;  %v14297_v44 = vrot.slane %v26026_v42, 1 }
 0xe4c   : > { %v13773_v26 = vpack.c.bf16 %v13665_v35, %v13663_v8  ;;  %v26735_v27 = vld [vmem:[#allocation15_spill] sm:$0xff]  ;;  %v14299_v8 = vrot.slane %v26028_v29, 1  ;;  %v14296_v35 = vrot.slane %v26024_v45, 1  ;;  %v21322_v42 = vld [vmem:[%s26523_s11 + $0xc8] sm:$0xff]   ;;  %v21325_v29 = vld [vmem:[%s26523_s11 + $0xe0] sm:$0xff]  }
 0xe4d   : > { %v26736_v60 = vld [vmem:[#allocation11_spill] sm:$0xff] }
 0xe4e   : > { %v21323_v45 = vld [vmem:[%s26523_s11 + $0xd0] sm:$0xff]  }
 0xe51   : > { %19575 = vmatmul.mubr.msk.bf16.vlgmr.msra.gmra.mrb[40].mxu1 %vm525_vm5, %v25634_v51 }
 0xe52   : > { %19578 = vmatprep.mubr.msk.bf16.mxu1 %vm525_vm5, %v25631_v23  ;;  %19607 = vmatpush3.bf16.msra.mxu1 %v25745_v63  ;;  %v21309_v63 = vld [vmem:[%s26523_s11 + $0x60] sm:$0xff]  }
 0xe53   : > { %19608 = vmatprep.subr.bf16.mxu1 %v21306_v18 }
 0xe56   : > { %19609 = vmatpush3.bf16.msra.mxu1 %v21306_v18  ;;  %v26731_v18 = vld [vmem:[#allocation23_spill] sm:$0xff] }
 0xe57   : > { %19610 = vmatprep.subr.bf16.mxu1 %v21307_v15 }
 0xe59   : > { %19579 = vmatmul.mubr.msk.bf16.gmra.mrb[44].mxu1 %vm525_vm5, %v25693_v24 }
 0xe5a   : > { %19582 = vmatprep.mubr.msk.bf16.mxu1 %vm525_vm5, %v25684_v0  ;;  %19611 = vmatpush3.bf16.msra.mxu1 %v21307_v15  ;;  %v26732_v15 = vld [vmem:[#allocation17_spill] sm:$0xff] }
 0xe5b   : > { %19612 = vmatprep.subr.bf16.mxu1 %v21308_v49 }
 0xe5e   : > { %19613 = vmatpush3.bf16.msra.mxu1 %v21308_v49  ;;  %v26733_v49 = vld [vmem:[#allocation7_spill] sm:$0xff] }
 0xe5f   : > { %19646 = vmatprep.subr.bf16.mxu1 %v21309_v63 }
 0xe61   : > { %19583 = vmatmul.mubr.msk.bf16.gmra.mrb[48].mxu1 %vm525_vm5, %v25757_v28 }
 0xe62   : > { %19586 = vmatprep.mubr.msk.bf16.mxu1 %vm525_vm5, %v25749_v48 }
 0xe69   : > { %19587 = vmatmul.mubr.msk.bf16.gmra.mrb[52].mxu1 %vm525_vm5, %v25816_v12 }
 0xe6a   : > { %19590 = vmatprep.mubr.msk.bf16.mxu1 %vm525_vm5, %v25807_v50 }
 0xe71   : > { %19591 = vmatmul.mubr.msk.bf16.gmra.mrb[56].mxu1 %vm525_vm5, %v25873_v2 }
 0xe72   : > { %19594 = vmatprep.mubr.msk.bf16.mxu1 %vm525_vm5, %v25865_v22 }
 0xe79   : > { %19595 = vmatmul.mubr.msk.bf16.gmra.mrb[60].mxu1 %vm525_vm5, %v25931_v47 }
 0xe7a   : > { %19598 = vmatprep.mubr.msk.bf16.mxu1 %vm525_vm5, %v25923_v6 }
 0xe81   : > { %19599 = vmatmul.mubr.msk.bf16.gmra.mrb[64].mxu1 %vm525_vm5, %v25978_v34 }
 0xe82   : > { %19602 = vmatprep.mubr.msk.bf16.mxu1 %vm525_vm5, %v25973_v9 }
 0xe89   : > { %19603 = vmatmul.mubr.msk.bf16.gmra.mrb[68].mxu1 %vm525_vm5, %v26014_v39 }
 0xe8a   : > { %19614 = vmatprep.mubr.msk.bf16.mxu1 %vm525_vm5, %v13773_v26  ;;  %v14298_v26 = vsel %vm859_vm3, %v14296_v35, %v14297_v44 }
 0xe91   : > { %19615 = vmatmul.mubr.msk.bf16.vlgmr.msra.gmra.mrb[40].mxu1 %vm525_vm5, %v25686_v4 }
 0xe92   : > { %19618 = vmatprep.mubr.msk.bf16.mxu1 %vm525_vm5, %v25715_v41  ;;  %19647 = vmatpush3.bf16.msra.mxu1 %v21309_v63  ;;  %v26734_v63 = vld [vmem:[#allocation8_spill] sm:$0xff] }
 0xe93   : > { %19648 = vmatprep.subr.bf16.mxu1 %v21310_v16 }
 0xe96   : > { %19649 = vmatpush3.bf16.msra.mxu1 %v21310_v16  ;;  %v14300_v16 = vsel %vm859_vm3, %v14297_v44, %v14299_v8 }
 0xe97   : > { %19650 = vmatprep.subr.bf16.mxu1 %v21311_v19 }
 0xe99   : > { %19619 = vmatmul.mubr.msk.bf16.gmra.mrb[44].mxu1 %vm525_vm5, %v25763_v7 }
 0xe9a   : > { %19622 = vmatprep.mubr.msk.bf16.mxu1 %vm525_vm5, %v25809_v52  ;;  %19651 = vmatpush3.bf16.msra.mxu1 %v21311_v19  ;;  %v26235_v19 = vpack.c.bf16 %v14300_v16, %v14298_v26 }
 0xe9b   : > { %19652 = vmatprep.subr.bf16.mxu1 %v21312_v62 }
 0xe9e   : > { %19653 = vmatpush3.bf16.msra.mxu1 %v21312_v62  ;;  %v21326_v62 = vld [vmem:[%s26523_s11 + $0xe8] sm:$0xff]  }
 0xe9f   : > { %19686 = vmatprep.subr.bf16.mxu1 %v21313_v36 }
 0xea1   : > { %19623 = vmatmul.mubr.msk.bf16.gmra.mrb[48].mxu1 %vm525_vm5, %v25831_v1 }
 0xea2   : > { %19626 = vmatprep.mubr.msk.bf16.mxu1 %vm525_vm5, %v25875_v10 }
 0xea9   : > { %19627 = vmatmul.mubr.msk.bf16.gmra.mrb[52].mxu1 %vm525_vm5, %v25911_v43 }
 0xeaa   : > { %19630 = vmatprep.mubr.msk.bf16.mxu1 %vm525_vm5, %v25933_v56 }
 0xeb1   : > { %19631 = vmatmul.mubr.msk.bf16.gmra.mrb[56].mxu1 %vm525_vm5, %v25975_v3 }
 0xeb2   : > { %19634 = vmatprep.mubr.msk.bf16.mxu1 %vm525_vm5, %v25989_v59 }
 0xeb9   : > { %19635 = vmatmul.mubr.msk.bf16.gmra.mrb[60].mxu1 %vm525_vm5, %v26005_v37 }
 0xeba   : > { %19638 = vmatprep.mubr.msk.bf16.mxu1 %vm525_vm5, %v26009_v55 }
 0xec1   : > { %19639 = vmatmul.mubr.msk.bf16.gmra.mrb[64].mxu1 %vm525_vm5, %v26016_v31 }
 0xec2   : > { %19642 = vmatprep.mubr.msk.bf16.mxu1 %vm525_vm5, %v26034_v33 }
 0xec9   : > { %19643 = vmatmul.mubr.msk.bf16.gmra.mrb[68].mxu1 %vm525_vm5, %v26039_v61 }
 0xeca   : > { %19654 = vmatprep.mubr.msk.bf16.mxu1 %vm525_vm5, %v25634_v51  ;;  %v21316_v51 = vld [vmem:[%s26523_s11 + $0x98] sm:$0xff]  }
 0xed1   : > { %19655 = vmatmul.mubr.msk.bf16.vlgmr.msra.gmra.mrb[40].mxu1 %vm525_vm5, %v25631_v23 }
 0xed2   : > { %19658 = vmatprep.mubr.msk.bf16.mxu1 %vm525_vm5, %v25693_v24  ;;  %19687 = vmatpush3.bf16.msra.mxu1 %v21313_v36  ;;  %v21327_v36 = vld [vmem:[%s26523_s11 + $0xf0] sm:$0xff]  }
 0xed3   : > { %19688 = vmatprep.subr.bf16.mxu1 %v21314_v54 }
 0xed6   : > { %19689 = vmatpush3.bf16.msra.mxu1 %v21314_v54 }
 0xed7   : > { %19690 = vmatprep.subr.bf16.mxu1 %v21315_v30 }
 0xed9   : > { %19659 = vmatmul.mubr.msk.bf16.gmra.mrb[44].mxu1 %vm525_vm5, %v25684_v0 }
 0xeda   : > { %19662 = vmatprep.mubr.msk.bf16.mxu1 %vm525_vm5, %v25757_v28  ;;  %19691 = vmatpush3.bf16.msra.mxu1 %v21315_v30 }
 0xedb   : > { %19692 = vmatprep.subr.bf16.mxu1 %v21316_v51 }
 0xede   : > { %19693 = vmatpush3.bf16.msra.mxu1 %v21316_v51 }
 0xedf   : > { %19726 = vmatprep.subr.bf16.mxu1 %v21317_v13 }
 0xee1   : > { %19663 = vmatmul.mubr.msk.bf16.gmra.mrb[48].mxu1 %vm525_vm5, %v25749_v48 }
 0xee2   : > { %19666 = vmatprep.mubr.msk.bf16.mxu1 %vm525_vm5, %v25816_v12 }
 0xee9   : > { %19667 = vmatmul.mubr.msk.bf16.gmra.mrb[52].mxu1 %vm525_vm5, %v25807_v50 }
 0xeea   : > { %19670 = vmatprep.mubr.msk.bf16.mxu1 %vm525_vm5, %v25873_v2 }
 0xef1   : > { %19671 = vmatmul.mubr.msk.bf16.gmra.mrb[56].mxu1 %vm525_vm5, %v25865_v22 }
 0xef2   : > { %19674 = vmatprep.mubr.msk.bf16.mxu1 %vm525_vm5, %v25931_v47 }
 0xef9   : > { %19675 = vmatmul.mubr.msk.bf16.gmra.mrb[60].mxu1 %vm525_vm5, %v25923_v6 }
 0xefa   : > { %19678 = vmatprep.mubr.msk.bf16.mxu1 %vm525_vm5, %v25978_v34 }
 0xf01   : > { %19679 = vmatmul.mubr.msk.bf16.gmra.mrb[64].mxu1 %vm525_vm5, %v25973_v9 }
 0xf02   : > { %19682 = vmatprep.mubr.msk.bf16.mxu1 %vm525_vm5, %v26014_v39 }
 0xf09   : > { %19683 = vmatmul.mubr.msk.bf16.gmra.mrb[68].mxu1 %vm525_vm5, %v26184_v58 }
 0xf0a   : > { %19694 = vmatprep.mubr.msk.bf16.mxu1 %vm525_vm5, %v25645_v20  ;;  %v21320_v20 = vld [vmem:[%s26523_s11 + $0xb8] sm:$0xff]  }
 0xf11   : > { %19695 = vmatmul.mubr.msk.bf16.vlgmr.msra.gmra.mrb[40].mxu1 %vm525_vm5, %v25642_v21 }
 0xf12   : > { %19698 = vmatprep.mubr.msk.bf16.mxu1 %vm525_vm5, %v25706_v5  ;;  %19727 = vmatpush3.bf16.msra.mxu1 %v21317_v13 }
 0xf13   : > { %19728 = vmatprep.subr.bf16.mxu1 %v21318_v17 }
 0xf16   : > { %19729 = vmatpush3.bf16.msra.mxu1 %v21318_v17 }
 0xf17   : > { %19730 = vmatprep.subr.bf16.mxu1 %v21319_v38 }
 0xf19   : > { %19699 = vmatmul.mubr.msk.bf16.gmra.mrb[44].mxu1 %vm525_vm5, %v25703_v46 }
 0xf1a   : > { %19702 = vmatprep.mubr.msk.bf16.mxu1 %vm525_vm5, %v25771_v14  ;;  %19731 = vmatpush3.bf16.msra.mxu1 %v21319_v38 }
 0xf1b   : > { %19732 = vmatprep.subr.bf16.mxu1 %v21320_v20 }
 0xf1e   : > { %19733 = vmatpush3.bf16.msra.mxu1 %v21320_v20 }
 0xf1f   : > { %19766 = vmatprep.subr.bf16.mxu1 %v21321_v11 }
 0xf21   : > { %19703 = vmatmul.mubr.msk.bf16.gmra.mrb[48].mxu1 %vm525_vm5, %v25768_v32 }
 0xf22   : > { %19706 = vmatprep.mubr.msk.bf16.mxu1 %vm525_vm5, %v26731_v18 }
 0xf29   : > { %19707 = vmatmul.mubr.msk.bf16.gmra.mrb[52].mxu1 %vm525_vm5, %v26732_v15 }
 0xf2a   : > { %19710 = vmatprep.mubr.msk.bf16.mxu1 %vm525_vm5, %v26733_v49 }
 0xf31   : > { %19711 = vmatmul.mubr.msk.bf16.gmra.mrb[56].mxu1 %vm525_vm5, %v26734_v63 }
 0xf32   : > { %19714 = vmatprep.mubr.msk.bf16.mxu1 %vm525_vm5, %v26735_v27 }
 0xf39   : > { %19715 = vmatmul.mubr.msk.bf16.gmra.mrb[60].mxu1 %vm525_vm5, %v26736_v60 }
 0xf3a   : > { %19718 = vmatprep.mubr.msk.bf16.mxu1 %vm525_vm5, %v25991_v53 }
 0xf41   : > { %19719 = vmatmul.mubr.msk.bf16.gmra.mrb[64].mxu1 %vm525_vm5, %v25987_v25 }
 0xf42   : > { %19722 = vmatprep.mubr.msk.bf16.mxu1 %vm525_vm5, %v26030_v40 }
 0xf49   : > { %19723 = vmatmul.mubr.msk.bf16.gmra.mrb[68].mxu1 %vm525_vm5, %v26235_v19 }
 0xf4a   : > { %19734 = vmatprep.mubr.msk.bf16.mxu1 %vm525_vm5, %v25686_v4  ;;  %v21324_v4 = vld [vmem:[%s26523_s11 + $0xd8] sm:$0xff]  }
 0xf51   : > { %19735 = vmatmul.mubr.msk.bf16.vlgmr.msra.gmra.mrb[40].mxu1 %vm525_vm5, %v25715_v41 }
 0xf52   : > { %19738 = vmatprep.mubr.msk.bf16.mxu1 %vm525_vm5, %v25763_v7  ;;  %19767 = vmatpush3.bf16.msra.mxu1 %v21321_v11 }
 0xf53   : > { %19768 = vmatprep.subr.bf16.mxu1 %v21322_v42 }
 0xf56   : > { %19769 = vmatpush3.bf16.msra.mxu1 %v21322_v42 }
 0xf57   : > { %19770 = vmatprep.subr.bf16.mxu1 %v21323_v45 }
 0xf59   : > { %19739 = vmatmul.mubr.msk.bf16.gmra.mrb[44].mxu1 %vm525_vm5, %v25809_v52 }
 0xf5a   : > { %19742 = vmatprep.mubr.msk.bf16.mxu1 %vm525_vm5, %v25831_v1  ;;  %19771 = vmatpush3.bf16.msra.mxu1 %v21323_v45 }
 0xf5b   : > { %19772 = vmatprep.subr.bf16.mxu1 %v21324_v4 }
 0xf5e   : > { %19773 = vmatpush3.bf16.msra.mxu1 %v21324_v4 }
 0xf5f   : > { %19806 = vmatprep.subr.bf16.mxu1 %v21325_v29 }
 0xf61   : > { %19743 = vmatmul.mubr.msk.bf16.gmra.mrb[48].mxu1 %vm525_vm5, %v25875_v10 }
 0xf62   : > { %19746 = vmatprep.mubr.msk.bf16.mxu1 %vm525_vm5, %v25911_v43 }
 0xf69   : > { %19747 = vmatmul.mubr.msk.bf16.gmra.mrb[52].mxu1 %vm525_vm5, %v25933_v56 }
 0xf6a   : > { %19750 = vmatprep.mubr.msk.bf16.mxu1 %vm525_vm5, %v25975_v3 }
 0xf71   : > { %19751 = vmatmul.mubr.msk.bf16.gmra.mrb[56].mxu1 %vm525_vm5, %v25989_v59 }
 0xf72   : > { %19754 = vmatprep.mubr.msk.bf16.mxu1 %vm525_vm5, %v26005_v37 }
 0xf79   : > { %19755 = vmatmul.mubr.msk.bf16.gmra.mrb[60].mxu1 %vm525_vm5, %v26009_v55 }
 0xf7a   : > { %19758 = vmatprep.mubr.msk.bf16.mxu1 %vm525_vm5, %v26016_v31 }
 0xf81   : > { %19759 = vmatmul.mubr.msk.bf16.gmra.mrb[64].mxu1 %vm525_vm5, %v26034_v33 }
 0xf82   : > { %19762 = vmatprep.mubr.msk.bf16.mxu1 %vm525_vm5, %v26039_v61 }
 0xf89   : > { %19763 = vmatmul.mubr.msk.bf16.gmra.mrb[68].mxu1 %vm525_vm5, %v26047_v57 }
 0xf8a   : > { %19774 = vmatprep.mubr.msk.bf16.mxu1 %vm525_vm5, %v25631_v23  ;;  %v21328_v23 = vld [vmem:[%s26523_s11 + $0xf8] sm:$0xff]  }
 0xf91   : > { %19775 = vmatmul.mubr.msk.bf16.vlgmr.msra.gmra.mrb[40].mxu1 %vm525_vm5, %v25693_v24  ;;  %v12983_v24 = vld [vmem:[#allocation3 + $0x198] sm:$0xff] }
 0xf92   : > { %19778 = vmatprep.mubr.msk.bf16.mxu1 %vm525_vm5, %v25684_v0  ;;  %19807 = vmatpush3.bf16.msra.mxu1 %v21325_v29  ;;  %v21329_v0 = vld [vmem:[%s26523_s11 + $0x100] sm:$0xff]  }
 0xf93   : > { %19808 = vmatprep.subr.bf16.mxu1 %v21326_v62 }
 0xf96   : > { %19809 = vmatpush3.bf16.msra.mxu1 %v21326_v62 }
 0xf97   : > { %19810 = vmatprep.subr.bf16.mxu1 %v21327_v36 }
 0xf99   : > { %19779 = vmatmul.mubr.msk.bf16.gmra.mrb[44].mxu1 %vm525_vm5, %v25757_v28  ;;  %v15240_v28 = vrot.slane %v12983_v24, 2 }
 0xf9a   : > { %19782 = vmatprep.mubr.msk.bf16.mxu1 %vm525_vm5, %v25749_v48  ;;  %19811 = vmatpush3.bf16.msra.mxu1 %v21327_v36  ;;  %v12984_v48 = vld [vmem:[#allocation3 + $0x1a0] sm:$0xff] }
 0xf9b   : > { %19812 = vmatprep.subr.bf16.mxu1 %v21328_v23 }
 0xf9e   : > { %19813 = vmatpush3.bf16.msra.mxu1 %v21328_v23 }
 0xf9f   : > { %19846 = vmatprep.subr.bf16.mxu1 %v21329_v0 }
 0xfa1   : > { %19783 = vmatmul.mubr.msk.bf16.gmra.mrb[48].mxu1 %vm525_vm5, %v25816_v12  ;;  %v12985_v12 = vld [vmem:[#allocation3 + $0x1a8] sm:$0x3] }
 0xfa2   : > { %19786 = vmatprep.mubr.msk.bf16.mxu1 %vm525_vm5, %v25807_v50  ;;  %v15241_v50 = vrot.slane %v12984_v48, 2 }
 0xfa9   : > { %19787 = vmatmul.mubr.msk.bf16.gmra.mrb[52].mxu1 %vm525_vm5, %v25873_v2  ;;  %v15243_v2 = vrot.slane %v12985_v12, 2 }
 0xfaa   : > { %19790 = vmatprep.mubr.msk.bf16.mxu1 %vm525_vm5, %v25865_v22  ;;  %v15242_v22 = vsel %vm1415_vm4, %v15240_v28, %v15241_v50 }
 0xfb1   : > { %19791 = vmatmul.mubr.msk.bf16.gmra.mrb[56].mxu1 %vm525_vm5, %v25931_v47  ;;  %v14770_v47 = vpack.c.bf16 %v12984_v48, %v12983_v24 }
 0xfb2   : > { %19794 = vmatprep.mubr.msk.bf16.mxu1 %vm525_vm5, %v25923_v6  ;;  %v15244_v6 = vsel %vm1415_vm4, %v15241_v50, %v15243_v2 }
 0xfb9   : > { %19795 = vmatmul.mubr.msk.bf16.gmra.mrb[60].mxu1 %vm525_vm5, %v25978_v34  ;;  %v15247_v34 = vpack.c.bf16 %v15244_v6, %v15242_v22 }
 0xfba   : > { %19798 = vmatprep.mubr.msk.bf16.mxu1 %vm525_vm5, %v25973_v9  ;;  %v21330_v9 = vld [vmem:[%s26523_s11 + $0x108] sm:$0xff]  }
 0xfc1   : > { %19799 = vmatmul.mubr.msk.bf16.gmra.mrb[64].mxu1 %vm525_vm5, %v26014_v39  ;;  %v21331_v39 = vld [vmem:[%s26523_s11 + $0x110] sm:$0xff]  }
 0xfc2   : > { %19802 = vmatprep.mubr.msk.bf16.mxu1 %vm525_vm5, %v26184_v58 }
 0xfc9   : > { %19803 = vmatmul.mubr.msk.bf16.gmra.mrb[68].mxu1 %vm525_vm5, %v14770_v47 }
 0xfca   : > { %19814 = vmatprep.mubr.msk.bf16.mxu1 %vm525_vm5, %v25642_v21  ;;  %v21332_v21 = vld [vmem:[%s26523_s11 + $0x118] sm:$0xff]  }
 0xfd1   : > { %19815 = vmatmul.mubr.msk.bf16.vlgmr.msra.gmra.mrb[40].mxu1 %vm525_vm5, %v25706_v5  ;;  %v15004_v5 = vrot.slane %v12984_v48, 1 }
 0xfd2   : > { %19818 = vmatprep.mubr.msk.bf16.mxu1 %vm525_vm5, %v25703_v46  ;;  %19847 = vmatpush3.bf16.msra.mxu1 %v21329_v0  ;;  %v15003_v46 = vrot.slane %v12983_v24, 1 }
 0xfd3   : > { %19848 = vmatprep.subr.bf16.mxu1 %v21330_v9 }
 0xfd6   : > { %19849 = vmatpush3.bf16.msra.mxu1 %v21330_v9 }
 0xfd7   : > { %19850 = vmatprep.subr.bf16.mxu1 %v21331_v39 }
 0xfd9   : > { %19819 = vmatmul.mubr.msk.bf16.gmra.mrb[44].mxu1 %vm525_vm5, %v25771_v14  ;;  %v15005_v14 = vsel %vm859_vm3, %v15003_v46, %v15004_v5 }
 0xfda   : > { %19822 = vmatprep.mubr.msk.bf16.mxu1 %vm525_vm5, %v25768_v32  ;;  %19851 = vmatpush3.bf16.msra.mxu1 %v21331_v39  ;;  %v15006_v32 = vrot.slane %v12985_v12, 1 }
 0xfdb   : > { %19852 = vmatprep.subr.bf16.mxu1 %v21332_v21 }
 0xfdc   : > { %v15007_v54 = vsel %vm859_vm3, %v15004_v5, %v15006_v32 }
 0xfdd   : > { %v15010_v30 = vpack.c.bf16 %v15007_v54, %v15005_v14 }
 0xfde   : > { %19853 = vmatpush3.bf16.msra.mxu1 %v21332_v21 }
 0xfe1   : > { %19823 = vmatmul.mubr.msk.bf16.gmra.mrb[48].mxu1 %vm525_vm5, %v26731_v18 }
 0xfe2   : > { %19826 = vmatprep.mubr.msk.bf16.mxu1 %vm525_vm5, %v26732_v15 }
 0xfe9   : > { %19827 = vmatmul.mubr.msk.bf16.gmra.mrb[52].mxu1 %vm525_vm5, %v26733_v49 }
 0xfea   : > { %19830 = vmatprep.mubr.msk.bf16.mxu1 %vm525_vm5, %v26734_v63 }
 0xff1   : > { %19831 = vmatmul.mubr.msk.bf16.gmra.mrb[56].mxu1 %vm525_vm5, %v26735_v27 }
 0xff2   : > { %19834 = vmatprep.mubr.msk.bf16.mxu1 %vm525_vm5, %v26736_v60 }
 0xff9   : > { %19835 = vmatmul.mubr.msk.bf16.gmra.mrb[60].mxu1 %vm525_vm5, %v25991_v53 }
 0xffa   : > { %19838 = vmatprep.mubr.msk.bf16.mxu1 %vm525_vm5, %v25987_v25 }
0x1001   : > { %19839 = vmatmul.mubr.msk.bf16.gmra.mrb[64].mxu1 %vm525_vm5, %v26030_v40 }
0x1002   : > { %19842 = vmatprep.mubr.msk.bf16.mxu1 %vm525_vm5, %v26235_v19 }
0x1009   : > { %19843 = vmatmul.mubr.msk.bf16.gmra.mrb[68].mxu1 %vm525_vm5, %v15010_v30 }
0x100a   : > { %19854 = vmatprep.mubr.msk.bf16.mxu1 %vm525_vm5, %v25715_v41  ;;  %v26404_v41 = vld [vmem:[%s26524_s12] ss:$0 sm:$0xff] }
0x1011   : > { %19855 = vmatmul.mubr.msk.bf16.vlgmr.msra.gmra.mrb[40].mxu1 %vm525_vm5, %v25763_v7 }
0x1012   : > { %19858 = vmatprep.mubr.msk.bf16.mxu1 %vm525_vm5, %v25809_v52 }
0x1019   : > { %19859 = vmatmul.mubr.msk.bf16.gmra.mrb[44].mxu1 %vm525_vm5, %v25831_v1 }
0x101a   : > { %19862 = vmatprep.mubr.msk.bf16.mxu1 %vm525_vm5, %v25875_v10 }
0x1021   : > { %19863 = vmatmul.mubr.msk.bf16.gmra.mrb[48].mxu1 %vm525_vm5, %v25911_v43 }
0x1022   : > { %19866 = vmatprep.mubr.msk.bf16.mxu1 %vm525_vm5, %v25933_v56 }
0x1029   : > { %19867 = vmatmul.mubr.msk.bf16.gmra.mrb[52].mxu1 %vm525_vm5, %v25975_v3 }
0x102a   : > { %19870 = vmatprep.mubr.msk.bf16.mxu1 %vm525_vm5, %v25989_v59 }
0x1031   : > { %19871 = vmatmul.mubr.msk.bf16.gmra.mrb[56].mxu1 %vm525_vm5, %v26005_v37 }
0x1032   : > { %19874 = vmatprep.mubr.msk.bf16.mxu1 %vm525_vm5, %v26009_v55 }
0x1039   : > { %19875 = vmatmul.mubr.msk.bf16.gmra.mrb[60].mxu1 %vm525_vm5, %v26016_v31 }
0x103a   : > { %19878 = vmatprep.mubr.msk.bf16.mxu1 %vm525_vm5, %v26034_v33 }
0x1041   : > { %19879 = vmatmul.mubr.msk.bf16.gmra.mrb[64].mxu1 %vm525_vm5, %v26039_v61 }
0x1042   : > { %19882 = vmatprep.mubr.msk.bf16.mxu1 %vm525_vm5, %v26047_v57 }
0x1049   : > { %19883 = vmatmul.mubr.msk.bf16.gmra.mrb[68].mxu1 %vm525_vm5, %v15247_v34 }
0x10e4   : > { %v19856_v7 = vpop.f32.mrb[40].mxu1 }
0x10e5   : > { %v15486_v52 = vadd.f32 %v19856_v7, %v26404_v41  ;;  %v15318_v53 = vpop.f32.mrb[41].mxu1 }
0x10e6   : > { %v15484_v1 = vadd.f32 %v26404_v41, %v15318_v53  ;;  %v19857_v10 = vpop.f32.mrb[42].mxu1 }
0x10e7   : > { %v17021_v43 = vmul.f32 -1.442695, %v15486_v52  ;;  %v15487_v56 = vadd.f32 %v19857_v10, %v26404_v41  ;;  %v15321_v3 = vpop.f32.mrb[43].mxu1 }
0x10e8   : > { %v17019_v25 = vmul.f32 -1.442695, %v15484_v1  ;;  %v15485_v59 = vadd.f32 %v26404_v41, %v15321_v3 }
0x10e9   : > { %21333 = vpow2.f32 %v17021_v43  ;;  %v17022_v37 = vmul.f32 -1.442695, %v15487_v56 }
0x10ea   : > { %21335 = vpow2.f32 %v17019_v25  ;;  %v17020_v55 = vmul.f32 -1.442695, %v15485_v59 }
0x10eb   : > { %21337 = vpow2.f32 %v17022_v37 }
0x10ec   : > { %21339 = vpow2.f32 %v17020_v55  ;;  %v19860_v31 = vpop.f32.mrb[44].mxu1 }
0x10ed   : > { %v15490_v40 = vadd.f32 %v19860_v31, %v26404_v41  ;;  %v15334_v33 = vpop.f32.mrb[45].mxu1 }
0x10ee   : > { %v15488_v61 = vadd.f32 %v26404_v41, %v15334_v33  ;;  %v19861_v57 = vpop.f32.mrb[46].mxu1 }
0x10ef   : > { %v17025_v51 = vmul.f32 -1.442695, %v15490_v40  ;;  %v15491_v13 = vadd.f32 %v19861_v57, %v26404_v41  ;;  %v15337_v58 = vpop.f32.mrb[47].mxu1 }
0x10f0   : > { %v17023_v17 = vmul.f32 -1.442695, %v15488_v61  ;;  %v15489_v38 = vadd.f32 %v26404_v41, %v15337_v58 }
0x10f1   : > { %21341 = vpow2.f32 %v17025_v51  ;;  %v17026_v20 = vmul.f32 -1.442695, %v15491_v13 }
0x10f2   : > { %21343 = vpow2.f32 %v17023_v17  ;;  %v17024_v11 = vmul.f32 -1.442695, %v15489_v38 }
0x10f3   : > { %v21334_v18 = vpop.eup %21333  ;;  %21345 = vpow2.f32 %v17026_v20 }
0x10f4   : > { %v21336_v15 = vpop.eup %21335  ;;  %v15614_v49 = vadd.f32 1.0, %v21334_v18  ;;  %21347 = vpow2.f32 %v17024_v11  ;;  %v19864_v63 = vpop.f32.mrb[48].mxu1 }
0x10f5   : > { %v21338_v27 = vpop.eup %21337  ;;  %v15612_v60 = vadd.f32 1.0, %v21336_v15  ;;  %v15494_v44 = vadd.f32 %v19864_v63, %v26404_v41  ;;  %v15350_v8 = vpop.f32.mrb[49].mxu1 }
0x10f6   : > { %v21340_v35 = vpop.eup %21339  ;;  %21349 = vrcp.f32 %v15614_v49  ;;  %v15615_v26 = vadd.f32 1.0, %v21338_v27  ;;  %v15492_v16 = vadd.f32 %v26404_v41, %v15350_v8  ;;  %v19865_v19 = vpop.f32.mrb[50].mxu1 }
0x10f7   : > { %21351 = vrcp.f32 %v15612_v60  ;;  %v15613_v42 = vadd.f32 1.0, %v21340_v35  ;;  %v17029_v45 = vmul.f32 -1.442695, %v15494_v44  ;;  %v15495_v4 = vadd.f32 %v19865_v19, %v26404_v41  ;;  %v15353_v29 = vpop.f32.mrb[51].mxu1 }
0x10f8   : > { %21353 = vrcp.f32 %v15615_v26  ;;  %v17027_v62 = vmul.f32 -1.442695, %v15492_v16  ;;  %v15493_v36 = vadd.f32 %v26404_v41, %v15353_v29 }
0x10f9   : > { %21355 = vrcp.f32 %v15613_v42  ;;  %v17030_v23 = vmul.f32 -1.442695, %v15495_v4 }
0x10fa   : > { %21357 = vpow2.f32 %v17029_v45  ;;  %v17028_v0 = vmul.f32 -1.442695, %v15493_v36 }
0x10fb   : > { %v21342_v24 = vpop.eup %21341  ;;  %21359 = vpow2.f32 %v17027_v62 }
0x10fc   : > { %v21344_v48 = vpop.eup %21343  ;;  %v15618_v28 = vadd.f32 1.0, %v21342_v24  ;;  %21361 = vpow2.f32 %v17030_v23  ;;  %v19868_v50 = vpop.f32.mrb[52].mxu1 }
0x10fd   : > { %v21346_v12 = vpop.eup %21345  ;;  %v15616_v22 = vadd.f32 1.0, %v21344_v48  ;;  %21363 = vpow2.f32 %v17028_v0  ;;  %v15498_v2 = vadd.f32 %v19868_v50, %v26404_v41  ;;  %v15366_v6 = vpop.f32.mrb[53].mxu1 }
0x10fe   : > { %v21348_v47 = vpop.eup %21347  ;;  %21365 = vrcp.f32 %v15618_v28  ;;  %v15619_v34 = vadd.f32 1.0, %v21346_v12  ;;  %v15496_v9 = vadd.f32 %v26404_v41, %v15366_v6  ;;  %v19869_v39 = vpop.f32.mrb[54].mxu1 }
0x10ff   : > { %21367 = vrcp.f32 %v15616_v22  ;;  %v15617_v21 = vadd.f32 1.0, %v21348_v47  ;;  %v17033_v46 = vmul.f32 -1.442695, %v15498_v2  ;;  %v15499_v5 = vadd.f32 %v19869_v39, %v26404_v41  ;;  %v15369_v32 = vpop.f32.mrb[55].mxu1 }
0x1100   : > { %v21350_v14 = vpop.eup %21349  ;;  %21369 = vrcp.f32 %v15619_v34  ;;  %v17031_v54 = vmul.f32 -1.442695, %v15496_v9  ;;  %v15497_v30 = vadd.f32 %v26404_v41, %v15369_v32 }
0x1101   : > { %v21352_v7 = vpop.eup %21351  ;;  %15711 = vst.msk [vmem:[%s26424_s23 + $0x10] sm:$0xff] %vm15708_vm14, %v21350_v14  ;;  %21371 = vrcp.f32 %v15617_v21  ;;  %v17034_v52 = vmul.f32 -1.442695, %v15499_v5 }
0x1102   : > { %v21354_v53 = vpop.eup %21353  ;;  %15709 = vst.msk [vmem:[%s26424_s23] sm:$0xff] %vm15708_vm14, %v21352_v7  ;;  %21373 = vpow2.f32 %v17033_v46  ;;  %v17032_v1 = vmul.f32 -1.442695, %v15497_v30 }
0x1103   : > { %v21356_v10 = vpop.eup %21355  ;;  %15712 = vst.msk [vmem:[%s26424_s23 + $0x18] sm:$0xff] %vm15708_vm14, %v21354_v53  ;;  %21375 = vpow2.f32 %v17031_v54 }
0x1104   : > { %v21358_v43 = vpop.eup %21357  ;;  %15710 = vst.msk [vmem:[%s26424_s23 + $0x8] sm:$0xff] %vm15708_vm14, %v21356_v10  ;;  %21377 = vpow2.f32 %v17034_v52  ;;  %v19872_v56 = vpop.f32.mrb[56].mxu1 }
0x1105   : > { %v21360_v3 = vpop.eup %21359  ;;  %v15622_v25 = vadd.f32 1.0, %v21358_v43  ;;  %21379 = vpow2.f32 %v17032_v1  ;;  %v15502_v59 = vadd.f32 %v19872_v56, %v26404_v41  ;;  %v15382_v37 = vpop.f32.mrb[57].mxu1 }
0x1106   : > { %v21362_v55 = vpop.eup %21361  ;;  %v15620_v31 = vadd.f32 1.0, %v21360_v3  ;;  %v15500_v40 = vadd.f32 %v26404_v41, %v15382_v37  ;;  %v19873_v33 = vpop.f32.mrb[58].mxu1 }
0x1107   : > { %v21364_v61 = vpop.eup %21363  ;;  %21381 = vrcp.f32 %v15622_v25  ;;  %v15623_v57 = vadd.f32 1.0, %v21362_v55  ;;  %v17037_v51 = vmul.f32 -1.442695, %v15502_v59  ;;  %v15503_v13 = vadd.f32 %v19873_v33, %v26404_v41  ;;  %v15385_v58 = vpop.f32.mrb[59].mxu1 }
0x1108   : > { %v21366_v17 = vpop.eup %21365  ;;  %21383 = vrcp.f32 %v15620_v31  ;;  %v15621_v38 = vadd.f32 1.0, %v21364_v61  ;;  %v17035_v20 = vmul.f32 -1.442695, %v15500_v40  ;;  %v15501_v11 = vadd.f32 %v26404_v41, %v15385_v58 }
0x1109   : > { %v21368_v18 = vpop.eup %21367  ;;  %15715 = vst.msk [vmem:[%s26424_s23 + $0x30] sm:$0xff] %vm15708_vm14, %v21366_v17  ;;  %21385 = vrcp.f32 %v15623_v57  ;;  %v17038_v15 = vmul.f32 -1.442695, %v15503_v13 }
0x110a   : > { %v21370_v49 = vpop.eup %21369  ;;  %15713 = vst.msk [vmem:[%s26424_s23 + $0x20] sm:$0xff] %vm15708_vm14, %v21368_v18  ;;  %21387 = vrcp.f32 %v15621_v38  ;;  %v17036_v63 = vmul.f32 -1.442695, %v15501_v11 }
0x110b   : > { %v21372_v27 = vpop.eup %21371  ;;  %15716 = vst.msk [vmem:[%s26424_s23 + $0x38] sm:$0xff] %vm15708_vm14, %v21370_v49  ;;  %21389 = vpow2.f32 %v17037_v51 }
0x110c   : > { %v21374_v60 = vpop.eup %21373  ;;  %15714 = vst.msk [vmem:[%s26424_s23 + $0x28] sm:$0xff] %vm15708_vm14, %v21372_v27  ;;  %21391 = vpow2.f32 %v17035_v20  ;;  %v19876_v44 = vpop.f32.mrb[60].mxu1 }
0x110d   : > { %v21376_v8 = vpop.eup %21375  ;;  %v15626_v35 = vadd.f32 1.0, %v21374_v60  ;;  %21393 = vpow2.f32 %v17038_v15  ;;  %v15506_v26 = vadd.f32 %v19876_v44, %v26404_v41  ;;  %v15398_v16 = vpop.f32.mrb[61].mxu1 }
0x110e   : > { %v21378_v19 = vpop.eup %21377  ;;  %v15624_v42 = vadd.f32 1.0, %v21376_v8  ;;  %21395 = vpow2.f32 %v17036_v63  ;;  %v15504_v45 = vadd.f32 %v26404_v41, %v15398_v16  ;;  %v19877_v4 = vpop.f32.mrb[62].mxu1 }
0x110f   : > { %v21380_v29 = vpop.eup %21379  ;;  %21397 = vrcp.f32 %v15626_v35  ;;  %v15627_v62 = vadd.f32 1.0, %v21378_v19  ;;  %v17041_v36 = vmul.f32 -1.442695, %v15506_v26  ;;  %v15507_v23 = vadd.f32 %v19877_v4, %v26404_v41  ;;  %v15401_v0 = vpop.f32.mrb[63].mxu1 }
0x1110   : > { %21399 = vrcp.f32 %v15624_v42  ;;  %v15625_v24 = vadd.f32 1.0, %v21380_v29  ;;  %v17039_v48 = vmul.f32 -1.442695, %v15504_v45  ;;  %v15505_v28 = vadd.f32 %v26404_v41, %v15401_v0 }
0x1111   : > { %v21382_v50 = vpop.eup %21381  ;;  %21401 = vrcp.f32 %v15627_v62  ;;  %v17042_v12 = vmul.f32 -1.442695, %v15507_v23 }
0x1112   : > { %v21384_v22 = vpop.eup %21383  ;;  %15719 = vst.msk [vmem:[%s26424_s23 + $0x50] sm:$0xff] %vm15708_vm14, %v21382_v50  ;;  %21403 = vrcp.f32 %v15625_v24  ;;  %v17040_v2 = vmul.f32 -1.442695, %v15505_v28 }
0x1113   : > { %v21386_v6 = vpop.eup %21385  ;;  %15717 = vst.msk [vmem:[%s26424_s23 + $0x40] sm:$0xff] %vm15708_vm14, %v21384_v22  ;;  %21405 = vpow2.f32 %v17041_v36 }
0x1114   : > { %v21388_v47 = vpop.eup %21387  ;;  %15720 = vst.msk [vmem:[%s26424_s23 + $0x58] sm:$0xff] %vm15708_vm14, %v21386_v6  ;;  %21407 = vpow2.f32 %v17039_v48  ;;  %v19880_v34 = vpop.f32.mrb[64].mxu1 }
0x1115   : > { %v21390_v9 = vpop.eup %21389  ;;  %15718 = vst.msk [vmem:[%s26424_s23 + $0x48] sm:$0xff] %vm15708_vm14, %v21388_v47  ;;  %21409 = vpow2.f32 %v17042_v12  ;;  %v15510_v39 = vadd.f32 %v19880_v34, %v26404_v41  ;;  %v15414_v21 = vpop.f32.mrb[65].mxu1 }
0x1116   : > { %v21392_v46 = vpop.eup %21391  ;;  %v15630_v5 = vadd.f32 1.0, %v21390_v9  ;;  %21411 = vpow2.f32 %v17040_v2  ;;  %v15508_v32 = vadd.f32 %v26404_v41, %v15414_v21  ;;  %v19881_v14 = vpop.f32.mrb[66].mxu1 }
0x1117   : > { %v21394_v54 = vpop.eup %21393  ;;  %v15628_v30 = vadd.f32 1.0, %v21392_v46  ;;  %v15511_v7 = vadd.f32 %v19881_v14, %v26404_v41  ;;  %v15417_v52 = vpop.f32.mrb[67].mxu1  ;;  %v17045_v10 = vmul.f32 -1.442695, %v15510_v39 }
0x1118   : > { %v21396_v53 = vpop.eup %21395  ;;  %21413 = vrcp.f32 %v15630_v5  ;;  %v15631_v1 = vadd.f32 1.0, %v21394_v54  ;;  %v15509_v43 = vadd.f32 %v26404_v41, %v15417_v52  ;;  %v17043_v25 = vmul.f32 -1.442695, %v15508_v32 }
0x1119   : > { %v21398_v56 = vpop.eup %21397  ;;  %21415 = vrcp.f32 %v15628_v30  ;;  %v15629_v3 = vadd.f32 1.0, %v21396_v53  ;;  %v17046_v37 = vmul.f32 -1.442695, %v15511_v7 }
0x111a   : > { %v21400_v59 = vpop.eup %21399  ;;  %15723 = vst.msk [vmem:[%s26424_s23 + $0x70] sm:$0xff] %vm15708_vm14, %v21398_v56  ;;  %21417 = vrcp.f32 %v15631_v1  ;;  %v17044_v31 = vmul.f32 -1.442695, %v15509_v43 }
0x111b   : > { %v21402_v55 = vpop.eup %21401  ;;  %15721 = vst.msk [vmem:[%s26424_s23 + $0x60] sm:$0xff] %vm15708_vm14, %v21400_v59  ;;  %21419 = vrcp.f32 %v15629_v3 }
0x111c   : > { %v21404_v40 = vpop.eup %21403  ;;  %15724 = vst.msk [vmem:[%s26424_s23 + $0x78] sm:$0xff] %vm15708_vm14, %v21402_v55  ;;  %21421 = vpow2.f32 %v17045_v10  ;;  %v19884_v33 = vpop.f32.mrb[68].mxu1 }
0x111d   : > { %v21406_v61 = vpop.eup %21405  ;;  %15722 = vst.msk [vmem:[%s26424_s23 + $0x68] sm:$0xff] %vm15708_vm14, %v21404_v40  ;;  %21423 = vpow2.f32 %v17043_v25  ;;  %v15514_v57 = vadd.f32 %v19884_v33, %v26404_v41  ;;  %v15430_v51 = vpop.f32.mrb[69].mxu1 }
0x111e   : > { %v21408_v13 = vpop.eup %21407  ;;  %v15634_v58 = vadd.f32 1.0, %v21406_v61  ;;  %21425 = vpow2.f32 %v17046_v37  ;;  %v15512_v17 = vadd.f32 %v26404_v41, %v15430_v51  ;;  %v19885_v38 = vpop.f32.mrb[70].mxu1 }
0x111f   : > { %v21410_v20 = vpop.eup %21409  ;;  %v15632_v11 = vadd.f32 1.0, %v21408_v13  ;;  %21427 = vpow2.f32 %v17044_v31  ;;  %v15515_v18 = vadd.f32 %v19885_v38, %v26404_v41  ;;  %v15433_v15 = vpop.f32.mrb[71].mxu1  ;;  %v17049_v27 = vmul.f32 -1.442695, %v15514_v57 }
0x1120   : > { %v21412_v49 = vpop.eup %21411  ;;  %21429 = vrcp.f32 %v15634_v58  ;;  %v15635_v63 = vadd.f32 1.0, %v21410_v20  ;;  %v15513_v60 = vadd.f32 %v26404_v41, %v15433_v15  ;;  %v17047_v8 = vmul.f32 -1.442695, %v15512_v17 }
0x1121   : > { %21431 = vrcp.f32 %v15632_v11  ;;  %v15633_v44 = vadd.f32 1.0, %v21412_v49  ;;  %v17050_v26 = vmul.f32 -1.442695, %v15515_v18 }
0x1122   : > { %v21414_v35 = vpop.eup %21413  ;;  %21433 = vrcp.f32 %v15635_v63  ;;  %v17048_v19 = vmul.f32 -1.442695, %v15513_v60 }
0x1123   : > { %v21416_v16 = vpop.eup %21415  ;;  %15727 = vst.msk [vmem:[%s26424_s23 + $0x90] sm:$0xff] %vm15708_vm14, %v21414_v35  ;;  %21435 = vrcp.f32 %v15633_v44 }
0x1124   : > { %v21418_v42 = vpop.eup %21417  ;;  %15725 = vst.msk [vmem:[%s26424_s23 + $0x80] sm:$0xff] %vm15708_vm14, %v21416_v16  ;;  %21437 = vpow2.f32 %v17049_v27 }
0x1125   : > { %v21420_v45 = vpop.eup %21419  ;;  %15728 = vst.msk [vmem:[%s26424_s23 + $0x98] sm:$0xff] %vm15708_vm14, %v21418_v42  ;;  %21439 = vpow2.f32 %v17047_v8 }
0x1126   : > { %v21422_v41 = vpop.eup %21421  ;;  %15726 = vst.msk [vmem:[%s26424_s23 + $0x88] sm:$0xff] %vm15708_vm14, %v21420_v45  ;;  %21441 = vpow2.f32 %v17050_v26 }
0x1127   : > { %v21424_v4 = vpop.eup %21423  ;;  %v15638_v29 = vadd.f32 1.0, %v21422_v41  ;;  %21443 = vpow2.f32 %v17048_v19 }
0x1128   : > { %v21426_v62 = vpop.eup %21425  ;;  %v15636_v36 = vadd.f32 1.0, %v21424_v4 }
0x1129   : > { %v21428_v23 = vpop.eup %21427  ;;  %21445 = vrcp.f32 %v15638_v29  ;;  %v15639_v0 = vadd.f32 1.0, %v21426_v62 }
0x112a   : > { %v21430_v24 = vpop.eup %21429  ;;  %21447 = vrcp.f32 %v15636_v36  ;;  %v15637_v48 = vadd.f32 1.0, %v21428_v23 }
0x112b   : > { %v21432_v28 = vpop.eup %21431  ;;  %15731 = vst.msk [vmem:[%s26424_s23 + $0xb0] sm:$0xff] %vm15708_vm14, %v21430_v24  ;;  %21449 = vrcp.f32 %v15639_v0 }
0x112c   : > { %v21434_v50 = vpop.eup %21433  ;;  %15729 = vst.msk [vmem:[%s26424_s23 + $0xa0] sm:$0xff] %vm15708_vm14, %v21432_v28  ;;  %21451 = vrcp.f32 %v15637_v48 }
0x112d   : > { %v21436_v12 = vpop.eup %21435  ;;  %15732 = vst.msk [vmem:[%s26424_s23 + $0xb8] sm:$0xff] %vm15708_vm14, %v21434_v50 }
0x112e   : > { %v21438_v22 = vpop.eup %21437  ;;  %15730 = vst.msk [vmem:[%s26424_s23 + $0xa8] sm:$0xff] %vm15708_vm14, %v21436_v12 }
0x112f   : > { %v21440_v2 = vpop.eup %21439  ;;  %v15642_v6 = vadd.f32 1.0, %v21438_v22 }
0x1130   : > { %v21442_v47 = vpop.eup %21441  ;;  %v15640_v34 = vadd.f32 1.0, %v21440_v2 }
0x1131   : > { %v21444_v9 = vpop.eup %21443  ;;  %21453 = vrcp.f32 %v15642_v6  ;;  %v15643_v39 = vadd.f32 1.0, %v21442_v47 }
0x1132   : > { %21455 = vrcp.f32 %v15640_v34  ;;  %v15641_v21 = vadd.f32 1.0, %v21444_v9 }
0x1133   : > { %v21446_v46 = vpop.eup %21445  ;;  %21457 = vrcp.f32 %v15643_v39 }
0x1134   : > { %v21448_v5 = vpop.eup %21447  ;;  %15735 = vst.msk [vmem:[%s26424_s23 + $0xd0] sm:$0xff] %vm15708_vm14, %v21446_v46  ;;  %21459 = vrcp.f32 %v15641_v21 }
0x1135   : > { %v21450_v32 = vpop.eup %21449  ;;  %15733 = vst.msk [vmem:[%s26424_s23 + $0xc0] sm:$0xff] %vm15708_vm14, %v21448_v5 }
0x1136   : > { %v21452_v14 = vpop.eup %21451  ;;  %15736 = vst.msk [vmem:[%s26424_s23 + $0xd8] sm:$0xff] %vm15708_vm14, %v21450_v32 }
0x1137   : > { %15734 = vst.msk [vmem:[%s26424_s23 + $0xc8] sm:$0xff] %vm15708_vm14, %v21452_v14 }
0x113b   : > { %v21454_v54 = vpop.eup %21453 }
0x113c   : > { %v21456_v30 = vpop.eup %21455  ;;  %15739 = vst.msk [vmem:[%s26424_s23 + $0xf0] sm:$0xff] %vm15708_vm14, %v21454_v54 }
0x113d   : > { %v21458_v7 = vpop.eup %21457  ;;  %15737 = vst.msk [vmem:[%s26424_s23 + $0xe0] sm:$0xff] %vm15708_vm14, %v21456_v30 }
0x113e   : > { %v21460_v52 = vpop.eup %21459  ;;  %15740 = vst.msk [vmem:[%s26424_s23 + $0xf8] sm:$0xff] %vm15708_vm14, %v21458_v7 }
0x113f   : > { %15738 = vst.msk [vmem:[%s26424_s23 + $0xe8] sm:$0xff] %vm15708_vm14, %v21460_v52 }
0x1140 PF: > { %s24_s29 = sadd.s32 1, %s21471_s29  }
0x1141   : > { %p21_p4 = scmp.ge.s32.totalorder %s24_s29, 4  }
0x1143   :  { %23 = sbr.rel (!%p21_p4) target bundleno = 1 (0x1), region = 159 }

</bundles_post_ra>
